<compile_context>
chip_gen: v6e
topology: v6e:2x2x1
jax: 0.10.0
libtpu: 0.0.40
codegen_flags: <defaults>
</compile_context>

<pallas_src>
import functools
import math

import jax
import jax.numpy as jnp
from jax.experimental import pallas as pl
from jax.experimental.pallas import tpu as pltpu


K = 9                                   # kernel_size of every conv
DILATIONS = (1, 2, 4, 8, 8, 4, 2, 1)    # conv1 .. conv8
N_LAYERS = len(DILATIONS)
PAD = 128                               # >= (K-1)*max(d)=64; 128 keeps slabs lane-aligned


# ----------------------------------------------------------------------------
# Fused Pallas kernel: whole NetworkNoise4 forward for one (B_TILE, L) tile
# ----------------------------------------------------------------------------
def _fused_kernel(w_ref, b_ref, x_ref, means_ref, stds_ref, act_ref, skip_ref,
                  *, L, BT):
    # w_ref   : SMEM (N_LAYERS*2*2*K,) flattened weights, index (layer, co, ci, k)
    # b_ref   : SMEM (N_LAYERS*2,)     flattened biases,  index (layer, co)
    # x_ref   : VMEM (BT, L)   single-channel input rows (batch on sublanes)
    # means_ref / stds_ref : VMEM (BT, L) outputs
    # act_ref : VMEM (2, BT, PAD+L) scratch; cols [0, PAD) zero (causal pad),
    #           cols [PAD, PAD+L) hold the current layer's input (per channel)
    # skip_ref: VMEM (4, BT, L) scratch for pre-activation skips x1_0,x1_1,x2_0,x2_1
    f32 = jnp.float32
    N = PAD + L

    # Zero the shared causal-pad head every grid step (required since the batch
    # grid axis is "parallel" and scratch is re-used per core).
    act_ref[:, :, 0:PAD] = jnp.zeros((2, BT, PAD), f32)

    def w(layer, co, ci, k):
        return w_ref[((layer * 2 + co) * 2 + ci) * K + k]

    def bias(layer, co):
        return b_ref[layer * 2 + co]

    def shifted(slab, off):
        # Returns v with v[:, j] == slab[:, j + off] for j in [0, L).
        # slab is the full lane-aligned (BT, PAD+L) load; 0 < off <= PAD so no wrap.
        if off % 128 == 0:
            return slab[:, off:off + L]                    # aligned slice, no XLU
        return pltpu.roll(slab, N - off, axis=1)[:, :L]    # XLU lane rotate

    def conv(layer, single_in):
        d = DILATIONS[layer]
        base = PAD - (K - 1) * d              # y[t] = sum_k w_k * x[t - (K-1-k)*d]
        s0 = act_ref[0]                       # one aligned slab load per channel
        s1 = None if single_in else act_ref[1]
        y0 = jnp.full((BT, L), bias(layer, 0), f32)
        y1 = jnp.full((BT, L), bias(layer, 1), f32)
        for k in range(K):                    # static unroll over the 9 taps
            off = base + k * d
            t0 = shifted(s0, off)
            y0 = y0 + w(layer, 0, 0, k) * t0
            y1 = y1 + w(layer, 1, 0, k) * t0
            if not single_in:
                t1 = shifted(s1, off)
                y0 = y0 + w(layer, 0, 1, k) * t1
                y1 = y1 + w(layer, 1, 1, k) * t1
        return y0, y1

    def store_act(a0, a1):
        act_ref[0, :, PAD:PAD + L] = a0
        act_ref[1, :, PAD:PAD + L] = a1

    # conv1: 1 -> 2 channels (only channel-0 row of the scratch is read)
    act_ref[0, :, PAD:PAD + L] = x_ref[...]
    x1_0, x1_1 = conv(0, single_in=True)                  # pre-activation skip "x1"
    skip_ref[0] = x1_0
    skip_ref[1] = x1_1
    store_act(jnp.tanh(x1_0), jnp.tanh(x1_1))

    a0, a1 = conv(1, False); store_act(jnp.tanh(a0), jnp.tanh(a1))   # conv2
    a0, a1 = conv(2, False); store_act(jnp.tanh(a0), jnp.tanh(a1))   # conv3

    x2_0, x2_1 = conv(3, False)                           # conv4 -> skip "x2"
    skip_ref[2] = x2_0
    skip_ref[3] = x2_1
    store_act(jnp.tanh(x2_0 + skip_ref[0]), jnp.tanh(x2_1 + skip_ref[1]))

    a0, a1 = conv(4, False); store_act(jnp.tanh(a0), jnp.tanh(a1))   # conv5
    a0, a1 = conv(5, False); store_act(jnp.tanh(a0), jnp.tanh(a1))   # conv6
    a0, a1 = conv(6, False); store_act(jnp.tanh(a0), jnp.tanh(a1))   # conv7

    y0, y1 = conv(7, False)                               # conv8
    means_ref[...] = skip_ref[0] + skip_ref[2] + y0       # channel 0 -> means
    stds_ref[...] = jnp.exp(0.5 * (skip_ref[1] + skip_ref[3] + y1))  # exp on EUP


# ----------------------------------------------------------------------------
# Wrapper
# ----------------------------------------------------------------------------
def _pick_b_tile(batch):
    if batch >= 16:
        return 8                      # full sublane packing, grid >= 2
    # keep the grid >= 2 steps so v7x's second TensorCore is not idle
    return max(1, (batch + 1) // 2)


def network_noise4_forward(W, Bv, x, cur_gt=None):
    """W: (8,2,2,K) f32, Bv: (8,2) f32, x: (B,1,L) NCL -> (means, stds), each (B,L)."""
    del cur_gt                                            # unused by the reference forward
    x2d = x[:, 0, :] if x.ndim == 3 else x
    batch, L = x2d.shape

    # Lane-pad L to a multiple of 128 (causal conv: zero tail never affects t < L)
    # and batch-pad to a multiple of B_TILE (padded rows are sliced off).
    b_tile = _pick_b_tile(batch)
    Lp = ((L + 127) // 128) * 128
    Bp = ((batch + b_tile - 1) // b_tile) * b_tile
    xp = jnp.zeros((Bp, Lp), jnp.float32).at[:batch, :L].set(x2d.astype(jnp.float32))
    n_steps = Bp // b_tile

    kernel = functools.partial(_fused_kernel, L=Lp, BT=b_tile)
    means, stds = pl.pallas_call(
        kernel,
        out_shape=(jax.ShapeDtypeStruct((Bp, Lp), jnp.float32),
                   jax.ShapeDtypeStruct((Bp, Lp), jnp.float32)),
        grid=(n_steps,),
        in_specs=[
            pl.BlockSpec(memory_space=pltpu.MemorySpace.SMEM),   # weights (scalars)
            pl.BlockSpec(memory_space=pltpu.MemorySpace.SMEM),   # biases  (scalars)
            pl.BlockSpec((b_tile, Lp), lambda bi: (bi, 0)),      # input rows
        ],
        out_specs=(
            pl.BlockSpec((b_tile, Lp), lambda bi: (bi, 0)),
            pl.BlockSpec((b_tile, Lp), lambda bi: (bi, 0)),
        ),
        scratch_shapes=[
            pltpu.VMEM((2, b_tile, PAD + Lp), jnp.float32),      # activations + causal pad
            pltpu.VMEM((4, b_tile, Lp), jnp.float32),            # x1/x2 skip tensors
        ],
        compiler_params=pltpu.CompilerParams(
            dimension_semantics=("parallel",)),                  # v7x: 2 TCs share batch
    )(W.reshape(-1).astype(jnp.float32), Bv.reshape(-1).astype(jnp.float32), xp)
    return means[:batch, :L], stds[:batch, :L]


# ----------------------------------------------------------------------------
# Parameters (PyTorch Conv1d-style uniform init, deterministic)
# ----------------------------------------------------------------------------
def build_params(key, kernel_size=K):
    cins = (1, 2, 2, 2, 2, 2, 2, 2)
    keys = jax.random.split(key, N_LAYERS)
    w_list, b_list = [], []
    for i, cin in enumerate(cins):
        kw, kb = jax.random.split(keys[i])
        bound = 1.0 / math.sqrt(cin * kernel_size)
        w = jax.random.uniform(kw, (2, cin, kernel_size), jnp.float32, -bound, bound)
        b = jax.random.uniform(kb, (2,), jnp.float32, -bound, bound)
        if cin == 1:  # pad the unused 2nd input channel of conv1 with zero weights
            w = jnp.concatenate([w, jnp.zeros((2, 1, kernel_size), jnp.float32)], axis=1)
        w_list.append(w)
        b_list.append(b)
    return jnp.stack(w_list), jnp.stack(b_list)           # (8,2,2,K), (8,2)


# ----------------------------------------------------------------------------
# Pure-JAX reference (for correctness check only)
# ----------------------------------------------------------------------------
def _ref_causal_conv(x, w, b, d):
    # x: (B, Cin, L), w: (Cout, Cin, Kk), b: (Cout,)
    L = x.shape[-1]
    Kk = w.shape[-1]
    pad = (Kk - 1) * d
    xp = jnp.pad(x, ((0, 0), (0, 0), (pad, 0)))
    y = b[None, :, None]
    for k in range(Kk):
        y = y + jnp.einsum('oc,bcl->bol', w[:, :, k], xp[:, :, k * d:k * d + L])
    return y


def reference_forward(W, Bv, x):
    x1 = _ref_causal_conv(x, W[0, :, :1, :], Bv[0], DILATIONS[0])
    h = jnp.tanh(x1)
    h = jnp.tanh(_ref_causal_conv(h, W[1], Bv[1], DILATIONS[1]))
    h = jnp.tanh(_ref_causal_conv(h, W[2], Bv[2], DILATIONS[2]))
    x2 = _ref_causal_conv(h, W[3], Bv[3], DILATIONS[3])
    h = jnp.tanh(x2 + x1)
    h = jnp.tanh(_ref_causal_conv(h, W[4], Bv[4], DILATIONS[4]))
    h = jnp.tanh(_ref_causal_conv(h, W[5], Bv[5], DILATIONS[5]))
    h = jnp.tanh(_ref_causal_conv(h, W[6], Bv[6], DILATIONS[6]))
    y = _ref_causal_conv(h, W[7], Bv[7], DILATIONS[7])
    y = x1 + x2 + y
    return y[:, 0, :], jnp.exp(0.5 * y[:, 1, :])


# ----------------------------------------------------------------------------
if __name__ == "__main__":
    key = jax.random.PRNGKey(0)
    pkey, xkey = jax.random.split(key)

    Bsz, L = 16, 256                                   # B_TILE=8 -> 2 grid steps, lane-dense L
    W, Bv = build_params(pkey)
    x = jax.random.normal(xkey, (Bsz, 1, L), jnp.float32)      # NCL, single channel
    cur_gt = jnp.zeros((Bsz, 1, L), jnp.float32)               # unused (API parity only)

    fwd = jax.jit(functools.partial(network_noise4_forward, W, Bv))
    means, stds = fwd(x, cur_gt)
    jax.block_until_ready((means, stds))

    ref_means, ref_stds = reference_forward(W, Bv, x)
    assert means.shape == (Bsz, L) and stds.shape == (Bsz, L)
    assert bool(jnp.all(jnp.isfinite(means))) and bool(jnp.all(stds > 0))
    assert bool(jnp.allclose(means, ref_means, rtol=1e-4, atol=1e-4)), \
        float(jnp.max(jnp.abs(means - ref_means)))
    assert bool(jnp.allclose(stds, ref_stds, rtol=1e-4, atol=1e-4)), \
        float(jnp.max(jnp.abs(stds - ref_stds)))
    print("KERNEL_OK")
</pallas_src>

<mosaic_0001>
module attributes {stable_mosaic.version = 11 : i64} {
  func.func @_fused_kernel(%arg0: i32, %arg1: memref<288xf32, #tpu.memory_space<smem>>, %arg2: memref<16xf32, #tpu.memory_space<smem>>, %arg3: memref<8x256xf32, #tpu.memory_space<vmem>>, %arg4: memref<8x256xf32, #tpu.memory_space<vmem>>, %arg5: memref<8x256xf32, #tpu.memory_space<vmem>>, %arg6: memref<2x8x384xf32, #tpu.memory_space<vmem>>, %arg7: memref<4x8x256xf32, #tpu.memory_space<vmem>>) attributes {dimension_semantics = [#tpu.dimension_semantics<parallel>], iteration_bounds = array<i64: 2>, scalar_prefetch = 0 : i64, scratch_operands = 2 : i64, tpu.core_type = #tpu.core_type<tc>, window_params = [{transform_indices = @transform_0, window_bounds = array<i64: 288>}, {transform_indices = @transform_1, window_bounds = array<i64: 16>}, {transform_indices = @transform_2, window_bounds = array<i64: 8, 256>}, {transform_indices = @transform_3, window_bounds = array<i64: 8, 256>}, {transform_indices = @transform_4, window_bounds = array<i64: 8, 256>}]} {
    %cst = arith.constant 0.000000e+00 : f32
    %0 = vector.broadcast %cst : f32 to vector<2x8x128xf32>
    %c0 = arith.constant 0 : index
    %c0_0 = arith.constant 0 : index
    %c0_1 = arith.constant 0 : index
    %1 = vector.load %arg6[%c0, %c0_0, %c0_1] : memref<2x8x384xf32, #tpu.memory_space<vmem>>, vector<2x8x128xf32>
    tpu.vector_store %arg6[%c0, %c0_0, %c0_1], %0 {strides = array<i32>} : memref<2x8x384xf32, #tpu.memory_space<vmem>>, vector<2x8x128xf32>,
    %c0_2 = arith.constant 0 : index
    %c0_3 = arith.constant 0 : index
    %2 = vector.load %arg3[%c0_2, %c0_3] : memref<8x256xf32, #tpu.memory_space<vmem>>, vector<8x256xf32>
    %c0_4 = arith.constant 0 : index
    %c0_5 = arith.constant 0 : index
    %c128 = arith.constant 128 : index
    %3 = vector.load %arg6[%c0_4, %c0_5, %c128] : memref<2x8x384xf32, #tpu.memory_space<vmem>>, vector<1x8x256xf32>
    %4 = vector.shape_cast %3 : vector<1x8x256xf32> to vector<8x256xf32>
    %5 = vector.shape_cast %2 : vector<8x256xf32> to vector<1x8x256xf32>
    tpu.vector_store %arg6[%c0_4, %c0_5, %c128], %5 {strides = array<i32>} : memref<2x8x384xf32, #tpu.memory_space<vmem>>, vector<1x8x256xf32>,
    %c0_6 = arith.constant 0 : index
    %c0_7 = arith.constant 0 : index
    %c0_8 = arith.constant 0 : index
    %6 = vector.load %arg6[%c0_6, %c0_7, %c0_8] : memref<2x8x384xf32, #tpu.memory_space<vmem>>, vector<1x8x384xf32>
    %7 = vector.shape_cast %6 : vector<1x8x384xf32> to vector<8x384xf32>
    %c0_9 = arith.constant 0 : index
    %8 = memref.load %arg2[%c0_9] : memref<16xf32, #tpu.memory_space<smem>>
    %9 = vector.broadcast %8 : f32 to vector<8x256xf32>
    %c1 = arith.constant 1 : index
    %10 = memref.load %arg2[%c1] : memref<16xf32, #tpu.memory_space<smem>>
    %11 = vector.broadcast %10 : f32 to vector<8x256xf32>
    %c264_i32 = arith.constant 264 : i32
    %12 = tpu.dynamic_rotate %7 by %c264_i32 dim 1 : vector<8x384xf32>, i32 -> vector<8x384xf32>
    %13 = vector.extract_strided_slice %12 {offsets = [0, 0], sizes = [8, 256], strides = [1, 1]} : vector<8x384xf32> to vector<8x256xf32>
    %c0_10 = arith.constant 0 : index
    %14 = memref.load %arg1[%c0_10] : memref<288xf32, #tpu.memory_space<smem>>
    %15 = vector.broadcast %14 : f32 to vector<8x256xf32>
    %16 = arith.mulf %15, %13 : vector<8x256xf32>
    %17 = arith.addf %9, %16 : vector<8x256xf32>
    %c18 = arith.constant 18 : index
    %18 = memref.load %arg1[%c18] : memref<288xf32, #tpu.memory_space<smem>>
    %19 = vector.broadcast %18 : f32 to vector<8x256xf32>
    %20 = arith.mulf %19, %13 : vector<8x256xf32>
    %21 = arith.addf %11, %20 : vector<8x256xf32>
    %c263_i32 = arith.constant 263 : i32
    %22 = tpu.dynamic_rotate %7 by %c263_i32 dim 1 : vector<8x384xf32>, i32 -> vector<8x384xf32>
    %23 = vector.extract_strided_slice %22 {offsets = [0, 0], sizes = [8, 256], strides = [1, 1]} : vector<8x384xf32> to vector<8x256xf32>
    %c1_11 = arith.constant 1 : index
    %24 = memref.load %arg1[%c1_11] : memref<288xf32, #tpu.memory_space<smem>>
    %25 = vector.broadcast %24 : f32 to vector<8x256xf32>
    %26 = arith.mulf %25, %23 : vector<8x256xf32>
    %27 = arith.addf %17, %26 : vector<8x256xf32>
    %c19 = arith.constant 19 : index
    %28 = memref.load %arg1[%c19] : memref<288xf32, #tpu.memory_space<smem>>
    %29 = vector.broadcast %28 : f32 to vector<8x256xf32>
    %30 = arith.mulf %29, %23 : vector<8x256xf32>
    %31 = arith.addf %21, %30 : vector<8x256xf32>
    %c262_i32 = arith.constant 262 : i32
    %32 = tpu.dynamic_rotate %7 by %c262_i32 dim 1 : vector<8x384xf32>, i32 -> vector<8x384xf32>
    %33 = vector.extract_strided_slice %32 {offsets = [0, 0], sizes = [8, 256], strides = [1, 1]} : vector<8x384xf32> to vector<8x256xf32>
    %c2 = arith.constant 2 : index
    %34 = memref.load %arg1[%c2] : memref<288xf32, #tpu.memory_space<smem>>
    %35 = vector.broadcast %34 : f32 to vector<8x256xf32>
    %36 = arith.mulf %35, %33 : vector<8x256xf32>
    %37 = arith.addf %27, %36 : vector<8x256xf32>
    %c20 = arith.constant 20 : index
    %38 = memref.load %arg1[%c20] : memref<288xf32, #tpu.memory_space<smem>>
    %39 = vector.broadcast %38 : f32 to vector<8x256xf32>
    %40 = arith.mulf %39, %33 : vector<8x256xf32>
    %41 = arith.addf %31, %40 : vector<8x256xf32>
    %c261_i32 = arith.constant 261 : i32
    %42 = tpu.dynamic_rotate %7 by %c261_i32 dim 1 : vector<8x384xf32>, i32 -> vector<8x384xf32>
    %43 = vector.extract_strided_slice %42 {offsets = [0, 0], sizes = [8, 256], strides = [1, 1]} : vector<8x384xf32> to vector<8x256xf32>
    %c3 = arith.constant 3 : index
    %44 = memref.load %arg1[%c3] : memref<288xf32, #tpu.memory_space<smem>>
    %45 = vector.broadcast %44 : f32 to vector<8x256xf32>
    %46 = arith.mulf %45, %43 : vector<8x256xf32>
    %47 = arith.addf %37, %46 : vector<8x256xf32>
    %c21 = arith.constant 21 : index
    %48 = memref.load %arg1[%c21] : memref<288xf32, #tpu.memory_space<smem>>
    %49 = vector.broadcast %48 : f32 to vector<8x256xf32>
    %50 = arith.mulf %49, %43 : vector<8x256xf32>
    %51 = arith.addf %41, %50 : vector<8x256xf32>
    %c260_i32 = arith.constant 260 : i32
    %52 = tpu.dynamic_rotate %7 by %c260_i32 dim 1 : vector<8x384xf32>, i32 -> vector<8x384xf32>
    %53 = vector.extract_strided_slice %52 {offsets = [0, 0], sizes = [8, 256], strides = [1, 1]} : vector<8x384xf32> to vector<8x256xf32>
    %c4 = arith.constant 4 : index
    %54 = memref.load %arg1[%c4] : memref<288xf32, #tpu.memory_space<smem>>
    %55 = vector.broadcast %54 : f32 to vector<8x256xf32>
    %56 = arith.mulf %55, %53 : vector<8x256xf32>
    %57 = arith.addf %47, %56 : vector<8x256xf32>
    %c22 = arith.constant 22 : index
    %58 = memref.load %arg1[%c22] : memref<288xf32, #tpu.memory_space<smem>>
    %59 = vector.broadcast %58 : f32 to vector<8x256xf32>
    %60 = arith.mulf %59, %53 : vector<8x256xf32>
    %61 = arith.addf %51, %60 : vector<8x256xf32>
    %c259_i32 = arith.constant 259 : i32
    %62 = tpu.dynamic_rotate %7 by %c259_i32 dim 1 : vector<8x384xf32>, i32 -> vector<8x384xf32>
    %63 = vector.extract_strided_slice %62 {offsets = [0, 0], sizes = [8, 256], strides = [1, 1]} : vector<8x384xf32> to vector<8x256xf32>
    %c5 = arith.constant 5 : index
    %64 = memref.load %arg1[%c5] : memref<288xf32, #tpu.memory_space<smem>>
    %65 = vector.broadcast %64 : f32 to vector<8x256xf32>
    %66 = arith.mulf %65, %63 : vector<8x256xf32>
    %67 = arith.addf %57, %66 : vector<8x256xf32>
    %c23 = arith.constant 23 : index
    %68 = memref.load %arg1[%c23] : memref<288xf32, #tpu.memory_space<smem>>
    %69 = vector.broadcast %68 : f32 to vector<8x256xf32>
    %70 = arith.mulf %69, %63 : vector<8x256xf32>
    %71 = arith.addf %61, %70 : vector<8x256xf32>
    %c258_i32 = arith.constant 258 : i32
    %72 = tpu.dynamic_rotate %7 by %c258_i32 dim 1 : vector<8x384xf32>, i32 -> vector<8x384xf32>
    %73 = vector.extract_strided_slice %72 {offsets = [0, 0], sizes = [8, 256], strides = [1, 1]} : vector<8x384xf32> to vector<8x256xf32>
    %c6 = arith.constant 6 : index
    %74 = memref.load %arg1[%c6] : memref<288xf32, #tpu.memory_space<smem>>
    %75 = vector.broadcast %74 : f32 to vector<8x256xf32>
    %76 = arith.mulf %75, %73 : vector<8x256xf32>
    %77 = arith.addf %67, %76 : vector<8x256xf32>
    %c24 = arith.constant 24 : index
    %78 = memref.load %arg1[%c24] : memref<288xf32, #tpu.memory_space<smem>>
    %79 = vector.broadcast %78 : f32 to vector<8x256xf32>
    %80 = arith.mulf %79, %73 : vector<8x256xf32>
    %81 = arith.addf %71, %80 : vector<8x256xf32>
    %c257_i32 = arith.constant 257 : i32
    %82 = tpu.dynamic_rotate %7 by %c257_i32 dim 1 : vector<8x384xf32>, i32 -> vector<8x384xf32>
    %83 = vector.extract_strided_slice %82 {offsets = [0, 0], sizes = [8, 256], strides = [1, 1]} : vector<8x384xf32> to vector<8x256xf32>
    %c7 = arith.constant 7 : index
    %84 = memref.load %arg1[%c7] : memref<288xf32, #tpu.memory_space<smem>>
    %85 = vector.broadcast %84 : f32 to vector<8x256xf32>
    %86 = arith.mulf %85, %83 : vector<8x256xf32>
    %87 = arith.addf %77, %86 : vector<8x256xf32>
    %c25 = arith.constant 25 : index
    %88 = memref.load %arg1[%c25] : memref<288xf32, #tpu.memory_space<smem>>
    %89 = vector.broadcast %88 : f32 to vector<8x256xf32>
    %90 = arith.mulf %89, %83 : vector<8x256xf32>
    %91 = arith.addf %81, %90 : vector<8x256xf32>
    %92 = vector.extract_strided_slice %7 {offsets = [0, 128], sizes = [8, 256], strides = [1, 1]} : vector<8x384xf32> to vector<8x256xf32>
    %c8 = arith.constant 8 : index
    %93 = memref.load %arg1[%c8] : memref<288xf32, #tpu.memory_space<smem>>
    %94 = vector.broadcast %93 : f32 to vector<8x256xf32>
    %95 = arith.mulf %94, %92 : vector<8x256xf32>
    %96 = arith.addf %87, %95 : vector<8x256xf32>
    %c26 = arith.constant 26 : index
    %97 = memref.load %arg1[%c26] : memref<288xf32, #tpu.memory_space<smem>>
    %98 = vector.broadcast %97 : f32 to vector<8x256xf32>
    %99 = arith.mulf %98, %92 : vector<8x256xf32>
    %100 = arith.addf %91, %99 : vector<8x256xf32>
    %c0_12 = arith.constant 0 : index
    %c0_13 = arith.constant 0 : index
    %c0_14 = arith.constant 0 : index
    %101 = vector.load %arg7[%c0_12, %c0_13, %c0_14] : memref<4x8x256xf32, #tpu.memory_space<vmem>>, vector<1x8x256xf32>
    %102 = vector.shape_cast %101 : vector<1x8x256xf32> to vector<8x256xf32>
    %103 = vector.shape_cast %96 : vector<8x256xf32> to vector<1x8x256xf32>
    tpu.vector_store %arg7[%c0_12, %c0_13, %c0_14], %103 {strides = array<i32>} : memref<4x8x256xf32, #tpu.memory_space<vmem>>, vector<1x8x256xf32>,
    %c1_15 = arith.constant 1 : index
    %c0_16 = arith.constant 0 : index
    %c0_17 = arith.constant 0 : index
    %104 = vector.load %arg7[%c1_15, %c0_16, %c0_17] : memref<4x8x256xf32, #tpu.memory_space<vmem>>, vector<1x8x256xf32>
    %105 = vector.shape_cast %104 : vector<1x8x256xf32> to vector<8x256xf32>
    %106 = vector.shape_cast %100 : vector<8x256xf32> to vector<1x8x256xf32>
    tpu.vector_store %arg7[%c1_15, %c0_16, %c0_17], %106 {strides = array<i32>} : memref<4x8x256xf32, #tpu.memory_space<vmem>>, vector<1x8x256xf32>,
    %107 = math.tanh %96 : vector<8x256xf32>
    %108 = math.tanh %100 : vector<8x256xf32>
    %c0_18 = arith.constant 0 : index
    %c0_19 = arith.constant 0 : index
    %c128_20 = arith.constant 128 : index
    %109 = vector.load %arg6[%c0_18, %c0_19, %c128_20] : memref<2x8x384xf32, #tpu.memory_space<vmem>>, vector<1x8x256xf32>
    %110 = vector.shape_cast %109 : vector<1x8x256xf32> to vector<8x256xf32>
    %111 = vector.shape_cast %107 : vector<8x256xf32> to vector<1x8x256xf32>
    tpu.vector_store %arg6[%c0_18, %c0_19, %c128_20], %111 {strides = array<i32>} : memref<2x8x384xf32, #tpu.memory_space<vmem>>, vector<1x8x256xf32>,
    %c1_21 = arith.constant 1 : index
    %c0_22 = arith.constant 0 : index
    %c128_23 = arith.constant 128 : index
    %112 = vector.load %arg6[%c1_21, %c0_22, %c128_23] : memref<2x8x384xf32, #tpu.memory_space<vmem>>, vector<1x8x256xf32>
    %113 = vector.shape_cast %112 : vector<1x8x256xf32> to vector<8x256xf32>
    %114 = vector.shape_cast %108 : vector<8x256xf32> to vector<1x8x256xf32>
    tpu.vector_store %arg6[%c1_21, %c0_22, %c128_23], %114 {strides = array<i32>} : memref<2x8x384xf32, #tpu.memory_space<vmem>>, vector<1x8x256xf32>,
    %c0_24 = arith.constant 0 : index
    %c0_25 = arith.constant 0 : index
    %c0_26 = arith.constant 0 : index
    %115 = vector.load %arg6[%c0_24, %c0_25, %c0_26] : memref<2x8x384xf32, #tpu.memory_space<vmem>>, vector<1x8x384xf32>
    %116 = vector.shape_cast %115 : vector<1x8x384xf32> to vector<8x384xf32>
    %c1_27 = arith.constant 1 : index
    %c0_28 = arith.constant 0 : index
    %c0_29 = arith.constant 0 : index
    %117 = vector.load %arg6[%c1_27, %c0_28, %c0_29] : memref<2x8x384xf32, #tpu.memory_space<vmem>>, vector<1x8x384xf32>
    %118 = vector.shape_cast %117 : vector<1x8x384xf32> to vector<8x384xf32>
    %c2_30 = arith.constant 2 : index
    %119 = memref.load %arg2[%c2_30] : memref<16xf32, #tpu.memory_space<smem>>
    %120 = vector.broadcast %119 : f32 to vector<8x256xf32>
    %c3_31 = arith.constant 3 : index
    %121 = memref.load %arg2[%c3_31] : memref<16xf32, #tpu.memory_space<smem>>
    %122 = vector.broadcast %121 : f32 to vector<8x256xf32>
    %c272_i32 = arith.constant 272 : i32
    %123 = tpu.dynamic_rotate %116 by %c272_i32 dim 1 : vector<8x384xf32>, i32 -> vector<8x384xf32>
    %124 = vector.extract_strided_slice %123 {offsets = [0, 0], sizes = [8, 256], strides = [1, 1]} : vector<8x384xf32> to vector<8x256xf32>
    %c36 = arith.constant 36 : index
    %125 = memref.load %arg1[%c36] : memref<288xf32, #tpu.memory_space<smem>>
    %126 = vector.broadcast %125 : f32 to vector<8x256xf32>
    %127 = arith.mulf %126, %124 : vector<8x256xf32>
    %128 = arith.addf %120, %127 : vector<8x256xf32>
    %c54 = arith.constant 54 : index
    %129 = memref.load %arg1[%c54] : memref<288xf32, #tpu.memory_space<smem>>
    %130 = vector.broadcast %129 : f32 to vector<8x256xf32>
    %131 = arith.mulf %130, %124 : vector<8x256xf32>
    %132 = arith.addf %122, %131 : vector<8x256xf32>
    %c272_i32_32 = arith.constant 272 : i32
    %133 = tpu.dynamic_rotate %118 by %c272_i32_32 dim 1 : vector<8x384xf32>, i32 -> vector<8x384xf32>
    %134 = vector.extract_strided_slice %133 {offsets = [0, 0], sizes = [8, 256], strides = [1, 1]} : vector<8x384xf32> to vector<8x256xf32>
    %c45 = arith.constant 45 : index
    %135 = memref.load %arg1[%c45] : memref<288xf32, #tpu.memory_space<smem>>
    %136 = vector.broadcast %135 : f32 to vector<8x256xf32>
    %137 = arith.mulf %136, %134 : vector<8x256xf32>
    %138 = arith.addf %128, %137 : vector<8x256xf32>
    %c63 = arith.constant 63 : index
    %139 = memref.load %arg1[%c63] : memref<288xf32, #tpu.memory_space<smem>>
    %140 = vector.broadcast %139 : f32 to vector<8x256xf32>
    %141 = arith.mulf %140, %134 : vector<8x256xf32>
    %142 = arith.addf %132, %141 : vector<8x256xf32>
    %c270_i32 = arith.constant 270 : i32
    %143 = tpu.dynamic_rotate %116 by %c270_i32 dim 1 : vector<8x384xf32>, i32 -> vector<8x384xf32>
    %144 = vector.extract_strided_slice %143 {offsets = [0, 0], sizes = [8, 256], strides = [1, 1]} : vector<8x384xf32> to vector<8x256xf32>
    %c37 = arith.constant 37 : index
    %145 = memref.load %arg1[%c37] : memref<288xf32, #tpu.memory_space<smem>>
    %146 = vector.broadcast %145 : f32 to vector<8x256xf32>
    %147 = arith.mulf %146, %144 : vector<8x256xf32>
    %148 = arith.addf %138, %147 : vector<8x256xf32>
    %c55 = arith.constant 55 : index
    %149 = memref.load %arg1[%c55] : memref<288xf32, #tpu.memory_space<smem>>
    %150 = vector.broadcast %149 : f32 to vector<8x256xf32>
    %151 = arith.mulf %150, %144 : vector<8x256xf32>
    %152 = arith.addf %142, %151 : vector<8x256xf32>
    %c270_i32_33 = arith.constant 270 : i32
    %153 = tpu.dynamic_rotate %118 by %c270_i32_33 dim 1 : vector<8x384xf32>, i32 -> vector<8x384xf32>
    %154 = vector.extract_strided_slice %153 {offsets = [0, 0], sizes = [8, 256], strides = [1, 1]} : vector<8x384xf32> to vector<8x256xf32>
    %c46 = arith.constant 46 : index
    %155 = memref.load %arg1[%c46] : memref<288xf32, #tpu.memory_space<smem>>
    %156 = vector.broadcast %155 : f32 to vector<8x256xf32>
    %157 = arith.mulf %156, %154 : vector<8x256xf32>
    %158 = arith.addf %148, %157 : vector<8x256xf32>
    %c64 = arith.constant 64 : index
    %159 = memref.load %arg1[%c64] : memref<288xf32, #tpu.memory_space<smem>>
    %160 = vector.broadcast %159 : f32 to vector<8x256xf32>
    %161 = arith.mulf %160, %154 : vector<8x256xf32>
    %162 = arith.addf %152, %161 : vector<8x256xf32>
    %c268_i32 = arith.constant 268 : i32
    %163 = tpu.dynamic_rotate %116 by %c268_i32 dim 1 : vector<8x384xf32>, i32 -> vector<8x384xf32>
    %164 = vector.extract_strided_slice %163 {offsets = [0, 0], sizes = [8, 256], strides = [1, 1]} : vector<8x384xf32> to vector<8x256xf32>
    %c38 = arith.constant 38 : index
    %165 = memref.load %arg1[%c38] : memref<288xf32, #tpu.memory_space<smem>>
    %166 = vector.broadcast %165 : f32 to vector<8x256xf32>
    %167 = arith.mulf %166, %164 : vector<8x256xf32>
    %168 = arith.addf %158, %167 : vector<8x256xf32>
    %c56 = arith.constant 56 : index
    %169 = memref.load %arg1[%c56] : memref<288xf32, #tpu.memory_space<smem>>
    %170 = vector.broadcast %169 : f32 to vector<8x256xf32>
    %171 = arith.mulf %170, %164 : vector<8x256xf32>
    %172 = arith.addf %162, %171 : vector<8x256xf32>
    %c268_i32_34 = arith.constant 268 : i32
    %173 = tpu.dynamic_rotate %118 by %c268_i32_34 dim 1 : vector<8x384xf32>, i32 -> vector<8x384xf32>
    %174 = vector.extract_strided_slice %173 {offsets = [0, 0], sizes = [8, 256], strides = [1, 1]} : vector<8x384xf32> to vector<8x256xf32>
    %c47 = arith.constant 47 : index
    %175 = memref.load %arg1[%c47] : memref<288xf32, #tpu.memory_space<smem>>
    %176 = vector.broadcast %175 : f32 to vector<8x256xf32>
    %177 = arith.mulf %176, %174 : vector<8x256xf32>
    %178 = arith.addf %168, %177 : vector<8x256xf32>
    %c65 = arith.constant 65 : index
    %179 = memref.load %arg1[%c65] : memref<288xf32, #tpu.memory_space<smem>>
    %180 = vector.broadcast %179 : f32 to vector<8x256xf32>
    %181 = arith.mulf %180, %174 : vector<8x256xf32>
    %182 = arith.addf %172, %181 : vector<8x256xf32>
    %c266_i32 = arith.constant 266 : i32
    %183 = tpu.dynamic_rotate %116 by %c266_i32 dim 1 : vector<8x384xf32>, i32 -> vector<8x384xf32>
    %184 = vector.extract_strided_slice %183 {offsets = [0, 0], sizes = [8, 256], strides = [1, 1]} : vector<8x384xf32> to vector<8x256xf32>
    %c39 = arith.constant 39 : index
    %185 = memref.load %arg1[%c39] : memref<288xf32, #tpu.memory_space<smem>>
    %186 = vector.broadcast %185 : f32 to vector<8x256xf32>
    %187 = arith.mulf %186, %184 : vector<8x256xf32>
    %188 = arith.addf %178, %187 : vector<8x256xf32>
    %c57 = arith.constant 57 : index
    %189 = memref.load %arg1[%c57] : memref<288xf32, #tpu.memory_space<smem>>
    %190 = vector.broadcast %189 : f32 to vector<8x256xf32>
    %191 = arith.mulf %190, %184 : vector<8x256xf32>
    %192 = arith.addf %182, %191 : vector<8x256xf32>
    %c266_i32_35 = arith.constant 266 : i32
    %193 = tpu.dynamic_rotate %118 by %c266_i32_35 dim 1 : vector<8x384xf32>, i32 -> vector<8x384xf32>
    %194 = vector.extract_strided_slice %193 {offsets = [0, 0], sizes = [8, 256], strides = [1, 1]} : vector<8x384xf32> to vector<8x256xf32>
    %c48 = arith.constant 48 : index
    %195 = memref.load %arg1[%c48] : memref<288xf32, #tpu.memory_space<smem>>
    %196 = vector.broadcast %195 : f32 to vector<8x256xf32>
    %197 = arith.mulf %196, %194 : vector<8x256xf32>
    %198 = arith.addf %188, %197 : vector<8x256xf32>
    %c66 = arith.constant 66 : index
    %199 = memref.load %arg1[%c66] : memref<288xf32, #tpu.memory_space<smem>>
    %200 = vector.broadcast %199 : f32 to vector<8x256xf32>
    %201 = arith.mulf %200, %194 : vector<8x256xf32>
    %202 = arith.addf %192, %201 : vector<8x256xf32>
    %c264_i32_36 = arith.constant 264 : i32
    %203 = tpu.dynamic_rotate %116 by %c264_i32_36 dim 1 : vector<8x384xf32>, i32 -> vector<8x384xf32>
    %204 = vector.extract_strided_slice %203 {offsets = [0, 0], sizes = [8, 256], strides = [1, 1]} : vector<8x384xf32> to vector<8x256xf32>
    %c40 = arith.constant 40 : index
    %205 = memref.load %arg1[%c40] : memref<288xf32, #tpu.memory_space<smem>>
    %206 = vector.broadcast %205 : f32 to vector<8x256xf32>
    %207 = arith.mulf %206, %204 : vector<8x256xf32>
    %208 = arith.addf %198, %207 : vector<8x256xf32>
    %c58 = arith.constant 58 : index
    %209 = memref.load %arg1[%c58] : memref<288xf32, #tpu.memory_space<smem>>
    %210 = vector.broadcast %209 : f32 to vector<8x256xf32>
    %211 = arith.mulf %210, %204 : vector<8x256xf32>
    %212 = arith.addf %202, %211 : vector<8x256xf32>
    %c264_i32_37 = arith.constant 264 : i32
    %213 = tpu.dynamic_rotate %118 by %c264_i32_37 dim 1 : vector<8x384xf32>, i32 -> vector<8x384xf32>
    %214 = vector.extract_strided_slice %213 {offsets = [0, 0], sizes = [8, 256], strides = [1, 1]} : vector<8x384xf32> to vector<8x256xf32>
    %c49 = arith.constant 49 : index
    %215 = memref.load %arg1[%c49] : memref<288xf32, #tpu.memory_space<smem>>
    %216 = vector.broadcast %215 : f32 to vector<8x256xf32>
    %217 = arith.mulf %216, %214 : vector<8x256xf32>
    %218 = arith.addf %208, %217 : vector<8x256xf32>
    %c67 = arith.constant 67 : index
    %219 = memref.load %arg1[%c67] : memref<288xf32, #tpu.memory_space<smem>>
    %220 = vector.broadcast %219 : f32 to vector<8x256xf32>
    %221 = arith.mulf %220, %214 : vector<8x256xf32>
    %222 = arith.addf %212, %221 : vector<8x256xf32>
    %c262_i32_38 = arith.constant 262 : i32
    %223 = tpu.dynamic_rotate %116 by %c262_i32_38 dim 1 : vector<8x384xf32>, i32 -> vector<8x384xf32>
    %224 = vector.extract_strided_slice %223 {offsets = [0, 0], sizes = [8, 256], strides = [1, 1]} : vector<8x384xf32> to vector<8x256xf32>
    %c41 = arith.constant 41 : index
    %225 = memref.load %arg1[%c41] : memref<288xf32, #tpu.memory_space<smem>>
    %226 = vector.broadcast %225 : f32 to vector<8x256xf32>
    %227 = arith.mulf %226, %224 : vector<8x256xf32>
    %228 = arith.addf %218, %227 : vector<8x256xf32>
    %c59 = arith.constant 59 : index
    %229 = memref.load %arg1[%c59] : memref<288xf32, #tpu.memory_space<smem>>
    %230 = vector.broadcast %229 : f32 to vector<8x256xf32>
    %231 = arith.mulf %230, %224 : vector<8x256xf32>
    %232 = arith.addf %222, %231 : vector<8x256xf32>
    %c262_i32_39 = arith.constant 262 : i32
    %233 = tpu.dynamic_rotate %118 by %c262_i32_39 dim 1 : vector<8x384xf32>, i32 -> vector<8x384xf32>
    %234 = vector.extract_strided_slice %233 {offsets = [0, 0], sizes = [8, 256], strides = [1, 1]} : vector<8x384xf32> to vector<8x256xf32>
    %c50 = arith.constant 50 : index
    %235 = memref.load %arg1[%c50] : memref<288xf32, #tpu.memory_space<smem>>
    %236 = vector.broadcast %235 : f32 to vector<8x256xf32>
    %237 = arith.mulf %236, %234 : vector<8x256xf32>
    %238 = arith.addf %228, %237 : vector<8x256xf32>
    %c68 = arith.constant 68 : index
    %239 = memref.load %arg1[%c68] : memref<288xf32, #tpu.memory_space<smem>>
    %240 = vector.broadcast %239 : f32 to vector<8x256xf32>
    %241 = arith.mulf %240, %234 : vector<8x256xf32>
    %242 = arith.addf %232, %241 : vector<8x256xf32>
    %c260_i32_40 = arith.constant 260 : i32
    %243 = tpu.dynamic_rotate %116 by %c260_i32_40 dim 1 : vector<8x384xf32>, i32 -> vector<8x384xf32>
    %244 = vector.extract_strided_slice %243 {offsets = [0, 0], sizes = [8, 256], strides = [1, 1]} : vector<8x384xf32> to vector<8x256xf32>
    %c42 = arith.constant 42 : index
    %245 = memref.load %arg1[%c42] : memref<288xf32, #tpu.memory_space<smem>>
    %246 = vector.broadcast %245 : f32 to vector<8x256xf32>
    %247 = arith.mulf %246, %244 : vector<8x256xf32>
    %248 = arith.addf %238, %247 : vector<8x256xf32>
    %c60 = arith.constant 60 : index
    %249 = memref.load %arg1[%c60] : memref<288xf32, #tpu.memory_space<smem>>
    %250 = vector.broadcast %249 : f32 to vector<8x256xf32>
    %251 = arith.mulf %250, %244 : vector<8x256xf32>
    %252 = arith.addf %242, %251 : vector<8x256xf32>
    %c260_i32_41 = arith.constant 260 : i32
    %253 = tpu.dynamic_rotate %118 by %c260_i32_41 dim 1 : vector<8x384xf32>, i32 -> vector<8x384xf32>
    %254 = vector.extract_strided_slice %253 {offsets = [0, 0], sizes = [8, 256], strides = [1, 1]} : vector<8x384xf32> to vector<8x256xf32>
    %c51 = arith.constant 51 : index
    %255 = memref.load %arg1[%c51] : memref<288xf32, #tpu.memory_space<smem>>
    %256 = vector.broadcast %255 : f32 to vector<8x256xf32>
    %257 = arith.mulf %256, %254 : vector<8x256xf32>
    %258 = arith.addf %248, %257 : vector<8x256xf32>
    %c69 = arith.constant 69 : index
    %259 = memref.load %arg1[%c69] : memref<288xf32, #tpu.memory_space<smem>>
    %260 = vector.broadcast %259 : f32 to vector<8x256xf32>
    %261 = arith.mulf %260, %254 : vector<8x256xf32>
    %262 = arith.addf %252, %261 : vector<8x256xf32>
    %c258_i32_42 = arith.constant 258 : i32
    %263 = tpu.dynamic_rotate %116 by %c258_i32_42 dim 1 : vector<8x384xf32>, i32 -> vector<8x384xf32>
    %264 = vector.extract_strided_slice %263 {offsets = [0, 0], sizes = [8, 256], strides = [1, 1]} : vector<8x384xf32> to vector<8x256xf32>
    %c43 = arith.constant 43 : index
    %265 = memref.load %arg1[%c43] : memref<288xf32, #tpu.memory_space<smem>>
    %266 = vector.broadcast %265 : f32 to vector<8x256xf32>
    %267 = arith.mulf %266, %264 : vector<8x256xf32>
    %268 = arith.addf %258, %267 : vector<8x256xf32>
    %c61 = arith.constant 61 : index
    %269 = memref.load %arg1[%c61] : memref<288xf32, #tpu.memory_space<smem>>
    %270 = vector.broadcast %269 : f32 to vector<8x256xf32>
    %271 = arith.mulf %270, %264 : vector<8x256xf32>
    %272 = arith.addf %262, %271 : vector<8x256xf32>
    %c258_i32_43 = arith.constant 258 : i32
    %273 = tpu.dynamic_rotate %118 by %c258_i32_43 dim 1 : vector<8x384xf32>, i32 -> vector<8x384xf32>
    %274 = vector.extract_strided_slice %273 {offsets = [0, 0], sizes = [8, 256], strides = [1, 1]} : vector<8x384xf32> to vector<8x256xf32>
    %c52 = arith.constant 52 : index
    %275 = memref.load %arg1[%c52] : memref<288xf32, #tpu.memory_space<smem>>
    %276 = vector.broadcast %275 : f32 to vector<8x256xf32>
    %277 = arith.mulf %276, %274 : vector<8x256xf32>
    %278 = arith.addf %268, %277 : vector<8x256xf32>
    %c70 = arith.constant 70 : index
    %279 = memref.load %arg1[%c70] : memref<288xf32, #tpu.memory_space<smem>>
    %280 = vector.broadcast %279 : f32 to vector<8x256xf32>
    %281 = arith.mulf %280, %274 : vector<8x256xf32>
    %282 = arith.addf %272, %281 : vector<8x256xf32>
    %283 = vector.extract_strided_slice %116 {offsets = [0, 128], sizes = [8, 256], strides = [1, 1]} : vector<8x384xf32> to vector<8x256xf32>
    %c44 = arith.constant 44 : index
    %284 = memref.load %arg1[%c44] : memref<288xf32, #tpu.memory_space<smem>>
    %285 = vector.broadcast %284 : f32 to vector<8x256xf32>
    %286 = arith.mulf %285, %283 : vector<8x256xf32>
    %287 = arith.addf %278, %286 : vector<8x256xf32>
    %c62 = arith.constant 62 : index
    %288 = memref.load %arg1[%c62] : memref<288xf32, #tpu.memory_space<smem>>
    %289 = vector.broadcast %288 : f32 to vector<8x256xf32>
    %290 = arith.mulf %289, %283 : vector<8x256xf32>
    %291 = arith.addf %282, %290 : vector<8x256xf32>
    %292 = vector.extract_strided_slice %118 {offsets = [0, 128], sizes = [8, 256], strides = [1, 1]} : vector<8x384xf32> to vector<8x256xf32>
    %c53 = arith.constant 53 : index
    %293 = memref.load %arg1[%c53] : memref<288xf32, #tpu.memory_space<smem>>
    %294 = vector.broadcast %293 : f32 to vector<8x256xf32>
    %295 = arith.mulf %294, %292 : vector<8x256xf32>
    %296 = arith.addf %287, %295 : vector<8x256xf32>
    %c71 = arith.constant 71 : index
    %297 = memref.load %arg1[%c71] : memref<288xf32, #tpu.memory_space<smem>>
    %298 = vector.broadcast %297 : f32 to vector<8x256xf32>
    %299 = arith.mulf %298, %292 : vector<8x256xf32>
    %300 = arith.addf %291, %299 : vector<8x256xf32>
    %301 = math.tanh %296 : vector<8x256xf32>
    %302 = math.tanh %300 : vector<8x256xf32>
    %c0_44 = arith.constant 0 : index
    %c0_45 = arith.constant 0 : index
    %c128_46 = arith.constant 128 : index
    %303 = vector.load %arg6[%c0_44, %c0_45, %c128_46] : memref<2x8x384xf32, #tpu.memory_space<vmem>>, vector<1x8x256xf32>
    %304 = vector.shape_cast %303 : vector<1x8x256xf32> to vector<8x256xf32>
    %305 = vector.shape_cast %301 : vector<8x256xf32> to vector<1x8x256xf32>
    tpu.vector_store %arg6[%c0_44, %c0_45, %c128_46], %305 {strides = array<i32>} : memref<2x8x384xf32, #tpu.memory_space<vmem>>, vector<1x8x256xf32>,
    %c1_47 = arith.constant 1 : index
    %c0_48 = arith.constant 0 : index
    %c128_49 = arith.constant 128 : index
    %306 = vector.load %arg6[%c1_47, %c0_48, %c128_49] : memref<2x8x384xf32, #tpu.memory_space<vmem>>, vector<1x8x256xf32>
    %307 = vector.shape_cast %306 : vector<1x8x256xf32> to vector<8x256xf32>
    %308 = vector.shape_cast %302 : vector<8x256xf32> to vector<1x8x256xf32>
    tpu.vector_store %arg6[%c1_47, %c0_48, %c128_49], %308 {strides = array<i32>} : memref<2x8x384xf32, #tpu.memory_space<vmem>>, vector<1x8x256xf32>,
    %c0_50 = arith.constant 0 : index
    %c0_51 = arith.constant 0 : index
    %c0_52 = arith.constant 0 : index
    %309 = vector.load %arg6[%c0_50, %c0_51, %c0_52] : memref<2x8x384xf32, #tpu.memory_space<vmem>>, vector<1x8x384xf32>
    %310 = vector.shape_cast %309 : vector<1x8x384xf32> to vector<8x384xf32>
    %c1_53 = arith.constant 1 : index
    %c0_54 = arith.constant 0 : index
    %c0_55 = arith.constant 0 : index
    %311 = vector.load %arg6[%c1_53, %c0_54, %c0_55] : memref<2x8x384xf32, #tpu.memory_space<vmem>>, vector<1x8x384xf32>
    %312 = vector.shape_cast %311 : vector<1x8x384xf32> to vector<8x384xf32>
    %c4_56 = arith.constant 4 : index
    %313 = memref.load %arg2[%c4_56] : memref<16xf32, #tpu.memory_space<smem>>
    %314 = vector.broadcast %313 : f32 to vector<8x256xf32>
    %c5_57 = arith.constant 5 : index
    %315 = memref.load %arg2[%c5_57] : memref<16xf32, #tpu.memory_space<smem>>
    %316 = vector.broadcast %315 : f32 to vector<8x256xf32>
    %c288_i32 = arith.constant 288 : i32
    %317 = tpu.dynamic_rotate %310 by %c288_i32 dim 1 : vector<8x384xf32>, i32 -> vector<8x384xf32>
    %318 = vector.extract_strided_slice %317 {offsets = [0, 0], sizes = [8, 256], strides = [1, 1]} : vector<8x384xf32> to vector<8x256xf32>
    %c72 = arith.constant 72 : index
    %319 = memref.load %arg1[%c72] : memref<288xf32, #tpu.memory_space<smem>>
    %320 = vector.broadcast %319 : f32 to vector<8x256xf32>
    %321 = arith.mulf %320, %318 : vector<8x256xf32>
    %322 = arith.addf %314, %321 : vector<8x256xf32>
    %c90 = arith.constant 90 : index
    %323 = memref.load %arg1[%c90] : memref<288xf32, #tpu.memory_space<smem>>
    %324 = vector.broadcast %323 : f32 to vector<8x256xf32>
    %325 = arith.mulf %324, %318 : vector<8x256xf32>
    %326 = arith.addf %316, %325 : vector<8x256xf32>
    %c288_i32_58 = arith.constant 288 : i32
    %327 = tpu.dynamic_rotate %312 by %c288_i32_58 dim 1 : vector<8x384xf32>, i32 -> vector<8x384xf32>
    %328 = vector.extract_strided_slice %327 {offsets = [0, 0], sizes = [8, 256], strides = [1, 1]} : vector<8x384xf32> to vector<8x256xf32>
    %c81 = arith.constant 81 : index
    %329 = memref.load %arg1[%c81] : memref<288xf32, #tpu.memory_space<smem>>
    %330 = vector.broadcast %329 : f32 to vector<8x256xf32>
    %331 = arith.mulf %330, %328 : vector<8x256xf32>
    %332 = arith.addf %322, %331 : vector<8x256xf32>
    %c99 = arith.constant 99 : index
    %333 = memref.load %arg1[%c99] : memref<288xf32, #tpu.memory_space<smem>>
    %334 = vector.broadcast %333 : f32 to vector<8x256xf32>
    %335 = arith.mulf %334, %328 : vector<8x256xf32>
    %336 = arith.addf %326, %335 : vector<8x256xf32>
    %c284_i32 = arith.constant 284 : i32
    %337 = tpu.dynamic_rotate %310 by %c284_i32 dim 1 : vector<8x384xf32>, i32 -> vector<8x384xf32>
    %338 = vector.extract_strided_slice %337 {offsets = [0, 0], sizes = [8, 256], strides = [1, 1]} : vector<8x384xf32> to vector<8x256xf32>
    %c73 = arith.constant 73 : index
    %339 = memref.load %arg1[%c73] : memref<288xf32, #tpu.memory_space<smem>>
    %340 = vector.broadcast %339 : f32 to vector<8x256xf32>
    %341 = arith.mulf %340, %338 : vector<8x256xf32>
    %342 = arith.addf %332, %341 : vector<8x256xf32>
    %c91 = arith.constant 91 : index
    %343 = memref.load %arg1[%c91] : memref<288xf32, #tpu.memory_space<smem>>
    %344 = vector.broadcast %343 : f32 to vector<8x256xf32>
    %345 = arith.mulf %344, %338 : vector<8x256xf32>
    %346 = arith.addf %336, %345 : vector<8x256xf32>
    %c284_i32_59 = arith.constant 284 : i32
    %347 = tpu.dynamic_rotate %312 by %c284_i32_59 dim 1 : vector<8x384xf32>, i32 -> vector<8x384xf32>
    %348 = vector.extract_strided_slice %347 {offsets = [0, 0], sizes = [8, 256], strides = [1, 1]} : vector<8x384xf32> to vector<8x256xf32>
    %c82 = arith.constant 82 : index
    %349 = memref.load %arg1[%c82] : memref<288xf32, #tpu.memory_space<smem>>
    %350 = vector.broadcast %349 : f32 to vector<8x256xf32>
    %351 = arith.mulf %350, %348 : vector<8x256xf32>
    %352 = arith.addf %342, %351 : vector<8x256xf32>
    %c100 = arith.constant 100 : index
    %353 = memref.load %arg1[%c100] : memref<288xf32, #tpu.memory_space<smem>>
    %354 = vector.broadcast %353 : f32 to vector<8x256xf32>
    %355 = arith.mulf %354, %348 : vector<8x256xf32>
    %356 = arith.addf %346, %355 : vector<8x256xf32>
    %c280_i32 = arith.constant 280 : i32
    %357 = tpu.dynamic_rotate %310 by %c280_i32 dim 1 : vector<8x384xf32>, i32 -> vector<8x384xf32>
    %358 = vector.extract_strided_slice %357 {offsets = [0, 0], sizes = [8, 256], strides = [1, 1]} : vector<8x384xf32> to vector<8x256xf32>
    %c74 = arith.constant 74 : index
    %359 = memref.load %arg1[%c74] : memref<288xf32, #tpu.memory_space<smem>>
    %360 = vector.broadcast %359 : f32 to vector<8x256xf32>
    %361 = arith.mulf %360, %358 : vector<8x256xf32>
    %362 = arith.addf %352, %361 : vector<8x256xf32>
    %c92 = arith.constant 92 : index
    %363 = memref.load %arg1[%c92] : memref<288xf32, #tpu.memory_space<smem>>
    %364 = vector.broadcast %363 : f32 to vector<8x256xf32>
    %365 = arith.mulf %364, %358 : vector<8x256xf32>
    %366 = arith.addf %356, %365 : vector<8x256xf32>
    %c280_i32_60 = arith.constant 280 : i32
    %367 = tpu.dynamic_rotate %312 by %c280_i32_60 dim 1 : vector<8x384xf32>, i32 -> vector<8x384xf32>
    %368 = vector.extract_strided_slice %367 {offsets = [0, 0], sizes = [8, 256], strides = [1, 1]} : vector<8x384xf32> to vector<8x256xf32>
    %c83 = arith.constant 83 : index
    %369 = memref.load %arg1[%c83] : memref<288xf32, #tpu.memory_space<smem>>
    %370 = vector.broadcast %369 : f32 to vector<8x256xf32>
    %371 = arith.mulf %370, %368 : vector<8x256xf32>
    %372 = arith.addf %362, %371 : vector<8x256xf32>
    %c101 = arith.constant 101 : index
    %373 = memref.load %arg1[%c101] : memref<288xf32, #tpu.memory_space<smem>>
    %374 = vector.broadcast %373 : f32 to vector<8x256xf32>
    %375 = arith.mulf %374, %368 : vector<8x256xf32>
    %376 = arith.addf %366, %375 : vector<8x256xf32>
    %c276_i32 = arith.constant 276 : i32
    %377 = tpu.dynamic_rotate %310 by %c276_i32 dim 1 : vector<8x384xf32>, i32 -> vector<8x384xf32>
    %378 = vector.extract_strided_slice %377 {offsets = [0, 0], sizes = [8, 256], strides = [1, 1]} : vector<8x384xf32> to vector<8x256xf32>
    %c75 = arith.constant 75 : index
    %379 = memref.load %arg1[%c75] : memref<288xf32, #tpu.memory_space<smem>>
    %380 = vector.broadcast %379 : f32 to vector<8x256xf32>
    %381 = arith.mulf %380, %378 : vector<8x256xf32>
    %382 = arith.addf %372, %381 : vector<8x256xf32>
    %c93 = arith.constant 93 : index
    %383 = memref.load %arg1[%c93] : memref<288xf32, #tpu.memory_space<smem>>
    %384 = vector.broadcast %383 : f32 to vector<8x256xf32>
    %385 = arith.mulf %384, %378 : vector<8x256xf32>
    %386 = arith.addf %376, %385 : vector<8x256xf32>
    %c276_i32_61 = arith.constant 276 : i32
    %387 = tpu.dynamic_rotate %312 by %c276_i32_61 dim 1 : vector<8x384xf32>, i32 -> vector<8x384xf32>
    %388 = vector.extract_strided_slice %387 {offsets = [0, 0], sizes = [8, 256], strides = [1, 1]} : vector<8x384xf32> to vector<8x256xf32>
    %c84 = arith.constant 84 : index
    %389 = memref.load %arg1[%c84] : memref<288xf32, #tpu.memory_space<smem>>
    %390 = vector.broadcast %389 : f32 to vector<8x256xf32>
    %391 = arith.mulf %390, %388 : vector<8x256xf32>
    %392 = arith.addf %382, %391 : vector<8x256xf32>
    %c102 = arith.constant 102 : index
    %393 = memref.load %arg1[%c102] : memref<288xf32, #tpu.memory_space<smem>>
    %394 = vector.broadcast %393 : f32 to vector<8x256xf32>
    %395 = arith.mulf %394, %388 : vector<8x256xf32>
    %396 = arith.addf %386, %395 : vector<8x256xf32>
    %c272_i32_62 = arith.constant 272 : i32
    %397 = tpu.dynamic_rotate %310 by %c272_i32_62 dim 1 : vector<8x384xf32>, i32 -> vector<8x384xf32>
    %398 = vector.extract_strided_slice %397 {offsets = [0, 0], sizes = [8, 256], strides = [1, 1]} : vector<8x384xf32> to vector<8x256xf32>
    %c76 = arith.constant 76 : index
    %399 = memref.load %arg1[%c76] : memref<288xf32, #tpu.memory_space<smem>>
    %400 = vector.broadcast %399 : f32 to vector<8x256xf32>
    %401 = arith.mulf %400, %398 : vector<8x256xf32>
    %402 = arith.addf %392, %401 : vector<8x256xf32>
    %c94 = arith.constant 94 : index
    %403 = memref.load %arg1[%c94] : memref<288xf32, #tpu.memory_space<smem>>
    %404 = vector.broadcast %403 : f32 to vector<8x256xf32>
    %405 = arith.mulf %404, %398 : vector<8x256xf32>
    %406 = arith.addf %396, %405 : vector<8x256xf32>
    %c272_i32_63 = arith.constant 272 : i32
    %407 = tpu.dynamic_rotate %312 by %c272_i32_63 dim 1 : vector<8x384xf32>, i32 -> vector<8x384xf32>
    %408 = vector.extract_strided_slice %407 {offsets = [0, 0], sizes = [8, 256], strides = [1, 1]} : vector<8x384xf32> to vector<8x256xf32>
    %c85 = arith.constant 85 : index
    %409 = memref.load %arg1[%c85] : memref<288xf32, #tpu.memory_space<smem>>
    %410 = vector.broadcast %409 : f32 to vector<8x256xf32>
    %411 = arith.mulf %410, %408 : vector<8x256xf32>
    %412 = arith.addf %402, %411 : vector<8x256xf32>
    %c103 = arith.constant 103 : index
    %413 = memref.load %arg1[%c103] : memref<288xf32, #tpu.memory_space<smem>>
    %414 = vector.broadcast %413 : f32 to vector<8x256xf32>
    %415 = arith.mulf %414, %408 : vector<8x256xf32>
    %416 = arith.addf %406, %415 : vector<8x256xf32>
    %c268_i32_64 = arith.constant 268 : i32
    %417 = tpu.dynamic_rotate %310 by %c268_i32_64 dim 1 : vector<8x384xf32>, i32 -> vector<8x384xf32>
    %418 = vector.extract_strided_slice %417 {offsets = [0, 0], sizes = [8, 256], strides = [1, 1]} : vector<8x384xf32> to vector<8x256xf32>
    %c77 = arith.constant 77 : index
    %419 = memref.load %arg1[%c77] : memref<288xf32, #tpu.memory_space<smem>>
    %420 = vector.broadcast %419 : f32 to vector<8x256xf32>
    %421 = arith.mulf %420, %418 : vector<8x256xf32>
    %422 = arith.addf %412, %421 : vector<8x256xf32>
    %c95 = arith.constant 95 : index
    %423 = memref.load %arg1[%c95] : memref<288xf32, #tpu.memory_space<smem>>
    %424 = vector.broadcast %423 : f32 to vector<8x256xf32>
    %425 = arith.mulf %424, %418 : vector<8x256xf32>
    %426 = arith.addf %416, %425 : vector<8x256xf32>
    %c268_i32_65 = arith.constant 268 : i32
    %427 = tpu.dynamic_rotate %312 by %c268_i32_65 dim 1 : vector<8x384xf32>, i32 -> vector<8x384xf32>
    %428 = vector.extract_strided_slice %427 {offsets = [0, 0], sizes = [8, 256], strides = [1, 1]} : vector<8x384xf32> to vector<8x256xf32>
    %c86 = arith.constant 86 : index
    %429 = memref.load %arg1[%c86] : memref<288xf32, #tpu.memory_space<smem>>
    %430 = vector.broadcast %429 : f32 to vector<8x256xf32>
    %431 = arith.mulf %430, %428 : vector<8x256xf32>
    %432 = arith.addf %422, %431 : vector<8x256xf32>
    %c104 = arith.constant 104 : index
    %433 = memref.load %arg1[%c104] : memref<288xf32, #tpu.memory_space<smem>>
    %434 = vector.broadcast %433 : f32 to vector<8x256xf32>
    %435 = arith.mulf %434, %428 : vector<8x256xf32>
    %436 = arith.addf %426, %435 : vector<8x256xf32>
    %c264_i32_66 = arith.constant 264 : i32
    %437 = tpu.dynamic_rotate %310 by %c264_i32_66 dim 1 : vector<8x384xf32>, i32 -> vector<8x384xf32>
    %438 = vector.extract_strided_slice %437 {offsets = [0, 0], sizes = [8, 256], strides = [1, 1]} : vector<8x384xf32> to vector<8x256xf32>
    %c78 = arith.constant 78 : index
    %439 = memref.load %arg1[%c78] : memref<288xf32, #tpu.memory_space<smem>>
    %440 = vector.broadcast %439 : f32 to vector<8x256xf32>
    %441 = arith.mulf %440, %438 : vector<8x256xf32>
    %442 = arith.addf %432, %441 : vector<8x256xf32>
    %c96 = arith.constant 96 : index
    %443 = memref.load %arg1[%c96] : memref<288xf32, #tpu.memory_space<smem>>
    %444 = vector.broadcast %443 : f32 to vector<8x256xf32>
    %445 = arith.mulf %444, %438 : vector<8x256xf32>
    %446 = arith.addf %436, %445 : vector<8x256xf32>
    %c264_i32_67 = arith.constant 264 : i32
    %447 = tpu.dynamic_rotate %312 by %c264_i32_67 dim 1 : vector<8x384xf32>, i32 -> vector<8x384xf32>
    %448 = vector.extract_strided_slice %447 {offsets = [0, 0], sizes = [8, 256], strides = [1, 1]} : vector<8x384xf32> to vector<8x256xf32>
    %c87 = arith.constant 87 : index
    %449 = memref.load %arg1[%c87] : memref<288xf32, #tpu.memory_space<smem>>
    %450 = vector.broadcast %449 : f32 to vector<8x256xf32>
    %451 = arith.mulf %450, %448 : vector<8x256xf32>
    %452 = arith.addf %442, %451 : vector<8x256xf32>
    %c105 = arith.constant 105 : index
    %453 = memref.load %arg1[%c105] : memref<288xf32, #tpu.memory_space<smem>>
    %454 = vector.broadcast %453 : f32 to vector<8x256xf32>
    %455 = arith.mulf %454, %448 : vector<8x256xf32>
    %456 = arith.addf %446, %455 : vector<8x256xf32>
    %c260_i32_68 = arith.constant 260 : i32
    %457 = tpu.dynamic_rotate %310 by %c260_i32_68 dim 1 : vector<8x384xf32>, i32 -> vector<8x384xf32>
    %458 = vector.extract_strided_slice %457 {offsets = [0, 0], sizes = [8, 256], strides = [1, 1]} : vector<8x384xf32> to vector<8x256xf32>
    %c79 = arith.constant 79 : index
    %459 = memref.load %arg1[%c79] : memref<288xf32, #tpu.memory_space<smem>>
    %460 = vector.broadcast %459 : f32 to vector<8x256xf32>
    %461 = arith.mulf %460, %458 : vector<8x256xf32>
    %462 = arith.addf %452, %461 : vector<8x256xf32>
    %c97 = arith.constant 97 : index
    %463 = memref.load %arg1[%c97] : memref<288xf32, #tpu.memory_space<smem>>
    %464 = vector.broadcast %463 : f32 to vector<8x256xf32>
    %465 = arith.mulf %464, %458 : vector<8x256xf32>
    %466 = arith.addf %456, %465 : vector<8x256xf32>
    %c260_i32_69 = arith.constant 260 : i32
    %467 = tpu.dynamic_rotate %312 by %c260_i32_69 dim 1 : vector<8x384xf32>, i32 -> vector<8x384xf32>
    %468 = vector.extract_strided_slice %467 {offsets = [0, 0], sizes = [8, 256], strides = [1, 1]} : vector<8x384xf32> to vector<8x256xf32>
    %c88 = arith.constant 88 : index
    %469 = memref.load %arg1[%c88] : memref<288xf32, #tpu.memory_space<smem>>
    %470 = vector.broadcast %469 : f32 to vector<8x256xf32>
    %471 = arith.mulf %470, %468 : vector<8x256xf32>
    %472 = arith.addf %462, %471 : vector<8x256xf32>
    %c106 = arith.constant 106 : index
    %473 = memref.load %arg1[%c106] : memref<288xf32, #tpu.memory_space<smem>>
    %474 = vector.broadcast %473 : f32 to vector<8x256xf32>
    %475 = arith.mulf %474, %468 : vector<8x256xf32>
    %476 = arith.addf %466, %475 : vector<8x256xf32>
    %477 = vector.extract_strided_slice %310 {offsets = [0, 128], sizes = [8, 256], strides = [1, 1]} : vector<8x384xf32> to vector<8x256xf32>
    %c80 = arith.constant 80 : index
    %478 = memref.load %arg1[%c80] : memref<288xf32, #tpu.memory_space<smem>>
    %479 = vector.broadcast %478 : f32 to vector<8x256xf32>
    %480 = arith.mulf %479, %477 : vector<8x256xf32>
    %481 = arith.addf %472, %480 : vector<8x256xf32>
    %c98 = arith.constant 98 : index
    %482 = memref.load %arg1[%c98] : memref<288xf32, #tpu.memory_space<smem>>
    %483 = vector.broadcast %482 : f32 to vector<8x256xf32>
    %484 = arith.mulf %483, %477 : vector<8x256xf32>
    %485 = arith.addf %476, %484 : vector<8x256xf32>
    %486 = vector.extract_strided_slice %312 {offsets = [0, 128], sizes = [8, 256], strides = [1, 1]} : vector<8x384xf32> to vector<8x256xf32>
    %c89 = arith.constant 89 : index
    %487 = memref.load %arg1[%c89] : memref<288xf32, #tpu.memory_space<smem>>
    %488 = vector.broadcast %487 : f32 to vector<8x256xf32>
    %489 = arith.mulf %488, %486 : vector<8x256xf32>
    %490 = arith.addf %481, %489 : vector<8x256xf32>
    %c107 = arith.constant 107 : index
    %491 = memref.load %arg1[%c107] : memref<288xf32, #tpu.memory_space<smem>>
    %492 = vector.broadcast %491 : f32 to vector<8x256xf32>
    %493 = arith.mulf %492, %486 : vector<8x256xf32>
    %494 = arith.addf %485, %493 : vector<8x256xf32>
    %495 = math.tanh %490 : vector<8x256xf32>
    %496 = math.tanh %494 : vector<8x256xf32>
    %c0_70 = arith.constant 0 : index
    %c0_71 = arith.constant 0 : index
    %c128_72 = arith.constant 128 : index
    %497 = vector.load %arg6[%c0_70, %c0_71, %c128_72] : memref<2x8x384xf32, #tpu.memory_space<vmem>>, vector<1x8x256xf32>
    %498 = vector.shape_cast %497 : vector<1x8x256xf32> to vector<8x256xf32>
    %499 = vector.shape_cast %495 : vector<8x256xf32> to vector<1x8x256xf32>
    tpu.vector_store %arg6[%c0_70, %c0_71, %c128_72], %499 {strides = array<i32>} : memref<2x8x384xf32, #tpu.memory_space<vmem>>, vector<1x8x256xf32>,
    %c1_73 = arith.constant 1 : index
    %c0_74 = arith.constant 0 : index
    %c128_75 = arith.constant 128 : index
    %500 = vector.load %arg6[%c1_73, %c0_74, %c128_75] : memref<2x8x384xf32, #tpu.memory_space<vmem>>, vector<1x8x256xf32>
    %501 = vector.shape_cast %500 : vector<1x8x256xf32> to vector<8x256xf32>
    %502 = vector.shape_cast %496 : vector<8x256xf32> to vector<1x8x256xf32>
    tpu.vector_store %arg6[%c1_73, %c0_74, %c128_75], %502 {strides = array<i32>} : memref<2x8x384xf32, #tpu.memory_space<vmem>>, vector<1x8x256xf32>,
    %c0_76 = arith.constant 0 : index
    %c0_77 = arith.constant 0 : index
    %c0_78 = arith.constant 0 : index
    %503 = vector.load %arg6[%c0_76, %c0_77, %c0_78] : memref<2x8x384xf32, #tpu.memory_space<vmem>>, vector<1x8x384xf32>
    %504 = vector.shape_cast %503 : vector<1x8x384xf32> to vector<8x384xf32>
    %c1_79 = arith.constant 1 : index
    %c0_80 = arith.constant 0 : index
    %c0_81 = arith.constant 0 : index
    %505 = vector.load %arg6[%c1_79, %c0_80, %c0_81] : memref<2x8x384xf32, #tpu.memory_space<vmem>>, vector<1x8x384xf32>
    %506 = vector.shape_cast %505 : vector<1x8x384xf32> to vector<8x384xf32>
    %c6_82 = arith.constant 6 : index
    %507 = memref.load %arg2[%c6_82] : memref<16xf32, #tpu.memory_space<smem>>
    %508 = vector.broadcast %507 : f32 to vector<8x256xf32>
    %c7_83 = arith.constant 7 : index
    %509 = memref.load %arg2[%c7_83] : memref<16xf32, #tpu.memory_space<smem>>
    %510 = vector.broadcast %509 : f32 to vector<8x256xf32>
    %c320_i32 = arith.constant 320 : i32
    %511 = tpu.dynamic_rotate %504 by %c320_i32 dim 1 : vector<8x384xf32>, i32 -> vector<8x384xf32>
    %512 = vector.extract_strided_slice %511 {offsets = [0, 0], sizes = [8, 256], strides = [1, 1]} : vector<8x384xf32> to vector<8x256xf32>
    %c108 = arith.constant 108 : index
    %513 = memref.load %arg1[%c108] : memref<288xf32, #tpu.memory_space<smem>>
    %514 = vector.broadcast %513 : f32 to vector<8x256xf32>
    %515 = arith.mulf %514, %512 : vector<8x256xf32>
    %516 = arith.addf %508, %515 : vector<8x256xf32>
    %c126 = arith.constant 126 : index
    %517 = memref.load %arg1[%c126] : memref<288xf32, #tpu.memory_space<smem>>
    %518 = vector.broadcast %517 : f32 to vector<8x256xf32>
    %519 = arith.mulf %518, %512 : vector<8x256xf32>
    %520 = arith.addf %510, %519 : vector<8x256xf32>
    %c320_i32_84 = arith.constant 320 : i32
    %521 = tpu.dynamic_rotate %506 by %c320_i32_84 dim 1 : vector<8x384xf32>, i32 -> vector<8x384xf32>
    %522 = vector.extract_strided_slice %521 {offsets = [0, 0], sizes = [8, 256], strides = [1, 1]} : vector<8x384xf32> to vector<8x256xf32>
    %c117 = arith.constant 117 : index
    %523 = memref.load %arg1[%c117] : memref<288xf32, #tpu.memory_space<smem>>
    %524 = vector.broadcast %523 : f32 to vector<8x256xf32>
    %525 = arith.mulf %524, %522 : vector<8x256xf32>
    %526 = arith.addf %516, %525 : vector<8x256xf32>
    %c135 = arith.constant 135 : index
    %527 = memref.load %arg1[%c135] : memref<288xf32, #tpu.memory_space<smem>>
    %528 = vector.broadcast %527 : f32 to vector<8x256xf32>
    %529 = arith.mulf %528, %522 : vector<8x256xf32>
    %530 = arith.addf %520, %529 : vector<8x256xf32>
    %c312_i32 = arith.constant 312 : i32
    %531 = tpu.dynamic_rotate %504 by %c312_i32 dim 1 : vector<8x384xf32>, i32 -> vector<8x384xf32>
    %532 = vector.extract_strided_slice %531 {offsets = [0, 0], sizes = [8, 256], strides = [1, 1]} : vector<8x384xf32> to vector<8x256xf32>
    %c109 = arith.constant 109 : index
    %533 = memref.load %arg1[%c109] : memref<288xf32, #tpu.memory_space<smem>>
    %534 = vector.broadcast %533 : f32 to vector<8x256xf32>
    %535 = arith.mulf %534, %532 : vector<8x256xf32>
    %536 = arith.addf %526, %535 : vector<8x256xf32>
    %c127 = arith.constant 127 : index
    %537 = memref.load %arg1[%c127] : memref<288xf32, #tpu.memory_space<smem>>
    %538 = vector.broadcast %537 : f32 to vector<8x256xf32>
    %539 = arith.mulf %538, %532 : vector<8x256xf32>
    %540 = arith.addf %530, %539 : vector<8x256xf32>
    %c312_i32_85 = arith.constant 312 : i32
    %541 = tpu.dynamic_rotate %506 by %c312_i32_85 dim 1 : vector<8x384xf32>, i32 -> vector<8x384xf32>
    %542 = vector.extract_strided_slice %541 {offsets = [0, 0], sizes = [8, 256], strides = [1, 1]} : vector<8x384xf32> to vector<8x256xf32>
    %c118 = arith.constant 118 : index
    %543 = memref.load %arg1[%c118] : memref<288xf32, #tpu.memory_space<smem>>
    %544 = vector.broadcast %543 : f32 to vector<8x256xf32>
    %545 = arith.mulf %544, %542 : vector<8x256xf32>
    %546 = arith.addf %536, %545 : vector<8x256xf32>
    %c136 = arith.constant 136 : index
    %547 = memref.load %arg1[%c136] : memref<288xf32, #tpu.memory_space<smem>>
    %548 = vector.broadcast %547 : f32 to vector<8x256xf32>
    %549 = arith.mulf %548, %542 : vector<8x256xf32>
    %550 = arith.addf %540, %549 : vector<8x256xf32>
    %c304_i32 = arith.constant 304 : i32
    %551 = tpu.dynamic_rotate %504 by %c304_i32 dim 1 : vector<8x384xf32>, i32 -> vector<8x384xf32>
    %552 = vector.extract_strided_slice %551 {offsets = [0, 0], sizes = [8, 256], strides = [1, 1]} : vector<8x384xf32> to vector<8x256xf32>
    %c110 = arith.constant 110 : index
    %553 = memref.load %arg1[%c110] : memref<288xf32, #tpu.memory_space<smem>>
    %554 = vector.broadcast %553 : f32 to vector<8x256xf32>
    %555 = arith.mulf %554, %552 : vector<8x256xf32>
    %556 = arith.addf %546, %555 : vector<8x256xf32>
    %c128_86 = arith.constant 128 : index
    %557 = memref.load %arg1[%c128_86] : memref<288xf32, #tpu.memory_space<smem>>
    %558 = vector.broadcast %557 : f32 to vector<8x256xf32>
    %559 = arith.mulf %558, %552 : vector<8x256xf32>
    %560 = arith.addf %550, %559 : vector<8x256xf32>
    %c304_i32_87 = arith.constant 304 : i32
    %561 = tpu.dynamic_rotate %506 by %c304_i32_87 dim 1 : vector<8x384xf32>, i32 -> vector<8x384xf32>
    %562 = vector.extract_strided_slice %561 {offsets = [0, 0], sizes = [8, 256], strides = [1, 1]} : vector<8x384xf32> to vector<8x256xf32>
    %c119 = arith.constant 119 : index
    %563 = memref.load %arg1[%c119] : memref<288xf32, #tpu.memory_space<smem>>
    %564 = vector.broadcast %563 : f32 to vector<8x256xf32>
    %565 = arith.mulf %564, %562 : vector<8x256xf32>
    %566 = arith.addf %556, %565 : vector<8x256xf32>
    %c137 = arith.constant 137 : index
    %567 = memref.load %arg1[%c137] : memref<288xf32, #tpu.memory_space<smem>>
    %568 = vector.broadcast %567 : f32 to vector<8x256xf32>
    %569 = arith.mulf %568, %562 : vector<8x256xf32>
    %570 = arith.addf %560, %569 : vector<8x256xf32>
    %c296_i32 = arith.constant 296 : i32
    %571 = tpu.dynamic_rotate %504 by %c296_i32 dim 1 : vector<8x384xf32>, i32 -> vector<8x384xf32>
    %572 = vector.extract_strided_slice %571 {offsets = [0, 0], sizes = [8, 256], strides = [1, 1]} : vector<8x384xf32> to vector<8x256xf32>
    %c111 = arith.constant 111 : index
    %573 = memref.load %arg1[%c111] : memref<288xf32, #tpu.memory_space<smem>>
    %574 = vector.broadcast %573 : f32 to vector<8x256xf32>
    %575 = arith.mulf %574, %572 : vector<8x256xf32>
    %576 = arith.addf %566, %575 : vector<8x256xf32>
    %c129 = arith.constant 129 : index
    %577 = memref.load %arg1[%c129] : memref<288xf32, #tpu.memory_space<smem>>
    %578 = vector.broadcast %577 : f32 to vector<8x256xf32>
    %579 = arith.mulf %578, %572 : vector<8x256xf32>
    %580 = arith.addf %570, %579 : vector<8x256xf32>
    %c296_i32_88 = arith.constant 296 : i32
    %581 = tpu.dynamic_rotate %506 by %c296_i32_88 dim 1 : vector<8x384xf32>, i32 -> vector<8x384xf32>
    %582 = vector.extract_strided_slice %581 {offsets = [0, 0], sizes = [8, 256], strides = [1, 1]} : vector<8x384xf32> to vector<8x256xf32>
    %c120 = arith.constant 120 : index
    %583 = memref.load %arg1[%c120] : memref<288xf32, #tpu.memory_space<smem>>
    %584 = vector.broadcast %583 : f32 to vector<8x256xf32>
    %585 = arith.mulf %584, %582 : vector<8x256xf32>
    %586 = arith.addf %576, %585 : vector<8x256xf32>
    %c138 = arith.constant 138 : index
    %587 = memref.load %arg1[%c138] : memref<288xf32, #tpu.memory_space<smem>>
    %588 = vector.broadcast %587 : f32 to vector<8x256xf32>
    %589 = arith.mulf %588, %582 : vector<8x256xf32>
    %590 = arith.addf %580, %589 : vector<8x256xf32>
    %c288_i32_89 = arith.constant 288 : i32
    %591 = tpu.dynamic_rotate %504 by %c288_i32_89 dim 1 : vector<8x384xf32>, i32 -> vector<8x384xf32>
    %592 = vector.extract_strided_slice %591 {offsets = [0, 0], sizes = [8, 256], strides = [1, 1]} : vector<8x384xf32> to vector<8x256xf32>
    %c112 = arith.constant 112 : index
    %593 = memref.load %arg1[%c112] : memref<288xf32, #tpu.memory_space<smem>>
    %594 = vector.broadcast %593 : f32 to vector<8x256xf32>
    %595 = arith.mulf %594, %592 : vector<8x256xf32>
    %596 = arith.addf %586, %595 : vector<8x256xf32>
    %c130 = arith.constant 130 : index
    %597 = memref.load %arg1[%c130] : memref<288xf32, #tpu.memory_space<smem>>
    %598 = vector.broadcast %597 : f32 to vector<8x256xf32>
    %599 = arith.mulf %598, %592 : vector<8x256xf32>
    %600 = arith.addf %590, %599 : vector<8x256xf32>
    %c288_i32_90 = arith.constant 288 : i32
    %601 = tpu.dynamic_rotate %506 by %c288_i32_90 dim 1 : vector<8x384xf32>, i32 -> vector<8x384xf32>
    %602 = vector.extract_strided_slice %601 {offsets = [0, 0], sizes = [8, 256], strides = [1, 1]} : vector<8x384xf32> to vector<8x256xf32>
    %c121 = arith.constant 121 : index
    %603 = memref.load %arg1[%c121] : memref<288xf32, #tpu.memory_space<smem>>
    %604 = vector.broadcast %603 : f32 to vector<8x256xf32>
    %605 = arith.mulf %604, %602 : vector<8x256xf32>
    %606 = arith.addf %596, %605 : vector<8x256xf32>
    %c139 = arith.constant 139 : index
    %607 = memref.load %arg1[%c139] : memref<288xf32, #tpu.memory_space<smem>>
    %608 = vector.broadcast %607 : f32 to vector<8x256xf32>
    %609 = arith.mulf %608, %602 : vector<8x256xf32>
    %610 = arith.addf %600, %609 : vector<8x256xf32>
    %c280_i32_91 = arith.constant 280 : i32
    %611 = tpu.dynamic_rotate %504 by %c280_i32_91 dim 1 : vector<8x384xf32>, i32 -> vector<8x384xf32>
    %612 = vector.extract_strided_slice %611 {offsets = [0, 0], sizes = [8, 256], strides = [1, 1]} : vector<8x384xf32> to vector<8x256xf32>
    %c113 = arith.constant 113 : index
    %613 = memref.load %arg1[%c113] : memref<288xf32, #tpu.memory_space<smem>>
    %614 = vector.broadcast %613 : f32 to vector<8x256xf32>
    %615 = arith.mulf %614, %612 : vector<8x256xf32>
    %616 = arith.addf %606, %615 : vector<8x256xf32>
    %c131 = arith.constant 131 : index
    %617 = memref.load %arg1[%c131] : memref<288xf32, #tpu.memory_space<smem>>
    %618 = vector.broadcast %617 : f32 to vector<8x256xf32>
    %619 = arith.mulf %618, %612 : vector<8x256xf32>
    %620 = arith.addf %610, %619 : vector<8x256xf32>
    %c280_i32_92 = arith.constant 280 : i32
    %621 = tpu.dynamic_rotate %506 by %c280_i32_92 dim 1 : vector<8x384xf32>, i32 -> vector<8x384xf32>
    %622 = vector.extract_strided_slice %621 {offsets = [0, 0], sizes = [8, 256], strides = [1, 1]} : vector<8x384xf32> to vector<8x256xf32>
    %c122 = arith.constant 122 : index
    %623 = memref.load %arg1[%c122] : memref<288xf32, #tpu.memory_space<smem>>
    %624 = vector.broadcast %623 : f32 to vector<8x256xf32>
    %625 = arith.mulf %624, %622 : vector<8x256xf32>
    %626 = arith.addf %616, %625 : vector<8x256xf32>
    %c140 = arith.constant 140 : index
    %627 = memref.load %arg1[%c140] : memref<288xf32, #tpu.memory_space<smem>>
    %628 = vector.broadcast %627 : f32 to vector<8x256xf32>
    %629 = arith.mulf %628, %622 : vector<8x256xf32>
    %630 = arith.addf %620, %629 : vector<8x256xf32>
    %c272_i32_93 = arith.constant 272 : i32
    %631 = tpu.dynamic_rotate %504 by %c272_i32_93 dim 1 : vector<8x384xf32>, i32 -> vector<8x384xf32>
    %632 = vector.extract_strided_slice %631 {offsets = [0, 0], sizes = [8, 256], strides = [1, 1]} : vector<8x384xf32> to vector<8x256xf32>
    %c114 = arith.constant 114 : index
    %633 = memref.load %arg1[%c114] : memref<288xf32, #tpu.memory_space<smem>>
    %634 = vector.broadcast %633 : f32 to vector<8x256xf32>
    %635 = arith.mulf %634, %632 : vector<8x256xf32>
    %636 = arith.addf %626, %635 : vector<8x256xf32>
    %c132 = arith.constant 132 : index
    %637 = memref.load %arg1[%c132] : memref<288xf32, #tpu.memory_space<smem>>
    %638 = vector.broadcast %637 : f32 to vector<8x256xf32>
    %639 = arith.mulf %638, %632 : vector<8x256xf32>
    %640 = arith.addf %630, %639 : vector<8x256xf32>
    %c272_i32_94 = arith.constant 272 : i32
    %641 = tpu.dynamic_rotate %506 by %c272_i32_94 dim 1 : vector<8x384xf32>, i32 -> vector<8x384xf32>
    %642 = vector.extract_strided_slice %641 {offsets = [0, 0], sizes = [8, 256], strides = [1, 1]} : vector<8x384xf32> to vector<8x256xf32>
    %c123 = arith.constant 123 : index
    %643 = memref.load %arg1[%c123] : memref<288xf32, #tpu.memory_space<smem>>
    %644 = vector.broadcast %643 : f32 to vector<8x256xf32>
    %645 = arith.mulf %644, %642 : vector<8x256xf32>
    %646 = arith.addf %636, %645 : vector<8x256xf32>
    %c141 = arith.constant 141 : index
    %647 = memref.load %arg1[%c141] : memref<288xf32, #tpu.memory_space<smem>>
    %648 = vector.broadcast %647 : f32 to vector<8x256xf32>
    %649 = arith.mulf %648, %642 : vector<8x256xf32>
    %650 = arith.addf %640, %649 : vector<8x256xf32>
    %c264_i32_95 = arith.constant 264 : i32
    %651 = tpu.dynamic_rotate %504 by %c264_i32_95 dim 1 : vector<8x384xf32>, i32 -> vector<8x384xf32>
    %652 = vector.extract_strided_slice %651 {offsets = [0, 0], sizes = [8, 256], strides = [1, 1]} : vector<8x384xf32> to vector<8x256xf32>
    %c115 = arith.constant 115 : index
    %653 = memref.load %arg1[%c115] : memref<288xf32, #tpu.memory_space<smem>>
    %654 = vector.broadcast %653 : f32 to vector<8x256xf32>
    %655 = arith.mulf %654, %652 : vector<8x256xf32>
    %656 = arith.addf %646, %655 : vector<8x256xf32>
    %c133 = arith.constant 133 : index
    %657 = memref.load %arg1[%c133] : memref<288xf32, #tpu.memory_space<smem>>
    %658 = vector.broadcast %657 : f32 to vector<8x256xf32>
    %659 = arith.mulf %658, %652 : vector<8x256xf32>
    %660 = arith.addf %650, %659 : vector<8x256xf32>
    %c264_i32_96 = arith.constant 264 : i32
    %661 = tpu.dynamic_rotate %506 by %c264_i32_96 dim 1 : vector<8x384xf32>, i32 -> vector<8x384xf32>
    %662 = vector.extract_strided_slice %661 {offsets = [0, 0], sizes = [8, 256], strides = [1, 1]} : vector<8x384xf32> to vector<8x256xf32>
    %c124 = arith.constant 124 : index
    %663 = memref.load %arg1[%c124] : memref<288xf32, #tpu.memory_space<smem>>
    %664 = vector.broadcast %663 : f32 to vector<8x256xf32>
    %665 = arith.mulf %664, %662 : vector<8x256xf32>
    %666 = arith.addf %656, %665 : vector<8x256xf32>
    %c142 = arith.constant 142 : index
    %667 = memref.load %arg1[%c142] : memref<288xf32, #tpu.memory_space<smem>>
    %668 = vector.broadcast %667 : f32 to vector<8x256xf32>
    %669 = arith.mulf %668, %662 : vector<8x256xf32>
    %670 = arith.addf %660, %669 : vector<8x256xf32>
    %671 = vector.extract_strided_slice %504 {offsets = [0, 128], sizes = [8, 256], strides = [1, 1]} : vector<8x384xf32> to vector<8x256xf32>
    %c116 = arith.constant 116 : index
    %672 = memref.load %arg1[%c116] : memref<288xf32, #tpu.memory_space<smem>>
    %673 = vector.broadcast %672 : f32 to vector<8x256xf32>
    %674 = arith.mulf %673, %671 : vector<8x256xf32>
    %675 = arith.addf %666, %674 : vector<8x256xf32>
    %c134 = arith.constant 134 : index
    %676 = memref.load %arg1[%c134] : memref<288xf32, #tpu.memory_space<smem>>
    %677 = vector.broadcast %676 : f32 to vector<8x256xf32>
    %678 = arith.mulf %677, %671 : vector<8x256xf32>
    %679 = arith.addf %670, %678 : vector<8x256xf32>
    %680 = vector.extract_strided_slice %506 {offsets = [0, 128], sizes = [8, 256], strides = [1, 1]} : vector<8x384xf32> to vector<8x256xf32>
    %c125 = arith.constant 125 : index
    %681 = memref.load %arg1[%c125] : memref<288xf32, #tpu.memory_space<smem>>
    %682 = vector.broadcast %681 : f32 to vector<8x256xf32>
    %683 = arith.mulf %682, %680 : vector<8x256xf32>
    %684 = arith.addf %675, %683 : vector<8x256xf32>
    %c143 = arith.constant 143 : index
    %685 = memref.load %arg1[%c143] : memref<288xf32, #tpu.memory_space<smem>>
    %686 = vector.broadcast %685 : f32 to vector<8x256xf32>
    %687 = arith.mulf %686, %680 : vector<8x256xf32>
    %688 = arith.addf %679, %687 : vector<8x256xf32>
    %c2_97 = arith.constant 2 : index
    %c0_98 = arith.constant 0 : index
    %c0_99 = arith.constant 0 : index
    %689 = vector.load %arg7[%c2_97, %c0_98, %c0_99] : memref<4x8x256xf32, #tpu.memory_space<vmem>>, vector<1x8x256xf32>
    %690 = vector.shape_cast %689 : vector<1x8x256xf32> to vector<8x256xf32>
    %691 = vector.shape_cast %684 : vector<8x256xf32> to vector<1x8x256xf32>
    tpu.vector_store %arg7[%c2_97, %c0_98, %c0_99], %691 {strides = array<i32>} : memref<4x8x256xf32, #tpu.memory_space<vmem>>, vector<1x8x256xf32>,
    %c3_100 = arith.constant 3 : index
    %c0_101 = arith.constant 0 : index
    %c0_102 = arith.constant 0 : index
    %692 = vector.load %arg7[%c3_100, %c0_101, %c0_102] : memref<4x8x256xf32, #tpu.memory_space<vmem>>, vector<1x8x256xf32>
    %693 = vector.shape_cast %692 : vector<1x8x256xf32> to vector<8x256xf32>
    %694 = vector.shape_cast %688 : vector<8x256xf32> to vector<1x8x256xf32>
    tpu.vector_store %arg7[%c3_100, %c0_101, %c0_102], %694 {strides = array<i32>} : memref<4x8x256xf32, #tpu.memory_space<vmem>>, vector<1x8x256xf32>,
    %c0_103 = arith.constant 0 : index
    %c0_104 = arith.constant 0 : index
    %c0_105 = arith.constant 0 : index
    %695 = vector.load %arg7[%c0_103, %c0_104, %c0_105] : memref<4x8x256xf32, #tpu.memory_space<vmem>>, vector<1x8x256xf32>
    %696 = vector.shape_cast %695 : vector<1x8x256xf32> to vector<8x256xf32>
    %697 = arith.addf %684, %696 : vector<8x256xf32>
    %698 = math.tanh %697 : vector<8x256xf32>
    %c1_106 = arith.constant 1 : index
    %c0_107 = arith.constant 0 : index
    %c0_108 = arith.constant 0 : index
    %699 = vector.load %arg7[%c1_106, %c0_107, %c0_108] : memref<4x8x256xf32, #tpu.memory_space<vmem>>, vector<1x8x256xf32>
    %700 = vector.shape_cast %699 : vector<1x8x256xf32> to vector<8x256xf32>
    %701 = arith.addf %688, %700 : vector<8x256xf32>
    %702 = math.tanh %701 : vector<8x256xf32>
    %c0_109 = arith.constant 0 : index
    %c0_110 = arith.constant 0 : index
    %c128_111 = arith.constant 128 : index
    %703 = vector.load %arg6[%c0_109, %c0_110, %c128_111] : memref<2x8x384xf32, #tpu.memory_space<vmem>>, vector<1x8x256xf32>
    %704 = vector.shape_cast %703 : vector<1x8x256xf32> to vector<8x256xf32>
    %705 = vector.shape_cast %698 : vector<8x256xf32> to vector<1x8x256xf32>
    tpu.vector_store %arg6[%c0_109, %c0_110, %c128_111], %705 {strides = array<i32>} : memref<2x8x384xf32, #tpu.memory_space<vmem>>, vector<1x8x256xf32>,
    %c1_112 = arith.constant 1 : index
    %c0_113 = arith.constant 0 : index
    %c128_114 = arith.constant 128 : index
    %706 = vector.load %arg6[%c1_112, %c0_113, %c128_114] : memref<2x8x384xf32, #tpu.memory_space<vmem>>, vector<1x8x256xf32>
    %707 = vector.shape_cast %706 : vector<1x8x256xf32> to vector<8x256xf32>
    %708 = vector.shape_cast %702 : vector<8x256xf32> to vector<1x8x256xf32>
    tpu.vector_store %arg6[%c1_112, %c0_113, %c128_114], %708 {strides = array<i32>} : memref<2x8x384xf32, #tpu.memory_space<vmem>>, vector<1x8x256xf32>,
    %c0_115 = arith.constant 0 : index
    %c0_116 = arith.constant 0 : index
    %c0_117 = arith.constant 0 : index
    %709 = vector.load %arg6[%c0_115, %c0_116, %c0_117] : memref<2x8x384xf32, #tpu.memory_space<vmem>>, vector<1x8x384xf32>
    %710 = vector.shape_cast %709 : vector<1x8x384xf32> to vector<8x384xf32>
    %c1_118 = arith.constant 1 : index
    %c0_119 = arith.constant 0 : index
    %c0_120 = arith.constant 0 : index
    %711 = vector.load %arg6[%c1_118, %c0_119, %c0_120] : memref<2x8x384xf32, #tpu.memory_space<vmem>>, vector<1x8x384xf32>
    %712 = vector.shape_cast %711 : vector<1x8x384xf32> to vector<8x384xf32>
    %c8_121 = arith.constant 8 : index
    %713 = memref.load %arg2[%c8_121] : memref<16xf32, #tpu.memory_space<smem>>
    %714 = vector.broadcast %713 : f32 to vector<8x256xf32>
    %c9 = arith.constant 9 : index
    %715 = memref.load %arg2[%c9] : memref<16xf32, #tpu.memory_space<smem>>
    %716 = vector.broadcast %715 : f32 to vector<8x256xf32>
    %c320_i32_122 = arith.constant 320 : i32
    %717 = tpu.dynamic_rotate %710 by %c320_i32_122 dim 1 : vector<8x384xf32>, i32 -> vector<8x384xf32>
    %718 = vector.extract_strided_slice %717 {offsets = [0, 0], sizes = [8, 256], strides = [1, 1]} : vector<8x384xf32> to vector<8x256xf32>
    %c144 = arith.constant 144 : index
    %719 = memref.load %arg1[%c144] : memref<288xf32, #tpu.memory_space<smem>>
    %720 = vector.broadcast %719 : f32 to vector<8x256xf32>
    %721 = arith.mulf %720, %718 : vector<8x256xf32>
    %722 = arith.addf %714, %721 : vector<8x256xf32>
    %c162 = arith.constant 162 : index
    %723 = memref.load %arg1[%c162] : memref<288xf32, #tpu.memory_space<smem>>
    %724 = vector.broadcast %723 : f32 to vector<8x256xf32>
    %725 = arith.mulf %724, %718 : vector<8x256xf32>
    %726 = arith.addf %716, %725 : vector<8x256xf32>
    %c320_i32_123 = arith.constant 320 : i32
    %727 = tpu.dynamic_rotate %712 by %c320_i32_123 dim 1 : vector<8x384xf32>, i32 -> vector<8x384xf32>
    %728 = vector.extract_strided_slice %727 {offsets = [0, 0], sizes = [8, 256], strides = [1, 1]} : vector<8x384xf32> to vector<8x256xf32>
    %c153 = arith.constant 153 : index
    %729 = memref.load %arg1[%c153] : memref<288xf32, #tpu.memory_space<smem>>
    %730 = vector.broadcast %729 : f32 to vector<8x256xf32>
    %731 = arith.mulf %730, %728 : vector<8x256xf32>
    %732 = arith.addf %722, %731 : vector<8x256xf32>
    %c171 = arith.constant 171 : index
    %733 = memref.load %arg1[%c171] : memref<288xf32, #tpu.memory_space<smem>>
    %734 = vector.broadcast %733 : f32 to vector<8x256xf32>
    %735 = arith.mulf %734, %728 : vector<8x256xf32>
    %736 = arith.addf %726, %735 : vector<8x256xf32>
    %c312_i32_124 = arith.constant 312 : i32
    %737 = tpu.dynamic_rotate %710 by %c312_i32_124 dim 1 : vector<8x384xf32>, i32 -> vector<8x384xf32>
    %738 = vector.extract_strided_slice %737 {offsets = [0, 0], sizes = [8, 256], strides = [1, 1]} : vector<8x384xf32> to vector<8x256xf32>
    %c145 = arith.constant 145 : index
    %739 = memref.load %arg1[%c145] : memref<288xf32, #tpu.memory_space<smem>>
    %740 = vector.broadcast %739 : f32 to vector<8x256xf32>
    %741 = arith.mulf %740, %738 : vector<8x256xf32>
    %742 = arith.addf %732, %741 : vector<8x256xf32>
    %c163 = arith.constant 163 : index
    %743 = memref.load %arg1[%c163] : memref<288xf32, #tpu.memory_space<smem>>
    %744 = vector.broadcast %743 : f32 to vector<8x256xf32>
    %745 = arith.mulf %744, %738 : vector<8x256xf32>
    %746 = arith.addf %736, %745 : vector<8x256xf32>
    %c312_i32_125 = arith.constant 312 : i32
    %747 = tpu.dynamic_rotate %712 by %c312_i32_125 dim 1 : vector<8x384xf32>, i32 -> vector<8x384xf32>
    %748 = vector.extract_strided_slice %747 {offsets = [0, 0], sizes = [8, 256], strides = [1, 1]} : vector<8x384xf32> to vector<8x256xf32>
    %c154 = arith.constant 154 : index
    %749 = memref.load %arg1[%c154] : memref<288xf32, #tpu.memory_space<smem>>
    %750 = vector.broadcast %749 : f32 to vector<8x256xf32>
    %751 = arith.mulf %750, %748 : vector<8x256xf32>
    %752 = arith.addf %742, %751 : vector<8x256xf32>
    %c172 = arith.constant 172 : index
    %753 = memref.load %arg1[%c172] : memref<288xf32, #tpu.memory_space<smem>>
    %754 = vector.broadcast %753 : f32 to vector<8x256xf32>
    %755 = arith.mulf %754, %748 : vector<8x256xf32>
    %756 = arith.addf %746, %755 : vector<8x256xf32>
    %c304_i32_126 = arith.constant 304 : i32
    %757 = tpu.dynamic_rotate %710 by %c304_i32_126 dim 1 : vector<8x384xf32>, i32 -> vector<8x384xf32>
    %758 = vector.extract_strided_slice %757 {offsets = [0, 0], sizes = [8, 256], strides = [1, 1]} : vector<8x384xf32> to vector<8x256xf32>
    %c146 = arith.constant 146 : index
    %759 = memref.load %arg1[%c146] : memref<288xf32, #tpu.memory_space<smem>>
    %760 = vector.broadcast %759 : f32 to vector<8x256xf32>
    %761 = arith.mulf %760, %758 : vector<8x256xf32>
    %762 = arith.addf %752, %761 : vector<8x256xf32>
    %c164 = arith.constant 164 : index
    %763 = memref.load %arg1[%c164] : memref<288xf32, #tpu.memory_space<smem>>
    %764 = vector.broadcast %763 : f32 to vector<8x256xf32>
    %765 = arith.mulf %764, %758 : vector<8x256xf32>
    %766 = arith.addf %756, %765 : vector<8x256xf32>
    %c304_i32_127 = arith.constant 304 : i32
    %767 = tpu.dynamic_rotate %712 by %c304_i32_127 dim 1 : vector<8x384xf32>, i32 -> vector<8x384xf32>
    %768 = vector.extract_strided_slice %767 {offsets = [0, 0], sizes = [8, 256], strides = [1, 1]} : vector<8x384xf32> to vector<8x256xf32>
    %c155 = arith.constant 155 : index
    %769 = memref.load %arg1[%c155] : memref<288xf32, #tpu.memory_space<smem>>
    %770 = vector.broadcast %769 : f32 to vector<8x256xf32>
    %771 = arith.mulf %770, %768 : vector<8x256xf32>
    %772 = arith.addf %762, %771 : vector<8x256xf32>
    %c173 = arith.constant 173 : index
    %773 = memref.load %arg1[%c173] : memref<288xf32, #tpu.memory_space<smem>>
    %774 = vector.broadcast %773 : f32 to vector<8x256xf32>
    %775 = arith.mulf %774, %768 : vector<8x256xf32>
    %776 = arith.addf %766, %775 : vector<8x256xf32>
    %c296_i32_128 = arith.constant 296 : i32
    %777 = tpu.dynamic_rotate %710 by %c296_i32_128 dim 1 : vector<8x384xf32>, i32 -> vector<8x384xf32>
    %778 = vector.extract_strided_slice %777 {offsets = [0, 0], sizes = [8, 256], strides = [1, 1]} : vector<8x384xf32> to vector<8x256xf32>
    %c147 = arith.constant 147 : index
    %779 = memref.load %arg1[%c147] : memref<288xf32, #tpu.memory_space<smem>>
    %780 = vector.broadcast %779 : f32 to vector<8x256xf32>
    %781 = arith.mulf %780, %778 : vector<8x256xf32>
    %782 = arith.addf %772, %781 : vector<8x256xf32>
    %c165 = arith.constant 165 : index
    %783 = memref.load %arg1[%c165] : memref<288xf32, #tpu.memory_space<smem>>
    %784 = vector.broadcast %783 : f32 to vector<8x256xf32>
    %785 = arith.mulf %784, %778 : vector<8x256xf32>
    %786 = arith.addf %776, %785 : vector<8x256xf32>
    %c296_i32_129 = arith.constant 296 : i32
    %787 = tpu.dynamic_rotate %712 by %c296_i32_129 dim 1 : vector<8x384xf32>, i32 -> vector<8x384xf32>
    %788 = vector.extract_strided_slice %787 {offsets = [0, 0], sizes = [8, 256], strides = [1, 1]} : vector<8x384xf32> to vector<8x256xf32>
    %c156 = arith.constant 156 : index
    %789 = memref.load %arg1[%c156] : memref<288xf32, #tpu.memory_space<smem>>
    %790 = vector.broadcast %789 : f32 to vector<8x256xf32>
    %791 = arith.mulf %790, %788 : vector<8x256xf32>
    %792 = arith.addf %782, %791 : vector<8x256xf32>
    %c174 = arith.constant 174 : index
    %793 = memref.load %arg1[%c174] : memref<288xf32, #tpu.memory_space<smem>>
    %794 = vector.broadcast %793 : f32 to vector<8x256xf32>
    %795 = arith.mulf %794, %788 : vector<8x256xf32>
    %796 = arith.addf %786, %795 : vector<8x256xf32>
    %c288_i32_130 = arith.constant 288 : i32
    %797 = tpu.dynamic_rotate %710 by %c288_i32_130 dim 1 : vector<8x384xf32>, i32 -> vector<8x384xf32>
    %798 = vector.extract_strided_slice %797 {offsets = [0, 0], sizes = [8, 256], strides = [1, 1]} : vector<8x384xf32> to vector<8x256xf32>
    %c148 = arith.constant 148 : index
    %799 = memref.load %arg1[%c148] : memref<288xf32, #tpu.memory_space<smem>>
    %800 = vector.broadcast %799 : f32 to vector<8x256xf32>
    %801 = arith.mulf %800, %798 : vector<8x256xf32>
    %802 = arith.addf %792, %801 : vector<8x256xf32>
    %c166 = arith.constant 166 : index
    %803 = memref.load %arg1[%c166] : memref<288xf32, #tpu.memory_space<smem>>
    %804 = vector.broadcast %803 : f32 to vector<8x256xf32>
    %805 = arith.mulf %804, %798 : vector<8x256xf32>
    %806 = arith.addf %796, %805 : vector<8x256xf32>
    %c288_i32_131 = arith.constant 288 : i32
    %807 = tpu.dynamic_rotate %712 by %c288_i32_131 dim 1 : vector<8x384xf32>, i32 -> vector<8x384xf32>
    %808 = vector.extract_strided_slice %807 {offsets = [0, 0], sizes = [8, 256], strides = [1, 1]} : vector<8x384xf32> to vector<8x256xf32>
    %c157 = arith.constant 157 : index
    %809 = memref.load %arg1[%c157] : memref<288xf32, #tpu.memory_space<smem>>
    %810 = vector.broadcast %809 : f32 to vector<8x256xf32>
    %811 = arith.mulf %810, %808 : vector<8x256xf32>
    %812 = arith.addf %802, %811 : vector<8x256xf32>
    %c175 = arith.constant 175 : index
    %813 = memref.load %arg1[%c175] : memref<288xf32, #tpu.memory_space<smem>>
    %814 = vector.broadcast %813 : f32 to vector<8x256xf32>
    %815 = arith.mulf %814, %808 : vector<8x256xf32>
    %816 = arith.addf %806, %815 : vector<8x256xf32>
    %c280_i32_132 = arith.constant 280 : i32
    %817 = tpu.dynamic_rotate %710 by %c280_i32_132 dim 1 : vector<8x384xf32>, i32 -> vector<8x384xf32>
    %818 = vector.extract_strided_slice %817 {offsets = [0, 0], sizes = [8, 256], strides = [1, 1]} : vector<8x384xf32> to vector<8x256xf32>
    %c149 = arith.constant 149 : index
    %819 = memref.load %arg1[%c149] : memref<288xf32, #tpu.memory_space<smem>>
    %820 = vector.broadcast %819 : f32 to vector<8x256xf32>
    %821 = arith.mulf %820, %818 : vector<8x256xf32>
    %822 = arith.addf %812, %821 : vector<8x256xf32>
    %c167 = arith.constant 167 : index
    %823 = memref.load %arg1[%c167] : memref<288xf32, #tpu.memory_space<smem>>
    %824 = vector.broadcast %823 : f32 to vector<8x256xf32>
    %825 = arith.mulf %824, %818 : vector<8x256xf32>
    %826 = arith.addf %816, %825 : vector<8x256xf32>
    %c280_i32_133 = arith.constant 280 : i32
    %827 = tpu.dynamic_rotate %712 by %c280_i32_133 dim 1 : vector<8x384xf32>, i32 -> vector<8x384xf32>
    %828 = vector.extract_strided_slice %827 {offsets = [0, 0], sizes = [8, 256], strides = [1, 1]} : vector<8x384xf32> to vector<8x256xf32>
    %c158 = arith.constant 158 : index
    %829 = memref.load %arg1[%c158] : memref<288xf32, #tpu.memory_space<smem>>
    %830 = vector.broadcast %829 : f32 to vector<8x256xf32>
    %831 = arith.mulf %830, %828 : vector<8x256xf32>
    %832 = arith.addf %822, %831 : vector<8x256xf32>
    %c176 = arith.constant 176 : index
    %833 = memref.load %arg1[%c176] : memref<288xf32, #tpu.memory_space<smem>>
    %834 = vector.broadcast %833 : f32 to vector<8x256xf32>
    %835 = arith.mulf %834, %828 : vector<8x256xf32>
    %836 = arith.addf %826, %835 : vector<8x256xf32>
    %c272_i32_134 = arith.constant 272 : i32
    %837 = tpu.dynamic_rotate %710 by %c272_i32_134 dim 1 : vector<8x384xf32>, i32 -> vector<8x384xf32>
    %838 = vector.extract_strided_slice %837 {offsets = [0, 0], sizes = [8, 256], strides = [1, 1]} : vector<8x384xf32> to vector<8x256xf32>
    %c150 = arith.constant 150 : index
    %839 = memref.load %arg1[%c150] : memref<288xf32, #tpu.memory_space<smem>>
    %840 = vector.broadcast %839 : f32 to vector<8x256xf32>
    %841 = arith.mulf %840, %838 : vector<8x256xf32>
    %842 = arith.addf %832, %841 : vector<8x256xf32>
    %c168 = arith.constant 168 : index
    %843 = memref.load %arg1[%c168] : memref<288xf32, #tpu.memory_space<smem>>
    %844 = vector.broadcast %843 : f32 to vector<8x256xf32>
    %845 = arith.mulf %844, %838 : vector<8x256xf32>
    %846 = arith.addf %836, %845 : vector<8x256xf32>
    %c272_i32_135 = arith.constant 272 : i32
    %847 = tpu.dynamic_rotate %712 by %c272_i32_135 dim 1 : vector<8x384xf32>, i32 -> vector<8x384xf32>
    %848 = vector.extract_strided_slice %847 {offsets = [0, 0], sizes = [8, 256], strides = [1, 1]} : vector<8x384xf32> to vector<8x256xf32>
    %c159 = arith.constant 159 : index
    %849 = memref.load %arg1[%c159] : memref<288xf32, #tpu.memory_space<smem>>
    %850 = vector.broadcast %849 : f32 to vector<8x256xf32>
    %851 = arith.mulf %850, %848 : vector<8x256xf32>
    %852 = arith.addf %842, %851 : vector<8x256xf32>
    %c177 = arith.constant 177 : index
    %853 = memref.load %arg1[%c177] : memref<288xf32, #tpu.memory_space<smem>>
    %854 = vector.broadcast %853 : f32 to vector<8x256xf32>
    %855 = arith.mulf %854, %848 : vector<8x256xf32>
    %856 = arith.addf %846, %855 : vector<8x256xf32>
    %c264_i32_136 = arith.constant 264 : i32
    %857 = tpu.dynamic_rotate %710 by %c264_i32_136 dim 1 : vector<8x384xf32>, i32 -> vector<8x384xf32>
    %858 = vector.extract_strided_slice %857 {offsets = [0, 0], sizes = [8, 256], strides = [1, 1]} : vector<8x384xf32> to vector<8x256xf32>
    %c151 = arith.constant 151 : index
    %859 = memref.load %arg1[%c151] : memref<288xf32, #tpu.memory_space<smem>>
    %860 = vector.broadcast %859 : f32 to vector<8x256xf32>
    %861 = arith.mulf %860, %858 : vector<8x256xf32>
    %862 = arith.addf %852, %861 : vector<8x256xf32>
    %c169 = arith.constant 169 : index
    %863 = memref.load %arg1[%c169] : memref<288xf32, #tpu.memory_space<smem>>
    %864 = vector.broadcast %863 : f32 to vector<8x256xf32>
    %865 = arith.mulf %864, %858 : vector<8x256xf32>
    %866 = arith.addf %856, %865 : vector<8x256xf32>
    %c264_i32_137 = arith.constant 264 : i32
    %867 = tpu.dynamic_rotate %712 by %c264_i32_137 dim 1 : vector<8x384xf32>, i32 -> vector<8x384xf32>
    %868 = vector.extract_strided_slice %867 {offsets = [0, 0], sizes = [8, 256], strides = [1, 1]} : vector<8x384xf32> to vector<8x256xf32>
    %c160 = arith.constant 160 : index
    %869 = memref.load %arg1[%c160] : memref<288xf32, #tpu.memory_space<smem>>
    %870 = vector.broadcast %869 : f32 to vector<8x256xf32>
    %871 = arith.mulf %870, %868 : vector<8x256xf32>
    %872 = arith.addf %862, %871 : vector<8x256xf32>
    %c178 = arith.constant 178 : index
    %873 = memref.load %arg1[%c178] : memref<288xf32, #tpu.memory_space<smem>>
    %874 = vector.broadcast %873 : f32 to vector<8x256xf32>
    %875 = arith.mulf %874, %868 : vector<8x256xf32>
    %876 = arith.addf %866, %875 : vector<8x256xf32>
    %877 = vector.extract_strided_slice %710 {offsets = [0, 128], sizes = [8, 256], strides = [1, 1]} : vector<8x384xf32> to vector<8x256xf32>
    %c152 = arith.constant 152 : index
    %878 = memref.load %arg1[%c152] : memref<288xf32, #tpu.memory_space<smem>>
    %879 = vector.broadcast %878 : f32 to vector<8x256xf32>
    %880 = arith.mulf %879, %877 : vector<8x256xf32>
    %881 = arith.addf %872, %880 : vector<8x256xf32>
    %c170 = arith.constant 170 : index
    %882 = memref.load %arg1[%c170] : memref<288xf32, #tpu.memory_space<smem>>
    %883 = vector.broadcast %882 : f32 to vector<8x256xf32>
    %884 = arith.mulf %883, %877 : vector<8x256xf32>
    %885 = arith.addf %876, %884 : vector<8x256xf32>
    %886 = vector.extract_strided_slice %712 {offsets = [0, 128], sizes = [8, 256], strides = [1, 1]} : vector<8x384xf32> to vector<8x256xf32>
    %c161 = arith.constant 161 : index
    %887 = memref.load %arg1[%c161] : memref<288xf32, #tpu.memory_space<smem>>
    %888 = vector.broadcast %887 : f32 to vector<8x256xf32>
    %889 = arith.mulf %888, %886 : vector<8x256xf32>
    %890 = arith.addf %881, %889 : vector<8x256xf32>
    %c179 = arith.constant 179 : index
    %891 = memref.load %arg1[%c179] : memref<288xf32, #tpu.memory_space<smem>>
    %892 = vector.broadcast %891 : f32 to vector<8x256xf32>
    %893 = arith.mulf %892, %886 : vector<8x256xf32>
    %894 = arith.addf %885, %893 : vector<8x256xf32>
    %895 = math.tanh %890 : vector<8x256xf32>
    %896 = math.tanh %894 : vector<8x256xf32>
    %c0_138 = arith.constant 0 : index
    %c0_139 = arith.constant 0 : index
    %c128_140 = arith.constant 128 : index
    %897 = vector.load %arg6[%c0_138, %c0_139, %c128_140] : memref<2x8x384xf32, #tpu.memory_space<vmem>>, vector<1x8x256xf32>
    %898 = vector.shape_cast %897 : vector<1x8x256xf32> to vector<8x256xf32>
    %899 = vector.shape_cast %895 : vector<8x256xf32> to vector<1x8x256xf32>
    tpu.vector_store %arg6[%c0_138, %c0_139, %c128_140], %899 {strides = array<i32>} : memref<2x8x384xf32, #tpu.memory_space<vmem>>, vector<1x8x256xf32>,
    %c1_141 = arith.constant 1 : index
    %c0_142 = arith.constant 0 : index
    %c128_143 = arith.constant 128 : index
    %900 = vector.load %arg6[%c1_141, %c0_142, %c128_143] : memref<2x8x384xf32, #tpu.memory_space<vmem>>, vector<1x8x256xf32>
    %901 = vector.shape_cast %900 : vector<1x8x256xf32> to vector<8x256xf32>
    %902 = vector.shape_cast %896 : vector<8x256xf32> to vector<1x8x256xf32>
    tpu.vector_store %arg6[%c1_141, %c0_142, %c128_143], %902 {strides = array<i32>} : memref<2x8x384xf32, #tpu.memory_space<vmem>>, vector<1x8x256xf32>,
    %c0_144 = arith.constant 0 : index
    %c0_145 = arith.constant 0 : index
    %c0_146 = arith.constant 0 : index
    %903 = vector.load %arg6[%c0_144, %c0_145, %c0_146] : memref<2x8x384xf32, #tpu.memory_space<vmem>>, vector<1x8x384xf32>
    %904 = vector.shape_cast %903 : vector<1x8x384xf32> to vector<8x384xf32>
    %c1_147 = arith.constant 1 : index
    %c0_148 = arith.constant 0 : index
    %c0_149 = arith.constant 0 : index
    %905 = vector.load %arg6[%c1_147, %c0_148, %c0_149] : memref<2x8x384xf32, #tpu.memory_space<vmem>>, vector<1x8x384xf32>
    %906 = vector.shape_cast %905 : vector<1x8x384xf32> to vector<8x384xf32>
    %c10 = arith.constant 10 : index
    %907 = memref.load %arg2[%c10] : memref<16xf32, #tpu.memory_space<smem>>
    %908 = vector.broadcast %907 : f32 to vector<8x256xf32>
    %c11 = arith.constant 11 : index
    %909 = memref.load %arg2[%c11] : memref<16xf32, #tpu.memory_space<smem>>
    %910 = vector.broadcast %909 : f32 to vector<8x256xf32>
    %c288_i32_150 = arith.constant 288 : i32
    %911 = tpu.dynamic_rotate %904 by %c288_i32_150 dim 1 : vector<8x384xf32>, i32 -> vector<8x384xf32>
    %912 = vector.extract_strided_slice %911 {offsets = [0, 0], sizes = [8, 256], strides = [1, 1]} : vector<8x384xf32> to vector<8x256xf32>
    %c180 = arith.constant 180 : index
    %913 = memref.load %arg1[%c180] : memref<288xf32, #tpu.memory_space<smem>>
    %914 = vector.broadcast %913 : f32 to vector<8x256xf32>
    %915 = arith.mulf %914, %912 : vector<8x256xf32>
    %916 = arith.addf %908, %915 : vector<8x256xf32>
    %c198 = arith.constant 198 : index
    %917 = memref.load %arg1[%c198] : memref<288xf32, #tpu.memory_space<smem>>
    %918 = vector.broadcast %917 : f32 to vector<8x256xf32>
    %919 = arith.mulf %918, %912 : vector<8x256xf32>
    %920 = arith.addf %910, %919 : vector<8x256xf32>
    %c288_i32_151 = arith.constant 288 : i32
    %921 = tpu.dynamic_rotate %906 by %c288_i32_151 dim 1 : vector<8x384xf32>, i32 -> vector<8x384xf32>
    %922 = vector.extract_strided_slice %921 {offsets = [0, 0], sizes = [8, 256], strides = [1, 1]} : vector<8x384xf32> to vector<8x256xf32>
    %c189 = arith.constant 189 : index
    %923 = memref.load %arg1[%c189] : memref<288xf32, #tpu.memory_space<smem>>
    %924 = vector.broadcast %923 : f32 to vector<8x256xf32>
    %925 = arith.mulf %924, %922 : vector<8x256xf32>
    %926 = arith.addf %916, %925 : vector<8x256xf32>
    %c207 = arith.constant 207 : index
    %927 = memref.load %arg1[%c207] : memref<288xf32, #tpu.memory_space<smem>>
    %928 = vector.broadcast %927 : f32 to vector<8x256xf32>
    %929 = arith.mulf %928, %922 : vector<8x256xf32>
    %930 = arith.addf %920, %929 : vector<8x256xf32>
    %c284_i32_152 = arith.constant 284 : i32
    %931 = tpu.dynamic_rotate %904 by %c284_i32_152 dim 1 : vector<8x384xf32>, i32 -> vector<8x384xf32>
    %932 = vector.extract_strided_slice %931 {offsets = [0, 0], sizes = [8, 256], strides = [1, 1]} : vector<8x384xf32> to vector<8x256xf32>
    %c181 = arith.constant 181 : index
    %933 = memref.load %arg1[%c181] : memref<288xf32, #tpu.memory_space<smem>>
    %934 = vector.broadcast %933 : f32 to vector<8x256xf32>
    %935 = arith.mulf %934, %932 : vector<8x256xf32>
    %936 = arith.addf %926, %935 : vector<8x256xf32>
    %c199 = arith.constant 199 : index
    %937 = memref.load %arg1[%c199] : memref<288xf32, #tpu.memory_space<smem>>
    %938 = vector.broadcast %937 : f32 to vector<8x256xf32>
    %939 = arith.mulf %938, %932 : vector<8x256xf32>
    %940 = arith.addf %930, %939 : vector<8x256xf32>
    %c284_i32_153 = arith.constant 284 : i32
    %941 = tpu.dynamic_rotate %906 by %c284_i32_153 dim 1 : vector<8x384xf32>, i32 -> vector<8x384xf32>
    %942 = vector.extract_strided_slice %941 {offsets = [0, 0], sizes = [8, 256], strides = [1, 1]} : vector<8x384xf32> to vector<8x256xf32>
    %c190 = arith.constant 190 : index
    %943 = memref.load %arg1[%c190] : memref<288xf32, #tpu.memory_space<smem>>
    %944 = vector.broadcast %943 : f32 to vector<8x256xf32>
    %945 = arith.mulf %944, %942 : vector<8x256xf32>
    %946 = arith.addf %936, %945 : vector<8x256xf32>
    %c208 = arith.constant 208 : index
    %947 = memref.load %arg1[%c208] : memref<288xf32, #tpu.memory_space<smem>>
    %948 = vector.broadcast %947 : f32 to vector<8x256xf32>
    %949 = arith.mulf %948, %942 : vector<8x256xf32>
    %950 = arith.addf %940, %949 : vector<8x256xf32>
    %c280_i32_154 = arith.constant 280 : i32
    %951 = tpu.dynamic_rotate %904 by %c280_i32_154 dim 1 : vector<8x384xf32>, i32 -> vector<8x384xf32>
    %952 = vector.extract_strided_slice %951 {offsets = [0, 0], sizes = [8, 256], strides = [1, 1]} : vector<8x384xf32> to vector<8x256xf32>
    %c182 = arith.constant 182 : index
    %953 = memref.load %arg1[%c182] : memref<288xf32, #tpu.memory_space<smem>>
    %954 = vector.broadcast %953 : f32 to vector<8x256xf32>
    %955 = arith.mulf %954, %952 : vector<8x256xf32>
    %956 = arith.addf %946, %955 : vector<8x256xf32>
    %c200 = arith.constant 200 : index
    %957 = memref.load %arg1[%c200] : memref<288xf32, #tpu.memory_space<smem>>
    %958 = vector.broadcast %957 : f32 to vector<8x256xf32>
    %959 = arith.mulf %958, %952 : vector<8x256xf32>
    %960 = arith.addf %950, %959 : vector<8x256xf32>
    %c280_i32_155 = arith.constant 280 : i32
    %961 = tpu.dynamic_rotate %906 by %c280_i32_155 dim 1 : vector<8x384xf32>, i32 -> vector<8x384xf32>
    %962 = vector.extract_strided_slice %961 {offsets = [0, 0], sizes = [8, 256], strides = [1, 1]} : vector<8x384xf32> to vector<8x256xf32>
    %c191 = arith.constant 191 : index
    %963 = memref.load %arg1[%c191] : memref<288xf32, #tpu.memory_space<smem>>
    %964 = vector.broadcast %963 : f32 to vector<8x256xf32>
    %965 = arith.mulf %964, %962 : vector<8x256xf32>
    %966 = arith.addf %956, %965 : vector<8x256xf32>
    %c209 = arith.constant 209 : index
    %967 = memref.load %arg1[%c209] : memref<288xf32, #tpu.memory_space<smem>>
    %968 = vector.broadcast %967 : f32 to vector<8x256xf32>
    %969 = arith.mulf %968, %962 : vector<8x256xf32>
    %970 = arith.addf %960, %969 : vector<8x256xf32>
    %c276_i32_156 = arith.constant 276 : i32
    %971 = tpu.dynamic_rotate %904 by %c276_i32_156 dim 1 : vector<8x384xf32>, i32 -> vector<8x384xf32>
    %972 = vector.extract_strided_slice %971 {offsets = [0, 0], sizes = [8, 256], strides = [1, 1]} : vector<8x384xf32> to vector<8x256xf32>
    %c183 = arith.constant 183 : index
    %973 = memref.load %arg1[%c183] : memref<288xf32, #tpu.memory_space<smem>>
    %974 = vector.broadcast %973 : f32 to vector<8x256xf32>
    %975 = arith.mulf %974, %972 : vector<8x256xf32>
    %976 = arith.addf %966, %975 : vector<8x256xf32>
    %c201 = arith.constant 201 : index
    %977 = memref.load %arg1[%c201] : memref<288xf32, #tpu.memory_space<smem>>
    %978 = vector.broadcast %977 : f32 to vector<8x256xf32>
    %979 = arith.mulf %978, %972 : vector<8x256xf32>
    %980 = arith.addf %970, %979 : vector<8x256xf32>
    %c276_i32_157 = arith.constant 276 : i32
    %981 = tpu.dynamic_rotate %906 by %c276_i32_157 dim 1 : vector<8x384xf32>, i32 -> vector<8x384xf32>
    %982 = vector.extract_strided_slice %981 {offsets = [0, 0], sizes = [8, 256], strides = [1, 1]} : vector<8x384xf32> to vector<8x256xf32>
    %c192 = arith.constant 192 : index
    %983 = memref.load %arg1[%c192] : memref<288xf32, #tpu.memory_space<smem>>
    %984 = vector.broadcast %983 : f32 to vector<8x256xf32>
    %985 = arith.mulf %984, %982 : vector<8x256xf32>
    %986 = arith.addf %976, %985 : vector<8x256xf32>
    %c210 = arith.constant 210 : index
    %987 = memref.load %arg1[%c210] : memref<288xf32, #tpu.memory_space<smem>>
    %988 = vector.broadcast %987 : f32 to vector<8x256xf32>
    %989 = arith.mulf %988, %982 : vector<8x256xf32>
    %990 = arith.addf %980, %989 : vector<8x256xf32>
    %c272_i32_158 = arith.constant 272 : i32
    %991 = tpu.dynamic_rotate %904 by %c272_i32_158 dim 1 : vector<8x384xf32>, i32 -> vector<8x384xf32>
    %992 = vector.extract_strided_slice %991 {offsets = [0, 0], sizes = [8, 256], strides = [1, 1]} : vector<8x384xf32> to vector<8x256xf32>
    %c184 = arith.constant 184 : index
    %993 = memref.load %arg1[%c184] : memref<288xf32, #tpu.memory_space<smem>>
    %994 = vector.broadcast %993 : f32 to vector<8x256xf32>
    %995 = arith.mulf %994, %992 : vector<8x256xf32>
    %996 = arith.addf %986, %995 : vector<8x256xf32>
    %c202 = arith.constant 202 : index
    %997 = memref.load %arg1[%c202] : memref<288xf32, #tpu.memory_space<smem>>
    %998 = vector.broadcast %997 : f32 to vector<8x256xf32>
    %999 = arith.mulf %998, %992 : vector<8x256xf32>
    %1000 = arith.addf %990, %999 : vector<8x256xf32>
    %c272_i32_159 = arith.constant 272 : i32
    %1001 = tpu.dynamic_rotate %906 by %c272_i32_159 dim 1 : vector<8x384xf32>, i32 -> vector<8x384xf32>
    %1002 = vector.extract_strided_slice %1001 {offsets = [0, 0], sizes = [8, 256], strides = [1, 1]} : vector<8x384xf32> to vector<8x256xf32>
    %c193 = arith.constant 193 : index
    %1003 = memref.load %arg1[%c193] : memref<288xf32, #tpu.memory_space<smem>>
    %1004 = vector.broadcast %1003 : f32 to vector<8x256xf32>
    %1005 = arith.mulf %1004, %1002 : vector<8x256xf32>
    %1006 = arith.addf %996, %1005 : vector<8x256xf32>
    %c211 = arith.constant 211 : index
    %1007 = memref.load %arg1[%c211] : memref<288xf32, #tpu.memory_space<smem>>
    %1008 = vector.broadcast %1007 : f32 to vector<8x256xf32>
    %1009 = arith.mulf %1008, %1002 : vector<8x256xf32>
    %1010 = arith.addf %1000, %1009 : vector<8x256xf32>
    %c268_i32_160 = arith.constant 268 : i32
    %1011 = tpu.dynamic_rotate %904 by %c268_i32_160 dim 1 : vector<8x384xf32>, i32 -> vector<8x384xf32>
    %1012 = vector.extract_strided_slice %1011 {offsets = [0, 0], sizes = [8, 256], strides = [1, 1]} : vector<8x384xf32> to vector<8x256xf32>
    %c185 = arith.constant 185 : index
    %1013 = memref.load %arg1[%c185] : memref<288xf32, #tpu.memory_space<smem>>
    %1014 = vector.broadcast %1013 : f32 to vector<8x256xf32>
    %1015 = arith.mulf %1014, %1012 : vector<8x256xf32>
    %1016 = arith.addf %1006, %1015 : vector<8x256xf32>
    %c203 = arith.constant 203 : index
    %1017 = memref.load %arg1[%c203] : memref<288xf32, #tpu.memory_space<smem>>
    %1018 = vector.broadcast %1017 : f32 to vector<8x256xf32>
    %1019 = arith.mulf %1018, %1012 : vector<8x256xf32>
    %1020 = arith.addf %1010, %1019 : vector<8x256xf32>
    %c268_i32_161 = arith.constant 268 : i32
    %1021 = tpu.dynamic_rotate %906 by %c268_i32_161 dim 1 : vector<8x384xf32>, i32 -> vector<8x384xf32>
    %1022 = vector.extract_strided_slice %1021 {offsets = [0, 0], sizes = [8, 256], strides = [1, 1]} : vector<8x384xf32> to vector<8x256xf32>
    %c194 = arith.constant 194 : index
    %1023 = memref.load %arg1[%c194] : memref<288xf32, #tpu.memory_space<smem>>
    %1024 = vector.broadcast %1023 : f32 to vector<8x256xf32>
    %1025 = arith.mulf %1024, %1022 : vector<8x256xf32>
    %1026 = arith.addf %1016, %1025 : vector<8x256xf32>
    %c212 = arith.constant 212 : index
    %1027 = memref.load %arg1[%c212] : memref<288xf32, #tpu.memory_space<smem>>
    %1028 = vector.broadcast %1027 : f32 to vector<8x256xf32>
    %1029 = arith.mulf %1028, %1022 : vector<8x256xf32>
    %1030 = arith.addf %1020, %1029 : vector<8x256xf32>
    %c264_i32_162 = arith.constant 264 : i32
    %1031 = tpu.dynamic_rotate %904 by %c264_i32_162 dim 1 : vector<8x384xf32>, i32 -> vector<8x384xf32>
    %1032 = vector.extract_strided_slice %1031 {offsets = [0, 0], sizes = [8, 256], strides = [1, 1]} : vector<8x384xf32> to vector<8x256xf32>
    %c186 = arith.constant 186 : index
    %1033 = memref.load %arg1[%c186] : memref<288xf32, #tpu.memory_space<smem>>
    %1034 = vector.broadcast %1033 : f32 to vector<8x256xf32>
    %1035 = arith.mulf %1034, %1032 : vector<8x256xf32>
    %1036 = arith.addf %1026, %1035 : vector<8x256xf32>
    %c204 = arith.constant 204 : index
    %1037 = memref.load %arg1[%c204] : memref<288xf32, #tpu.memory_space<smem>>
    %1038 = vector.broadcast %1037 : f32 to vector<8x256xf32>
    %1039 = arith.mulf %1038, %1032 : vector<8x256xf32>
    %1040 = arith.addf %1030, %1039 : vector<8x256xf32>
    %c264_i32_163 = arith.constant 264 : i32
    %1041 = tpu.dynamic_rotate %906 by %c264_i32_163 dim 1 : vector<8x384xf32>, i32 -> vector<8x384xf32>
    %1042 = vector.extract_strided_slice %1041 {offsets = [0, 0], sizes = [8, 256], strides = [1, 1]} : vector<8x384xf32> to vector<8x256xf32>
    %c195 = arith.constant 195 : index
    %1043 = memref.load %arg1[%c195] : memref<288xf32, #tpu.memory_space<smem>>
    %1044 = vector.broadcast %1043 : f32 to vector<8x256xf32>
    %1045 = arith.mulf %1044, %1042 : vector<8x256xf32>
    %1046 = arith.addf %1036, %1045 : vector<8x256xf32>
    %c213 = arith.constant 213 : index
    %1047 = memref.load %arg1[%c213] : memref<288xf32, #tpu.memory_space<smem>>
    %1048 = vector.broadcast %1047 : f32 to vector<8x256xf32>
    %1049 = arith.mulf %1048, %1042 : vector<8x256xf32>
    %1050 = arith.addf %1040, %1049 : vector<8x256xf32>
    %c260_i32_164 = arith.constant 260 : i32
    %1051 = tpu.dynamic_rotate %904 by %c260_i32_164 dim 1 : vector<8x384xf32>, i32 -> vector<8x384xf32>
    %1052 = vector.extract_strided_slice %1051 {offsets = [0, 0], sizes = [8, 256], strides = [1, 1]} : vector<8x384xf32> to vector<8x256xf32>
    %c187 = arith.constant 187 : index
    %1053 = memref.load %arg1[%c187] : memref<288xf32, #tpu.memory_space<smem>>
    %1054 = vector.broadcast %1053 : f32 to vector<8x256xf32>
    %1055 = arith.mulf %1054, %1052 : vector<8x256xf32>
    %1056 = arith.addf %1046, %1055 : vector<8x256xf32>
    %c205 = arith.constant 205 : index
    %1057 = memref.load %arg1[%c205] : memref<288xf32, #tpu.memory_space<smem>>
    %1058 = vector.broadcast %1057 : f32 to vector<8x256xf32>
    %1059 = arith.mulf %1058, %1052 : vector<8x256xf32>
    %1060 = arith.addf %1050, %1059 : vector<8x256xf32>
    %c260_i32_165 = arith.constant 260 : i32
    %1061 = tpu.dynamic_rotate %906 by %c260_i32_165 dim 1 : vector<8x384xf32>, i32 -> vector<8x384xf32>
    %1062 = vector.extract_strided_slice %1061 {offsets = [0, 0], sizes = [8, 256], strides = [1, 1]} : vector<8x384xf32> to vector<8x256xf32>
    %c196 = arith.constant 196 : index
    %1063 = memref.load %arg1[%c196] : memref<288xf32, #tpu.memory_space<smem>>
    %1064 = vector.broadcast %1063 : f32 to vector<8x256xf32>
    %1065 = arith.mulf %1064, %1062 : vector<8x256xf32>
    %1066 = arith.addf %1056, %1065 : vector<8x256xf32>
    %c214 = arith.constant 214 : index
    %1067 = memref.load %arg1[%c214] : memref<288xf32, #tpu.memory_space<smem>>
    %1068 = vector.broadcast %1067 : f32 to vector<8x256xf32>
    %1069 = arith.mulf %1068, %1062 : vector<8x256xf32>
    %1070 = arith.addf %1060, %1069 : vector<8x256xf32>
    %1071 = vector.extract_strided_slice %904 {offsets = [0, 128], sizes = [8, 256], strides = [1, 1]} : vector<8x384xf32> to vector<8x256xf32>
    %c188 = arith.constant 188 : index
    %1072 = memref.load %arg1[%c188] : memref<288xf32, #tpu.memory_space<smem>>
    %1073 = vector.broadcast %1072 : f32 to vector<8x256xf32>
    %1074 = arith.mulf %1073, %1071 : vector<8x256xf32>
    %1075 = arith.addf %1066, %1074 : vector<8x256xf32>
    %c206 = arith.constant 206 : index
    %1076 = memref.load %arg1[%c206] : memref<288xf32, #tpu.memory_space<smem>>
    %1077 = vector.broadcast %1076 : f32 to vector<8x256xf32>
    %1078 = arith.mulf %1077, %1071 : vector<8x256xf32>
    %1079 = arith.addf %1070, %1078 : vector<8x256xf32>
    %1080 = vector.extract_strided_slice %906 {offsets = [0, 128], sizes = [8, 256], strides = [1, 1]} : vector<8x384xf32> to vector<8x256xf32>
    %c197 = arith.constant 197 : index
    %1081 = memref.load %arg1[%c197] : memref<288xf32, #tpu.memory_space<smem>>
    %1082 = vector.broadcast %1081 : f32 to vector<8x256xf32>
    %1083 = arith.mulf %1082, %1080 : vector<8x256xf32>
    %1084 = arith.addf %1075, %1083 : vector<8x256xf32>
    %c215 = arith.constant 215 : index
    %1085 = memref.load %arg1[%c215] : memref<288xf32, #tpu.memory_space<smem>>
    %1086 = vector.broadcast %1085 : f32 to vector<8x256xf32>
    %1087 = arith.mulf %1086, %1080 : vector<8x256xf32>
    %1088 = arith.addf %1079, %1087 : vector<8x256xf32>
    %1089 = math.tanh %1084 : vector<8x256xf32>
    %1090 = math.tanh %1088 : vector<8x256xf32>
    %c0_166 = arith.constant 0 : index
    %c0_167 = arith.constant 0 : index
    %c128_168 = arith.constant 128 : index
    %1091 = vector.load %arg6[%c0_166, %c0_167, %c128_168] : memref<2x8x384xf32, #tpu.memory_space<vmem>>, vector<1x8x256xf32>
    %1092 = vector.shape_cast %1091 : vector<1x8x256xf32> to vector<8x256xf32>
    %1093 = vector.shape_cast %1089 : vector<8x256xf32> to vector<1x8x256xf32>
    tpu.vector_store %arg6[%c0_166, %c0_167, %c128_168], %1093 {strides = array<i32>} : memref<2x8x384xf32, #tpu.memory_space<vmem>>, vector<1x8x256xf32>,
    %c1_169 = arith.constant 1 : index
    %c0_170 = arith.constant 0 : index
    %c128_171 = arith.constant 128 : index
    %1094 = vector.load %arg6[%c1_169, %c0_170, %c128_171] : memref<2x8x384xf32, #tpu.memory_space<vmem>>, vector<1x8x256xf32>
    %1095 = vector.shape_cast %1094 : vector<1x8x256xf32> to vector<8x256xf32>
    %1096 = vector.shape_cast %1090 : vector<8x256xf32> to vector<1x8x256xf32>
    tpu.vector_store %arg6[%c1_169, %c0_170, %c128_171], %1096 {strides = array<i32>} : memref<2x8x384xf32, #tpu.memory_space<vmem>>, vector<1x8x256xf32>,
    %c0_172 = arith.constant 0 : index
    %c0_173 = arith.constant 0 : index
    %c0_174 = arith.constant 0 : index
    %1097 = vector.load %arg6[%c0_172, %c0_173, %c0_174] : memref<2x8x384xf32, #tpu.memory_space<vmem>>, vector<1x8x384xf32>
    %1098 = vector.shape_cast %1097 : vector<1x8x384xf32> to vector<8x384xf32>
    %c1_175 = arith.constant 1 : index
    %c0_176 = arith.constant 0 : index
    %c0_177 = arith.constant 0 : index
    %1099 = vector.load %arg6[%c1_175, %c0_176, %c0_177] : memref<2x8x384xf32, #tpu.memory_space<vmem>>, vector<1x8x384xf32>
    %1100 = vector.shape_cast %1099 : vector<1x8x384xf32> to vector<8x384xf32>
    %c12 = arith.constant 12 : index
    %1101 = memref.load %arg2[%c12] : memref<16xf32, #tpu.memory_space<smem>>
    %1102 = vector.broadcast %1101 : f32 to vector<8x256xf32>
    %c13 = arith.constant 13 : index
    %1103 = memref.load %arg2[%c13] : memref<16xf32, #tpu.memory_space<smem>>
    %1104 = vector.broadcast %1103 : f32 to vector<8x256xf32>
    %c272_i32_178 = arith.constant 272 : i32
    %1105 = tpu.dynamic_rotate %1098 by %c272_i32_178 dim 1 : vector<8x384xf32>, i32 -> vector<8x384xf32>
    %1106 = vector.extract_strided_slice %1105 {offsets = [0, 0], sizes = [8, 256], strides = [1, 1]} : vector<8x384xf32> to vector<8x256xf32>
    %c216 = arith.constant 216 : index
    %1107 = memref.load %arg1[%c216] : memref<288xf32, #tpu.memory_space<smem>>
    %1108 = vector.broadcast %1107 : f32 to vector<8x256xf32>
    %1109 = arith.mulf %1108, %1106 : vector<8x256xf32>
    %1110 = arith.addf %1102, %1109 : vector<8x256xf32>
    %c234 = arith.constant 234 : index
    %1111 = memref.load %arg1[%c234] : memref<288xf32, #tpu.memory_space<smem>>
    %1112 = vector.broadcast %1111 : f32 to vector<8x256xf32>
    %1113 = arith.mulf %1112, %1106 : vector<8x256xf32>
    %1114 = arith.addf %1104, %1113 : vector<8x256xf32>
    %c272_i32_179 = arith.constant 272 : i32
    %1115 = tpu.dynamic_rotate %1100 by %c272_i32_179 dim 1 : vector<8x384xf32>, i32 -> vector<8x384xf32>
    %1116 = vector.extract_strided_slice %1115 {offsets = [0, 0], sizes = [8, 256], strides = [1, 1]} : vector<8x384xf32> to vector<8x256xf32>
    %c225 = arith.constant 225 : index
    %1117 = memref.load %arg1[%c225] : memref<288xf32, #tpu.memory_space<smem>>
    %1118 = vector.broadcast %1117 : f32 to vector<8x256xf32>
    %1119 = arith.mulf %1118, %1116 : vector<8x256xf32>
    %1120 = arith.addf %1110, %1119 : vector<8x256xf32>
    %c243 = arith.constant 243 : index
    %1121 = memref.load %arg1[%c243] : memref<288xf32, #tpu.memory_space<smem>>
    %1122 = vector.broadcast %1121 : f32 to vector<8x256xf32>
    %1123 = arith.mulf %1122, %1116 : vector<8x256xf32>
    %1124 = arith.addf %1114, %1123 : vector<8x256xf32>
    %c270_i32_180 = arith.constant 270 : i32
    %1125 = tpu.dynamic_rotate %1098 by %c270_i32_180 dim 1 : vector<8x384xf32>, i32 -> vector<8x384xf32>
    %1126 = vector.extract_strided_slice %1125 {offsets = [0, 0], sizes = [8, 256], strides = [1, 1]} : vector<8x384xf32> to vector<8x256xf32>
    %c217 = arith.constant 217 : index
    %1127 = memref.load %arg1[%c217] : memref<288xf32, #tpu.memory_space<smem>>
    %1128 = vector.broadcast %1127 : f32 to vector<8x256xf32>
    %1129 = arith.mulf %1128, %1126 : vector<8x256xf32>
    %1130 = arith.addf %1120, %1129 : vector<8x256xf32>
    %c235 = arith.constant 235 : index
    %1131 = memref.load %arg1[%c235] : memref<288xf32, #tpu.memory_space<smem>>
    %1132 = vector.broadcast %1131 : f32 to vector<8x256xf32>
    %1133 = arith.mulf %1132, %1126 : vector<8x256xf32>
    %1134 = arith.addf %1124, %1133 : vector<8x256xf32>
    %c270_i32_181 = arith.constant 270 : i32
    %1135 = tpu.dynamic_rotate %1100 by %c270_i32_181 dim 1 : vector<8x384xf32>, i32 -> vector<8x384xf32>
    %1136 = vector.extract_strided_slice %1135 {offsets = [0, 0], sizes = [8, 256], strides = [1, 1]} : vector<8x384xf32> to vector<8x256xf32>
    %c226 = arith.constant 226 : index
    %1137 = memref.load %arg1[%c226] : memref<288xf32, #tpu.memory_space<smem>>
    %1138 = vector.broadcast %1137 : f32 to vector<8x256xf32>
    %1139 = arith.mulf %1138, %1136 : vector<8x256xf32>
    %1140 = arith.addf %1130, %1139 : vector<8x256xf32>
    %c244 = arith.constant 244 : index
    %1141 = memref.load %arg1[%c244] : memref<288xf32, #tpu.memory_space<smem>>
    %1142 = vector.broadcast %1141 : f32 to vector<8x256xf32>
    %1143 = arith.mulf %1142, %1136 : vector<8x256xf32>
    %1144 = arith.addf %1134, %1143 : vector<8x256xf32>
    %c268_i32_182 = arith.constant 268 : i32
    %1145 = tpu.dynamic_rotate %1098 by %c268_i32_182 dim 1 : vector<8x384xf32>, i32 -> vector<8x384xf32>
    %1146 = vector.extract_strided_slice %1145 {offsets = [0, 0], sizes = [8, 256], strides = [1, 1]} : vector<8x384xf32> to vector<8x256xf32>
    %c218 = arith.constant 218 : index
    %1147 = memref.load %arg1[%c218] : memref<288xf32, #tpu.memory_space<smem>>
    %1148 = vector.broadcast %1147 : f32 to vector<8x256xf32>
    %1149 = arith.mulf %1148, %1146 : vector<8x256xf32>
    %1150 = arith.addf %1140, %1149 : vector<8x256xf32>
    %c236 = arith.constant 236 : index
    %1151 = memref.load %arg1[%c236] : memref<288xf32, #tpu.memory_space<smem>>
    %1152 = vector.broadcast %1151 : f32 to vector<8x256xf32>
    %1153 = arith.mulf %1152, %1146 : vector<8x256xf32>
    %1154 = arith.addf %1144, %1153 : vector<8x256xf32>
    %c268_i32_183 = arith.constant 268 : i32
    %1155 = tpu.dynamic_rotate %1100 by %c268_i32_183 dim 1 : vector<8x384xf32>, i32 -> vector<8x384xf32>
    %1156 = vector.extract_strided_slice %1155 {offsets = [0, 0], sizes = [8, 256], strides = [1, 1]} : vector<8x384xf32> to vector<8x256xf32>
    %c227 = arith.constant 227 : index
    %1157 = memref.load %arg1[%c227] : memref<288xf32, #tpu.memory_space<smem>>
    %1158 = vector.broadcast %1157 : f32 to vector<8x256xf32>
    %1159 = arith.mulf %1158, %1156 : vector<8x256xf32>
    %1160 = arith.addf %1150, %1159 : vector<8x256xf32>
    %c245 = arith.constant 245 : index
    %1161 = memref.load %arg1[%c245] : memref<288xf32, #tpu.memory_space<smem>>
    %1162 = vector.broadcast %1161 : f32 to vector<8x256xf32>
    %1163 = arith.mulf %1162, %1156 : vector<8x256xf32>
    %1164 = arith.addf %1154, %1163 : vector<8x256xf32>
    %c266_i32_184 = arith.constant 266 : i32
    %1165 = tpu.dynamic_rotate %1098 by %c266_i32_184 dim 1 : vector<8x384xf32>, i32 -> vector<8x384xf32>
    %1166 = vector.extract_strided_slice %1165 {offsets = [0, 0], sizes = [8, 256], strides = [1, 1]} : vector<8x384xf32> to vector<8x256xf32>
    %c219 = arith.constant 219 : index
    %1167 = memref.load %arg1[%c219] : memref<288xf32, #tpu.memory_space<smem>>
    %1168 = vector.broadcast %1167 : f32 to vector<8x256xf32>
    %1169 = arith.mulf %1168, %1166 : vector<8x256xf32>
    %1170 = arith.addf %1160, %1169 : vector<8x256xf32>
    %c237 = arith.constant 237 : index
    %1171 = memref.load %arg1[%c237] : memref<288xf32, #tpu.memory_space<smem>>
    %1172 = vector.broadcast %1171 : f32 to vector<8x256xf32>
    %1173 = arith.mulf %1172, %1166 : vector<8x256xf32>
    %1174 = arith.addf %1164, %1173 : vector<8x256xf32>
    %c266_i32_185 = arith.constant 266 : i32
    %1175 = tpu.dynamic_rotate %1100 by %c266_i32_185 dim 1 : vector<8x384xf32>, i32 -> vector<8x384xf32>
    %1176 = vector.extract_strided_slice %1175 {offsets = [0, 0], sizes = [8, 256], strides = [1, 1]} : vector<8x384xf32> to vector<8x256xf32>
    %c228 = arith.constant 228 : index
    %1177 = memref.load %arg1[%c228] : memref<288xf32, #tpu.memory_space<smem>>
    %1178 = vector.broadcast %1177 : f32 to vector<8x256xf32>
    %1179 = arith.mulf %1178, %1176 : vector<8x256xf32>
    %1180 = arith.addf %1170, %1179 : vector<8x256xf32>
    %c246 = arith.constant 246 : index
    %1181 = memref.load %arg1[%c246] : memref<288xf32, #tpu.memory_space<smem>>
    %1182 = vector.broadcast %1181 : f32 to vector<8x256xf32>
    %1183 = arith.mulf %1182, %1176 : vector<8x256xf32>
    %1184 = arith.addf %1174, %1183 : vector<8x256xf32>
    %c264_i32_186 = arith.constant 264 : i32
    %1185 = tpu.dynamic_rotate %1098 by %c264_i32_186 dim 1 : vector<8x384xf32>, i32 -> vector<8x384xf32>
    %1186 = vector.extract_strided_slice %1185 {offsets = [0, 0], sizes = [8, 256], strides = [1, 1]} : vector<8x384xf32> to vector<8x256xf32>
    %c220 = arith.constant 220 : index
    %1187 = memref.load %arg1[%c220] : memref<288xf32, #tpu.memory_space<smem>>
    %1188 = vector.broadcast %1187 : f32 to vector<8x256xf32>
    %1189 = arith.mulf %1188, %1186 : vector<8x256xf32>
    %1190 = arith.addf %1180, %1189 : vector<8x256xf32>
    %c238 = arith.constant 238 : index
    %1191 = memref.load %arg1[%c238] : memref<288xf32, #tpu.memory_space<smem>>
    %1192 = vector.broadcast %1191 : f32 to vector<8x256xf32>
    %1193 = arith.mulf %1192, %1186 : vector<8x256xf32>
    %1194 = arith.addf %1184, %1193 : vector<8x256xf32>
    %c264_i32_187 = arith.constant 264 : i32
    %1195 = tpu.dynamic_rotate %1100 by %c264_i32_187 dim 1 : vector<8x384xf32>, i32 -> vector<8x384xf32>
    %1196 = vector.extract_strided_slice %1195 {offsets = [0, 0], sizes = [8, 256], strides = [1, 1]} : vector<8x384xf32> to vector<8x256xf32>
    %c229 = arith.constant 229 : index
    %1197 = memref.load %arg1[%c229] : memref<288xf32, #tpu.memory_space<smem>>
    %1198 = vector.broadcast %1197 : f32 to vector<8x256xf32>
    %1199 = arith.mulf %1198, %1196 : vector<8x256xf32>
    %1200 = arith.addf %1190, %1199 : vector<8x256xf32>
    %c247 = arith.constant 247 : index
    %1201 = memref.load %arg1[%c247] : memref<288xf32, #tpu.memory_space<smem>>
    %1202 = vector.broadcast %1201 : f32 to vector<8x256xf32>
    %1203 = arith.mulf %1202, %1196 : vector<8x256xf32>
    %1204 = arith.addf %1194, %1203 : vector<8x256xf32>
    %c262_i32_188 = arith.constant 262 : i32
    %1205 = tpu.dynamic_rotate %1098 by %c262_i32_188 dim 1 : vector<8x384xf32>, i32 -> vector<8x384xf32>
    %1206 = vector.extract_strided_slice %1205 {offsets = [0, 0], sizes = [8, 256], strides = [1, 1]} : vector<8x384xf32> to vector<8x256xf32>
    %c221 = arith.constant 221 : index
    %1207 = memref.load %arg1[%c221] : memref<288xf32, #tpu.memory_space<smem>>
    %1208 = vector.broadcast %1207 : f32 to vector<8x256xf32>
    %1209 = arith.mulf %1208, %1206 : vector<8x256xf32>
    %1210 = arith.addf %1200, %1209 : vector<8x256xf32>
    %c239 = arith.constant 239 : index
    %1211 = memref.load %arg1[%c239] : memref<288xf32, #tpu.memory_space<smem>>
    %1212 = vector.broadcast %1211 : f32 to vector<8x256xf32>
    %1213 = arith.mulf %1212, %1206 : vector<8x256xf32>
    %1214 = arith.addf %1204, %1213 : vector<8x256xf32>
    %c262_i32_189 = arith.constant 262 : i32
    %1215 = tpu.dynamic_rotate %1100 by %c262_i32_189 dim 1 : vector<8x384xf32>, i32 -> vector<8x384xf32>
    %1216 = vector.extract_strided_slice %1215 {offsets = [0, 0], sizes = [8, 256], strides = [1, 1]} : vector<8x384xf32> to vector<8x256xf32>
    %c230 = arith.constant 230 : index
    %1217 = memref.load %arg1[%c230] : memref<288xf32, #tpu.memory_space<smem>>
    %1218 = vector.broadcast %1217 : f32 to vector<8x256xf32>
    %1219 = arith.mulf %1218, %1216 : vector<8x256xf32>
    %1220 = arith.addf %1210, %1219 : vector<8x256xf32>
    %c248 = arith.constant 248 : index
    %1221 = memref.load %arg1[%c248] : memref<288xf32, #tpu.memory_space<smem>>
    %1222 = vector.broadcast %1221 : f32 to vector<8x256xf32>
    %1223 = arith.mulf %1222, %1216 : vector<8x256xf32>
    %1224 = arith.addf %1214, %1223 : vector<8x256xf32>
    %c260_i32_190 = arith.constant 260 : i32
    %1225 = tpu.dynamic_rotate %1098 by %c260_i32_190 dim 1 : vector<8x384xf32>, i32 -> vector<8x384xf32>
    %1226 = vector.extract_strided_slice %1225 {offsets = [0, 0], sizes = [8, 256], strides = [1, 1]} : vector<8x384xf32> to vector<8x256xf32>
    %c222 = arith.constant 222 : index
    %1227 = memref.load %arg1[%c222] : memref<288xf32, #tpu.memory_space<smem>>
    %1228 = vector.broadcast %1227 : f32 to vector<8x256xf32>
    %1229 = arith.mulf %1228, %1226 : vector<8x256xf32>
    %1230 = arith.addf %1220, %1229 : vector<8x256xf32>
    %c240 = arith.constant 240 : index
    %1231 = memref.load %arg1[%c240] : memref<288xf32, #tpu.memory_space<smem>>
    %1232 = vector.broadcast %1231 : f32 to vector<8x256xf32>
    %1233 = arith.mulf %1232, %1226 : vector<8x256xf32>
    %1234 = arith.addf %1224, %1233 : vector<8x256xf32>
    %c260_i32_191 = arith.constant 260 : i32
    %1235 = tpu.dynamic_rotate %1100 by %c260_i32_191 dim 1 : vector<8x384xf32>, i32 -> vector<8x384xf32>
    %1236 = vector.extract_strided_slice %1235 {offsets = [0, 0], sizes = [8, 256], strides = [1, 1]} : vector<8x384xf32> to vector<8x256xf32>
    %c231 = arith.constant 231 : index
    %1237 = memref.load %arg1[%c231] : memref<288xf32, #tpu.memory_space<smem>>
    %1238 = vector.broadcast %1237 : f32 to vector<8x256xf32>
    %1239 = arith.mulf %1238, %1236 : vector<8x256xf32>
    %1240 = arith.addf %1230, %1239 : vector<8x256xf32>
    %c249 = arith.constant 249 : index
    %1241 = memref.load %arg1[%c249] : memref<288xf32, #tpu.memory_space<smem>>
    %1242 = vector.broadcast %1241 : f32 to vector<8x256xf32>
    %1243 = arith.mulf %1242, %1236 : vector<8x256xf32>
    %1244 = arith.addf %1234, %1243 : vector<8x256xf32>
    %c258_i32_192 = arith.constant 258 : i32
    %1245 = tpu.dynamic_rotate %1098 by %c258_i32_192 dim 1 : vector<8x384xf32>, i32 -> vector<8x384xf32>
    %1246 = vector.extract_strided_slice %1245 {offsets = [0, 0], sizes = [8, 256], strides = [1, 1]} : vector<8x384xf32> to vector<8x256xf32>
    %c223 = arith.constant 223 : index
    %1247 = memref.load %arg1[%c223] : memref<288xf32, #tpu.memory_space<smem>>
    %1248 = vector.broadcast %1247 : f32 to vector<8x256xf32>
    %1249 = arith.mulf %1248, %1246 : vector<8x256xf32>
    %1250 = arith.addf %1240, %1249 : vector<8x256xf32>
    %c241 = arith.constant 241 : index
    %1251 = memref.load %arg1[%c241] : memref<288xf32, #tpu.memory_space<smem>>
    %1252 = vector.broadcast %1251 : f32 to vector<8x256xf32>
    %1253 = arith.mulf %1252, %1246 : vector<8x256xf32>
    %1254 = arith.addf %1244, %1253 : vector<8x256xf32>
    %c258_i32_193 = arith.constant 258 : i32
    %1255 = tpu.dynamic_rotate %1100 by %c258_i32_193 dim 1 : vector<8x384xf32>, i32 -> vector<8x384xf32>
    %1256 = vector.extract_strided_slice %1255 {offsets = [0, 0], sizes = [8, 256], strides = [1, 1]} : vector<8x384xf32> to vector<8x256xf32>
    %c232 = arith.constant 232 : index
    %1257 = memref.load %arg1[%c232] : memref<288xf32, #tpu.memory_space<smem>>
    %1258 = vector.broadcast %1257 : f32 to vector<8x256xf32>
    %1259 = arith.mulf %1258, %1256 : vector<8x256xf32>
    %1260 = arith.addf %1250, %1259 : vector<8x256xf32>
    %c250 = arith.constant 250 : index
    %1261 = memref.load %arg1[%c250] : memref<288xf32, #tpu.memory_space<smem>>
    %1262 = vector.broadcast %1261 : f32 to vector<8x256xf32>
    %1263 = arith.mulf %1262, %1256 : vector<8x256xf32>
    %1264 = arith.addf %1254, %1263 : vector<8x256xf32>
    %1265 = vector.extract_strided_slice %1098 {offsets = [0, 128], sizes = [8, 256], strides = [1, 1]} : vector<8x384xf32> to vector<8x256xf32>
    %c224 = arith.constant 224 : index
    %1266 = memref.load %arg1[%c224] : memref<288xf32, #tpu.memory_space<smem>>
    %1267 = vector.broadcast %1266 : f32 to vector<8x256xf32>
    %1268 = arith.mulf %1267, %1265 : vector<8x256xf32>
    %1269 = arith.addf %1260, %1268 : vector<8x256xf32>
    %c242 = arith.constant 242 : index
    %1270 = memref.load %arg1[%c242] : memref<288xf32, #tpu.memory_space<smem>>
    %1271 = vector.broadcast %1270 : f32 to vector<8x256xf32>
    %1272 = arith.mulf %1271, %1265 : vector<8x256xf32>
    %1273 = arith.addf %1264, %1272 : vector<8x256xf32>
    %1274 = vector.extract_strided_slice %1100 {offsets = [0, 128], sizes = [8, 256], strides = [1, 1]} : vector<8x384xf32> to vector<8x256xf32>
    %c233 = arith.constant 233 : index
    %1275 = memref.load %arg1[%c233] : memref<288xf32, #tpu.memory_space<smem>>
    %1276 = vector.broadcast %1275 : f32 to vector<8x256xf32>
    %1277 = arith.mulf %1276, %1274 : vector<8x256xf32>
    %1278 = arith.addf %1269, %1277 : vector<8x256xf32>
    %c251 = arith.constant 251 : index
    %1279 = memref.load %arg1[%c251] : memref<288xf32, #tpu.memory_space<smem>>
    %1280 = vector.broadcast %1279 : f32 to vector<8x256xf32>
    %1281 = arith.mulf %1280, %1274 : vector<8x256xf32>
    %1282 = arith.addf %1273, %1281 : vector<8x256xf32>
    %1283 = math.tanh %1278 : vector<8x256xf32>
    %1284 = math.tanh %1282 : vector<8x256xf32>
    %c0_194 = arith.constant 0 : index
    %c0_195 = arith.constant 0 : index
    %c128_196 = arith.constant 128 : index
    %1285 = vector.load %arg6[%c0_194, %c0_195, %c128_196] : memref<2x8x384xf32, #tpu.memory_space<vmem>>, vector<1x8x256xf32>
    %1286 = vector.shape_cast %1285 : vector<1x8x256xf32> to vector<8x256xf32>
    %1287 = vector.shape_cast %1283 : vector<8x256xf32> to vector<1x8x256xf32>
    tpu.vector_store %arg6[%c0_194, %c0_195, %c128_196], %1287 {strides = array<i32>} : memref<2x8x384xf32, #tpu.memory_space<vmem>>, vector<1x8x256xf32>,
    %c1_197 = arith.constant 1 : index
    %c0_198 = arith.constant 0 : index
    %c128_199 = arith.constant 128 : index
    %1288 = vector.load %arg6[%c1_197, %c0_198, %c128_199] : memref<2x8x384xf32, #tpu.memory_space<vmem>>, vector<1x8x256xf32>
    %1289 = vector.shape_cast %1288 : vector<1x8x256xf32> to vector<8x256xf32>
    %1290 = vector.shape_cast %1284 : vector<8x256xf32> to vector<1x8x256xf32>
    tpu.vector_store %arg6[%c1_197, %c0_198, %c128_199], %1290 {strides = array<i32>} : memref<2x8x384xf32, #tpu.memory_space<vmem>>, vector<1x8x256xf32>,
    %c0_200 = arith.constant 0 : index
    %c0_201 = arith.constant 0 : index
    %c0_202 = arith.constant 0 : index
    %1291 = vector.load %arg6[%c0_200, %c0_201, %c0_202] : memref<2x8x384xf32, #tpu.memory_space<vmem>>, vector<1x8x384xf32>
    %1292 = vector.shape_cast %1291 : vector<1x8x384xf32> to vector<8x384xf32>
    %c1_203 = arith.constant 1 : index
    %c0_204 = arith.constant 0 : index
    %c0_205 = arith.constant 0 : index
    %1293 = vector.load %arg6[%c1_203, %c0_204, %c0_205] : memref<2x8x384xf32, #tpu.memory_space<vmem>>, vector<1x8x384xf32>
    %1294 = vector.shape_cast %1293 : vector<1x8x384xf32> to vector<8x384xf32>
    %c14 = arith.constant 14 : index
    %1295 = memref.load %arg2[%c14] : memref<16xf32, #tpu.memory_space<smem>>
    %1296 = vector.broadcast %1295 : f32 to vector<8x256xf32>
    %c15 = arith.constant 15 : index
    %1297 = memref.load %arg2[%c15] : memref<16xf32, #tpu.memory_space<smem>>
    %1298 = vector.broadcast %1297 : f32 to vector<8x256xf32>
    %c264_i32_206 = arith.constant 264 : i32
    %1299 = tpu.dynamic_rotate %1292 by %c264_i32_206 dim 1 : vector<8x384xf32>, i32 -> vector<8x384xf32>
    %1300 = vector.extract_strided_slice %1299 {offsets = [0, 0], sizes = [8, 256], strides = [1, 1]} : vector<8x384xf32> to vector<8x256xf32>
    %c252 = arith.constant 252 : index
    %1301 = memref.load %arg1[%c252] : memref<288xf32, #tpu.memory_space<smem>>
    %1302 = vector.broadcast %1301 : f32 to vector<8x256xf32>
    %1303 = arith.mulf %1302, %1300 : vector<8x256xf32>
    %1304 = arith.addf %1296, %1303 : vector<8x256xf32>
    %c270 = arith.constant 270 : index
    %1305 = memref.load %arg1[%c270] : memref<288xf32, #tpu.memory_space<smem>>
    %1306 = vector.broadcast %1305 : f32 to vector<8x256xf32>
    %1307 = arith.mulf %1306, %1300 : vector<8x256xf32>
    %1308 = arith.addf %1298, %1307 : vector<8x256xf32>
    %c264_i32_207 = arith.constant 264 : i32
    %1309 = tpu.dynamic_rotate %1294 by %c264_i32_207 dim 1 : vector<8x384xf32>, i32 -> vector<8x384xf32>
    %1310 = vector.extract_strided_slice %1309 {offsets = [0, 0], sizes = [8, 256], strides = [1, 1]} : vector<8x384xf32> to vector<8x256xf32>
    %c261 = arith.constant 261 : index
    %1311 = memref.load %arg1[%c261] : memref<288xf32, #tpu.memory_space<smem>>
    %1312 = vector.broadcast %1311 : f32 to vector<8x256xf32>
    %1313 = arith.mulf %1312, %1310 : vector<8x256xf32>
    %1314 = arith.addf %1304, %1313 : vector<8x256xf32>
    %c279 = arith.constant 279 : index
    %1315 = memref.load %arg1[%c279] : memref<288xf32, #tpu.memory_space<smem>>
    %1316 = vector.broadcast %1315 : f32 to vector<8x256xf32>
    %1317 = arith.mulf %1316, %1310 : vector<8x256xf32>
    %1318 = arith.addf %1308, %1317 : vector<8x256xf32>
    %c263_i32_208 = arith.constant 263 : i32
    %1319 = tpu.dynamic_rotate %1292 by %c263_i32_208 dim 1 : vector<8x384xf32>, i32 -> vector<8x384xf32>
    %1320 = vector.extract_strided_slice %1319 {offsets = [0, 0], sizes = [8, 256], strides = [1, 1]} : vector<8x384xf32> to vector<8x256xf32>
    %c253 = arith.constant 253 : index
    %1321 = memref.load %arg1[%c253] : memref<288xf32, #tpu.memory_space<smem>>
    %1322 = vector.broadcast %1321 : f32 to vector<8x256xf32>
    %1323 = arith.mulf %1322, %1320 : vector<8x256xf32>
    %1324 = arith.addf %1314, %1323 : vector<8x256xf32>
    %c271 = arith.constant 271 : index
    %1325 = memref.load %arg1[%c271] : memref<288xf32, #tpu.memory_space<smem>>
    %1326 = vector.broadcast %1325 : f32 to vector<8x256xf32>
    %1327 = arith.mulf %1326, %1320 : vector<8x256xf32>
    %1328 = arith.addf %1318, %1327 : vector<8x256xf32>
    %c263_i32_209 = arith.constant 263 : i32
    %1329 = tpu.dynamic_rotate %1294 by %c263_i32_209 dim 1 : vector<8x384xf32>, i32 -> vector<8x384xf32>
    %1330 = vector.extract_strided_slice %1329 {offsets = [0, 0], sizes = [8, 256], strides = [1, 1]} : vector<8x384xf32> to vector<8x256xf32>
    %c262 = arith.constant 262 : index
    %1331 = memref.load %arg1[%c262] : memref<288xf32, #tpu.memory_space<smem>>
    %1332 = vector.broadcast %1331 : f32 to vector<8x256xf32>
    %1333 = arith.mulf %1332, %1330 : vector<8x256xf32>
    %1334 = arith.addf %1324, %1333 : vector<8x256xf32>
    %c280 = arith.constant 280 : index
    %1335 = memref.load %arg1[%c280] : memref<288xf32, #tpu.memory_space<smem>>
    %1336 = vector.broadcast %1335 : f32 to vector<8x256xf32>
    %1337 = arith.mulf %1336, %1330 : vector<8x256xf32>
    %1338 = arith.addf %1328, %1337 : vector<8x256xf32>
    %c262_i32_210 = arith.constant 262 : i32
    %1339 = tpu.dynamic_rotate %1292 by %c262_i32_210 dim 1 : vector<8x384xf32>, i32 -> vector<8x384xf32>
    %1340 = vector.extract_strided_slice %1339 {offsets = [0, 0], sizes = [8, 256], strides = [1, 1]} : vector<8x384xf32> to vector<8x256xf32>
    %c254 = arith.constant 254 : index
    %1341 = memref.load %arg1[%c254] : memref<288xf32, #tpu.memory_space<smem>>
    %1342 = vector.broadcast %1341 : f32 to vector<8x256xf32>
    %1343 = arith.mulf %1342, %1340 : vector<8x256xf32>
    %1344 = arith.addf %1334, %1343 : vector<8x256xf32>
    %c272 = arith.constant 272 : index
    %1345 = memref.load %arg1[%c272] : memref<288xf32, #tpu.memory_space<smem>>
    %1346 = vector.broadcast %1345 : f32 to vector<8x256xf32>
    %1347 = arith.mulf %1346, %1340 : vector<8x256xf32>
    %1348 = arith.addf %1338, %1347 : vector<8x256xf32>
    %c262_i32_211 = arith.constant 262 : i32
    %1349 = tpu.dynamic_rotate %1294 by %c262_i32_211 dim 1 : vector<8x384xf32>, i32 -> vector<8x384xf32>
    %1350 = vector.extract_strided_slice %1349 {offsets = [0, 0], sizes = [8, 256], strides = [1, 1]} : vector<8x384xf32> to vector<8x256xf32>
    %c263 = arith.constant 263 : index
    %1351 = memref.load %arg1[%c263] : memref<288xf32, #tpu.memory_space<smem>>
    %1352 = vector.broadcast %1351 : f32 to vector<8x256xf32>
    %1353 = arith.mulf %1352, %1350 : vector<8x256xf32>
    %1354 = arith.addf %1344, %1353 : vector<8x256xf32>
    %c281 = arith.constant 281 : index
    %1355 = memref.load %arg1[%c281] : memref<288xf32, #tpu.memory_space<smem>>
    %1356 = vector.broadcast %1355 : f32 to vector<8x256xf32>
    %1357 = arith.mulf %1356, %1350 : vector<8x256xf32>
    %1358 = arith.addf %1348, %1357 : vector<8x256xf32>
    %c261_i32_212 = arith.constant 261 : i32
    %1359 = tpu.dynamic_rotate %1292 by %c261_i32_212 dim 1 : vector<8x384xf32>, i32 -> vector<8x384xf32>
    %1360 = vector.extract_strided_slice %1359 {offsets = [0, 0], sizes = [8, 256], strides = [1, 1]} : vector<8x384xf32> to vector<8x256xf32>
    %c255 = arith.constant 255 : index
    %1361 = memref.load %arg1[%c255] : memref<288xf32, #tpu.memory_space<smem>>
    %1362 = vector.broadcast %1361 : f32 to vector<8x256xf32>
    %1363 = arith.mulf %1362, %1360 : vector<8x256xf32>
    %1364 = arith.addf %1354, %1363 : vector<8x256xf32>
    %c273 = arith.constant 273 : index
    %1365 = memref.load %arg1[%c273] : memref<288xf32, #tpu.memory_space<smem>>
    %1366 = vector.broadcast %1365 : f32 to vector<8x256xf32>
    %1367 = arith.mulf %1366, %1360 : vector<8x256xf32>
    %1368 = arith.addf %1358, %1367 : vector<8x256xf32>
    %c261_i32_213 = arith.constant 261 : i32
    %1369 = tpu.dynamic_rotate %1294 by %c261_i32_213 dim 1 : vector<8x384xf32>, i32 -> vector<8x384xf32>
    %1370 = vector.extract_strided_slice %1369 {offsets = [0, 0], sizes = [8, 256], strides = [1, 1]} : vector<8x384xf32> to vector<8x256xf32>
    %c264 = arith.constant 264 : index
    %1371 = memref.load %arg1[%c264] : memref<288xf32, #tpu.memory_space<smem>>
    %1372 = vector.broadcast %1371 : f32 to vector<8x256xf32>
    %1373 = arith.mulf %1372, %1370 : vector<8x256xf32>
    %1374 = arith.addf %1364, %1373 : vector<8x256xf32>
    %c282 = arith.constant 282 : index
    %1375 = memref.load %arg1[%c282] : memref<288xf32, #tpu.memory_space<smem>>
    %1376 = vector.broadcast %1375 : f32 to vector<8x256xf32>
    %1377 = arith.mulf %1376, %1370 : vector<8x256xf32>
    %1378 = arith.addf %1368, %1377 : vector<8x256xf32>
    %c260_i32_214 = arith.constant 260 : i32
    %1379 = tpu.dynamic_rotate %1292 by %c260_i32_214 dim 1 : vector<8x384xf32>, i32 -> vector<8x384xf32>
    %1380 = vector.extract_strided_slice %1379 {offsets = [0, 0], sizes = [8, 256], strides = [1, 1]} : vector<8x384xf32> to vector<8x256xf32>
    %c256 = arith.constant 256 : index
    %1381 = memref.load %arg1[%c256] : memref<288xf32, #tpu.memory_space<smem>>
    %1382 = vector.broadcast %1381 : f32 to vector<8x256xf32>
    %1383 = arith.mulf %1382, %1380 : vector<8x256xf32>
    %1384 = arith.addf %1374, %1383 : vector<8x256xf32>
    %c274 = arith.constant 274 : index
    %1385 = memref.load %arg1[%c274] : memref<288xf32, #tpu.memory_space<smem>>
    %1386 = vector.broadcast %1385 : f32 to vector<8x256xf32>
    %1387 = arith.mulf %1386, %1380 : vector<8x256xf32>
    %1388 = arith.addf %1378, %1387 : vector<8x256xf32>
    %c260_i32_215 = arith.constant 260 : i32
    %1389 = tpu.dynamic_rotate %1294 by %c260_i32_215 dim 1 : vector<8x384xf32>, i32 -> vector<8x384xf32>
    %1390 = vector.extract_strided_slice %1389 {offsets = [0, 0], sizes = [8, 256], strides = [1, 1]} : vector<8x384xf32> to vector<8x256xf32>
    %c265 = arith.constant 265 : index
    %1391 = memref.load %arg1[%c265] : memref<288xf32, #tpu.memory_space<smem>>
    %1392 = vector.broadcast %1391 : f32 to vector<8x256xf32>
    %1393 = arith.mulf %1392, %1390 : vector<8x256xf32>
    %1394 = arith.addf %1384, %1393 : vector<8x256xf32>
    %c283 = arith.constant 283 : index
    %1395 = memref.load %arg1[%c283] : memref<288xf32, #tpu.memory_space<smem>>
    %1396 = vector.broadcast %1395 : f32 to vector<8x256xf32>
    %1397 = arith.mulf %1396, %1390 : vector<8x256xf32>
    %1398 = arith.addf %1388, %1397 : vector<8x256xf32>
    %c259_i32_216 = arith.constant 259 : i32
    %1399 = tpu.dynamic_rotate %1292 by %c259_i32_216 dim 1 : vector<8x384xf32>, i32 -> vector<8x384xf32>
    %1400 = vector.extract_strided_slice %1399 {offsets = [0, 0], sizes = [8, 256], strides = [1, 1]} : vector<8x384xf32> to vector<8x256xf32>
    %c257 = arith.constant 257 : index
    %1401 = memref.load %arg1[%c257] : memref<288xf32, #tpu.memory_space<smem>>
    %1402 = vector.broadcast %1401 : f32 to vector<8x256xf32>
    %1403 = arith.mulf %1402, %1400 : vector<8x256xf32>
    %1404 = arith.addf %1394, %1403 : vector<8x256xf32>
    %c275 = arith.constant 275 : index
    %1405 = memref.load %arg1[%c275] : memref<288xf32, #tpu.memory_space<smem>>
    %1406 = vector.broadcast %1405 : f32 to vector<8x256xf32>
    %1407 = arith.mulf %1406, %1400 : vector<8x256xf32>
    %1408 = arith.addf %1398, %1407 : vector<8x256xf32>
    %c259_i32_217 = arith.constant 259 : i32
    %1409 = tpu.dynamic_rotate %1294 by %c259_i32_217 dim 1 : vector<8x384xf32>, i32 -> vector<8x384xf32>
    %1410 = vector.extract_strided_slice %1409 {offsets = [0, 0], sizes = [8, 256], strides = [1, 1]} : vector<8x384xf32> to vector<8x256xf32>
    %c266 = arith.constant 266 : index
    %1411 = memref.load %arg1[%c266] : memref<288xf32, #tpu.memory_space<smem>>
    %1412 = vector.broadcast %1411 : f32 to vector<8x256xf32>
    %1413 = arith.mulf %1412, %1410 : vector<8x256xf32>
    %1414 = arith.addf %1404, %1413 : vector<8x256xf32>
    %c284 = arith.constant 284 : index
    %1415 = memref.load %arg1[%c284] : memref<288xf32, #tpu.memory_space<smem>>
    %1416 = vector.broadcast %1415 : f32 to vector<8x256xf32>
    %1417 = arith.mulf %1416, %1410 : vector<8x256xf32>
    %1418 = arith.addf %1408, %1417 : vector<8x256xf32>
    %c258_i32_218 = arith.constant 258 : i32
    %1419 = tpu.dynamic_rotate %1292 by %c258_i32_218 dim 1 : vector<8x384xf32>, i32 -> vector<8x384xf32>
    %1420 = vector.extract_strided_slice %1419 {offsets = [0, 0], sizes = [8, 256], strides = [1, 1]} : vector<8x384xf32> to vector<8x256xf32>
    %c258 = arith.constant 258 : index
    %1421 = memref.load %arg1[%c258] : memref<288xf32, #tpu.memory_space<smem>>
    %1422 = vector.broadcast %1421 : f32 to vector<8x256xf32>
    %1423 = arith.mulf %1422, %1420 : vector<8x256xf32>
    %1424 = arith.addf %1414, %1423 : vector<8x256xf32>
    %c276 = arith.constant 276 : index
    %1425 = memref.load %arg1[%c276] : memref<288xf32, #tpu.memory_space<smem>>
    %1426 = vector.broadcast %1425 : f32 to vector<8x256xf32>
    %1427 = arith.mulf %1426, %1420 : vector<8x256xf32>
    %1428 = arith.addf %1418, %1427 : vector<8x256xf32>
    %c258_i32_219 = arith.constant 258 : i32
    %1429 = tpu.dynamic_rotate %1294 by %c258_i32_219 dim 1 : vector<8x384xf32>, i32 -> vector<8x384xf32>
    %1430 = vector.extract_strided_slice %1429 {offsets = [0, 0], sizes = [8, 256], strides = [1, 1]} : vector<8x384xf32> to vector<8x256xf32>
    %c267 = arith.constant 267 : index
    %1431 = memref.load %arg1[%c267] : memref<288xf32, #tpu.memory_space<smem>>
    %1432 = vector.broadcast %1431 : f32 to vector<8x256xf32>
    %1433 = arith.mulf %1432, %1430 : vector<8x256xf32>
    %1434 = arith.addf %1424, %1433 : vector<8x256xf32>
    %c285 = arith.constant 285 : index
    %1435 = memref.load %arg1[%c285] : memref<288xf32, #tpu.memory_space<smem>>
    %1436 = vector.broadcast %1435 : f32 to vector<8x256xf32>
    %1437 = arith.mulf %1436, %1430 : vector<8x256xf32>
    %1438 = arith.addf %1428, %1437 : vector<8x256xf32>
    %c257_i32_220 = arith.constant 257 : i32
    %1439 = tpu.dynamic_rotate %1292 by %c257_i32_220 dim 1 : vector<8x384xf32>, i32 -> vector<8x384xf32>
    %1440 = vector.extract_strided_slice %1439 {offsets = [0, 0], sizes = [8, 256], strides = [1, 1]} : vector<8x384xf32> to vector<8x256xf32>
    %c259 = arith.constant 259 : index
    %1441 = memref.load %arg1[%c259] : memref<288xf32, #tpu.memory_space<smem>>
    %1442 = vector.broadcast %1441 : f32 to vector<8x256xf32>
    %1443 = arith.mulf %1442, %1440 : vector<8x256xf32>
    %1444 = arith.addf %1434, %1443 : vector<8x256xf32>
    %c277 = arith.constant 277 : index
    %1445 = memref.load %arg1[%c277] : memref<288xf32, #tpu.memory_space<smem>>
    %1446 = vector.broadcast %1445 : f32 to vector<8x256xf32>
    %1447 = arith.mulf %1446, %1440 : vector<8x256xf32>
    %1448 = arith.addf %1438, %1447 : vector<8x256xf32>
    %c257_i32_221 = arith.constant 257 : i32
    %1449 = tpu.dynamic_rotate %1294 by %c257_i32_221 dim 1 : vector<8x384xf32>, i32 -> vector<8x384xf32>
    %1450 = vector.extract_strided_slice %1449 {offsets = [0, 0], sizes = [8, 256], strides = [1, 1]} : vector<8x384xf32> to vector<8x256xf32>
    %c268 = arith.constant 268 : index
    %1451 = memref.load %arg1[%c268] : memref<288xf32, #tpu.memory_space<smem>>
    %1452 = vector.broadcast %1451 : f32 to vector<8x256xf32>
    %1453 = arith.mulf %1452, %1450 : vector<8x256xf32>
    %1454 = arith.addf %1444, %1453 : vector<8x256xf32>
    %c286 = arith.constant 286 : index
    %1455 = memref.load %arg1[%c286] : memref<288xf32, #tpu.memory_space<smem>>
    %1456 = vector.broadcast %1455 : f32 to vector<8x256xf32>
    %1457 = arith.mulf %1456, %1450 : vector<8x256xf32>
    %1458 = arith.addf %1448, %1457 : vector<8x256xf32>
    %1459 = vector.extract_strided_slice %1292 {offsets = [0, 128], sizes = [8, 256], strides = [1, 1]} : vector<8x384xf32> to vector<8x256xf32>
    %c260 = arith.constant 260 : index
    %1460 = memref.load %arg1[%c260] : memref<288xf32, #tpu.memory_space<smem>>
    %1461 = vector.broadcast %1460 : f32 to vector<8x256xf32>
    %1462 = arith.mulf %1461, %1459 : vector<8x256xf32>
    %1463 = arith.addf %1454, %1462 : vector<8x256xf32>
    %c278 = arith.constant 278 : index
    %1464 = memref.load %arg1[%c278] : memref<288xf32, #tpu.memory_space<smem>>
    %1465 = vector.broadcast %1464 : f32 to vector<8x256xf32>
    %1466 = arith.mulf %1465, %1459 : vector<8x256xf32>
    %1467 = arith.addf %1458, %1466 : vector<8x256xf32>
    %1468 = vector.extract_strided_slice %1294 {offsets = [0, 128], sizes = [8, 256], strides = [1, 1]} : vector<8x384xf32> to vector<8x256xf32>
    %c269 = arith.constant 269 : index
    %1469 = memref.load %arg1[%c269] : memref<288xf32, #tpu.memory_space<smem>>
    %1470 = vector.broadcast %1469 : f32 to vector<8x256xf32>
    %1471 = arith.mulf %1470, %1468 : vector<8x256xf32>
    %1472 = arith.addf %1463, %1471 : vector<8x256xf32>
    %c287 = arith.constant 287 : index
    %1473 = memref.load %arg1[%c287] : memref<288xf32, #tpu.memory_space<smem>>
    %1474 = vector.broadcast %1473 : f32 to vector<8x256xf32>
    %1475 = arith.mulf %1474, %1468 : vector<8x256xf32>
    %1476 = arith.addf %1467, %1475 : vector<8x256xf32>
    %c0_222 = arith.constant 0 : index
    %c0_223 = arith.constant 0 : index
    %c0_224 = arith.constant 0 : index
    %1477 = vector.load %arg7[%c0_222, %c0_223, %c0_224] : memref<4x8x256xf32, #tpu.memory_space<vmem>>, vector<1x8x256xf32>
    %1478 = vector.shape_cast %1477 : vector<1x8x256xf32> to vector<8x256xf32>
    %c2_225 = arith.constant 2 : index
    %c0_226 = arith.constant 0 : index
    %c0_227 = arith.constant 0 : index
    %1479 = vector.load %arg7[%c2_225, %c0_226, %c0_227] : memref<4x8x256xf32, #tpu.memory_space<vmem>>, vector<1x8x256xf32>
    %1480 = vector.shape_cast %1479 : vector<1x8x256xf32> to vector<8x256xf32>
    %1481 = arith.addf %1478, %1480 : vector<8x256xf32>
    %1482 = arith.addf %1481, %1472 : vector<8x256xf32>
    %c0_228 = arith.constant 0 : index
    %c0_229 = arith.constant 0 : index
    %1483 = vector.load %arg4[%c0_228, %c0_229] : memref<8x256xf32, #tpu.memory_space<vmem>>, vector<8x256xf32>
    tpu.vector_store %arg4[%c0_228, %c0_229], %1482 {strides = array<i32>} : memref<8x256xf32, #tpu.memory_space<vmem>>, vector<8x256xf32>,
    %c1_230 = arith.constant 1 : index
    %c0_231 = arith.constant 0 : index
    %c0_232 = arith.constant 0 : index
    %1484 = vector.load %arg7[%c1_230, %c0_231, %c0_232] : memref<4x8x256xf32, #tpu.memory_space<vmem>>, vector<1x8x256xf32>
    %1485 = vector.shape_cast %1484 : vector<1x8x256xf32> to vector<8x256xf32>
    %c3_233 = arith.constant 3 : index
    %c0_234 = arith.constant 0 : index
    %c0_235 = arith.constant 0 : index
    %1486 = vector.load %arg7[%c3_233, %c0_234, %c0_235] : memref<4x8x256xf32, #tpu.memory_space<vmem>>, vector<1x8x256xf32>
    %1487 = vector.shape_cast %1486 : vector<1x8x256xf32> to vector<8x256xf32>
    %1488 = arith.addf %1485, %1487 : vector<8x256xf32>
    %1489 = arith.addf %1488, %1476 : vector<8x256xf32>
    %cst_236 = arith.constant 5.000000e-01 : f32
    %1490 = vector.broadcast %cst_236 : f32 to vector<8x256xf32>
    %1491 = arith.mulf %1490, %1489 : vector<8x256xf32>
    %1492 = math.exp %1491 : vector<8x256xf32>
    %c0_237 = arith.constant 0 : index
    %c0_238 = arith.constant 0 : index
    %1493 = vector.load %arg5[%c0_237, %c0_238] : memref<8x256xf32, #tpu.memory_space<vmem>>, vector<8x256xf32>
    tpu.vector_store %arg5[%c0_237, %c0_238], %1492 {strides = array<i32>} : memref<8x256xf32, #tpu.memory_space<vmem>>, vector<8x256xf32>,
    return
  }
  func.func @transform_0(%arg0: i32) -> i32 {
    %c0_i32 = arith.constant 0 : i32
    %c0_i32_0 = arith.constant 0 : i32
    return %c0_i32 : i32
  }
  func.func @transform_1(%arg0: i32) -> i32 {
    %c0_i32 = arith.constant 0 : i32
    %c0_i32_0 = arith.constant 0 : i32
    return %c0_i32 : i32
  }
  func.func @transform_2(%arg0: i32) -> (i32, i32) {
    %c0_i32 = arith.constant 0 : i32
    %c0_i32_0 = arith.constant 0 : i32
    return %arg0, %c0_i32 : i32, i32
  }
  func.func @transform_3(%arg0: i32) -> (i32, i32) {
    %c0_i32 = arith.constant 0 : i32
    %c0_i32_0 = arith.constant 0 : i32
    return %arg0, %c0_i32 : i32, i32
  }
  func.func @transform_4(%arg0: i32) -> (i32, i32) {
    %c0_i32 = arith.constant 0 : i32
    %c0_i32_0 = arith.constant 0 : i32
    return %arg0, %c0_i32 : i32, i32
  }
}

</mosaic_0001>

<bundles_post_ra>
// kernel: network_noise4_forward.1
= control target key start
LH: loop header
LB: loop body
LE: loop exit
PB: predicated region body
PF: predicated region fallthrough
CT: control target
= control target key end

     0   :  { %s7630_s0 = inlined_call_operand.vmem [shape: f32[288], index: 0, kind: input, shape index: {}]   ;;  %s7631_s1 = inlined_call_operand.vmem [shape: f32[16], index: 1, kind: input, shape index: {}]   ;;  %s7632_s2 = inlined_call_operand.vmem [shape: f32[16,256], index: 2, kind: input, shape index: {}]   ;;  %s7633_s3 = inlined_call_operand.hbm [shape: f32[16,256], index: 3, kind: output, shape index: {0}]   ;;  %s7634_s4 = inlined_call_operand.hbm [shape: f32[16,256], index: 4, kind: output, shape index: {1}]  }
   0x1   :  { %7713 = sst [smem:[#allocation25_spill]] %s7630_s0 }
   0x2   :  { %7714 = sst [smem:[#allocation26_spill]] %s7631_s1 }
   0x3   :  { %7715 = sst [smem:[#allocation27_spill]] %s7632_s2 }
   0x4   :  { %7716 = sst [smem:[#allocation28_spill]] %s7633_s3 }
   0x5   :  { %7717 = sst [smem:[#allocation29_spill]] %s7634_s4 }
   0x6   :  { %10 = vsyncpa [#allocation6], 0 }
   0x7   :  { %11 = vsyncpa [#allocation8], 0 }
   0x8   :  { %12 = vsyncpa [#allocation5], 0 }
   0x9   :  { %14 = vsyncpa [#allocation5 + $0x1], 0 }
   0xa   :  { %15 = vsyncpa [#allocation11], 0 }
   0xb   :  { %17 = vsyncpa [#allocation11 + $0x1], 0  ;;  %s4081_s15 = smov 0   ;;  %s4083_s16 = smov 0  }
   0xc   :  { %s4085_s17 = smov 0   ;;  %s4087_s18 = smov 0  }
   0xd LB: > { %7718 = sst [smem:[#allocation16_spill]] %s4017_s15  ;;  %s4102_s19 = sadd.s32 4294967295, %s4029_s18   ;;  %s4029_s18 = sphi %s4087_s18, %s8009_s18   ;;  %s4025_s17 = sphi %s4085_s17, %s8012_s17   ;;  %s4021_s16 = sphi %s4083_s16, %s8011_s16   ;;  %s4017_s15 = sphi %s4081_s15, %s8010_s15  }
   0xe   : > { %7719 = sst [smem:[#allocation17_spill]] %s4021_s16  ;;  %s3168_s20 = sadd.s32 4294967294, %s4029_s18  }
   0xf   : > { %7720 = sst [smem:[#allocation18_spill]] %s4025_s17  ;;  %s4106_s21 = sadd.s32 1, %s4029_s18  }
  0x10   : > { %7721 = sst [smem:[#allocation19_spill]] %s4029_s18  ;;  %s98_s22 = sadd.s32 1, %s4025_s17 }
  0x11   : > { %7722 = sst [smem:[#allocation20_spill]] %s4102_s19  ;;  %s95_s23 = ssub.s32 %s4029_s18, %s4106_s21 }
  0x12   : > { %7723 = sst [smem:[#allocation21_spill]] %s4106_s21  ;;  %p108_p0 = scmp.ne.s32.totalorder %s4025_s17, %s4021_s16 }
  0x13   : > { %p96_p1 = scmp.eq.s32.totalorder %s95_s23, 0  ;;  %p109_p2 = scmp.eq.s32.totalorder %s4102_s19, 1 }
  0x14   : > { %p114_p3 = scmp.ne.s32.totalorder %s4021_s16, %s4017_s15  ;;  %p115_p4 = scmp.eq.s32.totalorder %s3168_s20, 1 }
  0x15   : > { %s4117_s24 = scalar_select %p96_p1, %s4025_s17, %s98_s22  }
  0x16   : > { %p4119_p5 = por %p109_p2, %p108_p0  ;;  %p4123_p6 = por %p115_p4, %p114_p3 }
  0x17   : > { %7724 = sst [smem:[#allocation22_spill]] %s4117_s24  ;;  %p3169_p7 = scmp.ge.s32.totalorder %s4029_s18, 1 }
  0x18   : > { %s7725_s25 = scalar_select %p4119_p5, 1, 0 }
  0x19   : > { %s7727_s26 = scalar_select %p4123_p6, 1, 0 }
  0x1a   : > { %7726 = sst [smem:[#allocation23_spill]] %s7725_s25  ;;  %p148_p8 = scmp.lt.s32.totalorder %s4029_s18, 3 }
  0x1b   : > { %7728 = sst [smem:[#allocation24_spill]] %s7727_s26  ;;  %p7635_p9 = scmp.eq.s32.totalorder %s4102_s19, 0 }
  0x1c   : > { %p4130_p10 = pnand %p3169_p7, %p148_p8  ;;  %s7730_s0 = sld [smem:[#allocation25_spill]] }
  0x1d   : > { %s7731_s1 = sld [smem:[#allocation26_spill]] }
  0x1e   : > { %s7729_s27 = scalar_select %p4130_p10, 1, 0 }
  0x1f   : > { %p3487_p11 = pneg %p4130_p10 }
  0x21   : > { %p4144_p12 = pnand %p7635_p9, %p3487_p11 }
  0x22   : > { %s161_s30 = sshll.u32 %s7730_s0, 4  ;;  %s162_s30 = int_to_ptr.vmem [resolvable:$true] %s161_s30 }
  0x23   : > { %s172_s7 = sshll.u32 %s7731_s1, 4  ;;  %s3901_s9 = scalar_lea.vmem %s162_s30, 48  ;;  %s173_s7 = int_to_ptr.vmem [resolvable:$true] %s172_s7 }
  0x24   : > { %p3902_p13 = scmp.ne.s32.totalorder %s162_s30, %s3901_s9  ;;  %p3903_p0 = pneg %p4144_p12 }
  0x25   : > { %s3908_s10 = scalar_lea.vmem %s162_s30, 64  ;;  %p3909_p3 = scmp.lt.s32.totalorder %s162_s30, %s162_s30 }
  0x26   : > { %p3904_p1 = pnand %p3903_p0, %p3902_p13  ;;  %p3910_p4 = scmp.lt.s32.totalorder %s3908_s10, %s3901_s9 }
  0x28   : > { %p3905_p2 = pneg %p3904_p1  ;;  %p3911_p7 = por %p3910_p4, %p3909_p3 }
  0x2a   : > { %p3912_p8 = pnand %p3911_p7, %p3905_p2 }
  0x2c   : > { %3915 = shalt.err (!%p3912_p8)
}
  0x2d   : > { %s4031_s11 = smov [#allocation4]   ;;  %s3916_s12 = scalar_lea.vmem %s173_s7, 16 }
  0x2e   : > { %3490 = dma.vmem_to_smem (!%p4144_p12), %s162_s30, 48, %s4031_s11, [#allocation6]  }
  0x2f   : > { %p3917_p11 = scmp.ne.s32.totalorder %s173_s7, %s3916_s12  ;;  %p3924_p5 = scmp.lt.s32.totalorder %s173_s7, %s173_s7 }
  0x30   : > { %p3925_p13 = scmp.lt.s32.totalorder %s3916_s12, %s3916_s12 }
  0x31   : > { %p3919_p9 = pnand %p3917_p11, %p3903_p0 }
  0x32   : > { %p3926_p1 = por %p3925_p13, %p3924_p5 }
  0x33   : > { %p3920_p6 = pneg %p3919_p9 }
  0x35   : > { %p3927_p10 = pnand %p3926_p1, %p3920_p6 }
  0x37   : > { %3930 = shalt.err (!%p3927_p10)
}
  0x38   : > { %s4032_s13 = smov [#allocation7]   ;;  %p7733_p2 = scmp.ne.s32.totalorder %s7729_s27, 0 }
  0x39   : > { %3493 = dma.vmem_to_smem (!%p4144_p12), %s173_s7, 16, %s4032_s13, [#allocation8]  }
  0x3a   : > { %193 = sbr.rel (%p7733_p2) target bundleno = 1680 (0x690), region = 32  ;;  %p7734_p3 = scmp.eq.s32.totalorder (!%p7733_p2), %s4102_s19, 0 }
  0x3f   : > { %4000 = dma.done.wait (%p7734_p3), [#allocation6], 48   ;;  %p7735_p4 = pmov %p7734_p3 }
  0x40   : > { %p7736_p9 = pmov %p7734_p3 }
  0x41   : > { %4002 = vsyncadd (%p7735_p4), [#allocation6], 4294967248 }
  0x42   : > { %4004 = dma.done.wait (%p7736_p9), [#allocation8], 16   ;;  %p7737_p5 = pmov %p7734_p3 }
  0x44   : > { %4006 = vsyncadd (%p7737_p5), [#allocation8], 4294967280 }
  0x45   : > { %203 = sfence }
  0x46   : > { %v7685_v0 = vmov 0.0   ;;  %s7644_s14 = smov 7   ;;  %s7652_s20 = smov 8   ;;  %v253_v9 = vlaneseq }
  0x47   : > { %270 = vrot.lane.b32.xlu1 %v7685_v0, %s7644_s14  ;;  %247 = vrot.lane.b32.xlu0 %v7685_v0, %s7652_s20  ;;  %p229_p6 = scmp.lt.s32.totalorder %s4102_s19, 1  ;;  %s7738_s2 = sld [smem:[#allocation27_spill]] }
  0x48   : > { %s7650_s30 = smov 6   ;;  %s7642_s5 = smov 5   ;;  %v4265_v12 = vand.u32 127, %v253_v9 }
  0x49   : > { %s230_s22 = scalar_select %p229_p6, %s4102_s19, 1 }
  0x4a   : > { %s7648_s6 = smov 4   ;;  %s7640_s7 = smov 3   ;;  %vm255_vm0 = vcmp.lt.s32.totalorder %v4265_v12, 8  ;;  %vm7707_vm1 = vcmp.lt.s32.totalorder %v4265_v12, 7  ;;  %vm297_vm2 = vcmp.lt.s32.totalorder %v4265_v12, 6  ;;  %vm7706_vm3 = vcmp.lt.s32.totalorder %v4265_v12, 5 }
  0x4b   : > { %s3472_s23 = sshll.u32 %s230_s22, 4  ;;  %s7646_s8 = smov 2   ;;  %vm339_vm4 = vcmp.lt.s32.totalorder %v4265_v12, 4  ;;  %vm7705_vm5 = vcmp.lt.s32.totalorder %v4265_v12, 3  ;;  %vm381_vm6 = vcmp.lt.s32.totalorder %v4265_v12, 2  ;;  %vm7701_vm7 = vcmp.lt.s32.totalorder %v4265_v12, 1 }
  0x4c   : > { %s7638_s9 = smov 1   ;;  %s7658_s10 = smov 14   ;;  %vm459_vm8 = vcmp.lt.s32.totalorder %v4265_v12, 16  ;;  %vm500_vm9 = vcmp.lt.s32.totalorder %v4265_v12, 14  ;;  %vm541_vm10 = vcmp.lt.s32.totalorder %v4265_v12, 12  ;;  %vm582_vm11 = vcmp.lt.s32.totalorder %v4265_v12, 10 }
  0x4d   : > { %s233_s29 = scalar_lea.vmem %s7738_s2, %s3472_s23  ;;  %s7660_s11 = smov 16   ;;  %vm825_vm12 = vcmp.lt.s32.totalorder %v4265_v12, 32  ;;  %vm866_vm13 = vcmp.lt.s32.totalorder %v4265_v12, 28  ;;  %vm907_vm14 = vcmp.lt.s32.totalorder %v4265_v12, 24  ;;  %vm948_vm15 = vcmp.lt.s32.totalorder %v4265_v12, 20 }
  0x4e   : > { %v4179_v1 = vld [vmem:[%s233_s29 + $0x8] sm:$0xff]  ;;  %v4181_v2 = vld [vmem:[%s233_s29] sm:$0xff]  ;;  %s7654_s12 = smov 10   ;;  %s7656_s13 = smov 12  }
  0x4f   : > { %251 = vrot.lane.b32.xlu1 %v4179_v1, %s7652_s20  ;;  %249 = vrot.lane.b32.xlu0 %v4181_v2, %s7652_s20  ;;  %s4243_s22 = sld [smem:[#allocation7]] }
  0x50   : > { %s4245_s23 = sld [smem:[#allocation7 + $0x1]] }
  0x51   : > { %s4247_s27 = sld [smem:[#allocation4]] }
  0x52   : > { %s4249_s28 = sld [smem:[#allocation4 + $0x12]] }
  0x53   : > { %274 = vrot.lane.b32.xlu1 %v4179_v1, %s7644_s14  ;;  %272 = vrot.lane.b32.xlu0 %v4181_v2, %s7644_s14  ;;  %s4251_s29 = sld [smem:[#allocation4 + $0x1]] }
  0x54   : > { %s4259_s14 = sld [smem:[#allocation4 + $0x3]] }
  0x55   : > { %v244_v17 = vstv %s4243_s22  ;;  %s4287_s0 = sld [smem:[#allocation4 + $0x8]]  ;;  %s7664_s22 = smov 24  }
  0x56   : > { %v246_v18 = vstv %s4245_s23  ;;  %s4477_s23 = sld [smem:[#allocation4 + $0x2c]] }
  0x57   : > { %293 = vrot.lane.b32.xlu1 %v4181_v2, %s7650_s30  ;;  %291 = vrot.lane.b32.xlu0 %v7685_v0, %s7650_s30  ;;  %v259_v19 = vstv %s4247_s27  ;;  %s4479_s27 = sld [smem:[#allocation4 + $0x24]] }
  0x58   : > { %v265_v20 = vstv %s4249_s28  ;;  %s4481_s28 = sld [smem:[#allocation4 + $0x36]] }
  0x59   : > { %v280_v22 = vstv %s4251_s29  ;;  %s4483_s29 = sld [smem:[#allocation7 + $0x2]] }
  0x5a   : > { %v322_v27 = vstv %s4259_s14  ;;  %s4327_s14 = sld [smem:[#allocation4 + $0x19]] }
  0x5b   : > { %312 = vrot.lane.b32.xlu1 %v7685_v0, %s7642_s5  ;;  %295 = vrot.lane.b32.xlu0 %v4179_v1, %s7650_s30  ;;  %v418_v53 = vstv %s4287_s0  ;;  %s7739_s0 = smov 16   ;;  %s4501_s1 = sld [smem:[#allocation4 + $0x40]] }
  0x5c   : > { %s4503_s2 = sld [smem:[#allocation4 + $0x26]] }
  0x5d   : > { %s4505_s24 = sld [smem:[#allocation4 + $0x38]] }
  0x5e   : > { %s4507_s17 = sld [smem:[#allocation4 + $0x2f]] }
  0x5f   : > { %316 = vrot.lane.b32.xlu1 %v4179_v1, %s7642_s5  ;;  %314 = vrot.lane.b32.xlu0 %v4181_v2, %s7642_s5  ;;  %s4257_s5 = sld [smem:[#allocation4 + $0x14]] }
  0x60   : > { %s4511_s21 = sld [smem:[#allocation4 + $0x41]] }
  0x61   : > { %s4515_s26 = sld [smem:[#allocation4 + $0x27]] }
  0x62   : > { %s4517_s15 = sld [smem:[#allocation4 + $0x39]] }
  0x63   : > { %335 = vrot.lane.b32.xlu1 %v4181_v2, %s7648_s6  ;;  %333 = vrot.lane.b32.xlu0 %v7685_v0, %s7648_s6  ;;  %s4519_s18 = sld [smem:[#allocation4 + $0x30]] }
  0x64   : > { %s4523_s4 = sld [smem:[#allocation4 + $0x42]] }
  0x65   : > { %v307_v26 = vstv %s4257_s5  ;;  %s7741_s5 = smov 12   ;;  %s4527_s3 = sld [smem:[#allocation4 + $0x28]] }
  0x66   : > { %s4529_s25 = sld [smem:[#allocation4 + $0x3a]] }
  0x67   : > { %354 = vrot.lane.b32.xlu1 %v7685_v0, %s7640_s7  ;;  %337 = vrot.lane.b32.xlu0 %v4179_v1, %s7648_s6  ;;  %s4534_s19 = sld [smem:[#allocation4 + $0x31]] }
  0x68   : > { %s4543_s16 = sld [smem:[#allocation4 + $0x43]] }
  0x6b   : > { %358 = vrot.lane.b32.xlu1 %v4179_v1, %s7640_s7  ;;  %356 = vrot.lane.b32.xlu0 %v4181_v2, %s7640_s7  ;;  %s4255_s7 = sld [smem:[#allocation4 + $0x2]] }
  0x6f   : > { %377 = vrot.lane.b32.xlu1 %v4181_v2, %s7646_s8  ;;  %375 = vrot.lane.b32.xlu0 %v7685_v0, %s7646_s8 }
  0x71   : > { %v301_v25 = vstv %s4255_s7  ;;  %s7743_s7 = smov 8  }
  0x73   : > { %396 = vrot.lane.b32.xlu1 %v7685_v0, %s7638_s9  ;;  %379 = vrot.lane.b32.xlu0 %v4179_v1, %s7646_s8 }
  0x77   : > { %400 = vrot.lane.b32.xlu1 %v4179_v1, %s7638_s9  ;;  %398 = vrot.lane.b32.xlu0 %v4181_v2, %s7638_s9  ;;  %s4253_s9 = sld [smem:[#allocation4 + $0x13]] }
  0x7b   : > { %3567 = vrot.lane.b32.xlu1 %v7685_v0, %s7658_s10  ;;  %3562 = vrot.lane.b32.xlu0 %v7685_v0, %s7660_s11  ;;  %s4276_s10 = sld [smem:[#allocation4 + $0x18]] }
  0x7c   : > { %s4281_s11 = sld [smem:[#allocation4 + $0x7]] }
  0x7d   : > { %v286_v23 = vstv %s4253_s9  ;;  %s7745_s9 = smov 4  }
  0x7f   : > { %3577 = vrot.lane.b32.xlu1 %v7685_v0, %s7654_s12  ;;  %3572 = vrot.lane.b32.xlu0 %v7685_v0, %s7656_s13  ;;  %s4271_s12 = sld [smem:[#allocation4 + $0x17]] }
  0x80   : > { %s4273_s13 = sld [smem:[#allocation4 + $0x6]] }
  0x81   : > { %v391_v48 = vstv %s4276_s10  ;;  %s7746_s10 = smov 2  }
  0x82   : > { %v406_v49 = vstv %s4281_s11  ;;  %s7666_s11 = smov 28  }
  0x83   : > { %3587 = vrot.lane.b32.xlu1 %v7685_v0, %s7650_s30  ;;  %3582 = vrot.lane.b32.xlu0 %v7685_v0, %s7652_s20  ;;  %s4267_s30 = sld [smem:[#allocation4 + $0x16]] }
  0x84   : > { %s4269_s20 = sld [smem:[#allocation4 + $0x5]] }
  0x85   : > { %v370_v39 = vstv %s4271_s12  ;;  %s7668_s12 = smov 32  }
  0x86   : > { %v385_v45 = vstv %s4273_s13  ;;  %s7662_s13 = smov 20  }
  0x87   : > { %3597 = vrot.lane.b32.xlu1 %v7685_v0, %s7646_s8  ;;  %3592 = vrot.lane.b32.xlu0 %v7685_v0, %s7648_s6  ;;  %s4261_s8 = sld [smem:[#allocation4 + $0x15]] }
  0x88   : > { %s4263_s6 = sld [smem:[#allocation4 + $0x4]] }
  0x89   : > { %v349_v35 = vstv %s4267_s30  ;;  %s7740_s30 = smov 14  }
  0x8a   : > { %v364_v36 = vstv %s4269_s20  ;;  %s4333_s20 = sld [smem:[#allocation4 + $0x1a]] }
  0x8d   : > { %v328_v31 = vstv %s4261_s8  ;;  %s7744_s8 = smov 6  }
  0x8e   : > { %v343_v32 = vstv %s4263_s6  ;;  %s7742_s6 = smov 10  }
  0xb9   : > { %v271_v3 = vpop.permute.xlu1 %270  ;;  %v248_v4 = vpop.permute.xlu0 %247 }
  0xc1   : > { %v252_v5 = vpop.permute.xlu1 %251  ;;  %v250_v6 = vpop.permute.xlu0 %249 }
  0xc2   : > { %v257_v21 = vsel %vm255_vm0, %v248_v4, %v250_v6  ;;  %v256_v24 = vsel %vm255_vm0, %v250_v6, %v252_v5 }
  0xc3   : > { %v260_v33 = vmul.f32 %v259_v19, %v257_v21  ;;  %v261_v37 = vmul.f32 %v259_v19, %v256_v24  ;;  %v266_v38 = vmul.f32 %v265_v20, %v257_v21  ;;  %v267_v40 = vmul.f32 %v265_v20, %v256_v24 }
  0xc5   : > { %v275_v7 = vpop.permute.xlu1 %274  ;;  %v273_v8 = vpop.permute.xlu0 %272  ;;  %v262_v50 = vadd.f32 %v260_v33, %v244_v17  ;;  %v263_v54 = vadd.f32 %v261_v37, %v244_v17  ;;  %v268_v55 = vadd.f32 %v266_v38, %v246_v18  ;;  %v269_v58 = vadd.f32 %v267_v40, %v246_v18 }
  0xc6   : > { %v278_v30 = vsel %vm7707_vm1, %v271_v3, %v273_v8  ;;  %v277_v34 = vsel %vm7707_vm1, %v273_v8, %v275_v7  ;;  %vm1314_vm1 = vcmp.lt.s32.totalorder %v4265_v12, 40 }
  0xc7   : > { %v281_v41 = vmul.f32 %v280_v22, %v278_v30  ;;  %v282_v46 = vmul.f32 %v280_v22, %v277_v34  ;;  %v287_v47 = vmul.f32 %v286_v23, %v278_v30  ;;  %v288_v51 = vmul.f32 %v286_v23, %v277_v34 }
  0xc9   : > { %v294_v10 = vpop.permute.xlu1 %293  ;;  %v292_v11 = vpop.permute.xlu0 %291  ;;  %v283_v59 = vadd.f32 %v281_v41, %v262_v50  ;;  %v284_v3 = vadd.f32 %v282_v46, %v263_v54  ;;  %v289_v4 = vadd.f32 %v287_v47, %v268_v55  ;;  %v290_v7 = vadd.f32 %v288_v51, %v269_v58 }
  0xca   : > { %v299_v42 = vsel %vm297_vm2, %v292_v11, %v294_v10  ;;  %v412_v51 = vstv %s4327_s14  ;;  %v420_v55 = vmul.f32 %v418_v53, %v4179_v1  ;;  %s4487_s14 = sld [smem:[#allocation7 + $0x3]] }
  0xcb   : > { %v302_v56 = vmul.f32 %v301_v25, %v299_v42  ;;  %v308_v60 = vmul.f32 %v307_v26, %v299_v42 }
  0xcd   : > { %v313_v13 = vpop.permute.xlu1 %312  ;;  %v296_v14 = vpop.permute.xlu0 %295  ;;  %v304_v11 = vadd.f32 %v302_v56, %v283_v59  ;;  %v424_v59 = vstv %s4333_s20  ;;  %s4491_s20 = sld [smem:[#allocation4 + $0x2d]] }
  0xce   : > { %v298_v52 = vsel %vm297_vm2, %v294_v10, %v296_v14 }
  0xcf   : > { %v303_v5 = vmul.f32 %v301_v25, %v298_v52  ;;  %v309_v8 = vmul.f32 %v307_v26, %v298_v52 }
  0xd1   : > { %v317_v15 = vpop.permute.xlu1 %316  ;;  %v315_v16 = vpop.permute.xlu0 %314  ;;  %v305_v22 = vadd.f32 %v303_v5, %v284_v3  ;;  %v311_v26 = vadd.f32 %v309_v8, %v290_v7 }
  0xd2   : > { %v320_v57 = vsel %vm7706_vm3, %v313_v13, %v315_v16  ;;  %v319_v61 = vsel %vm7706_vm3, %v315_v16, %v317_v15  ;;  %v310_v16 = vadd.f32 %v308_v60, %v289_v4  ;;  %vm1273_vm3 = vcmp.lt.s32.totalorder %v4265_v12, 48 }
  0xd3   : > { %v323_v9 = vmul.f32 %v322_v27, %v320_v57  ;;  %v324_v13 = vmul.f32 %v322_v27, %v319_v61  ;;  %v329_v14 = vmul.f32 %v328_v31, %v320_v57  ;;  %v330_v17 = vmul.f32 %v328_v31, %v319_v61 }
  0xd4   : > { %v419_v61 = vmul.f32 %v418_v53, %v4181_v2  ;;  %v425_v53 = vmul.f32 %v424_v59, %v4181_v2 }
  0xd5   : > { %v336_v28 = vpop.permute.xlu1 %335  ;;  %v334_v29 = vpop.permute.xlu0 %333  ;;  %v325_v27 = vadd.f32 %v323_v9, %v304_v11  ;;  %v326_v30 = vadd.f32 %v324_v13, %v305_v22  ;;  %v331_v31 = vadd.f32 %v329_v14, %v310_v16  ;;  %v332_v37 = vadd.f32 %v330_v17, %v311_v26 }
  0xd6   : > { %v341_v6 = vsel %vm339_vm4, %v334_v29, %v336_v28  ;;  %v426_v11 = vmul.f32 %v424_v59, %v4179_v1 }
  0xd7   : > { %v344_v18 = vmul.f32 %v343_v32, %v341_v6  ;;  %v350_v23 = vmul.f32 %v349_v35, %v341_v6 }
  0xd9   : > { %v355_v43 = vpop.permute.xlu1 %354  ;;  %v338_v44 = vpop.permute.xlu0 %337  ;;  %v346_v38 = vadd.f32 %v344_v18, %v325_v27 }
  0xda   : > { %v340_v10 = vsel %vm339_vm4, %v336_v28, %v338_v44 }
  0xdb   : > { %v345_v24 = vmul.f32 %v343_v32, %v340_v10  ;;  %v351_v28 = vmul.f32 %v349_v35, %v340_v10 }
  0xdd   : > { %v359_v62 = vpop.permute.xlu1 %358  ;;  %v357_v63 = vpop.permute.xlu0 %356  ;;  %v347_v44 = vadd.f32 %v345_v24, %v326_v30 }
  0xde   : > { %v362_v15 = vsel %vm7705_vm5, %v355_v43, %v357_v63  ;;  %v361_v19 = vsel %vm7705_vm5, %v357_v63, %v359_v62  ;;  %v352_v43 = vadd.f32 %v350_v23, %v331_v31  ;;  %vm1232_vm5 = vcmp.lt.s32.totalorder %v4265_v12, 56 }
  0xdf   : > { %v365_v29 = vmul.f32 %v364_v36, %v362_v15  ;;  %v366_v33 = vmul.f32 %v364_v36, %v361_v19  ;;  %v371_v34 = vmul.f32 %v370_v39, %v362_v15  ;;  %v372_v40 = vmul.f32 %v370_v39, %v361_v19 }
  0xe0   : > { %v353_v36 = vadd.f32 %v351_v28, %v332_v37 }
  0xe1   : > { %v378_v20 = vpop.permute.xlu1 %377  ;;  %v376_v21 = vpop.permute.xlu0 %375  ;;  %v367_v47 = vadd.f32 %v365_v29, %v346_v38  ;;  %v368_v39 = vadd.f32 %v366_v33, %v347_v44  ;;  %v373_v52 = vadd.f32 %v371_v34, %v352_v43 }
  0xe2   : > { %v383_v25 = vsel %vm381_vm6, %v376_v21, %v378_v20  ;;  %v374_v56 = vadd.f32 %v372_v40, %v353_v36  ;;  %v463_v36 = vstv %s4479_s27  ;;  %s4563_s27 = sld [smem:[#allocation4 + $0x32]] }
  0xe3   : > { %v386_v32 = vmul.f32 %v385_v45, %v383_v25  ;;  %v392_v35 = vmul.f32 %v391_v48, %v383_v25 }
  0xe5   : > { %v397_v41 = vpop.permute.xlu1 %396  ;;  %v380_v42 = vpop.permute.xlu0 %379  ;;  %v388_v57 = vadd.f32 %v386_v32, %v367_v47  ;;  %v394_v62 = vadd.f32 %v392_v35, %v373_v52  ;;  %v450_v52 = vstv %s4483_s29  ;;  %s4571_s29 = sld [smem:[#allocation4 + $0x44]] }
  0xe6   : > { %v382_v46 = vsel %vm381_vm6, %v378_v20, %v380_v42 }
  0xe7   : > { %v387_v50 = vmul.f32 %v385_v45, %v382_v46  ;;  %v393_v54 = vmul.f32 %v391_v48, %v382_v46 }
  0xe9   : > { %v401_v58 = vpop.permute.xlu1 %400  ;;  %v399_v60 = vpop.permute.xlu0 %398  ;;  %v389_v45 = vadd.f32 %v387_v50, %v368_v39  ;;  %v395_v7 = vadd.f32 %v393_v54, %v374_v56  ;;  %v469_v56 = vstv %s4481_s28  ;;  %s4936_s28 = sld [smem:[#allocation4 + $0x48]] }
  0xea   : > { %v403_v63 = vsel %vm7701_vm7, %v399_v60, %v401_v58  ;;  %v404_v3 = vsel %vm7701_vm7, %v397_v41, %v399_v60  ;;  %vm1191_vm7 = vcmp.lt.s32.totalorder %v4265_v12, 64 }
  0xeb   : > { %v407_v48 = vmul.f32 %v406_v49, %v404_v3  ;;  %v408_v4 = vmul.f32 %v406_v49, %v403_v63  ;;  %v413_v5 = vmul.f32 %v412_v51, %v404_v3  ;;  %v414_v6 = vmul.f32 %v412_v51, %v403_v63 }
  0xec   : > { %v530_v3 = vstv %s4501_s1  ;;  %s4656_s1 = sld [smem:[#allocation4 + $0x2b]] }
  0xed   : > { %v409_v8 = vadd.f32 %v407_v48, %v388_v57  ;;  %v410_v9 = vadd.f32 %v408_v4, %v389_v45  ;;  %v415_v10 = vadd.f32 %v413_v5, %v394_v62  ;;  %v416_v13 = vadd.f32 %v414_v6, %v395_v7  ;;  %v4465_v19 = vpop.permute.xlu1 %3567  ;;  %v4467_v20 = vpop.permute.xlu0 %3562 }
  0xee   : > { %v3570_v34 = vunpack.i.h.bf16 %v4465_v19  ;;  %v3569_v37 = vunpack.i.l.bf16 %v4465_v19  ;;  %v3565_v38 = vunpack.i.h.bf16 %v4467_v20  ;;  %v3564_v32 = vunpack.i.l.bf16 %v4467_v20 }
  0xef   : > { %v4365_v14 = vadd.f32 %v419_v61, %v409_v8  ;;  %v4367_v15 = vadd.f32 %v420_v55, %v410_v9  ;;  %v4369_v16 = vadd.f32 %v425_v53, %v415_v10  ;;  %v4372_v49 = vadd.f32 %v426_v11, %v416_v13 }
  0xf0   : > { %v452_v55 = vstv %s4487_s14  ;;  %v483_v57 = vstv %s4491_s20  ;;  %v545_v6 = vstv %s4503_s2  ;;  %v551_v7 = vstv %s4505_s24  ;;  %s4674_s2 = sld [smem:[#allocation4 + $0x3d]]  ;;  %s7776_s24 = smov 20  }
  0xf1   : > { %3841 = vtanh.f32 %v4365_v14  ;;  %v4469_v21 = vpop.permute.xlu1 %3577  ;;  %v4471_v22 = vpop.permute.xlu0 %3572  ;;  %v565_v8 = vstv %s4507_s17  ;;  %v571_v9 = vstv %s4511_s21  ;;  %v586_v10 = vstv %s4515_s26  ;;  %s4782_s17 = sld [smem:[#allocation4 + $0x47]]  ;;  %s7775_s21 = smov 24  }
  0xf2   : > { %3843 = vtanh.f32 %v4367_v15  ;;  %v3580_v41 = vunpack.i.h.bf16 %v4469_v21  ;;  %v3579_v42 = vunpack.i.l.bf16 %v4469_v21  ;;  %v3575_v43 = vunpack.i.h.bf16 %v4471_v22  ;;  %s7693_s26 = smov 64   ;;  %s4938_s14 = sld [smem:[#allocation4 + $0x5a]] }
  0xf3   : > { %3845 = vtanh.f32 %v4369_v16  ;;  %v3574_v35 = vunpack.i.l.bf16 %v4471_v22  ;;  %v592_v53 = vstv %s4517_s15  ;;  %s4770_s15 = sld [smem:[#allocation4 + $0x34]] }
  0xf4   : > { %3847 = vtanh.f32 %v4372_v49  ;;  %s4940_s20 = sld [smem:[#allocation7 + $0x4]] }
  0xf5   : > { %v4473_v23 = vpop.permute.xlu1 %3587  ;;  %v4475_v24 = vpop.permute.xlu0 %3582 }
  0xf6   : > { %v3584_v39 = vunpack.i.l.bf16 %v4475_v24 }
  0xf9   : > { %v4485_v25 = vpop.permute.xlu1 %3597  ;;  %v4489_v26 = vpop.permute.xlu0 %3592 }
  0xfe   : > { %v4377_v2 = vpop.eup %3841 }
  0xff   : > { %v4379_v1 = vpop.eup %3843  ;;  %455 = vrot.lane.b32.xlu1 %v4377_v2, %s7739_s0 }
 0x100   : > { %457 = vrot.lane.b32.xlu0 %v4379_v1, %s7739_s0  ;;  %v4385_v17 = vpop.eup %3845 }
 0x101   : > { %v4387_v18 = vpop.eup %3847 }
 0x103   : > { %476 = vrot.lane.b32.xlu1 %v4385_v17, %s7739_s0 }
 0x104   : > { %478 = vrot.lane.b32.xlu0 %v4387_v18, %s7739_s0 }
 0x107   : > { %498 = vrot.lane.b32.xlu1 %v4379_v1, %s7740_s30 }
 0x108   : > { %496 = vrot.lane.b32.xlu0 %v4377_v2, %s7740_s30 }
 0x10b   : > { %519 = vrot.lane.b32.xlu1 %v4387_v18, %s7740_s30 }
 0x10c   : > { %517 = vrot.lane.b32.xlu0 %v4385_v17, %s7740_s30  ;;  %s5000_s30 = sld [smem:[#allocation4 + $0x67]] }
 0x10f   : > { %537 = vrot.lane.b32.xlu1 %v4377_v2, %s7741_s5 }
 0x110   : > { %539 = vrot.lane.b32.xlu0 %v4379_v1, %s7741_s5 }
 0x113   : > { %558 = vrot.lane.b32.xlu1 %v4385_v17, %s7741_s5 }
 0x114   : > { %560 = vrot.lane.b32.xlu0 %v4387_v18, %s7741_s5 }
 0x117   : > { %580 = vrot.lane.b32.xlu1 %v4379_v1, %s7742_s6 }
 0x118   : > { %578 = vrot.lane.b32.xlu0 %v4377_v2, %s7742_s6 }
 0x11b   : > { %601 = vrot.lane.b32.xlu1 %v4387_v18, %s7742_s6 }
 0x11c   : > { %599 = vrot.lane.b32.xlu0 %v4385_v17, %s7742_s6  ;;  %s4991_s6 = sld [smem:[#allocation4 + $0x55]] }
 0x11f   : > { %619 = vrot.lane.b32.xlu1 %v4377_v2, %s7743_s7 }
 0x120   : > { %621 = vrot.lane.b32.xlu0 %v4379_v1, %s7743_s7 }
 0x123   : > { %639 = vrot.lane.b32.xlu1 %v4385_v17, %s7743_s7 }
 0x124   : > { %641 = vrot.lane.b32.xlu0 %v4387_v18, %s7743_s7 }
 0x127   : > { %661 = vrot.lane.b32.xlu1 %v4379_v1, %s7744_s8 }
 0x128   : > { %659 = vrot.lane.b32.xlu0 %v4377_v2, %s7744_s8 }
 0x12b   : > { %681 = vrot.lane.b32.xlu1 %v4387_v18, %s7744_s8 }
 0x12c   : > { %679 = vrot.lane.b32.xlu0 %v4385_v17, %s7744_s8  ;;  %s4557_s8 = sld [smem:[#allocation4 + $0x3b]] }
 0x12f   : > { %699 = vrot.lane.b32.xlu1 %v4377_v2, %s7745_s9 }
 0x130   : > { %701 = vrot.lane.b32.xlu0 %v4379_v1, %s7745_s9 }
 0x133   : > { %719 = vrot.lane.b32.xlu1 %v4385_v17, %s7745_s9 }
 0x134   : > { %721 = vrot.lane.b32.xlu0 %v4387_v18, %s7745_s9 }
 0x137   : > { %741 = vrot.lane.b32.xlu1 %v4379_v1, %s7746_s10 }
 0x138   : > { %739 = vrot.lane.b32.xlu0 %v4377_v2, %s7746_s10 }
 0x13b   : > { %761 = vrot.lane.b32.xlu1 %v4387_v18, %s7746_s10 }
 0x13c   : > { %759 = vrot.lane.b32.xlu0 %v4385_v17, %s7746_s10  ;;  %s4551_s10 = sld [smem:[#allocation4 + $0x29]] }
 0x13f   : > { %3607 = vrot.lane.b32.xlu1 %v7685_v0, %s7666_s11  ;;  %s4497_s11 = sld [smem:[#allocation4 + $0x37]] }
 0x140   : > { %3602 = vrot.lane.b32.xlu0 %v7685_v0, %s7668_s12  ;;  %s4499_s12 = sld [smem:[#allocation4 + $0x2e]] }
 0x143   : > { %3617 = vrot.lane.b32.xlu1 %v7685_v0, %s7662_s13  ;;  %s4493_s13 = sld [smem:[#allocation4 + $0x3f]] }
 0x144   : > { %3612 = vrot.lane.b32.xlu0 %v7685_v0, %s7664_s22  ;;  %s4495_s22 = sld [smem:[#allocation4 + $0x25]] }
 0x145   : > { %v510_v45 = vstv %s4497_s11  ;;  %s4590_s11 = sld [smem:[#allocation4 + $0x3c]] }
 0x146   : > { %v524_v63 = vstv %s4499_s12  ;;  %s4628_s12 = sld [smem:[#allocation4 + $0x33]] }
 0x147   : > { %3627 = vrot.lane.b32.xlu1 %v7685_v0, %s7741_s5 }
 0x148   : > { %3622 = vrot.lane.b32.xlu0 %v7685_v0, %s7739_s0 }
 0x149   : > { %v489_v60 = vstv %s4493_s13  ;;  %s4584_s13 = sld [smem:[#allocation4 + $0x2a]] }
 0x14a   : > { %v504_v62 = vstv %s4495_s22  ;;  %s4632_s22 = sld [smem:[#allocation4 + $0x45]] }
 0x14b   : > { %3637 = vrot.lane.b32.xlu1 %v7685_v0, %s7745_s9 }
 0x14c   : > { %3632 = vrot.lane.b32.xlu0 %v7685_v0, %s7743_s7 }
 0x171   : > { %v456_v27 = vpop.permute.xlu1 %455 }
 0x172   : > { %v458_v28 = vpop.permute.xlu0 %457  ;;  %v461_v5 = vsel %vm459_vm8, %v3564_v32, %v456_v27 }
 0x173   : > { %v460_v4 = vsel %vm459_vm8, %v456_v27, %v458_v28  ;;  %v464_v32 = vmul.f32 %v463_v36, %v461_v5  ;;  %v470_v27 = vmul.f32 %v469_v56, %v461_v5  ;;  %v686_v5 = vstv %s4563_s27  ;;  %s4944_s27 = sld [smem:[#allocation7 + $0x5]] }
 0x174   : > { %v465_v0 = vmul.f32 %v463_v36, %v460_v4  ;;  %v471_v28 = vmul.f32 %v469_v56, %v460_v4 }
 0x175   : > { %v4509_v29 = vpop.permute.xlu1 %476  ;;  %v466_v4 = vadd.f32 %v464_v32, %v450_v52 }
 0x176   : > { %v4513_v30 = vpop.permute.xlu0 %478  ;;  %v481_v54 = vsel %vm459_vm8, %v3565_v38, %v4509_v29  ;;  %v467_v51 = vadd.f32 %v465_v0, %v450_v52  ;;  %v473_v0 = vadd.f32 %v471_v28, %v452_v55  ;;  %v706_v52 = vstv %s4584_s13  ;;  %s4950_s13 = sld [smem:[#allocation4 + $0x63]] }
 0x177   : > { %v480_v40 = vsel %vm459_vm8, %v4509_v29, %v4513_v30  ;;  %v484_v29 = vmul.f32 %v483_v57, %v481_v54  ;;  %v490_v46 = vmul.f32 %v489_v60, %v481_v54 }
 0x178   : > { %v485_v38 = vmul.f32 %v483_v57, %v480_v40  ;;  %v491_v59 = vmul.f32 %v489_v60, %v480_v40  ;;  %v472_v57 = vadd.f32 %v470_v27, %v452_v55  ;;  %v712_v40 = vstv %s4590_s11  ;;  %s4952_s11 = sld [smem:[#allocation4 + $0x49]] }
 0x179   : > { %v4521_v31 = vpop.permute.xlu1 %498  ;;  %v486_v54 = vadd.f32 %v484_v29, %v466_v4 }
 0x17a   : > { %v4525_v33 = vpop.permute.xlu0 %496  ;;  %v487_v19 = vadd.f32 %v485_v38, %v467_v51  ;;  %v492_v27 = vadd.f32 %v490_v46, %v472_v57  ;;  %v493_v51 = vadd.f32 %v491_v59, %v473_v0 }
 0x17b   : > { %v502_v36 = vsel %vm500_vm9, %v3569_v37, %v4525_v33  ;;  %v501_v30 = vsel %vm500_vm9, %v4525_v33, %v4521_v31 }
 0x17c   : > { %v505_v37 = vmul.f32 %v504_v62, %v502_v36  ;;  %v506_v13 = vmul.f32 %v504_v62, %v501_v30  ;;  %v511_v60 = vmul.f32 %v510_v45, %v502_v36  ;;  %v512_v62 = vmul.f32 %v510_v45, %v501_v30 }
 0x17d   : > { %v4541_v44 = vpop.permute.xlu1 %519 }
 0x17e   : > { %v4549_v47 = vpop.permute.xlu0 %517  ;;  %v507_v45 = vadd.f32 %v505_v37, %v486_v54  ;;  %v508_v28 = vadd.f32 %v506_v13, %v487_v19  ;;  %v513_v46 = vadd.f32 %v511_v60, %v492_v27 }
 0x17f   : > { %v522_v31 = vsel %vm500_vm9, %v3570_v34, %v4549_v47  ;;  %v521_v33 = vsel %vm500_vm9, %v4549_v47, %v4541_v44 }
 0x180   : > { %v525_v32 = vmul.f32 %v524_v63, %v522_v31  ;;  %v526_v56 = vmul.f32 %v524_v63, %v521_v33  ;;  %v531_v63 = vmul.f32 %v530_v3, %v522_v31  ;;  %v532_v36 = vmul.f32 %v530_v3, %v521_v33 }
 0x181   : > { %v4569_v61 = vpop.permute.xlu1 %537  ;;  %v726_v31 = vstv %s4628_s12  ;;  %v732_v33 = vstv %s4632_s22  ;;  %s4954_s12 = sld [smem:[#allocation4 + $0x5b]] }
 0x182   : > { %v540_v48 = vpop.permute.xlu0 %539  ;;  %v543_v47 = vsel %vm541_vm10, %v3574_v35, %v4569_v61  ;;  %v527_v3 = vadd.f32 %v525_v32, %v507_v45  ;;  %v528_v29 = vadd.f32 %v526_v56, %v508_v28  ;;  %v533_v4 = vadd.f32 %v531_v63, %v513_v46  ;;  %s4956_s22 = sld [smem:[#allocation4 + $0x52]] }
 0x183   : > { %v542_v44 = vsel %vm541_vm10, %v4569_v61, %v540_v48  ;;  %v514_v61 = vadd.f32 %v512_v62, %v493_v51  ;;  %v546_v59 = vmul.f32 %v545_v6, %v543_v47  ;;  %v552_v22 = vmul.f32 %v551_v7, %v543_v47 }
 0x184   : > { %v547_v13 = vmul.f32 %v545_v6, %v542_v44  ;;  %v746_v63 = vstv %s4656_s1  ;;  %s4958_s1 = sld [smem:[#allocation4 + $0x64]] }
 0x185   : > { %v559_v11 = vpop.permute.xlu1 %558  ;;  %v534_v37 = vadd.f32 %v532_v36, %v514_v61  ;;  %v554_v62 = vadd.f32 %v552_v22, %v533_v4  ;;  %v7753_v22 = vunpack.i.h.bf16 %v4475_v24 }
 0x186   : > { %v561_v58 = vpop.permute.xlu0 %560  ;;  %v563_v35 = vsel %vm541_vm10, %v3575_v43, %v559_v11  ;;  %v549_v57 = vadd.f32 %v547_v13, %v528_v29  ;;  %v7751_v13 = vstv %s4527_s3  ;;  %s4752_s3 = sld [smem:[#allocation4 + $0x3e]] }
 0x187   : > { %v562_v48 = vsel %vm541_vm10, %v559_v11, %v561_v58  ;;  %v553_v58 = vmul.f32 %v551_v7, %v542_v44  ;;  %v566_v11 = vmul.f32 %v565_v8, %v563_v35  ;;  %v548_v7 = vadd.f32 %v546_v59, %v527_v3 }
 0x188   : > { %v567_v38 = vmul.f32 %v565_v8, %v562_v48  ;;  %v572_v8 = vmul.f32 %v571_v9, %v563_v35  ;;  %v573_v0 = vmul.f32 %v571_v9, %v562_v48  ;;  %v7749_v35 = vstv %s4523_s4  ;;  %s4764_s4 = sld [smem:[#allocation4 + $0x35]] }
 0x189   : > { %v581_v50 = vpop.permute.xlu1 %580  ;;  %v555_v9 = vadd.f32 %v553_v58, %v534_v37  ;;  %v568_v32 = vadd.f32 %v566_v11, %v548_v7  ;;  %v7750_v59 = vmov %v7749_v35  ;;  %v7752_v3 = vmov %v7751_v13 }
 0x18a   : > { %v579_v20 = vpop.permute.xlu0 %578  ;;  %v569_v44 = vadd.f32 %v567_v38, %v549_v57  ;;  %v7754_v38 = vstv %s4529_s25  ;;  %s7691_s25 = smov 56  }
 0x18b   : > { %v584_v6 = vsel %vm582_vm11, %v3579_v42, %v579_v20  ;;  %v583_v56 = vsel %vm582_vm11, %v579_v20, %v581_v50  ;;  %v575_v36 = vadd.f32 %v573_v0, %v555_v9  ;;  %v7755_v7 = vmov %v7754_v38 }
 0x18c   : > { %v587_v42 = vmul.f32 %v586_v10, %v584_v6  ;;  %v588_v50 = vmul.f32 %v586_v10, %v583_v56  ;;  %v593_v47 = vmul.f32 %v592_v53, %v584_v6  ;;  %v594_v21 = vmul.f32 %v592_v53, %v583_v56 }
 0x18d   : > { %v602_v34 = vpop.permute.xlu1 %601  ;;  %v752_v56 = vstv %s4674_s2  ;;  %s4960_s2 = sld [smem:[#allocation4 + $0x4a]] }
 0x18e   : > { %v600_v55 = vpop.permute.xlu0 %599  ;;  %v589_v53 = vadd.f32 %v587_v42, %v568_v32  ;;  %v590_v48 = vadd.f32 %v588_v50, %v569_v44  ;;  %v596_v11 = vadd.f32 %v594_v21, %v575_v36  ;;  %v7756_v42 = vstv %s4534_s19  ;;  %s7774_s19 = smov 28  }
 0x18f   : > { %v604_v20 = vsel %vm582_vm11, %v3580_v41, %v600_v55  ;;  %v603_v19 = vsel %vm582_vm11, %v600_v55, %v602_v34  ;;  %v574_v34 = vadd.f32 %v572_v8, %v554_v62  ;;  %v7747_v55 = vstv %s4519_s18  ;;  %s7773_s18 = smov 32  }
 0x190   : > { %v607_v27 = vmul.f32 %v7747_v55, %v604_v20  ;;  %v7748_v51 = vmov %v7747_v55  ;;  %v613_v46 = vmul.f32 %v7749_v35, %v604_v20  ;;  %v7757_v20 = vstv %s4543_s16  ;;  %s4776_s16 = sld [smem:[#allocation4 + $0x46]] }
 0x191   : > { %v620_v30 = vpop.permute.xlu1 %619  ;;  %v608_v45 = vmul.f32 %v7748_v51, %v603_v19  ;;  %v7758_v62 = vunpack.i.l.bf16 %v4473_v23  ;;  %v7762_v36 = vstv %s4551_s10  ;;  %s7689_s10 = smov 48  }
 0x192   : > { %v622_v43 = vpop.permute.xlu0 %621  ;;  %v624_v41 = vsel %vm255_vm0, %v3584_v39, %v620_v30  ;;  %v614_v39 = vmul.f32 %v7750_v59, %v603_v19  ;;  %v609_v4 = vadd.f32 %v607_v27, %v589_v53  ;;  %v7761_v27 = vunpack.i.h.bf16 %v4473_v23 }
 0x193   : > { %v623_v10 = vsel %vm255_vm0, %v620_v30, %v622_v43  ;;  %v627_v30 = vmul.f32 %v7751_v13, %v624_v41  ;;  %v595_v43 = vadd.f32 %v593_v47, %v574_v34  ;;  %v633_v6 = vmul.f32 %v7754_v38, %v624_v41 }
 0x194   : > { %v628_v29 = vmul.f32 %v7752_v3, %v623_v10  ;;  %v610_v37 = vadd.f32 %v608_v45, %v590_v48  ;;  %v634_v57 = vmul.f32 %v7755_v7, %v623_v10  ;;  %v616_v44 = vadd.f32 %v614_v39, %v596_v11 }
 0x195   : > { %v640_v54 = vpop.permute.xlu1 %639  ;;  %v615_v24 = vadd.f32 %v613_v46, %v595_v43  ;;  %v629_v47 = vadd.f32 %v627_v30, %v609_v4  ;;  %v7759_v10 = vmov %v7756_v42  ;;  %v7760_v34 = vmov %v7757_v20 }
 0x196   : > { %v642_v60 = vpop.permute.xlu0 %641  ;;  %v644_v58 = vsel %vm255_vm0, %v7753_v22, %v640_v54  ;;  %v630_v21 = vadd.f32 %v628_v29, %v610_v37  ;;  %v636_v45 = vadd.f32 %v634_v57, %v616_v44  ;;  %v7763_v48 = vstv %s4557_s8  ;;  %s7687_s8 = smov 40  }
 0x197   : > { %v643_v8 = vsel %vm255_vm0, %v640_v54, %v642_v60  ;;  %v647_v50 = vmul.f32 %v7756_v42, %v644_v58  ;;  %v653_v19 = vmul.f32 %v7757_v20, %v644_v58  ;;  %v635_v60 = vadd.f32 %v633_v6, %v615_v24 }
 0x198   : > { %v648_v41 = vmul.f32 %v7759_v10, %v643_v8  ;;  %v654_v55 = vmul.f32 %v7760_v34, %v643_v8  ;;  %v7764_v39 = vmov %v7762_v36  ;;  %v7765_v30 = vmov %v7763_v48 }
 0x199   : > { %v662_v28 = vpop.permute.xlu1 %661  ;;  %v655_v59 = vadd.f32 %v653_v19, %v635_v60  ;;  %v7766_v22 = vstv %s4571_s29  ;;  %v7767_v11 = vunpack.i.l.bf16 %v4489_v26  ;;  %s4948_s29 = sld [smem:[#allocation4 + $0x51]] }
 0x19a   : > { %v660_v61 = vpop.permute.xlu0 %659  ;;  %v650_v6 = vadd.f32 %v648_v41, %v630_v21  ;;  %v656_v4 = vadd.f32 %v654_v55, %v636_v45  ;;  %v7768_v7 = vmov %v7766_v22  ;;  %v7769_v21 = vunpack.i.h.bf16 %v4489_v26 }
 0x19b   : > { %v664_v9 = vsel %vm297_vm2, %v7758_v62, %v660_v61  ;;  %v663_v54 = vsel %vm297_vm2, %v660_v61, %v662_v28  ;;  %v649_v61 = vadd.f32 %v647_v50, %v629_v47 }
 0x19c   : > { %v667_v53 = vmul.f32 %v7762_v36, %v664_v9  ;;  %v673_v35 = vmul.f32 %v7763_v48, %v664_v9  ;;  %v668_v13 = vmul.f32 %v7764_v39, %v663_v54  ;;  %v674_v23 = vmul.f32 %v7765_v30, %v663_v54 }
 0x19d   : > { %v682_v0 = vpop.permute.xlu1 %681  ;;  %v784_v48 = vstv %s4752_s3  ;;  %s4962_s3 = sld [smem:[#allocation4 + $0x5c]] }
 0x19e   : > { %v680_v32 = vpop.permute.xlu0 %679  ;;  %v669_v8 = vadd.f32 %v667_v53, %v649_v61  ;;  %v670_v20 = vadd.f32 %v668_v13, %v650_v6  ;;  %v676_v19 = vadd.f32 %v674_v23, %v656_v4 }
 0x19f   : > { %v684_v51 = vsel %vm297_vm2, %v7761_v27, %v680_v32  ;;  %v683_v28 = vsel %vm297_vm2, %v680_v32, %v682_v0  ;;  %v675_v0 = vadd.f32 %v673_v35, %v655_v59 }
 0x1a0   : > { %v687_v29 = vmul.f32 %v686_v5, %v684_v51  ;;  %v693_v58 = vmul.f32 %v7766_v22, %v684_v51  ;;  %v688_v37 = vmul.f32 %v686_v5, %v683_v28  ;;  %v694_v57 = vmul.f32 %v7768_v7, %v683_v28 }
 0x1a1   : > { %v700_v46 = vpop.permute.xlu1 %699  ;;  %v3600_v51 = vunpack.i.h.bf16 %v4485_v25 }
 0x1a2   : > { %v702_v3 = vpop.permute.xlu0 %701  ;;  %v704_v38 = vsel %vm339_vm4, %v7767_v11, %v700_v46  ;;  %v689_v32 = vadd.f32 %v687_v29, %v669_v8  ;;  %v695_v44 = vadd.f32 %v693_v58, %v675_v0  ;;  %v690_v60 = vadd.f32 %v688_v37, %v670_v20 }
 0x1a3   : > { %v703_v43 = vsel %vm339_vm4, %v700_v46, %v702_v3  ;;  %v707_v24 = vmul.f32 %v706_v52, %v704_v38  ;;  %v713_v42 = vmul.f32 %v712_v40, %v704_v38  ;;  %v696_v10 = vadd.f32 %v694_v57, %v676_v19 }
 0x1a4   : > { %v708_v5 = vmul.f32 %v706_v52, %v703_v43  ;;  %v714_v62 = vmul.f32 %v712_v40, %v703_v43  ;;  %v7770_v46 = vunpack.i.l.bf16 %v4485_v25  ;;  %v766_v3 = vstv %s4770_s15  ;;  %s4968_s15 = sld [smem:[#allocation4 + $0x65]] }
 0x1a5   : > { %v720_v50 = vpop.permute.xlu1 %719  ;;  %v709_v41 = vadd.f32 %v707_v24, %v689_v32  ;;  %v715_v34 = vadd.f32 %v713_v42, %v695_v44  ;;  %v772_v25 = vstv %s4776_s16  ;;  %v790_v11 = vstv %s4764_s4  ;;  %s4964_s4 = sld [smem:[#allocation4 + $0x53]] }
 0x1a6   : > { %v722_v9 = vpop.permute.xlu0 %721  ;;  %v724_v54 = vsel %vm339_vm4, %v7769_v21, %v720_v50  ;;  %v710_v45 = vadd.f32 %v708_v5, %v690_v60  ;;  %v716_v36 = vadd.f32 %v714_v62, %v696_v10  ;;  %v796_v38 = vstv %s4782_s17  ;;  %s4972_s16 = sld [smem:[#allocation4 + $0x4b]] }
 0x1a7   : > { %v723_v47 = vsel %vm339_vm4, %v720_v50, %v722_v9  ;;  %v727_v52 = vmul.f32 %v726_v31, %v724_v54  ;;  %v733_v40 = vmul.f32 %v732_v33, %v724_v54  ;;  %v7771_v0 = vstv %s4477_s23  ;;  %s4934_s23 = sld [smem:[#allocation4 + $0x50]] }
 0x1a8   : > { %v728_v55 = vmul.f32 %v726_v31, %v723_v47  ;;  %v734_v27 = vmul.f32 %v732_v33, %v723_v47  ;;  %v780_v24 = vmul.f32 %v4379_v1, %v7771_v0  ;;  %v786_v42 = vmul.f32 %v4379_v1, %v784_v48  ;;  %s4974_s17 = sld [smem:[#allocation4 + $0x5d]] }
 0x1a9   : > { %v742_v26 = vpop.permute.xlu1 %741  ;;  %v729_v35 = vadd.f32 %v727_v52, %v709_v41  ;;  %v735_v28 = vadd.f32 %v733_v40, %v715_v34  ;;  %v7772_v50 = vmov %v7771_v0  ;;  %v785_v19 = vmul.f32 %v4377_v2, %v784_v48 }
 0x1aa   : > { %v740_v53 = vpop.permute.xlu0 %739  ;;  %v730_v30 = vadd.f32 %v728_v55, %v710_v45  ;;  %v736_v23 = vadd.f32 %v734_v27, %v716_v36  ;;  %v779_v20 = vmul.f32 %v4377_v2, %v7772_v50  ;;  %v791_v44 = vmul.f32 %v4385_v17, %v790_v11 }
 0x1ab   : > { %v744_v31 = vsel %vm381_vm6, %v7770_v46, %v740_v53  ;;  %v743_v33 = vsel %vm381_vm6, %v740_v53, %v742_v26  ;;  %v792_v47 = vmul.f32 %v4387_v18, %v790_v11  ;;  %v797_v21 = vmul.f32 %v4385_v17, %v796_v38 }
 0x1ac   : > { %v747_v61 = vmul.f32 %v746_v63, %v744_v31  ;;  %v753_v59 = vmul.f32 %v752_v56, %v744_v31  ;;  %v748_v39 = vmul.f32 %v746_v63, %v743_v33  ;;  %v754_v13 = vmul.f32 %v752_v56, %v743_v33 }
 0x1ad   : > { %v762_v29 = vpop.permute.xlu1 %761  ;;  %v798_v54 = vmul.f32 %v4387_v18, %v796_v38  ;;  %v7777_v26 = vmov 0.0   ;;  %v818_v50 = vstv %s4944_s27  ;;  %s5083_s27 = sld [smem:[#allocation4 + $0x57]] }
 0x1ae   : > { %v749_v22 = vadd.f32 %v747_v61, %v729_v35  ;;  %v755_v58 = vadd.f32 %v753_v59, %v735_v28  ;;  %v760_v43 = vpop.permute.xlu0 %759  ;;  %v750_v6 = vadd.f32 %v748_v39, %v730_v30  ;;  %v756_v4 = vadd.f32 %v754_v13, %v736_v23 }
 0x1af   : > { %v764_v37 = vsel %vm381_vm6, %v3600_v51, %v760_v43  ;;  %v763_v63 = vsel %vm381_vm6, %v760_v43, %v762_v29 }
 0x1b0   : > { %v767_v56 = vmul.f32 %v766_v3, %v764_v37  ;;  %v773_v7 = vmul.f32 %v772_v25, %v764_v37  ;;  %v768_v57 = vmul.f32 %v766_v3, %v763_v63  ;;  %v774_v8 = vmul.f32 %v772_v25, %v763_v63 }
 0x1b1   : > { %v4922_v51 = vpop.permute.xlu1 %3607 }
 0x1b2   : > { %v769_v5 = vadd.f32 %v767_v56, %v749_v22  ;;  %v775_v62 = vadd.f32 %v773_v7, %v755_v58  ;;  %v770_v9 = vadd.f32 %v768_v57, %v750_v6  ;;  %v776_v32 = vadd.f32 %v774_v8, %v756_v4  ;;  %v4924_v45 = vpop.permute.xlu0 %3602 }
 0x1b3   : > { %v3605_v30 = vunpack.i.h.bf16 %v4924_v45  ;;  %v3604_v23 = vunpack.i.l.bf16 %v4924_v45  ;;  %v3610_v3 = vunpack.i.h.bf16 %v4922_v51  ;;  %v3609_v29 = vunpack.i.l.bf16 %v4922_v51 }
 0x1b4   : > { %v781_v60 = vadd.f32 %v779_v20, %v769_v5  ;;  %v782_v10 = vadd.f32 %v780_v24, %v770_v9  ;;  %v787_v1 = vadd.f32 %v785_v19, %v775_v62  ;;  %v788_v52 = vadd.f32 %v786_v42, %v776_v32 }
 0x1b5   : > { %v4926_v36 = vpop.permute.xlu1 %3617  ;;  %v829_v7 = vstv %s4936_s28  ;;  %v835_v57 = vstv %s4938_s14  ;;  %v816_v42 = vstv %s4940_s20  ;;  %v849_v20 = vstv %s4948_s29  ;;  %s5028_s28 = sld [smem:[#allocation4 + $0x68]] }
 0x1b6   : > { %v793_v40 = vadd.f32 %v791_v44, %v781_v60  ;;  %v794_v41 = vadd.f32 %v792_v47, %v782_v10  ;;  %v799_v34 = vadd.f32 %v797_v21, %v787_v1  ;;  %v800_v2 = vadd.f32 %v798_v54, %v788_v52  ;;  %v4928_v53 = vpop.permute.xlu0 %3612  ;;  %s5041_s14 = sld [smem:[#allocation4 + $0x4e]] }
 0x1b7   : > { %v3615_v22 = vunpack.i.h.bf16 %v4928_v53  ;;  %v3614_v58 = vunpack.i.l.bf16 %v4928_v53  ;;  %v3620_v43 = vunpack.i.h.bf16 %v4926_v36  ;;  %v3619_v38 = vunpack.i.l.bf16 %v4926_v36  ;;  %s5047_s20 = sld [smem:[#allocation4 + $0x60]] }
 0x1b8   : > { %3849 = vtanh.f32 %v793_v40  ;;  %v855_v19 = vstv %s4950_s13  ;;  %v870_v62 = vstv %s4952_s11  ;;  %v876_v9 = vstv %s4954_s12  ;;  %s5087_s29 = sld [smem:[#allocation4 + $0x69]] }
 0x1b9   : > { %3851 = vtanh.f32 %v794_v41  ;;  %v4930_v48 = vpop.permute.xlu1 %3627  ;;  %v890_v32 = vstv %s4956_s22  ;;  %v896_v44 = vstv %s4958_s1  ;;  %v911_v60 = vstv %s4960_s2  ;;  %s5111_s13 = sld [smem:[#allocation4 + $0x4f]] }
 0x1ba   : > { %3853 = vtanh.f32 %v799_v34  ;;  %v4932_v35 = vpop.permute.xlu0 %3622  ;;  %v917_v10 = vstv %s4962_s3  ;;  %v931_v1 = vstv %s4964_s4  ;;  %v937_v52 = vstv %s4968_s15  ;;  %s5129_s11 = sld [smem:[#allocation4 + $0x61]] }
 0x1bb   : > { %3855 = vtanh.f32 %v800_v2  ;;  %v952_v40 = vstv %s4972_s16  ;;  %v958_v41 = vstv %s4974_s17  ;;  %s5391_s12 = sld [smem:[#allocation4 + $0x6c]] }
 0x1bc   : > { %s5393_s22 = sld [smem:[#allocation4 + $0x7e]] }
 0x1bd   : > { %v4942_v28 = vpop.permute.xlu1 %3637  ;;  %s5395_s1 = sld [smem:[#allocation7 + $0x6]] }
 0x1be   : > { %v4946_v46 = vpop.permute.xlu0 %3632  ;;  %s5399_s2 = sld [smem:[#allocation7 + $0x7]] }
 0x1bf   : > { %s5403_s3 = sld [smem:[#allocation4 + $0x75]] }
 0x1c0   : > { %s5405_s4 = sld [smem:[#allocation4 + $0x87]] }
 0x1c1   : > { %s5407_s15 = sld [smem:[#allocation4 + $0x6d]] }
 0x1c2   : > { %s5409_s16 = sld [smem:[#allocation4 + $0x7f]] }
 0x1c3   : > { %s5411_s17 = sld [smem:[#allocation4 + $0x76]] }
 0x1c5   : > { %v4834_v55 = vpop.eup %3849 }
 0x1c6   : > { %v4836_v27 = vpop.eup %3851  ;;  %821 = vrot.lane.b32.xlu1 %v4834_v55, %s7773_s18 }
 0x1c7   : > { %823 = vrot.lane.b32.xlu0 %v4836_v27, %s7773_s18  ;;  %v4842_v17 = vpop.eup %3853 }
 0x1c8   : > { %v4844_v18 = vpop.eup %3855 }
 0x1ca   : > { %842 = vrot.lane.b32.xlu1 %v4842_v17, %s7773_s18 }
 0x1cb   : > { %844 = vrot.lane.b32.xlu0 %v4844_v18, %s7773_s18 }
 0x1ce   : > { %864 = vrot.lane.b32.xlu1 %v4836_v27, %s7774_s19 }
 0x1cf   : > { %862 = vrot.lane.b32.xlu0 %v4834_v55, %s7774_s19 }
 0x1d2   : > { %885 = vrot.lane.b32.xlu1 %v4844_v18, %s7774_s19 }
 0x1d3   : > { %883 = vrot.lane.b32.xlu0 %v4842_v17, %s7774_s19  ;;  %s5455_s19 = sld [smem:[#allocation4 + $0x8b]] }
 0x1d6   : > { %903 = vrot.lane.b32.xlu1 %v4834_v55, %s7775_s21 }
 0x1d7   : > { %905 = vrot.lane.b32.xlu0 %v4836_v27, %s7775_s21 }
 0x1da   : > { %924 = vrot.lane.b32.xlu1 %v4842_v17, %s7775_s21 }
 0x1db   : > { %926 = vrot.lane.b32.xlu0 %v4844_v18, %s7775_s21 }
 0x1de   : > { %946 = vrot.lane.b32.xlu1 %v4836_v27, %s7776_s24 }
 0x1df   : > { %944 = vrot.lane.b32.xlu0 %v4834_v55, %s7776_s24 }
 0x1e2   : > { %967 = vrot.lane.b32.xlu1 %v4844_v18, %s7776_s24 }
 0x1e3   : > { %965 = vrot.lane.b32.xlu0 %v4842_v17, %s7776_s24  ;;  %s5020_s24 = sld [smem:[#allocation4 + $0x56]] }
 0x1e6   : > { %985 = vrot.lane.b32.xlu1 %v4834_v55, %s7739_s0 }
 0x1e7   : > { %987 = vrot.lane.b32.xlu0 %v4836_v27, %s7739_s0 }
 0x1e9   : > { %v1052_v63 = vstv %s5020_s24  ;;  %s5237_s24 = sld [smem:[#allocation4 + $0x6b]] }
 0x1ea   : > { %1005 = vrot.lane.b32.xlu1 %v4842_v17, %s7739_s0 }
 0x1eb   : > { %1007 = vrot.lane.b32.xlu0 %v4844_v18, %s7739_s0 }
 0x1ee   : > { %1027 = vrot.lane.b32.xlu1 %v4836_v27, %s7741_s5 }
 0x1ef   : > { %1025 = vrot.lane.b32.xlu0 %v4834_v55, %s7741_s5 }
 0x1f2   : > { %1047 = vrot.lane.b32.xlu1 %v4844_v18, %s7741_s5 }
 0x1f3   : > { %1045 = vrot.lane.b32.xlu0 %v4842_v17, %s7741_s5  ;;  %s5014_s5 = sld [smem:[#allocation4 + $0x5f]] }
 0x1f6   : > { %1065 = vrot.lane.b32.xlu1 %v4834_v55, %s7743_s7 }
 0x1f7   : > { %1067 = vrot.lane.b32.xlu0 %v4836_v27, %s7743_s7 }
 0x1fa   : > { %1085 = vrot.lane.b32.xlu1 %v4842_v17, %s7743_s7 }
 0x1fb   : > { %1087 = vrot.lane.b32.xlu0 %v4844_v18, %s7743_s7 }
 0x1fe   : > { %1107 = vrot.lane.b32.xlu1 %v4836_v27, %s7745_s9 }
 0x1ff   : > { %1105 = vrot.lane.b32.xlu0 %v4834_v55, %s7745_s9 }
 0x202   : > { %1127 = vrot.lane.b32.xlu1 %v4844_v18, %s7745_s9 }
 0x203   : > { %1125 = vrot.lane.b32.xlu0 %v4842_v17, %s7745_s9  ;;  %s5008_s9 = sld [smem:[#allocation4 + $0x4d]] }
 0x206   : > { %3647 = vrot.lane.b32.xlu1 %v7777_v26, %s7691_s25  ;;  %s4984_s25 = sld [smem:[#allocation4 + $0x4c]] }
 0x207   : > { %3642 = vrot.lane.b32.xlu0 %v7777_v26, %s7693_s26  ;;  %s4986_s26 = sld [smem:[#allocation4 + $0x5e]] }
 0x20a   : > { %3657 = vrot.lane.b32.xlu1 %v7777_v26, %s7687_s8  ;;  %s4976_s8 = sld [smem:[#allocation4 + $0x54]] }
 0x20b   : > { %3652 = vrot.lane.b32.xlu0 %v7777_v26, %s7689_s10  ;;  %s4980_s10 = sld [smem:[#allocation4 + $0x66]] }
 0x20e   : > { %3667 = vrot.lane.b32.xlu1 %v7777_v26, %s7775_s21 }
 0x20f   : > { %3662 = vrot.lane.b32.xlu0 %v7777_v26, %s7773_s18 }
 0x212   : > { %3677 = vrot.lane.b32.xlu1 %v7777_v26, %s7743_s7 }
 0x213   : > { %3672 = vrot.lane.b32.xlu0 %v7777_v26, %s7739_s0 }
 0x238   : > { %v822_v31 = vpop.permute.xlu1 %821 }
 0x239   : > { %v824_v33 = vpop.permute.xlu0 %823  ;;  %v827_v54 = vsel %vm825_vm12, %v3604_v23, %v822_v31 }
 0x23a   : > { %v826_v21 = vsel %vm825_vm12, %v822_v31, %v824_v33  ;;  %v830_v23 = vmul.f32 %v829_v7, %v827_v54  ;;  %v836_v31 = vmul.f32 %v835_v57, %v827_v54 }
 0x23b   : > { %v831_v25 = vmul.f32 %v829_v7, %v826_v21  ;;  %v837_v33 = vmul.f32 %v835_v57, %v826_v21 }
 0x23c   : > { %v4966_v61 = vpop.permute.xlu1 %842  ;;  %v832_v54 = vadd.f32 %v830_v23, %v816_v42 }
 0x23d   : > { %v4970_v59 = vpop.permute.xlu0 %844  ;;  %v847_v8 = vsel %vm825_vm12, %v3605_v30, %v4966_v61  ;;  %v833_v57 = vadd.f32 %v831_v25, %v816_v42  ;;  %v839_v25 = vadd.f32 %v837_v33, %v818_v50 }
 0x23e   : > { %v846_v24 = vsel %vm825_vm12, %v4966_v61, %v4970_v59  ;;  %v850_v2 = vmul.f32 %v849_v20, %v847_v8  ;;  %v856_v21 = vmul.f32 %v855_v19, %v847_v8  ;;  %v1072_v8 = vstv %s5041_s14  ;;  %s5415_s14 = sld [smem:[#allocation4 + $0x6e]] }
 0x23f   : > { %v851_v61 = vmul.f32 %v849_v20, %v846_v24  ;;  %v857_v4 = vmul.f32 %v855_v19, %v846_v24  ;;  %v838_v20 = vadd.f32 %v836_v31, %v818_v50  ;;  %v1078_v24 = vstv %s5047_s20  ;;  %s5417_s20 = sld [smem:[#allocation4 + $0x80]] }
 0x240   : > { %v4978_v39 = vpop.permute.xlu1 %864  ;;  %v852_v42 = vadd.f32 %v850_v2, %v832_v54 }
 0x241   : > { %v4982_v13 = vpop.permute.xlu0 %862  ;;  %v853_v51 = vadd.f32 %v851_v61, %v833_v57  ;;  %v858_v2 = vadd.f32 %v856_v21, %v838_v20  ;;  %v859_v31 = vadd.f32 %v857_v4, %v839_v25 }
 0x242   : > { %v868_v7 = vsel %vm866_vm13, %v3609_v29, %v4982_v13  ;;  %v867_v59 = vsel %vm866_vm13, %v4982_v13, %v4978_v39 }
 0x243   : > { %v871_v29 = vmul.f32 %v870_v62, %v868_v7  ;;  %v872_v56 = vmul.f32 %v870_v62, %v867_v59  ;;  %v877_v19 = vmul.f32 %v876_v9, %v868_v7  ;;  %v878_v62 = vmul.f32 %v876_v9, %v867_v59 }
 0x244   : > { %v4998_v11 = vpop.permute.xlu1 %885 }
 0x245   : > { %v5006_v37 = vpop.permute.xlu0 %883  ;;  %v873_v9 = vadd.f32 %v871_v29, %v852_v42  ;;  %v874_v33 = vadd.f32 %v872_v56, %v853_v51  ;;  %v880_v59 = vadd.f32 %v878_v62, %v859_v31 }
 0x246   : > { %v888_v39 = vsel %vm866_vm13, %v3610_v3, %v5006_v37  ;;  %v887_v13 = vsel %vm866_vm13, %v5006_v37, %v4998_v11 }
 0x247   : > { %v891_v23 = vmul.f32 %v890_v32, %v888_v39  ;;  %v892_v45 = vmul.f32 %v890_v32, %v887_v13  ;;  %v897_v32 = vmul.f32 %v896_v44, %v888_v39  ;;  %v898_v7 = vmul.f32 %v896_v44, %v887_v13 }
 0x248   : > { %v5026_v5 = vpop.permute.xlu1 %903  ;;  %v1092_v39 = vstv %s5083_s27  ;;  %v1098_v13 = vstv %s5087_s29  ;;  %s5419_s27 = sld [smem:[#allocation4 + $0x77]] }
 0x249   : > { %v906_v47 = vpop.permute.xlu0 %905  ;;  %v909_v37 = vsel %vm907_vm14, %v3614_v58, %v5026_v5  ;;  %v893_v44 = vadd.f32 %v891_v23, %v873_v9  ;;  %v894_v54 = vadd.f32 %v892_v45, %v874_v33  ;;  %v900_v29 = vadd.f32 %v898_v7, %v880_v59  ;;  %s5423_s29 = sld [smem:[#allocation4 + $0x89]] }
 0x24a   : > { %v908_v11 = vsel %vm907_vm14, %v5026_v5, %v906_v47  ;;  %v879_v5 = vadd.f32 %v877_v19, %v858_v2  ;;  %v912_v4 = vmul.f32 %v911_v60, %v909_v37  ;;  %v918_v53 = vmul.f32 %v917_v10, %v909_v37 }
 0x24b   : > { %v913_v56 = vmul.f32 %v911_v60, %v908_v11  ;;  %v7779_v2 = vstv %s4976_s8  ;;  %v1112_v7 = vstv %s5111_s13  ;;  %s7807_s8 = smov 48   ;;  %s5427_s13 = sld [smem:[#allocation4 + $0x6f]] }
 0x24c   : > { %v925_v34 = vpop.permute.xlu1 %924  ;;  %v899_v21 = vadd.f32 %v897_v32, %v879_v5  ;;  %v7780_v9 = vmov %v7779_v2  ;;  %v7781_v5 = vstv %s4980_s10  ;;  %s7808_s10 = smov 40  }
 0x24d   : > { %v927_v0 = vpop.permute.xlu0 %926  ;;  %v929_v58 = vsel %vm907_vm14, %v3615_v22, %v925_v34  ;;  %v915_v20 = vadd.f32 %v913_v56, %v894_v54  ;;  %v7782_v56 = vmov %v7781_v5 }
 0x24e   : > { %v928_v47 = vsel %vm907_vm14, %v925_v34, %v927_v0  ;;  %v919_v0 = vmul.f32 %v917_v10, %v908_v11  ;;  %v932_v34 = vmul.f32 %v931_v1, %v929_v58  ;;  %v914_v10 = vadd.f32 %v912_v4, %v893_v44 }
 0x24f   : > { %v933_v57 = vmul.f32 %v931_v1, %v928_v47  ;;  %v938_v1 = vmul.f32 %v937_v52, %v929_v58  ;;  %v939_v25 = vmul.f32 %v937_v52, %v928_v47  ;;  %v920_v62 = vadd.f32 %v918_v53, %v899_v21 }
 0x250   : > { %v947_v30 = vpop.permute.xlu1 %946  ;;  %v921_v52 = vadd.f32 %v919_v0, %v900_v29  ;;  %v934_v23 = vadd.f32 %v932_v34, %v914_v10  ;;  %v7783_v44 = vstv %s4984_s25  ;;  %v1118_v29 = vstv %s5129_s11  ;;  %s7805_s25 = smov 64   ;;  %s5429_s11 = sld [smem:[#allocation4 + $0x81]] }
 0x251   : > { %v945_v6 = vpop.permute.xlu0 %944  ;;  %v935_v11 = vadd.f32 %v933_v57, %v915_v20  ;;  %v7784_v53 = vmov %v7783_v44 }
 0x252   : > { %v950_v60 = vsel %vm948_vm15, %v3619_v38, %v945_v6  ;;  %v949_v45 = vsel %vm948_vm15, %v945_v6, %v947_v30  ;;  %v941_v47 = vadd.f32 %v939_v25, %v921_v52 }
 0x253   : > { %v953_v38 = vmul.f32 %v952_v40, %v950_v60  ;;  %v954_v6 = vmul.f32 %v952_v40, %v949_v45  ;;  %v959_v37 = vmul.f32 %v958_v41, %v950_v60  ;;  %v960_v36 = vmul.f32 %v958_v41, %v949_v45 }
 0x254   : > { %v968_v3 = vpop.permute.xlu1 %967  ;;  %v7786_v45 = vstv %s4986_s26  ;;  %s7806_s26 = smov 56  }
 0x255   : > { %v966_v50 = vpop.permute.xlu0 %965  ;;  %v955_v41 = vadd.f32 %v953_v38, %v934_v23  ;;  %v956_v58 = vadd.f32 %v954_v6, %v935_v11  ;;  %v962_v60 = vadd.f32 %v960_v36, %v941_v47  ;;  %v7790_v23 = vunpack.i.l.bf16 %v4930_v48 }
 0x256   : > { %v970_v30 = vsel %vm948_vm15, %v3620_v43, %v966_v50  ;;  %v969_v51 = vsel %vm948_vm15, %v966_v50, %v968_v3  ;;  %v7778_v43 = vunpack.i.l.bf16 %v4932_v35  ;;  %v940_v50 = vadd.f32 %v938_v1, %v920_v62 }
 0x257   : > { %v973_v31 = vmul.f32 %v7779_v2, %v970_v30  ;;  %v974_v33 = vmul.f32 %v7780_v9, %v969_v51  ;;  %v979_v59 = vmul.f32 %v7781_v5, %v970_v30  ;;  %v7787_v1 = vmov %v7786_v45 }
 0x258   : > { %v986_v61 = vpop.permute.xlu1 %985  ;;  %v961_v57 = vadd.f32 %v959_v37, %v940_v50  ;;  %v7788_v30 = vstv %s4991_s6  ;;  %v7789_v62 = vstv %s5000_s30  ;;  %v7793_v9 = vunpack.i.h.bf16 %v4930_v48  ;;  %s5207_s30 = sld [smem:[#allocation4 + $0x62]] }
 0x259   : > { %v988_v22 = vpop.permute.xlu0 %987  ;;  %v990_v3 = vsel %vm459_vm8, %v7778_v43, %v986_v61  ;;  %v975_v10 = vadd.f32 %v973_v31, %v955_v41  ;;  %v976_v20 = vadd.f32 %v974_v33, %v956_v58  ;;  %v7792_v2 = vmov %v7789_v62  ;;  %s5225_s6 = sld [smem:[#allocation4 + $0x58]] }
 0x25a   : > { %v989_v40 = vsel %vm459_vm8, %v986_v61, %v988_v22  ;;  %v980_v61 = vmul.f32 %v7782_v56, %v969_v51  ;;  %v993_v54 = vmul.f32 %v7783_v44, %v990_v3  ;;  %v7785_v22 = vunpack.i.h.bf16 %v4932_v35 }
 0x25b   : > { %v994_v0 = vmul.f32 %v7784_v53, %v989_v40  ;;  %v999_v21 = vmul.f32 %v7786_v45, %v990_v3  ;;  %v1000_v25 = vmul.f32 %v7787_v1, %v989_v40  ;;  %v981_v35 = vadd.f32 %v979_v59, %v961_v57 }
 0x25c   : > { %v1006_v42 = vpop.permute.xlu1 %1005  ;;  %v982_v36 = vadd.f32 %v980_v61, %v962_v60  ;;  %v995_v40 = vadd.f32 %v993_v54, %v975_v10  ;;  %v7791_v3 = vmov %v7788_v30  ;;  %v7794_v41 = vstv %s5008_s9  ;;  %s5231_s9 = sld [smem:[#allocation4 + $0x6a]] }
 0x25d   : > { %v1008_v19 = vpop.permute.xlu0 %1007  ;;  %v1010_v34 = vsel %vm459_vm8, %v7785_v22, %v1006_v42  ;;  %v996_v43 = vadd.f32 %v994_v0, %v976_v20  ;;  %v7795_v5 = vstv %s5014_s5  ;;  %v7796_v44 = vmov %v7794_v41  ;;  %s5219_s5 = sld [smem:[#allocation4 + $0x59]] }
 0x25e   : > { %v1009_v38 = vsel %vm459_vm8, %v1006_v42, %v1008_v19  ;;  %v1013_v51 = vmul.f32 %v7788_v30, %v1010_v34  ;;  %v1019_v52 = vmul.f32 %v7789_v62, %v1010_v34  ;;  %v1001_v19 = vadd.f32 %v999_v21, %v981_v35 }
 0x25f   : > { %v1014_v50 = vmul.f32 %v7791_v3, %v1009_v38  ;;  %v1020_v31 = vmul.f32 %v7792_v2, %v1009_v38  ;;  %v1002_v47 = vadd.f32 %v1000_v25, %v982_v36  ;;  %v7797_v53 = vmov %v7795_v5 }
 0x260   : > { %v1028_v32 = vpop.permute.xlu1 %1027  ;;  %v1015_v56 = vadd.f32 %v1013_v51, %v995_v40  ;;  %v1021_v61 = vadd.f32 %v1019_v52, %v1001_v19  ;;  %v7798_v34 = vstv %s5028_s28  ;;  %v7799_v45 = vunpack.i.l.bf16 %v4946_v46  ;;  %s5413_s28 = sld [smem:[#allocation4 + $0x88]] }
 0x261   : > { %v1026_v4 = vpop.permute.xlu0 %1025  ;;  %v1016_v10 = vadd.f32 %v1014_v50, %v996_v43  ;;  %v1022_v20 = vadd.f32 %v1020_v31, %v1002_v47  ;;  %v7800_v25 = vmov %v7798_v34  ;;  %v3640_v47 = vunpack.i.h.bf16 %v4942_v28 }
 0x262   : > { %v1030_v11 = vsel %vm541_vm10, %v7790_v23, %v1026_v4  ;;  %v1029_v42 = vsel %vm541_vm10, %v1026_v4, %v1028_v32 }
 0x263   : > { %v1033_v58 = vmul.f32 %v7794_v41, %v1030_v11  ;;  %v1039_v59 = vmul.f32 %v7795_v5, %v1030_v11  ;;  %v1034_v54 = vmul.f32 %v7796_v44, %v1029_v42  ;;  %v1040_v48 = vmul.f32 %v7797_v53, %v1029_v42 }
 0x264   : > { %v1048_v6 = vpop.permute.xlu1 %1047  ;;  %v7801_v42 = vunpack.i.h.bf16 %v4946_v46 }
 0x265   : > { %v1046_v37 = vpop.permute.xlu0 %1045  ;;  %v1041_v35 = vadd.f32 %v1039_v59, %v1021_v61  ;;  %v1036_v52 = vadd.f32 %v1034_v54, %v1016_v10  ;;  %v1042_v23 = vadd.f32 %v1040_v48, %v1022_v20  ;;  %v1150_v59 = vstv %s5207_s30  ;;  %s5431_s30 = sld [smem:[#allocation4 + $0x78]] }
 0x266   : > { %v1050_v33 = vsel %vm541_vm10, %v7793_v9, %v1046_v37  ;;  %v1049_v32 = vsel %vm541_vm10, %v1046_v37, %v1048_v6  ;;  %v1035_v6 = vadd.f32 %v1033_v58, %v1015_v56  ;;  %v7802_v56 = vunpack.i.l.bf16 %v4942_v28 }
 0x267   : > { %v1053_v22 = vmul.f32 %v1052_v63, %v1050_v33  ;;  %v1059_v57 = vmul.f32 %v7798_v34, %v1050_v33  ;;  %v1054_v1 = vmul.f32 %v1052_v63, %v1049_v32  ;;  %v1060_v38 = vmul.f32 %v7800_v25, %v1049_v32 }
 0x268   : > { %v1066_v4 = vpop.permute.xlu1 %1065  ;;  %v1138_v28 = vstv %s5231_s9  ;;  %v1162_v10 = vstv %s5237_s24  ;;  %s5441_s9 = sld [smem:[#allocation4 + $0x82]] }
 0x269   : > { %v1068_v0 = vpop.permute.xlu0 %1067  ;;  %v1070_v21 = vsel %vm255_vm0, %v7799_v45, %v1066_v4  ;;  %v1055_v36 = vadd.f32 %v1053_v22, %v1035_v6  ;;  %v1061_v40 = vadd.f32 %v1059_v57, %v1041_v35  ;;  %v1056_v3 = vadd.f32 %v1054_v1, %v1036_v52  ;;  %s5446_s24 = sld [smem:[#allocation4 + $0x79]] }
 0x26a   : > { %v1069_v60 = vsel %vm255_vm0, %v1066_v4, %v1068_v0  ;;  %v1073_v30 = vmul.f32 %v1072_v8, %v1070_v21  ;;  %v1079_v51 = vmul.f32 %v1078_v24, %v1070_v21  ;;  %v1062_v50 = vadd.f32 %v1060_v38, %v1042_v23 }
 0x26b   : > { %v1074_v63 = vmul.f32 %v1072_v8, %v1069_v60  ;;  %v1080_v11 = vmul.f32 %v1078_v24, %v1069_v60  ;;  %v1132_v22 = vstv %s5225_s6  ;;  %v1156_v21 = vstv %s5219_s5  ;;  %s5435_s5 = sld [smem:[#allocation4 + $0x8a]] }
 0x26c   : > { %v1086_v62 = vpop.permute.xlu1 %1085  ;;  %v1075_v2 = vadd.f32 %v1073_v30, %v1055_v36  ;;  %v1081_v31 = vadd.f32 %v1079_v51, %v1061_v40  ;;  %v7803_v30 = vstv %s4934_s23  ;;  %s5389_s23 = sld [smem:[#allocation4 + $0x74]] }
 0x26d   : > { %v1088_v37 = vpop.permute.xlu0 %1087  ;;  %v1090_v19 = vsel %vm255_vm0, %v7801_v42, %v1086_v62  ;;  %v1076_v41 = vadd.f32 %v1074_v63, %v1056_v3  ;;  %v1082_v58 = vadd.f32 %v1080_v11, %v1062_v50  ;;  %v1146_v51 = vmul.f32 %v4836_v27, %v7803_v30  ;;  %s5439_s6 = sld [smem:[#allocation4 + $0x70]] }
 0x26e   : > { %v1089_v43 = vsel %vm255_vm0, %v1086_v62, %v1088_v37  ;;  %v1093_v8 = vmul.f32 %v1092_v39, %v1090_v19  ;;  %v1099_v24 = vmul.f32 %v1098_v13, %v1090_v19  ;;  %v1152_v62 = vmul.f32 %v4836_v27, %v1150_v59 }
 0x26f   : > { %v1094_v9 = vmul.f32 %v1092_v39, %v1089_v43  ;;  %v1100_v33 = vmul.f32 %v1098_v13, %v1089_v43  ;;  %v7804_v52 = vmov %v7803_v30  ;;  %v1151_v63 = vmul.f32 %v4834_v55, %v1150_v59 }
 0x270   : > { %v1108_v46 = vpop.permute.xlu1 %1107  ;;  %v1095_v32 = vadd.f32 %v1093_v8, %v1075_v2  ;;  %v1101_v4 = vadd.f32 %v1099_v24, %v1081_v31  ;;  %v1145_v23 = vmul.f32 %v4834_v55, %v7804_v52  ;;  %v1157_v43 = vmul.f32 %v4842_v17, %v1156_v21 }
 0x271   : > { %v1106_v5 = vpop.permute.xlu0 %1105  ;;  %v1096_v48 = vadd.f32 %v1094_v9, %v1076_v41  ;;  %v1102_v0 = vadd.f32 %v1100_v33, %v1082_v58  ;;  %v1158_v42 = vmul.f32 %v4844_v18, %v1156_v21  ;;  %v1163_v19 = vmul.f32 %v4842_v17, %v1162_v10 }
 0x272   : > { %v1110_v39 = vsel %vm339_vm4, %v7802_v56, %v1106_v5  ;;  %v1109_v13 = vsel %vm339_vm4, %v1106_v5, %v1108_v46  ;;  %v1164_v3 = vmul.f32 %v4844_v18, %v1162_v10  ;;  %v1184_v52 = vstv %s5399_s2  ;;  %s5538_s2 = sld [smem:[#allocation4 + $0x7b]] }
 0x273   : > { %v1113_v61 = vmul.f32 %v1112_v7, %v1110_v39  ;;  %v1119_v44 = vmul.f32 %v1118_v29, %v1110_v39  ;;  %v1114_v54 = vmul.f32 %v1112_v7, %v1109_v13  ;;  %v1120_v53 = vmul.f32 %v1118_v29, %v1109_v13 }
 0x274   : > { %v1128_v34 = vpop.permute.xlu1 %1127 }
 0x275   : > { %v1115_v57 = vadd.f32 %v1113_v61, %v1095_v32  ;;  %v1121_v60 = vadd.f32 %v1119_v44, %v1101_v4  ;;  %v1126_v45 = vpop.permute.xlu0 %1125  ;;  %v1116_v20 = vadd.f32 %v1114_v54, %v1096_v48  ;;  %v1122_v1 = vadd.f32 %v1120_v53, %v1102_v0 }
 0x276   : > { %v1130_v25 = vsel %vm339_vm4, %v3640_v47, %v1126_v45  ;;  %v1129_v7 = vsel %vm339_vm4, %v1126_v45, %v1128_v34 }
 0x277   : > { %v1133_v29 = vmul.f32 %v1132_v22, %v1130_v25  ;;  %v1139_v38 = vmul.f32 %v1138_v28, %v1130_v25  ;;  %v1134_v6 = vmul.f32 %v1132_v22, %v1129_v7  ;;  %v1140_v35 = vmul.f32 %v1138_v28, %v1129_v7 }
 0x278   : > { %v5377_v47 = vpop.permute.xlu1 %3647 }
 0x279   : > { %v1135_v11 = vadd.f32 %v1133_v29, %v1115_v57  ;;  %v1141_v37 = vadd.f32 %v1139_v38, %v1121_v60  ;;  %v1136_v36 = vadd.f32 %v1134_v6, %v1116_v20  ;;  %v1142_v40 = vadd.f32 %v1140_v35, %v1122_v1  ;;  %v5379_v41 = vpop.permute.xlu0 %3642 }
 0x27a   : > { %v3645_v48 = vunpack.i.h.bf16 %v5379_v41  ;;  %v3644_v0 = vunpack.i.l.bf16 %v5379_v41  ;;  %v3650_v22 = vunpack.i.h.bf16 %v5377_v47  ;;  %v3649_v34 = vunpack.i.l.bf16 %v5377_v47 }
 0x27b   : > { %v1147_v50 = vadd.f32 %v1145_v23, %v1135_v11  ;;  %v1148_v8 = vadd.f32 %v1146_v51, %v1136_v36  ;;  %v1153_v27 = vadd.f32 %v1151_v63, %v1141_v37  ;;  %v1154_v24 = vadd.f32 %v1152_v62, %v1142_v40 }
 0x27c   : > { %v5381_v58 = vpop.permute.xlu1 %3657  ;;  %v1195_v38 = vstv %s5391_s12  ;;  %v1201_v6 = vstv %s5393_s22  ;;  %v1182_v62 = vstv %s5395_s1  ;;  %v1215_v23 = vstv %s5403_s3  ;;  %s5483_s12 = sld [smem:[#allocation4 + $0x8c]] }
 0x27d   : > { %v1159_v2 = vadd.f32 %v1157_v43, %v1147_v50  ;;  %v1160_v31 = vadd.f32 %v1158_v42, %v1148_v8  ;;  %v1165_v9 = vadd.f32 %v1163_v19, %v1153_v27  ;;  %v1166_v55 = vadd.f32 %v1164_v3, %v1154_v24  ;;  %v5383_v5 = vpop.permute.xlu0 %3652  ;;  %s5496_s22 = sld [smem:[#allocation4 + $0x72]] }
 0x27e   : > { %v3655_v57 = vunpack.i.h.bf16 %v5383_v5  ;;  %v3654_v60 = vunpack.i.l.bf16 %v5383_v5  ;;  %v3660_v45 = vunpack.i.h.bf16 %v5381_v58  ;;  %v3659_v10 = vunpack.i.l.bf16 %v5381_v58  ;;  %s5502_s1 = sld [smem:[#allocation4 + $0x84]] }
 0x27f   : > { %3857 = vtanh.f32 %v1159_v2  ;;  %v1221_v63 = vstv %s5405_s4  ;;  %v1236_v37 = vstv %s5407_s15  ;;  %v1242_v36 = vstv %s5409_s16  ;;  %s5542_s3 = sld [smem:[#allocation4 + $0x8d]] }
 0x280   : > { %3859 = vtanh.f32 %v1160_v31  ;;  %v5385_v59 = vpop.permute.xlu1 %3667  ;;  %v1256_v40 = vstv %s5411_s17  ;;  %v1262_v43 = vstv %s5413_s28  ;;  %v1277_v50 = vstv %s5415_s14  ;;  %s5566_s4 = sld [smem:[#allocation4 + $0x73]]  ;;  %s7841_s17 = smov 12  }
 0x281   : > { %3861 = vtanh.f32 %v1165_v9  ;;  %v5387_v32 = vpop.permute.xlu0 %3662  ;;  %v1283_v8 = vstv %s5417_s20  ;;  %v1297_v27 = vstv %s5419_s27  ;;  %v1303_v24 = vstv %s5423_s29  ;;  %s5584_s15 = sld [smem:[#allocation4 + $0x85]]  ;;  %s7842_s28 = smov 4  }
 0x282   : > { %3863 = vtanh.f32 %v1166_v55  ;;  %v1318_v2 = vstv %s5427_s13  ;;  %v1324_v31 = vstv %s5429_s11  ;;  %s5686_s16 = sld [smem:[#allocation4 + $0x8e]] }
 0x283   : > { %s5860_s14 = sld [smem:[#allocation4 + $0x98]] }
 0x284   : > { %v5397_v4 = vpop.permute.xlu1 %3677  ;;  %s5862_s20 = sld [smem:[#allocation4 + $0x90]] }
 0x285   : > { %v5401_v56 = vpop.permute.xlu0 %3672  ;;  %s5864_s27 = sld [smem:[#allocation4 + $0xa2]] }
 0x286   : > { %s5866_s29 = sld [smem:[#allocation7 + $0x8]] }
 0x287   : > { %s5870_s13 = sld [smem:[#allocation7 + $0x9]] }
 0x288   : > { %s5874_s11 = sld [smem:[#allocation4 + $0x99]] }
 0x28c   : > { %v5289_v33 = vpop.eup %3857 }
 0x28d   : > { %v5291_v46 = vpop.eup %3859  ;;  %1187 = vrot.lane.b32.xlu1 %v5289_v33, %s7805_s25 }
 0x28e   : > { %1189 = vrot.lane.b32.xlu0 %v5291_v46, %s7805_s25  ;;  %v5297_v17 = vpop.eup %3861 }
 0x28f   : > { %v5299_v18 = vpop.eup %3863 }
 0x291   : > { %1208 = vrot.lane.b32.xlu1 %v5297_v17, %s7805_s25 }
 0x292   : > { %1210 = vrot.lane.b32.xlu0 %v5299_v18, %s7805_s25 }
 0x295   : > { %1230 = vrot.lane.b32.xlu1 %v5291_v46, %s7806_s26 }
 0x296   : > { %1228 = vrot.lane.b32.xlu0 %v5289_v33, %s7806_s26 }
 0x299   : > { %1251 = vrot.lane.b32.xlu1 %v5299_v18, %s7806_s26 }
 0x29a   : > { %1249 = vrot.lane.b32.xlu0 %v5297_v17, %s7806_s26 }
 0x29d   : > { %1269 = vrot.lane.b32.xlu1 %v5289_v33, %s7807_s8 }
 0x29e   : > { %1271 = vrot.lane.b32.xlu0 %v5291_v46, %s7807_s8 }
 0x2a1   : > { %1290 = vrot.lane.b32.xlu1 %v5297_v17, %s7807_s8 }
 0x2a2   : > { %1292 = vrot.lane.b32.xlu0 %v5299_v18, %s7807_s8 }
 0x2a5   : > { %1312 = vrot.lane.b32.xlu1 %v5291_v46, %s7808_s10 }
 0x2a6   : > { %1310 = vrot.lane.b32.xlu0 %v5289_v33, %s7808_s10 }
 0x2a9   : > { %1333 = vrot.lane.b32.xlu1 %v5299_v18, %s7808_s10 }
 0x2aa   : > { %1331 = vrot.lane.b32.xlu0 %v5297_v17, %s7808_s10 }
 0x2ad   : > { %1351 = vrot.lane.b32.xlu1 %v5289_v33, %s7773_s18 }
 0x2ae   : > { %1353 = vrot.lane.b32.xlu0 %v5291_v46, %s7773_s18 }
 0x2b1   : > { %1371 = vrot.lane.b32.xlu1 %v5297_v17, %s7773_s18 }
 0x2b2   : > { %1373 = vrot.lane.b32.xlu0 %v5299_v18, %s7773_s18 }
 0x2b5   : > { %1393 = vrot.lane.b32.xlu1 %v5291_v46, %s7775_s21 }
 0x2b6   : > { %1391 = vrot.lane.b32.xlu0 %v5289_v33, %s7775_s21 }
 0x2b9   : > { %1413 = vrot.lane.b32.xlu1 %v5299_v18, %s7775_s21 }
 0x2ba   : > { %1411 = vrot.lane.b32.xlu0 %v5297_v17, %s7775_s21 }
 0x2bd   : > { %1431 = vrot.lane.b32.xlu1 %v5289_v33, %s7739_s0 }
 0x2be   : > { %1433 = vrot.lane.b32.xlu0 %v5291_v46, %s7739_s0 }
 0x2c1   : > { %1451 = vrot.lane.b32.xlu1 %v5297_v17, %s7739_s0 }
 0x2c2   : > { %1453 = vrot.lane.b32.xlu0 %v5299_v18, %s7739_s0 }
 0x2c5   : > { %1473 = vrot.lane.b32.xlu1 %v5291_v46, %s7743_s7 }
 0x2c6   : > { %1471 = vrot.lane.b32.xlu0 %v5289_v33, %s7743_s7 }
 0x2c9   : > { %1493 = vrot.lane.b32.xlu1 %v5299_v18, %s7743_s7 }
 0x2ca   : > { %1491 = vrot.lane.b32.xlu0 %v5297_v17, %s7743_s7 }
 0x2cd   : > { %3687 = vrot.lane.b32.xlu1 %v7777_v26, %s7806_s26 }
 0x2ce   : > { %3682 = vrot.lane.b32.xlu0 %v7777_v26, %s7805_s25 }
 0x2d1   : > { %3697 = vrot.lane.b32.xlu1 %v7777_v26, %s7808_s10 }
 0x2d2   : > { %3692 = vrot.lane.b32.xlu0 %v7777_v26, %s7807_s8 }
 0x2d5   : > { %3707 = vrot.lane.b32.xlu1 %v7777_v26, %s7775_s21  ;;  %s5475_s21 = sld [smem:[#allocation4 + $0x7a]] }
 0x2d6   : > { %3702 = vrot.lane.b32.xlu0 %v7777_v26, %s7773_s18 }
 0x2d9   : > { %3717 = vrot.lane.b32.xlu1 %v7777_v26, %s7743_s7  ;;  %s5463_s7 = sld [smem:[#allocation4 + $0x71]] }
 0x2da   : > { %3712 = vrot.lane.b32.xlu0 %v7777_v26, %s7739_s0  ;;  %s5469_s0 = sld [smem:[#allocation4 + $0x83]] }
 0x2db   : > { %v1418_v7 = vstv %s5475_s21  ;;  %s5692_s21 = sld [smem:[#allocation4 + $0x8f]] }
 0x2ff   : > { %v1188_v39 = vpop.permute.xlu1 %1187 }
 0x300   : > { %v1190_v13 = vpop.permute.xlu0 %1189  ;;  %v1193_v3 = vsel %vm1191_vm7, %v3644_v0, %v1188_v39 }
 0x301   : > { %v1192_v19 = vsel %vm1191_vm7, %v1188_v39, %v1190_v13  ;;  %v1196_v0 = vmul.f32 %v1195_v38, %v1193_v3  ;;  %v1202_v39 = vmul.f32 %v1201_v6, %v1193_v3 }
 0x302   : > { %v1197_v28 = vmul.f32 %v1195_v38, %v1192_v19  ;;  %v1203_v13 = vmul.f32 %v1201_v6, %v1192_v19 }
 0x303   : > { %v5421_v61 = vpop.permute.xlu1 %1208  ;;  %v1198_v3 = vadd.f32 %v1196_v0, %v1182_v62 }
 0x304   : > { %v5425_v44 = vpop.permute.xlu0 %1210  ;;  %v1213_v35 = vsel %vm1191_vm7, %v3645_v48, %v5421_v61  ;;  %v1199_v6 = vadd.f32 %v1197_v28, %v1182_v62  ;;  %v1205_v28 = vadd.f32 %v1203_v13, %v1184_v52 }
 0x305   : > { %v1212_v51 = vsel %vm1191_vm7, %v5421_v61, %v5425_v44  ;;  %v1216_v55 = vmul.f32 %v1215_v23, %v1213_v35  ;;  %v1222_v19 = vmul.f32 %v1221_v63, %v1213_v35  ;;  %v1438_v35 = vstv %s5496_s22  ;;  %s5888_s22 = sld [smem:[#allocation4 + $0xa4]] }
 0x306   : > { %v1217_v61 = vmul.f32 %v1215_v23, %v1212_v51  ;;  %v1223_v1 = vmul.f32 %v1221_v63, %v1212_v51  ;;  %v1204_v23 = vadd.f32 %v1202_v39, %v1184_v52  ;;  %v1444_v51 = vstv %s5502_s1  ;;  %s5890_s1 = sld [smem:[#allocation4 + $0x9b]] }
 0x307   : > { %v5433_v54 = vpop.permute.xlu1 %1230  ;;  %v1218_v62 = vadd.f32 %v1216_v55, %v1198_v3 }
 0x308   : > { %v5437_v53 = vpop.permute.xlu0 %1228  ;;  %v1219_v47 = vadd.f32 %v1217_v61, %v1199_v6  ;;  %v1224_v55 = vadd.f32 %v1222_v19, %v1204_v23  ;;  %v1225_v39 = vadd.f32 %v1223_v1, %v1205_v28 }
 0x309   : > { %v1234_v38 = vsel %vm1232_vm5, %v3649_v34, %v5437_v53  ;;  %v1233_v44 = vsel %vm1232_vm5, %v5437_v53, %v5433_v54 }
 0x30a   : > { %v1237_v34 = vmul.f32 %v1236_v37, %v1234_v38  ;;  %v1238_v29 = vmul.f32 %v1236_v37, %v1233_v44  ;;  %v1243_v63 = vmul.f32 %v1242_v36, %v1234_v38  ;;  %v1244_v37 = vmul.f32 %v1242_v36, %v1233_v44 }
 0x30b   : > { %v5453_v21 = vpop.permute.xlu1 %1251 }
 0x30c   : > { %v5461_v25 = vpop.permute.xlu0 %1249  ;;  %v1239_v36 = vadd.f32 %v1237_v34, %v1218_v62  ;;  %v1240_v13 = vadd.f32 %v1238_v29, %v1219_v47  ;;  %v1246_v44 = vadd.f32 %v1244_v37, %v1225_v39 }
 0x30d   : > { %v1254_v54 = vsel %vm1232_vm5, %v3650_v22, %v5461_v25  ;;  %v1253_v53 = vsel %vm1232_vm5, %v5461_v25, %v5453_v21 }
 0x30e   : > { %v1257_v0 = vmul.f32 %v1256_v40, %v1254_v54  ;;  %v1258_v41 = vmul.f32 %v1256_v40, %v1253_v53  ;;  %v1263_v40 = vmul.f32 %v1262_v43, %v1254_v54  ;;  %v1264_v38 = vmul.f32 %v1262_v43, %v1253_v53 }
 0x30f   : > { %v5481_v11 = vpop.permute.xlu1 %1269  ;;  %v1458_v54 = vstv %s5538_s2  ;;  %v1464_v53 = vstv %s5542_s3  ;;  %s5894_s2 = sld [smem:[#allocation4 + $0xad]] }
 0x310   : > { %v1272_v42 = vpop.permute.xlu0 %1271  ;;  %v1275_v25 = vsel %vm1273_vm3, %v3654_v60, %v5481_v11  ;;  %v1259_v43 = vadd.f32 %v1257_v0, %v1239_v36  ;;  %v1260_v3 = vadd.f32 %v1258_v41, %v1240_v13  ;;  %v1266_v34 = vadd.f32 %v1264_v38, %v1246_v44  ;;  %s5898_s3 = sld [smem:[#allocation4 + $0x93]] }
 0x311   : > { %v1274_v21 = vsel %vm1273_vm3, %v5481_v11, %v1272_v42  ;;  %v1245_v11 = vadd.f32 %v1243_v63, %v1224_v55  ;;  %v1278_v1 = vmul.f32 %v1277_v50, %v1275_v25  ;;  %v1284_v5 = vmul.f32 %v1283_v8, %v1275_v25 }
 0x312   : > { %v1279_v29 = vmul.f32 %v1277_v50, %v1274_v21  ;;  %v7810_v55 = vstv %s5431_s30  ;;  %v1478_v38 = vstv %s5566_s4  ;;  %s5876_s30 = sld [smem:[#allocation4 + $0xab]] }
 0x313   : > { %v1291_v9 = vpop.permute.xlu1 %1290  ;;  %v1265_v19 = vadd.f32 %v1263_v40, %v1245_v11  ;;  %v7811_v36 = vmov %v7810_v55  ;;  %v7812_v11 = vstv %s5435_s5  ;;  %s5878_s5 = sld [smem:[#allocation4 + $0x91]] }
 0x314   : > { %v1293_v30 = vpop.permute.xlu0 %1292  ;;  %v1295_v60 = vsel %vm1273_vm3, %v3655_v57, %v1291_v9  ;;  %v1281_v23 = vadd.f32 %v1279_v29, %v1260_v3  ;;  %v7813_v29 = vmov %v7812_v11  ;;  %s5900_s4 = sld [smem:[#allocation4 + $0xa5]] }
 0x315   : > { %v1294_v42 = vsel %vm1273_vm3, %v1291_v9, %v1293_v30  ;;  %v1285_v30 = vmul.f32 %v1283_v8, %v1274_v21  ;;  %v1298_v9 = vmul.f32 %v1297_v27, %v1295_v60  ;;  %v1280_v8 = vadd.f32 %v1278_v1, %v1259_v43 }
 0x316   : > { %v1299_v6 = vmul.f32 %v1297_v27, %v1294_v42  ;;  %v1304_v27 = vmul.f32 %v1303_v24, %v1295_v60  ;;  %v1305_v28 = vmul.f32 %v1303_v24, %v1294_v42  ;;  %v1286_v37 = vadd.f32 %v1284_v5, %v1265_v19 }
 0x317   : > { %v1313_v48 = vpop.permute.xlu1 %1312  ;;  %v1287_v24 = vadd.f32 %v1285_v30, %v1266_v34  ;;  %v1300_v0 = vadd.f32 %v1298_v9, %v1280_v8  ;;  %v7814_v43 = vstv %s5439_s6  ;;  %v1484_v34 = vstv %s5584_s15  ;;  %s5880_s6 = sld [smem:[#allocation4 + $0xa3]] }
 0x318   : > { %v1311_v20 = vpop.permute.xlu0 %1310  ;;  %v1301_v21 = vadd.f32 %v1299_v6, %v1281_v23  ;;  %v7815_v5 = vmov %v7814_v43  ;;  %s5902_s15 = sld [smem:[#allocation4 + $0x9c]] }
 0x319   : > { %v1316_v50 = vsel %vm1314_vm1, %v3659_v10, %v1311_v20  ;;  %v1315_v41 = vsel %vm1314_vm1, %v1311_v20, %v1313_v48  ;;  %v1307_v42 = vadd.f32 %v1305_v28, %v1287_v24 }
 0x31a   : > { %v1319_v10 = vmul.f32 %v1318_v2, %v1316_v50  ;;  %v1320_v20 = vmul.f32 %v1318_v2, %v1315_v41  ;;  %v1325_v25 = vmul.f32 %v1324_v31, %v1316_v50  ;;  %v1326_v58 = vmul.f32 %v1324_v31, %v1315_v41 }
 0x31b   : > { %v1334_v22 = vpop.permute.xlu1 %1333  ;;  %v7817_v41 = vstv %s5441_s9  ;;  %s5882_s9 = sld [smem:[#allocation4 + $0x9a]] }
 0x31c   : > { %v1332_v52 = vpop.permute.xlu0 %1331  ;;  %v1321_v31 = vadd.f32 %v1319_v10, %v1300_v0  ;;  %v1322_v60 = vadd.f32 %v1320_v20, %v1301_v21  ;;  %v1328_v50 = vadd.f32 %v1326_v58, %v1307_v42  ;;  %v7821_v0 = vunpack.i.l.bf16 %v5385_v59 }
 0x31d   : > { %v1336_v48 = vsel %vm1314_vm1, %v3660_v45, %v1332_v52  ;;  %v1335_v47 = vsel %vm1314_vm1, %v1332_v52, %v1334_v22  ;;  %v7809_v45 = vunpack.i.l.bf16 %v5387_v32  ;;  %v1306_v52 = vadd.f32 %v1304_v27, %v1286_v37 }
 0x31e   : > { %v1339_v39 = vmul.f32 %v7810_v55, %v1336_v48  ;;  %v1340_v13 = vmul.f32 %v7811_v36, %v1335_v47  ;;  %v1345_v44 = vmul.f32 %v7812_v11, %v1336_v48  ;;  %v7818_v27 = vmov %v7817_v41 }
 0x31f   : > { %v1352_v61 = vpop.permute.xlu1 %1351  ;;  %v1327_v6 = vadd.f32 %v1325_v25, %v1306_v52  ;;  %v7819_v48 = vstv %s5446_s24  ;;  %v7820_v37 = vstv %s5455_s19  ;;  %v7824_v36 = vunpack.i.h.bf16 %v5385_v59  ;;  %s5662_s19 = sld [smem:[#allocation4 + $0x86]] }
 0x320   : > { %v1354_v57 = vpop.permute.xlu0 %1353  ;;  %v1356_v22 = vsel %vm825_vm12, %v7809_v45, %v1352_v61  ;;  %v1341_v8 = vadd.f32 %v1339_v39, %v1321_v31  ;;  %v1342_v23 = vadd.f32 %v1340_v13, %v1322_v60  ;;  %v7823_v55 = vmov %v7820_v37  ;;  %s5884_s24 = sld [smem:[#allocation4 + $0xac]] }
 0x321   : > { %v1355_v2 = vsel %vm825_vm12, %v1352_v61, %v1354_v57  ;;  %v1346_v61 = vmul.f32 %v7813_v29, %v1335_v47  ;;  %v1359_v3 = vmul.f32 %v7814_v43, %v1356_v22  ;;  %v7816_v57 = vunpack.i.h.bf16 %v5387_v32 }
 0x322   : > { %v1360_v30 = vmul.f32 %v7815_v5, %v1355_v2  ;;  %v1365_v19 = vmul.f32 %v7817_v41, %v1356_v22  ;;  %v1366_v28 = vmul.f32 %v7818_v27, %v1355_v2  ;;  %v1347_v32 = vadd.f32 %v1345_v44, %v1327_v6 }
 0x323   : > { %v1372_v62 = vpop.permute.xlu1 %1371  ;;  %v1348_v58 = vadd.f32 %v1346_v61, %v1328_v50  ;;  %v1361_v2 = vadd.f32 %v1359_v3, %v1341_v8  ;;  %v7822_v22 = vmov %v7819_v48  ;;  %v7825_v31 = vstv %s5463_s7  ;;  %s5680_s7 = sld [smem:[#allocation4 + $0x7c]] }
 0x324   : > { %v1374_v63 = vpop.permute.xlu0 %1373  ;;  %v1376_v9 = vsel %vm825_vm12, %v7816_v57, %v1372_v62  ;;  %v1362_v45 = vadd.f32 %v1360_v30, %v1342_v23  ;;  %v7826_v11 = vstv %s5469_s0  ;;  %v7827_v43 = vmov %v7825_v31  ;;  %s5674_s0 = sld [smem:[#allocation4 + $0x7d]] }
 0x325   : > { %v1375_v10 = vsel %vm825_vm12, %v1372_v62, %v1374_v63  ;;  %v1379_v47 = vmul.f32 %v7819_v48, %v1376_v9  ;;  %v1385_v24 = vmul.f32 %v7820_v37, %v1376_v9  ;;  %v1367_v63 = vadd.f32 %v1365_v19, %v1347_v32 }
 0x326   : > { %v1380_v52 = vmul.f32 %v7822_v22, %v1375_v10  ;;  %v1386_v39 = vmul.f32 %v7823_v55, %v1375_v10  ;;  %v1368_v42 = vadd.f32 %v1366_v28, %v1348_v58  ;;  %v7828_v5 = vmov %v7826_v11 }
 0x327   : > { %v1394_v40 = vpop.permute.xlu1 %1393  ;;  %v1381_v29 = vadd.f32 %v1379_v47, %v1361_v2  ;;  %v1387_v61 = vadd.f32 %v1385_v24, %v1367_v63  ;;  %v7829_v9 = vstv %s5483_s12  ;;  %v7830_v41 = vunpack.i.l.bf16 %v5401_v56  ;;  %s5886_s12 = sld [smem:[#allocation4 + $0x92]] }
 0x328   : > { %v1392_v1 = vpop.permute.xlu0 %1391  ;;  %v1382_v8 = vadd.f32 %v1380_v52, %v1362_v45  ;;  %v1388_v23 = vadd.f32 %v1386_v39, %v1368_v42  ;;  %v7831_v28 = vmov %v7829_v9  ;;  %v3680_v42 = vunpack.i.h.bf16 %v5397_v4 }
 0x329   : > { %v1396_v21 = vsel %vm907_vm14, %v7821_v0, %v1392_v1  ;;  %v1395_v62 = vsel %vm907_vm14, %v1392_v1, %v1394_v40 }
 0x32a   : > { %v1399_v60 = vmul.f32 %v7825_v31, %v1396_v21  ;;  %v1405_v44 = vmul.f32 %v7826_v11, %v1396_v21  ;;  %v1400_v3 = vmul.f32 %v7827_v43, %v1395_v62  ;;  %v1406_v59 = vmul.f32 %v7828_v5, %v1395_v62 }
 0x32b   : > { %v1414_v20 = vpop.permute.xlu1 %1413  ;;  %v7832_v62 = vunpack.i.h.bf16 %v5401_v56 }
 0x32c   : > { %v1412_v25 = vpop.permute.xlu0 %1411  ;;  %v1407_v32 = vadd.f32 %v1405_v44, %v1387_v61  ;;  %v1402_v24 = vadd.f32 %v1400_v3, %v1382_v8  ;;  %v1408_v0 = vadd.f32 %v1406_v59, %v1388_v23  ;;  %v1516_v44 = vstv %s5662_s19  ;;  %s5906_s19 = sld [smem:[#allocation4 + $0xae]] }
 0x32d   : > { %v1416_v13 = vsel %vm907_vm14, %v7824_v36, %v1412_v25  ;;  %v1415_v40 = vsel %vm907_vm14, %v1412_v25, %v1414_v20  ;;  %v1401_v20 = vadd.f32 %v1399_v60, %v1381_v29  ;;  %v7833_v29 = vunpack.i.l.bf16 %v5397_v4 }
 0x32e   : > { %v1419_v57 = vmul.f32 %v1418_v7, %v1416_v13  ;;  %v1425_v6 = vmul.f32 %v7829_v9, %v1416_v13  ;;  %v1420_v27 = vmul.f32 %v1418_v7, %v1415_v40  ;;  %v1426_v10 = vmul.f32 %v7831_v28, %v1415_v40 }
 0x32f   : > { %v1432_v1 = vpop.permute.xlu1 %1431  ;;  %v1504_v4 = vstv %s5686_s16  ;;  %v1528_v8 = vstv %s5692_s21  ;;  %s5915_s16 = sld [smem:[#allocation4 + $0x9d]] }
 0x330   : > { %v1434_v30 = vpop.permute.xlu0 %1433  ;;  %v1436_v19 = vsel %vm459_vm8, %v7830_v41, %v1432_v1  ;;  %v1421_v58 = vadd.f32 %v1419_v57, %v1401_v20  ;;  %v1427_v2 = vadd.f32 %v1425_v6, %v1407_v32  ;;  %v1422_v22 = vadd.f32 %v1420_v27, %v1402_v24  ;;  %s5924_s21 = sld [smem:[#allocation4 + $0xaf]] }
 0x331   : > { %v1435_v50 = vsel %vm459_vm8, %v1432_v1, %v1434_v30  ;;  %v1439_v48 = vmul.f32 %v1438_v35, %v1436_v19  ;;  %v1445_v47 = vmul.f32 %v1444_v51, %v1436_v19  ;;  %v1428_v52 = vadd.f32 %v1426_v10, %v1408_v0 }
 0x332   : > { %v1440_v7 = vmul.f32 %v1438_v35, %v1435_v50  ;;  %v1446_v21 = vmul.f32 %v1444_v51, %v1435_v50  ;;  %v1498_v57 = vstv %s5680_s7  ;;  %v1522_v19 = vstv %s5674_s0  ;;  %s5910_s0 = sld [smem:[#allocation4 + $0x94]] }
 0x333   : > { %v1452_v37 = vpop.permute.xlu1 %1451  ;;  %v1441_v55 = vadd.f32 %v1439_v48, %v1421_v58  ;;  %v1447_v39 = vadd.f32 %v1445_v47, %v1427_v2  ;;  %v7834_v48 = vstv %s5389_s23  ;;  %s7840_s23 = smov 20   ;;  %s5912_s7 = sld [smem:[#allocation4 + $0xa6]] }
 0x334   : > { %v1454_v25 = vpop.permute.xlu0 %1453  ;;  %v1456_v63 = vsel %vm459_vm8, %v7832_v62, %v1452_v37  ;;  %v1442_v31 = vadd.f32 %v1440_v7, %v1422_v22  ;;  %v1448_v60 = vadd.f32 %v1446_v21, %v1428_v52  ;;  %v1512_v47 = vmul.f32 %v5291_v46, %v7834_v48 }
 0x335   : > { %v1455_v45 = vsel %vm459_vm8, %v1452_v37, %v1454_v25  ;;  %v1459_v35 = vmul.f32 %v1458_v54, %v1456_v63  ;;  %v1465_v51 = vmul.f32 %v1464_v53, %v1456_v63  ;;  %v1518_v37 = vmul.f32 %v5291_v46, %v1516_v44 }
 0x336   : > { %v1460_v36 = vmul.f32 %v1458_v54, %v1455_v45  ;;  %v1466_v13 = vmul.f32 %v1464_v53, %v1455_v45  ;;  %v7835_v24 = vmov %v7834_v48  ;;  %v1517_v7 = vmul.f32 %v5289_v33, %v1516_v44 }
 0x337   : > { %v1474_v56 = vpop.permute.xlu1 %1473  ;;  %v1461_v40 = vadd.f32 %v1459_v35, %v1441_v55  ;;  %v1467_v1 = vadd.f32 %v1465_v51, %v1447_v39  ;;  %v1511_v0 = vmul.f32 %v5289_v33, %v7835_v24  ;;  %v1523_v45 = vmul.f32 %v5297_v17, %v1522_v19 }
 0x338   : > { %v1472_v11 = vpop.permute.xlu0 %1471  ;;  %v1462_v59 = vadd.f32 %v1460_v36, %v1442_v31  ;;  %v1468_v30 = vadd.f32 %v1466_v13, %v1448_v60  ;;  %v1524_v62 = vmul.f32 %v5299_v18, %v1522_v19  ;;  %v1529_v63 = vmul.f32 %v5297_v17, %v1528_v8 }
 0x339   : > { %v1476_v54 = vsel %vm255_vm0, %v7833_v29, %v1472_v11  ;;  %v1475_v53 = vsel %vm255_vm0, %v1472_v11, %v1474_v56  ;;  %v1530_v22 = vmul.f32 %v5299_v18, %v1528_v8  ;;  %v1574_v48 = vstv %s5862_s20  ;;  %s5964_s20 = sld [smem:[#allocation4 + $0x96]] }
 0x33a   : > { %v1479_v61 = vmul.f32 %v1478_v38, %v1476_v54  ;;  %v1485_v43 = vmul.f32 %v1484_v34, %v1476_v54  ;;  %v1480_v3 = vmul.f32 %v1478_v38, %v1475_v53  ;;  %v1486_v5 = vmul.f32 %v1484_v34, %v1475_v53 }
 0x33b   : > { %v1494_v9 = vpop.permute.xlu1 %1493  ;;  %v1564_v24 = vstv %s5870_s13  ;;  %s6009_s13 = sld [smem:[#allocation4 + $0xb1]] }
 0x33c   : > { %v1481_v6 = vadd.f32 %v1479_v61, %v1461_v40  ;;  %v1487_v50 = vadd.f32 %v1485_v43, %v1467_v1  ;;  %v1492_v41 = vpop.permute.xlu0 %1491  ;;  %v1482_v23 = vadd.f32 %v1480_v3, %v1462_v59  ;;  %v1488_v27 = vadd.f32 %v1486_v5, %v1468_v30 }
 0x33d   : > { %v1496_v28 = vsel %vm255_vm0, %v3680_v42, %v1492_v41  ;;  %v1495_v38 = vsel %vm255_vm0, %v1492_v41, %v1494_v9 }
 0x33e   : > { %v1499_v34 = vmul.f32 %v1498_v57, %v1496_v28  ;;  %v1505_v10 = vmul.f32 %v1504_v4, %v1496_v28  ;;  %v1500_v20 = vmul.f32 %v1498_v57, %v1495_v38  ;;  %v1506_v32 = vmul.f32 %v1504_v4, %v1495_v38 }
 0x340   : > { %v1501_v21 = vadd.f32 %v1499_v34, %v1481_v6  ;;  %v1507_v25 = vadd.f32 %v1505_v10, %v1487_v50  ;;  %v1502_v58 = vadd.f32 %v1500_v20, %v1482_v23  ;;  %v1508_v2 = vadd.f32 %v1506_v32, %v1488_v27  ;;  %v5850_v31 = vpop.permute.xlu0 %3682 }
 0x341   : > { %v3685_v59 = vunpack.i.h.bf16 %v5850_v31  ;;  %v3684_v57 = vunpack.i.l.bf16 %v5850_v31 }
 0x342   : > { %v1513_v52 = vadd.f32 %v1511_v0, %v1501_v21  ;;  %v1514_v35 = vadd.f32 %v1512_v47, %v1502_v58  ;;  %v1519_v46 = vadd.f32 %v1517_v7, %v1507_v25  ;;  %v1520_v51 = vadd.f32 %v1518_v37, %v1508_v2 }
 0x343   : > { %v1580_v47 = vstv %s5864_s27  ;;  %v1562_v37 = vstv %s5866_s29  ;;  %v1594_v0 = vstv %s5874_s11  ;;  %v1600_v7 = vstv %s5876_s30  ;;  %s5970_s27 = sld [smem:[#allocation4 + $0xa8]] }
 0x344   : > { %v1525_v55 = vadd.f32 %v1523_v45, %v1513_v52  ;;  %v1526_v39 = vadd.f32 %v1524_v62, %v1514_v35  ;;  %v1531_v36 = vadd.f32 %v1529_v63, %v1519_v46  ;;  %v1532_v33 = vadd.f32 %v1530_v22, %v1520_v51  ;;  %v5854_v11 = vpop.permute.xlu0 %3692  ;;  %s6005_s29 = sld [smem:[#allocation4 + $0x9f]] }
 0x345   : > { %v3695_v6 = vunpack.i.h.bf16 %v5854_v11  ;;  %v3694_v41 = vunpack.i.l.bf16 %v5854_v11  ;;  %v1614_v25 = vstv %s5878_s5  ;;  %v1620_v58 = vstv %s5880_s6  ;;  %s6033_s11 = sld [smem:[#allocation4 + $0x97]] }
 0x346   : > { %v5745_v13 = vadd.f32 %v1525_v55, %v4365_v14  ;;  %v5748_v56 = vadd.f32 %v1526_v39, %v4367_v15  ;;  %v5752_v17 = vadd.f32 %v1531_v36, %v4369_v16  ;;  %v5756_v18 = vadd.f32 %v1532_v33, %v4372_v49  ;;  %v5848_v49 = vpop.permute.xlu1 %3687  ;;  %s6051_s30 = sld [smem:[#allocation4 + $0xa9]] }
 0x347   : > { %v3690_v4 = vunpack.i.h.bf16 %v5848_v49  ;;  %v3689_v9 = vunpack.i.l.bf16 %v5848_v49  ;;  %v1634_v2 = vstv %s5882_s9  ;;  %v1640_v45 = vstv %s5884_s24  ;;  %s6129_s5 = sld [smem:[#allocation4 + $0xaa]]  ;;  %s7876_s9 = smov 6  }
 0x348   : > { %3865 = vtanh.f32 %v5745_v13  ;;  %v5858_v40 = vpop.permute.xlu0 %3702  ;;  %v1654_v52 = vstv %s5886_s12  ;;  %v1660_v35 = vstv %s5888_s22  ;;  %v1674_v46 = vstv %s5890_s1  ;;  %s6153_s6 = sld [smem:[#allocation4 + $0xb2]]  ;;  %s7877_s24 = smov 2  }
 0x349   : > { %3867 = vtanh.f32 %v5748_v56  ;;  %v1680_v51 = vstv %s5894_s2  ;;  %v1694_v55 = vstv %s5898_s3  ;;  %s6311_s12 = sld [smem:[#allocation4 + $0xbc]] }
 0x34a   : > { %3869 = vtanh.f32 %v5752_v17  ;;  %v5852_v60 = vpop.permute.xlu1 %3697  ;;  %s6313_s22 = sld [smem:[#allocation4 + $0xb4]] }
 0x34b   : > { %3871 = vtanh.f32 %v5756_v18  ;;  %v3700_v19 = vunpack.i.h.bf16 %v5852_v60  ;;  %v3699_v8 = vunpack.i.l.bf16 %v5852_v60  ;;  %s6315_s1 = sld [smem:[#allocation4 + $0xc6]] }
 0x34c   : > { %v5872_v29 = vpop.permute.xlu0 %3712  ;;  %s6317_s2 = sld [smem:[#allocation7 + $0xa]] }
 0x34d   : > { %s6321_s3 = sld [smem:[#allocation7 + $0xb]] }
 0x34e   : > { %v5856_v44 = vpop.permute.xlu1 %3707 }
 0x352   : > { %v5868_v1 = vpop.permute.xlu1 %3717 }
 0x355   : > { %v5760_v42 = vpop.eup %3865 }
 0x356   : > { %v5762_v14 = vpop.eup %3867  ;;  %1567 = vrot.lane.b32.xlu1 %v5760_v42, %s7805_s25 }
 0x357   : > { %1569 = vrot.lane.b32.xlu0 %v5762_v14, %s7805_s25  ;;  %v5768_v15 = vpop.eup %3869 }
 0x358   : > { %v5770_v16 = vpop.eup %3871 }
 0x35a   : > { %1587 = vrot.lane.b32.xlu1 %v5768_v15, %s7805_s25 }
 0x35b   : > { %1589 = vrot.lane.b32.xlu0 %v5770_v16, %s7805_s25  ;;  %s7836_s25 = smov 24  }
 0x35e   : > { %1609 = vrot.lane.b32.xlu1 %v5762_v14, %s7806_s26 }
 0x35f   : > { %1607 = vrot.lane.b32.xlu0 %v5760_v42, %s7806_s26 }
 0x362   : > { %1629 = vrot.lane.b32.xlu1 %v5770_v16, %s7806_s26 }
 0x363   : > { %1627 = vrot.lane.b32.xlu0 %v5768_v15, %s7806_s26  ;;  %s7837_s26 = smov 16  }
 0x366   : > { %1647 = vrot.lane.b32.xlu1 %v5760_v42, %s7807_s8 }
 0x367   : > { %1649 = vrot.lane.b32.xlu0 %v5762_v14, %s7807_s8 }
 0x36a   : > { %1667 = vrot.lane.b32.xlu1 %v5768_v15, %s7807_s8 }
 0x36b   : > { %1669 = vrot.lane.b32.xlu0 %v5770_v16, %s7807_s8  ;;  %s7838_s8 = smov 8  }
 0x36e   : > { %1689 = vrot.lane.b32.xlu1 %v5762_v14, %s7808_s10 }
 0x36f   : > { %1687 = vrot.lane.b32.xlu0 %v5760_v42, %s7808_s10 }
 0x372   : > { %1709 = vrot.lane.b32.xlu1 %v5770_v16, %s7808_s10 }
 0x373   : > { %1707 = vrot.lane.b32.xlu0 %v5768_v15, %s7808_s10  ;;  %s7839_s10 = smov 28  }
 0x376   : > { %1727 = vrot.lane.b32.xlu1 %v5760_v42, %s7773_s18 }
 0x377   : > { %1729 = vrot.lane.b32.xlu0 %v5762_v14, %s7773_s18 }
 0x37a   : > { %1747 = vrot.lane.b32.xlu1 %v5768_v15, %s7773_s18 }
 0x37b   : > { %1749 = vrot.lane.b32.xlu0 %v5770_v16, %s7773_s18 }
 0x37e   : > { %1769 = vrot.lane.b32.xlu1 %v5762_v14, %s7836_s25 }
 0x37f   : > { %1767 = vrot.lane.b32.xlu0 %v5760_v42, %s7836_s25 }
 0x382   : > { %1789 = vrot.lane.b32.xlu1 %v5770_v16, %s7836_s25 }
 0x383   : > { %1787 = vrot.lane.b32.xlu0 %v5768_v15, %s7836_s25 }
 0x386   : > { %1807 = vrot.lane.b32.xlu1 %v5760_v42, %s7837_s26 }
 0x387   : > { %1809 = vrot.lane.b32.xlu0 %v5762_v14, %s7837_s26 }
 0x38a   : > { %1827 = vrot.lane.b32.xlu1 %v5768_v15, %s7837_s26 }
 0x38b   : > { %1829 = vrot.lane.b32.xlu0 %v5770_v16, %s7837_s26 }
 0x38e   : > { %1849 = vrot.lane.b32.xlu1 %v5762_v14, %s7838_s8 }
 0x38f   : > { %1847 = vrot.lane.b32.xlu0 %v5760_v42, %s7838_s8 }
 0x392   : > { %1869 = vrot.lane.b32.xlu1 %v5770_v16, %s7838_s8 }
 0x393   : > { %1867 = vrot.lane.b32.xlu0 %v5768_v15, %s7838_s8 }
 0x396   : > { %3727 = vrot.lane.b32.xlu1 %v7777_v26, %s7839_s10 }
 0x397   : > { %3722 = vrot.lane.b32.xlu0 %v7777_v26, %s7773_s18 }
 0x39a   : > { %3737 = vrot.lane.b32.xlu1 %v7777_v26, %s7840_s23 }
 0x39b   : > { %3732 = vrot.lane.b32.xlu0 %v7777_v26, %s7836_s25 }
 0x39e   : > { %3747 = vrot.lane.b32.xlu1 %v7777_v26, %s7841_s17  ;;  %s5944_s17 = sld [smem:[#allocation4 + $0x9e]] }
 0x39f   : > { %3742 = vrot.lane.b32.xlu0 %v7777_v26, %s7837_s26  ;;  %s5952_s26 = sld [smem:[#allocation4 + $0xb0]] }
 0x3a2   : > { %3757 = vrot.lane.b32.xlu1 %v7777_v26, %s7842_s28  ;;  %s5932_s28 = sld [smem:[#allocation4 + $0x95]] }
 0x3a3   : > { %3752 = vrot.lane.b32.xlu0 %v7777_v26, %s7838_s8  ;;  %s5938_s8 = sld [smem:[#allocation4 + $0xa7]] }
 0x3a5   : > { %v1800_v34 = vstv %s5952_s26  ;;  %s6159_s26 = sld [smem:[#allocation4 + $0xb3]] }
 0x3c8   : > { %v1568_v54 = vpop.permute.xlu1 %1567 }
 0x3c9   : > { %v1570_v53 = vpop.permute.xlu0 %1569  ;;  %v1572_v22 = vsel %vm1191_vm7, %v3684_v57, %v1568_v54 }
 0x3ca   : > { %v1571_v63 = vsel %vm1191_vm7, %v1568_v54, %v1570_v53  ;;  %v1575_v54 = vmul.f32 %v1574_v48, %v1572_v22  ;;  %v1581_v53 = vmul.f32 %v1580_v47, %v1572_v22 }
 0x3cb   : > { %v1576_v57 = vmul.f32 %v1574_v48, %v1571_v63  ;;  %v1582_v30 = vmul.f32 %v1580_v47, %v1571_v63 }
 0x3cc   : > { %v5892_v61 = vpop.permute.xlu1 %1587  ;;  %v1577_v28 = vadd.f32 %v1575_v54, %v1562_v37 }
 0x3cd   : > { %v5896_v43 = vpop.permute.xlu0 %1589  ;;  %v1592_v20 = vsel %vm1191_vm7, %v3685_v59, %v5892_v61  ;;  %v1794_v59 = vstv %s5944_s17  ;;  %v1578_v31 = vadd.f32 %v1576_v57, %v1562_v37  ;;  %v1584_v37 = vadd.f32 %v1582_v30, %v1564_v24  ;;  %s7874_s17 = smov 14  }
 0x3ce   : > { %v1591_v10 = vsel %vm1191_vm7, %v5892_v61, %v5896_v43  ;;  %v1595_v33 = vmul.f32 %v1594_v0, %v1592_v20  ;;  %v1601_v22 = vmul.f32 %v1600_v7, %v1592_v20  ;;  %v1814_v20 = vstv %s5964_s20  ;;  %s6339_s20 = sld [smem:[#allocation4 + $0xc8]] }
 0x3cf   : > { %v1596_v38 = vmul.f32 %v1594_v0, %v1591_v10  ;;  %v1602_v47 = vmul.f32 %v1600_v7, %v1591_v10  ;;  %v1820_v10 = vstv %s5970_s27  ;;  %s6341_s27 = sld [smem:[#allocation4 + $0xbf]]  ;;  %vm7954_vm7 = vcmp.lt.s32.totalorder %v4265_v12, 5 }
 0x3d0   : > { %v5904_v3 = vpop.permute.xlu1 %1609  ;;  %v1597_v0 = vadd.f32 %v1595_v33, %v1577_v28 }
 0x3d1   : > { %v5908_v5 = vpop.permute.xlu0 %1607  ;;  %v1598_v49 = vadd.f32 %v1596_v38, %v1578_v31  ;;  %v1604_v38 = vadd.f32 %v1602_v47, %v1584_v37 }
 0x3d2   : > { %v1612_v48 = vsel %vm1232_vm5, %v3689_v9, %v5908_v5  ;;  %v1611_v43 = vsel %vm1232_vm5, %v5908_v5, %v5904_v3  ;;  %v1583_v9 = vadd.f32 %v1581_v53, %v1564_v24 }
 0x3d3   : > { %v1615_v23 = vmul.f32 %v1614_v25, %v1612_v48  ;;  %v1616_v39 = vmul.f32 %v1614_v25, %v1611_v43  ;;  %v1621_v7 = vmul.f32 %v1620_v58, %v1612_v48  ;;  %v1622_v25 = vmul.f32 %v1620_v58, %v1611_v43 }
 0x3d4   : > { %v5922_v50 = vpop.permute.xlu1 %1629  ;;  %v1603_v28 = vadd.f32 %v1601_v22, %v1583_v9  ;;  %v1840_v9 = vstv %s6009_s13  ;;  %s6349_s13 = sld [smem:[#allocation4 + $0xb7]] }
 0x3d5   : > { %v5930_v27 = vpop.permute.xlu0 %1627  ;;  %v1617_v24 = vadd.f32 %v1615_v23, %v1597_v0  ;;  %v1618_v58 = vadd.f32 %v1616_v39, %v1598_v49  ;;  %v1624_v31 = vadd.f32 %v1622_v25, %v1604_v38 }
 0x3d6   : > { %v1632_v3 = vsel %vm1232_vm5, %v3690_v4, %v5930_v27  ;;  %v1631_v5 = vsel %vm1232_vm5, %v5930_v27, %v5922_v50 }
 0x3d7   : > { %v1635_v54 = vmul.f32 %v1634_v2, %v1632_v3  ;;  %v1636_v57 = vmul.f32 %v1634_v2, %v1631_v5  ;;  %v1641_v2 = vmul.f32 %v1640_v45, %v1632_v3  ;;  %v1642_v33 = vmul.f32 %v1640_v45, %v1631_v5 }
 0x3d8   : > { %v5950_v21 = vpop.permute.xlu1 %1647  ;;  %v1834_v5 = vstv %s6005_s29  ;;  %s6345_s29 = sld [smem:[#allocation4 + $0xd1]] }
 0x3d9   : > { %v1650_v62 = vpop.permute.xlu0 %1649  ;;  %v1652_v30 = vsel %vm1273_vm3, %v3694_v41, %v5950_v21  ;;  %v1637_v45 = vadd.f32 %v1635_v54, %v1617_v24  ;;  %v1638_v48 = vadd.f32 %v1636_v57, %v1618_v58  ;;  %v1644_v3 = vadd.f32 %v1642_v33, %v1624_v31 }
 0x3da   : > { %v1651_v50 = vsel %vm1273_vm3, %v5950_v21, %v1650_v62  ;;  %v1623_v21 = vadd.f32 %v1621_v7, %v1603_v28  ;;  %v1655_v23 = vmul.f32 %v1654_v52, %v1652_v30  ;;  %v1661_v11 = vmul.f32 %v1660_v35, %v1652_v30 }
 0x3db   : > { %v1656_v39 = vmul.f32 %v1654_v52, %v1651_v50  ;;  %v7843_v30 = vstv %s5900_s4  ;;  %v7846_v24 = vstv %s5902_s15  ;;  %s6325_s4 = sld [smem:[#allocation4 + $0xbd]] }
 0x3dc   : > { %v1668_v36 = vpop.permute.xlu1 %1667  ;;  %v1643_v47 = vadd.f32 %v1641_v2, %v1623_v21  ;;  %v7847_v2 = vmov %v7846_v24  ;;  %s6327_s15 = sld [smem:[#allocation4 + $0xcf]] }
 0x3dd   : > { %v1670_v32 = vpop.permute.xlu0 %1669  ;;  %v1672_v41 = vsel %vm1273_vm3, %v3695_v6, %v1668_v36  ;;  %v1658_v37 = vadd.f32 %v1656_v39, %v1638_v48  ;;  %v7848_v39 = vstv %s5906_s19  ;;  %s6329_s19 = sld [smem:[#allocation4 + $0xb5]] }
 0x3de   : > { %v1671_v62 = vsel %vm1273_vm3, %v1668_v36, %v1670_v32  ;;  %v1662_v32 = vmul.f32 %v1660_v35, %v1651_v50  ;;  %v1675_v36 = vmul.f32 %v1674_v46, %v1672_v41  ;;  %v1657_v35 = vadd.f32 %v1655_v23, %v1637_v45 }
 0x3df   : > { %v1676_v43 = vmul.f32 %v1674_v46, %v1671_v62  ;;  %v1681_v46 = vmul.f32 %v1680_v51, %v1672_v41  ;;  %v1682_v0 = vmul.f32 %v1680_v51, %v1671_v62  ;;  %v1663_v54 = vadd.f32 %v1661_v11, %v1643_v47 }
 0x3e0   : > { %v1690_v61 = vpop.permute.xlu1 %1689  ;;  %v1664_v51 = vadd.f32 %v1662_v32, %v1644_v3  ;;  %v1677_v57 = vadd.f32 %v1675_v36, %v1657_v35  ;;  %v1854_v41 = vstv %s6033_s11  ;;  %v7849_v11 = vmov %v7848_v39  ;;  %s6351_s11 = sld [smem:[#allocation4 + $0xc9]] }
 0x3e1   : > { %v1688_v63 = vpop.permute.xlu0 %1687  ;;  %v1678_v50 = vadd.f32 %v1676_v43, %v1658_v37  ;;  %v7850_v32 = vstv %s5910_s0  ;;  %v7853_v35 = vstv %s5912_s7  ;;  %s6331_s0 = sld [smem:[#allocation4 + $0xc7]] }
 0x3e2   : > { %v1692_v52 = vsel %vm1314_vm1, %v3699_v8, %v1688_v63  ;;  %v1691_v22 = vsel %vm1314_vm1, %v1688_v63, %v1690_v61  ;;  %v1684_v21 = vadd.f32 %v1682_v0, %v1664_v51  ;;  %v7851_v36 = vmov %v7850_v32  ;;  %s6333_s7 = sld [smem:[#allocation4 + $0xbe]] }
 0x3e3   : > { %v1695_v8 = vmul.f32 %v1694_v55, %v1692_v52  ;;  %v1696_v61 = vmul.f32 %v1694_v55, %v1691_v22  ;;  %v1701_v28 = vmul.f32 %v7843_v30, %v1692_v52  ;;  %v7844_v55 = vmov %v7843_v30 }
 0x3e4   : > { %v1710_v4 = vpop.permute.xlu1 %1709  ;;  %v1702_v60 = vmul.f32 %v7844_v55, %v1691_v22  ;;  %v7852_v52 = vunpack.i.h.bf16 %v5858_v40  ;;  %v7855_v51 = vstv %s5915_s16  ;;  %s6335_s16 = sld [smem:[#allocation4 + $0xd0]] }
 0x3e5   : > { %v1708_v27 = vpop.permute.xlu0 %1707  ;;  %v1697_v31 = vadd.f32 %v1695_v8, %v1677_v57  ;;  %v1698_v23 = vadd.f32 %v1696_v61, %v1678_v50  ;;  %v7854_v61 = vmov %v7853_v35  ;;  %v7856_v50 = vstv %s5924_s21  ;;  %s6337_s21 = sld [smem:[#allocation4 + $0xb6]] }
 0x3e6   : > { %v1712_v63 = vsel %vm1314_vm1, %v3700_v19, %v1708_v27  ;;  %v1711_v7 = vsel %vm1314_vm1, %v1708_v27, %v1710_v4  ;;  %v7845_v19 = vunpack.i.l.bf16 %v5858_v40  ;;  %v1683_v27 = vadd.f32 %v1681_v46, %v1663_v54 }
 0x3e7   : > { %v1715_v58 = vmul.f32 %v7846_v24, %v1712_v63  ;;  %v1716_v33 = vmul.f32 %v7847_v2, %v1711_v7  ;;  %v1721_v45 = vmul.f32 %v7848_v39, %v1712_v63  ;;  %v1704_v3 = vadd.f32 %v1702_v60, %v1684_v21 }
 0x3e8   : > { %v1728_v53 = vpop.permute.xlu1 %1727  ;;  %v1703_v47 = vadd.f32 %v1701_v28, %v1683_v27  ;;  %v1860_v46 = vstv %s6051_s30  ;;  %v7857_v28 = vunpack.i.l.bf16 %v5856_v44  ;;  %v7858_v27 = vmov %v7855_v51  ;;  %s6353_s30 = sld [smem:[#allocation4 + $0xc0]] }
 0x3e9   : > { %v1730_v6 = vpop.permute.xlu0 %1729  ;;  %v1732_v4 = vsel %vm825_vm12, %v7845_v19, %v1728_v53  ;;  %v1717_v0 = vadd.f32 %v1715_v58, %v1697_v31  ;;  %v1718_v8 = vadd.f32 %v1716_v33, %v1698_v23  ;;  %v7859_v58 = vmov %v7856_v50 }
 0x3ea   : > { %v1731_v38 = vsel %vm825_vm12, %v1728_v53, %v1730_v6  ;;  %v1722_v53 = vmul.f32 %v7849_v11, %v1711_v7  ;;  %v1735_v6 = vmul.f32 %v7850_v32, %v1732_v4  ;;  %v1741_v37 = vmul.f32 %v7853_v35, %v1732_v4 }
 0x3eb   : > { %v1736_v43 = vmul.f32 %v7851_v36, %v1731_v38  ;;  %v1742_v63 = vmul.f32 %v7854_v61, %v1731_v38  ;;  %v1723_v40 = vadd.f32 %v1721_v45, %v1703_v47  ;;  %v7860_v33 = vunpack.i.h.bf16 %v5856_v44 }
 0x3ec   : > { %v1748_v49 = vpop.permute.xlu1 %1747  ;;  %v1724_v19 = vadd.f32 %v1722_v53, %v1704_v3  ;;  %v1737_v38 = vadd.f32 %v1735_v6, %v1717_v0  ;;  %v7861_v23 = vstv %s5932_s28  ;;  %v7862_v45 = vstv %s5938_s8  ;;  %s6141_s8 = sld [smem:[#allocation4 + $0xa1]] }
 0x3ed   : > { %v1750_v25 = vpop.permute.xlu0 %1749  ;;  %v1752_v22 = vsel %vm825_vm12, %v7852_v52, %v1748_v49  ;;  %v1738_v4 = vadd.f32 %v1736_v43, %v1718_v8  ;;  %v7863_v6 = vmov %v7861_v23  ;;  %v7864_v43 = vmov %v7862_v45  ;;  %s6147_s28 = sld [smem:[#allocation4 + $0xa0]] }
 0x3ee   : > { %v1751_v7 = vsel %vm825_vm12, %v1748_v49, %v1750_v25  ;;  %v1755_v57 = vmul.f32 %v7855_v51, %v1752_v22  ;;  %v1761_v30 = vmul.f32 %v7856_v50, %v1752_v22  ;;  %v1743_v25 = vadd.f32 %v1741_v37, %v1723_v40 }
 0x3ef   : > { %v1756_v24 = vmul.f32 %v7858_v27, %v1751_v7  ;;  %v1762_v2 = vmul.f32 %v7859_v58, %v1751_v7  ;;  %v1744_v31 = vadd.f32 %v1742_v63, %v1724_v19  ;;  %v7865_v35 = vunpack.i.l.bf16 %v5872_v29 }
 0x3f0   : > { %v1770_v62 = vpop.permute.xlu1 %1769  ;;  %v1757_v53 = vadd.f32 %v1755_v57, %v1737_v38  ;;  %v1763_v32 = vadd.f32 %v1761_v30, %v1743_v25  ;;  %v7866_v38 = vunpack.i.h.bf16 %v5872_v29  ;;  %vm7950_vm1 = vcmp.lt.s32.totalorder %v4265_v12, 7 }
 0x3f1   : > { %v1768_v48 = vpop.permute.xlu0 %1767  ;;  %v1758_v0 = vadd.f32 %v1756_v24, %v1738_v4  ;;  %v1764_v8 = vadd.f32 %v1762_v2, %v1744_v31 }
 0x3f2   : > { %v1772_v55 = vsel %vm907_vm14, %v7857_v28, %v1768_v48  ;;  %v1771_v49 = vsel %vm907_vm14, %v1768_v48, %v1770_v62 }
 0x3f3   : > { %v1775_v39 = vmul.f32 %v7861_v23, %v1772_v55  ;;  %v1781_v11 = vmul.f32 %v7862_v45, %v1772_v55  ;;  %v1776_v36 = vmul.f32 %v7863_v6, %v1771_v49  ;;  %v1782_v44 = vmul.f32 %v7864_v43, %v1771_v49 }
 0x3f4   : > { %v1790_v54 = vpop.permute.xlu1 %1789 }
 0x3f5   : > { %v1788_v60 = vpop.permute.xlu0 %1787  ;;  %v1777_v7 = vadd.f32 %v1775_v39, %v1757_v53  ;;  %v1778_v50 = vadd.f32 %v1776_v36, %v1758_v0  ;;  %v1784_v30 = vadd.f32 %v1782_v44, %v1764_v8  ;;  %v1892_v39 = vstv %s6129_s5  ;;  %s6357_s5 = sld [smem:[#allocation4 + $0xd2]] }
 0x3f6   : > { %v1792_v21 = vsel %vm907_vm14, %v7860_v33, %v1788_v60  ;;  %v1791_v62 = vsel %vm907_vm14, %v1788_v60, %v1790_v54  ;;  %v1783_v54 = vadd.f32 %v1781_v11, %v1763_v32  ;;  %v3720_v33 = vunpack.i.h.bf16 %v5868_v1 }
 0x3f7   : > { %v1795_v22 = vmul.f32 %v1794_v59, %v1792_v21  ;;  %v1801_v47 = vmul.f32 %v1800_v34, %v1792_v21  ;;  %v1796_v61 = vmul.f32 %v1794_v59, %v1791_v62  ;;  %v1802_v63 = vmul.f32 %v1800_v34, %v1791_v62 }
 0x3f8   : > { %v1808_v48 = vpop.permute.xlu1 %1807  ;;  %v7867_v62 = vunpack.i.l.bf16 %v5868_v1  ;;  %v1874_v44 = vstv %s6147_s28  ;;  %v1880_v1 = vstv %s6153_s6  ;;  %s6363_s28 = sld [smem:[#allocation4 + $0xca]] }
 0x3f9   : > { %v1810_v52 = vpop.permute.xlu0 %1809  ;;  %v1812_v37 = vsel %vm459_vm8, %v7865_v35, %v1808_v48  ;;  %v1797_v55 = vadd.f32 %v1795_v22, %v1777_v7  ;;  %v1803_v60 = vadd.f32 %v1801_v47, %v1783_v54  ;;  %v1798_v49 = vadd.f32 %v1796_v61, %v1778_v50  ;;  %s6366_s6 = sld [smem:[#allocation4 + $0xc1]] }
 0x3fa   : > { %v1811_v3 = vsel %vm459_vm8, %v1808_v48, %v1810_v52  ;;  %v1815_v40 = vmul.f32 %v1814_v20, %v1812_v37  ;;  %v1821_v51 = vmul.f32 %v1820_v10, %v1812_v37  ;;  %v1804_v25 = vadd.f32 %v1802_v63, %v1784_v30 }
 0x3fb   : > { %v1816_v59 = vmul.f32 %v1814_v20, %v1811_v3  ;;  %v1822_v34 = vmul.f32 %v1820_v10, %v1811_v3  ;;  %v1898_v35 = vstv %s6141_s8  ;;  %v1904_v37 = vstv %s6159_s26  ;;  %s6361_s8 = sld [smem:[#allocation4 + $0xb8]] }
 0x3fc   : > { %v1828_v57 = vpop.permute.xlu1 %1827  ;;  %v1817_v27 = vadd.f32 %v1815_v40, %v1797_v55  ;;  %v1823_v24 = vadd.f32 %v1821_v51, %v1803_v60  ;;  %v7868_v40 = vstv %s5860_s14  ;;  %s7875_s14 = smov 10   ;;  %s6375_s26 = sld [smem:[#allocation4 + $0xd3]] }
 0x3fd   : > { %v1830_v28 = vpop.permute.xlu0 %1829  ;;  %v1832_v4 = vsel %vm459_vm8, %v7866_v38, %v1828_v57  ;;  %v1818_v21 = vadd.f32 %v1816_v59, %v1798_v49  ;;  %v1824_v31 = vadd.f32 %v1822_v34, %v1804_v25  ;;  %v1888_v51 = vmul.f32 %v5762_v14, %v7868_v40 }
 0x3fe   : > { %v1831_v19 = vsel %vm459_vm8, %v1828_v57, %v1830_v28  ;;  %v1835_v20 = vmul.f32 %v1834_v5, %v1832_v4  ;;  %v1841_v10 = vmul.f32 %v1840_v9, %v1832_v4  ;;  %v1894_v57 = vmul.f32 %v5762_v14, %v1892_v39 }
 0x3ff   : > { %v1836_v58 = vmul.f32 %v1834_v5, %v1831_v19  ;;  %v1842_v2 = vmul.f32 %v1840_v9, %v1831_v19  ;;  %v7869_v50 = vmov %v7868_v40  ;;  %v1893_v59 = vmul.f32 %v5760_v42, %v1892_v39 }
 0x400   : > { %v1850_v29 = vpop.permute.xlu1 %1849  ;;  %v1837_v45 = vadd.f32 %v1835_v20, %v1817_v27  ;;  %v1843_v11 = vadd.f32 %v1841_v10, %v1823_v24  ;;  %v1887_v30 = vmul.f32 %v5760_v42, %v7869_v50  ;;  %v1899_v19 = vmul.f32 %v5768_v15, %v1898_v35 }
 0x401   : > { %v1848_v23 = vpop.permute.xlu0 %1847  ;;  %v1838_v36 = vadd.f32 %v1836_v58, %v1818_v21  ;;  %v1844_v43 = vadd.f32 %v1842_v2, %v1824_v31  ;;  %v1900_v38 = vmul.f32 %v5770_v16, %v1898_v35  ;;  %v1905_v4 = vmul.f32 %v5768_v15, %v1904_v37 }
 0x402   : > { %v1852_v5 = vsel %vm255_vm0, %v7867_v62, %v1848_v23  ;;  %v1851_v9 = vsel %vm255_vm0, %v1848_v23, %v1850_v29  ;;  %v1906_v49 = vmul.f32 %v5770_v16, %v1904_v37  ;;  %v1924_v40 = vstv %s6317_s2  ;;  %s6421_s2 = sld [smem:[#allocation4 + $0xcc]] }
 0x403   : > { %v1855_v48 = vmul.f32 %v1854_v41, %v1852_v5  ;;  %v1861_v53 = vmul.f32 %v1860_v46, %v1852_v5  ;;  %v1856_v32 = vmul.f32 %v1854_v41, %v1851_v9  ;;  %v1862_v6 = vmul.f32 %v1860_v46, %v1851_v9 }
 0x404   : > { %v1870_v52 = vpop.permute.xlu1 %1869  ;;  %v1926_v50 = vstv %s6321_s3  ;;  %s6456_s3 = sld [smem:[#allocation4 + $0xc3]] }
 0x405   : > { %v1857_v22 = vadd.f32 %v1855_v48, %v1837_v45  ;;  %v1863_v47 = vadd.f32 %v1861_v53, %v1843_v11  ;;  %v1868_v3 = vpop.permute.xlu0 %1867  ;;  %v1858_v0 = vadd.f32 %v1856_v32, %v1838_v36  ;;  %v1864_v8 = vadd.f32 %v1862_v6, %v1844_v43 }
 0x406   : > { %v1872_v61 = vsel %vm255_vm0, %v3720_v33, %v1868_v3  ;;  %v1871_v41 = vsel %vm255_vm0, %v1868_v3, %v1870_v52 }
 0x407   : > { %v1875_v46 = vmul.f32 %v1874_v44, %v1872_v61  ;;  %v1881_v63 = vmul.f32 %v1880_v1, %v1872_v61  ;;  %v1876_v7 = vmul.f32 %v1874_v44, %v1871_v41  ;;  %v1882_v54 = vmul.f32 %v1880_v1, %v1871_v41 }
 0x408   : > { %v6299_v33 = vpop.permute.xlu1 %3727 }
 0x409   : > { %v1877_v34 = vadd.f32 %v1875_v46, %v1857_v22  ;;  %v1883_v28 = vadd.f32 %v1881_v63, %v1863_v47  ;;  %v1878_v55 = vadd.f32 %v1876_v7, %v1858_v0  ;;  %v1884_v60 = vadd.f32 %v1882_v54, %v1864_v8  ;;  %v6301_v21 = vpop.permute.xlu0 %3722 }
 0x40a   : > { %v3725_v36 = vunpack.i.h.bf16 %v6301_v21  ;;  %v3724_v44 = vunpack.i.l.bf16 %v6301_v21  ;;  %v3730_v1 = vunpack.i.h.bf16 %v6299_v33  ;;  %v3729_v52 = vunpack.i.l.bf16 %v6299_v33 }
 0x40b   : > { %v1889_v25 = vadd.f32 %v1887_v30, %v1877_v34  ;;  %v1890_v20 = vadd.f32 %v1888_v51, %v1878_v55  ;;  %v1895_v14 = vadd.f32 %v1893_v59, %v1883_v28  ;;  %v1896_v10 = vadd.f32 %v1894_v57, %v1884_v60 }
 0x40c   : > { %v6303_v31 = vpop.permute.xlu1 %3737  ;;  %v1936_v63 = vstv %s6313_s22  ;;  %v1942_v51 = vstv %s6315_s1  ;;  %v1956_v30 = vstv %s6325_s4  ;;  %v1962_v59 = vstv %s6327_s15  ;;  %s6403_s22 = sld [smem:[#allocation4 + $0xd4]] }
 0x40d   : > { %v1901_v27 = vadd.f32 %v1899_v19, %v1889_v25  ;;  %v1902_v24 = vadd.f32 %v1900_v38, %v1890_v20  ;;  %v1907_v58 = vadd.f32 %v1905_v4, %v1895_v14  ;;  %v1908_v42 = vadd.f32 %v1906_v49, %v1896_v10  ;;  %v6305_v23 = vpop.permute.xlu0 %3732  ;;  %s6415_s1 = sld [smem:[#allocation4 + $0xba]] }
 0x40e   : > { %v3735_v22 = vunpack.i.h.bf16 %v6305_v23  ;;  %v3734_v3 = vunpack.i.l.bf16 %v6305_v23  ;;  %v3740_v35 = vunpack.i.h.bf16 %v6303_v31  ;;  %v3739_v37 = vunpack.i.l.bf16 %v6303_v31  ;;  %s6460_s4 = sld [smem:[#allocation4 + $0xd5]] }
 0x40f   : > { %3873 = vtanh.f32 %v1901_v27  ;;  %v1976_v28 = vstv %s6329_s19  ;;  %v1982_v55 = vstv %s6331_s0  ;;  %v1996_v60 = vstv %s6333_s7  ;;  %s6484_s15 = sld [smem:[#allocation4 + $0xbb]] }
 0x410   : > { %3875 = vtanh.f32 %v1902_v24  ;;  %v6307_v39 = vpop.permute.xlu1 %3747  ;;  %v2002_v19 = vstv %s6335_s16  ;;  %v2016_v25 = vstv %s6337_s21  ;;  %v2022_v20 = vstv %s6339_s20  ;;  %s6502_s19 = sld [smem:[#allocation4 + $0xcd]]  ;;  %s7910_s16 = smov 3  }
 0x411   : > { %3877 = vtanh.f32 %v1907_v58  ;;  %v6309_v45 = vpop.permute.xlu0 %3742  ;;  %v2036_v14 = vstv %s6341_s27  ;;  %v2042_v10 = vstv %s6345_s29  ;;  %v2056_v27 = vstv %s6349_s13  ;;  %s6580_s0 = sld [smem:[#allocation4 + $0xce]]  ;;  %s7911_s21 = smov 1  }
 0x412   : > { %3879 = vtanh.f32 %v1908_v42  ;;  %v2162_v46 = vstv %s6403_s22  ;;  %s6604_s7 = sld [smem:[#allocation4 + $0xd6]] }
 0x413   : > { %s6760_s20 = sld [smem:[#allocation4 + $0xe0]] }
 0x414   : > { %v6319_v11 = vpop.permute.xlu1 %3757  ;;  %s6764_s27 = sld [smem:[#allocation4 + $0xd8]] }
 0x415   : > { %v6323_v62 = vpop.permute.xlu0 %3752  ;;  %s6766_s29 = sld [smem:[#allocation4 + $0xea]] }
 0x416   : > { %s6768_s13 = sld [smem:[#allocation7 + $0xc]] }
 0x417   : > { %s6788_s22 = sld [smem:[#allocation4 + $0xda]] }
 0x41c   : > { %v6211_v2 = vpop.eup %3873 }
 0x41d   : > { %v6213_v29 = vpop.eup %3875  ;;  %1929 = vrot.lane.b32.xlu1 %v6211_v2, %s7773_s18 }
 0x41e   : > { %1931 = vrot.lane.b32.xlu0 %v6213_v29, %s7773_s18  ;;  %v6219_v15 = vpop.eup %3877 }
 0x41f   : > { %v6221_v16 = vpop.eup %3879 }
 0x421   : > { %1949 = vrot.lane.b32.xlu1 %v6219_v15, %s7773_s18 }
 0x422   : > { %1951 = vrot.lane.b32.xlu0 %v6221_v16, %s7773_s18  ;;  %s7870_s18 = smov 16  }
 0x425   : > { %1971 = vrot.lane.b32.xlu1 %v6213_v29, %s7839_s10 }
 0x426   : > { %1969 = vrot.lane.b32.xlu0 %v6211_v2, %s7839_s10 }
 0x429   : > { %1991 = vrot.lane.b32.xlu1 %v6221_v16, %s7839_s10 }
 0x42a   : > { %1989 = vrot.lane.b32.xlu0 %v6219_v15, %s7839_s10  ;;  %s7872_s10 = smov 8  }
 0x42d   : > { %2009 = vrot.lane.b32.xlu1 %v6211_v2, %s7836_s25 }
 0x42e   : > { %2011 = vrot.lane.b32.xlu0 %v6213_v29, %s7836_s25 }
 0x431   : > { %2029 = vrot.lane.b32.xlu1 %v6219_v15, %s7836_s25 }
 0x432   : > { %2031 = vrot.lane.b32.xlu0 %v6221_v16, %s7836_s25  ;;  %s7871_s25 = smov 12  }
 0x435   : > { %2051 = vrot.lane.b32.xlu1 %v6213_v29, %s7840_s23 }
 0x436   : > { %2049 = vrot.lane.b32.xlu0 %v6211_v2, %s7840_s23 }
 0x439   : > { %2071 = vrot.lane.b32.xlu1 %v6221_v16, %s7840_s23 }
 0x43a   : > { %2069 = vrot.lane.b32.xlu0 %v6219_v15, %s7840_s23  ;;  %s7873_s23 = smov 4  }
 0x43d   : > { %2089 = vrot.lane.b32.xlu1 %v6211_v2, %s7870_s18 }
 0x43e   : > { %2091 = vrot.lane.b32.xlu0 %v6213_v29, %s7870_s18 }
 0x441   : > { %2109 = vrot.lane.b32.xlu1 %v6219_v15, %s7870_s18 }
 0x442   : > { %2111 = vrot.lane.b32.xlu0 %v6221_v16, %s7870_s18 }
 0x445   : > { %2131 = vrot.lane.b32.xlu1 %v6213_v29, %s7871_s25 }
 0x446   : > { %2129 = vrot.lane.b32.xlu0 %v6211_v2, %s7871_s25 }
 0x449   : > { %2151 = vrot.lane.b32.xlu1 %v6221_v16, %s7871_s25 }
 0x44a   : > { %2149 = vrot.lane.b32.xlu0 %v6219_v15, %s7871_s25 }
 0x44d   : > { %2169 = vrot.lane.b32.xlu1 %v6211_v2, %s7872_s10 }
 0x44e   : > { %2171 = vrot.lane.b32.xlu0 %v6213_v29, %s7872_s10 }
 0x451   : > { %2189 = vrot.lane.b32.xlu1 %v6219_v15, %s7872_s10 }
 0x452   : > { %2191 = vrot.lane.b32.xlu0 %v6221_v16, %s7872_s10 }
 0x455   : > { %2211 = vrot.lane.b32.xlu1 %v6213_v29, %s7873_s23 }
 0x456   : > { %2209 = vrot.lane.b32.xlu0 %v6211_v2, %s7873_s23 }
 0x459   : > { %2231 = vrot.lane.b32.xlu1 %v6221_v16, %s7873_s23 }
 0x45a   : > { %2229 = vrot.lane.b32.xlu0 %v6219_v15, %s7873_s23 }
 0x45d   : > { %3767 = vrot.lane.b32.xlu1 %v7777_v26, %s7874_s17 }
 0x45e   : > { %3762 = vrot.lane.b32.xlu0 %v7777_v26, %s7870_s18 }
 0x461   : > { %3777 = vrot.lane.b32.xlu1 %v7777_v26, %s7875_s14 }
 0x462   : > { %3772 = vrot.lane.b32.xlu0 %v7777_v26, %s7871_s25 }
 0x465   : > { %3787 = vrot.lane.b32.xlu1 %v7777_v26, %s7876_s9  ;;  %s6395_s9 = sld [smem:[#allocation4 + $0xc2]] }
 0x466   : > { %3782 = vrot.lane.b32.xlu0 %v7777_v26, %s7872_s10 }
 0x469   : > { %3797 = vrot.lane.b32.xlu1 %v7777_v26, %s7877_s24  ;;  %s6383_s24 = sld [smem:[#allocation4 + $0xb9]] }
 0x46a   : > { %3792 = vrot.lane.b32.xlu0 %v7777_v26, %s7873_s23  ;;  %s6389_s23 = sld [smem:[#allocation4 + $0xcb]] }
 0x48f   : > { %v1930_v5 = vpop.permute.xlu1 %1929 }
 0x490   : > { %v1932_v9 = vpop.permute.xlu0 %1931  ;;  %v1934_v49 = vsel %vm825_vm12, %v3724_v44, %v1930_v5 }
 0x491   : > { %v1933_v4 = vsel %vm825_vm12, %v1930_v5, %v1932_v9  ;;  %v1937_v5 = vmul.f32 %v1936_v63, %v1934_v49  ;;  %v1943_v9 = vmul.f32 %v1942_v51, %v1934_v49 }
 0x492   : > { %v1938_v44 = vmul.f32 %v1936_v63, %v1933_v4  ;;  %v1944_v43 = vmul.f32 %v1942_v51, %v1933_v4 }
 0x493   : > { %v6343_v48 = vpop.permute.xlu1 %1949  ;;  %v1939_v61 = vadd.f32 %v1937_v5, %v1924_v40 }
 0x494   : > { %v6347_v53 = vpop.permute.xlu0 %1951  ;;  %v1954_v7 = vsel %vm825_vm12, %v3725_v36, %v6343_v48  ;;  %v2156_v36 = vstv %s6395_s9  ;;  %v1940_v21 = vadd.f32 %v1938_v44, %v1924_v40  ;;  %v1946_v40 = vadd.f32 %v1944_v43, %v1926_v50  ;;  %s6610_s9 = sld [smem:[#allocation4 + $0xd7]] }
 0x495   : > { %v1953_v54 = vsel %vm825_vm12, %v6343_v48, %v6347_v53  ;;  %v1957_v42 = vmul.f32 %v1956_v30, %v1954_v7  ;;  %v1963_v49 = vmul.f32 %v1962_v59, %v1954_v7  ;;  %v2176_v7 = vstv %s6415_s1  ;;  %s6790_s1 = sld [smem:[#allocation4 + $0xec]] }
 0x496   : > { %v1958_v41 = vmul.f32 %v1956_v30, %v1953_v54  ;;  %v1964_v51 = vmul.f32 %v1962_v59, %v1953_v54  ;;  %v2182_v54 = vstv %s6421_s2  ;;  %s6792_s2 = sld [smem:[#allocation4 + $0xe3]] }
 0x497   : > { %v6355_v32 = vpop.permute.xlu1 %1971  ;;  %v1959_v30 = vadd.f32 %v1957_v42, %v1939_v61 }
 0x498   : > { %v6359_v6 = vpop.permute.xlu0 %1969  ;;  %v1960_v33 = vadd.f32 %v1958_v41, %v1940_v21  ;;  %v1966_v41 = vadd.f32 %v1964_v51, %v1946_v40 }
 0x499   : > { %v1974_v63 = vsel %vm866_vm13, %v3729_v52, %v6359_v6  ;;  %v1973_v53 = vsel %vm866_vm13, %v6359_v6, %v6355_v32  ;;  %v1945_v52 = vadd.f32 %v1943_v9, %v1926_v50 }
 0x49a   : > { %v1977_v0 = vmul.f32 %v1976_v28, %v1974_v63  ;;  %v1978_v24 = vmul.f32 %v1976_v28, %v1973_v53  ;;  %v1983_v59 = vmul.f32 %v1982_v55, %v1974_v63  ;;  %v1984_v28 = vmul.f32 %v1982_v55, %v1973_v53 }
 0x49b   : > { %v6373_v47 = vpop.permute.xlu1 %1991  ;;  %v1965_v61 = vadd.f32 %v1963_v49, %v1945_v52  ;;  %v2202_v52 = vstv %s6460_s4  ;;  %s6798_s4 = sld [smem:[#allocation4 + $0xdb]] }
 0x49c   : > { %v6381_v8 = vpop.permute.xlu0 %1989  ;;  %v1979_v50 = vadd.f32 %v1977_v0, %v1959_v30  ;;  %v1980_v55 = vadd.f32 %v1978_v24, %v1960_v33  ;;  %v1986_v21 = vadd.f32 %v1984_v28, %v1966_v41 }
 0x49d   : > { %v1994_v32 = vsel %vm866_vm13, %v3730_v1, %v6381_v8  ;;  %v1993_v6 = vsel %vm866_vm13, %v6381_v8, %v6373_v47 }
 0x49e   : > { %v1997_v5 = vmul.f32 %v1996_v60, %v1994_v32  ;;  %v1998_v44 = vmul.f32 %v1996_v60, %v1993_v6  ;;  %v2003_v60 = vmul.f32 %v2002_v19, %v1994_v32  ;;  %v2004_v42 = vmul.f32 %v2002_v19, %v1993_v6 }
 0x49f   : > { %v6401_v34 = vpop.permute.xlu1 %2009  ;;  %v2196_v6 = vstv %s6456_s3  ;;  %s6794_s3 = sld [smem:[#allocation4 + $0xf5]] }
 0x4a0   : > { %v2012_v38 = vpop.permute.xlu0 %2011  ;;  %v2014_v43 = vsel %vm907_vm14, %v3734_v3, %v6401_v34  ;;  %v1999_v19 = vadd.f32 %v1997_v5, %v1979_v50  ;;  %v2000_v63 = vadd.f32 %v1998_v44, %v1980_v55  ;;  %v2006_v32 = vadd.f32 %v2004_v42, %v1986_v21 }
 0x4a1   : > { %v2013_v47 = vsel %vm907_vm14, %v6401_v34, %v2012_v38  ;;  %v1985_v34 = vadd.f32 %v1983_v59, %v1965_v61  ;;  %v2017_v0 = vmul.f32 %v2016_v25, %v2014_v43  ;;  %v2023_v23 = vmul.f32 %v2022_v20, %v2014_v43 }
 0x4a2   : > { %v2018_v24 = vmul.f32 %v2016_v25, %v2013_v47  ;;  %v7878_v43 = vstv %s6351_s11  ;;  %v7881_v50 = vstv %s6353_s30  ;;  %s6770_s11 = sld [smem:[#allocation7 + $0xd]] }
 0x4a3   : > { %v2030_v58 = vpop.permute.xlu1 %2029  ;;  %v2005_v51 = vadd.f32 %v2003_v60, %v1985_v34  ;;  %v7882_v60 = vmov %v7881_v50  ;;  %s6774_s30 = sld [smem:[#allocation4 + $0xe1]] }
 0x4a4   : > { %v2032_v57 = vpop.permute.xlu0 %2031  ;;  %v2034_v3 = vsel %vm907_vm14, %v3735_v22, %v2030_v58  ;;  %v2020_v40 = vadd.f32 %v2018_v24, %v2000_v63  ;;  %v7883_v24 = vstv %s6357_s5  ;;  %s6776_s5 = sld [smem:[#allocation4 + $0xf3]] }
 0x4a5   : > { %v2033_v38 = vsel %vm907_vm14, %v2030_v58, %v2032_v57  ;;  %v2024_v57 = vmul.f32 %v2022_v20, %v2013_v47  ;;  %v2037_v58 = vmul.f32 %v2036_v14, %v2034_v3  ;;  %v2019_v20 = vadd.f32 %v2017_v0, %v1999_v19 }
 0x4a6   : > { %v2038_v53 = vmul.f32 %v2036_v14, %v2033_v38  ;;  %v2043_v14 = vmul.f32 %v2042_v10, %v2034_v3  ;;  %v2044_v30 = vmul.f32 %v2042_v10, %v2033_v38  ;;  %v2025_v5 = vadd.f32 %v2023_v23, %v2005_v51 }
 0x4a7   : > { %v2052_v48 = vpop.permute.xlu1 %2051  ;;  %v2026_v10 = vadd.f32 %v2024_v57, %v2006_v32  ;;  %v2039_v44 = vadd.f32 %v2037_v58, %v2019_v20  ;;  %v2216_v3 = vstv %s6484_s15  ;;  %v7884_v23 = vmov %v7883_v24  ;;  %s6800_s15 = sld [smem:[#allocation4 + $0xed]] }
 0x4a8   : > { %v2050_v4 = vpop.permute.xlu0 %2049  ;;  %v2040_v47 = vadd.f32 %v2038_v53, %v2020_v40  ;;  %v7885_v57 = vstv %s6361_s8  ;;  %v7888_v20 = vstv %s6363_s28  ;;  %s6780_s8 = sld [smem:[#allocation4 + $0xd9]] }
 0x4a9   : > { %v2054_v25 = vsel %vm948_vm15, %v3739_v37, %v2050_v4  ;;  %v2053_v49 = vsel %vm948_vm15, %v2050_v4, %v2052_v48  ;;  %v2046_v34 = vadd.f32 %v2044_v30, %v2026_v10  ;;  %v7886_v58 = vmov %v7885_v57  ;;  %s6782_s28 = sld [smem:[#allocation4 + $0xeb]] }
 0x4aa   : > { %v2057_v37 = vmul.f32 %v2056_v27, %v2054_v25  ;;  %v2058_v48 = vmul.f32 %v2056_v27, %v2053_v49  ;;  %v2063_v61 = vmul.f32 %v7878_v43, %v2054_v25  ;;  %v7879_v27 = vmov %v7878_v43 }
 0x4ab   : > { %v2072_v1 = vpop.permute.xlu1 %2071  ;;  %v2064_v31 = vmul.f32 %v7879_v27, %v2053_v49  ;;  %v7887_v25 = vunpack.i.h.bf16 %v6309_v45  ;;  %v7890_v10 = vstv %s6366_s6  ;;  %s6784_s6 = sld [smem:[#allocation4 + $0xe2]] }
 0x4ac   : > { %v2070_v8 = vpop.permute.xlu0 %2069  ;;  %v2060_v21 = vadd.f32 %v2058_v48, %v2040_v47  ;;  %v2059_v0 = vadd.f32 %v2057_v37, %v2039_v44  ;;  %v7889_v48 = vmov %v7888_v20  ;;  %v7891_v47 = vstv %s6375_s26  ;;  %s6786_s26 = sld [smem:[#allocation4 + $0xf4]] }
 0x4ad   : > { %v2074_v4 = vsel %vm948_vm15, %v3740_v35, %v2070_v8  ;;  %v2073_v59 = vsel %vm948_vm15, %v2070_v8, %v2072_v1  ;;  %v7880_v35 = vunpack.i.l.bf16 %v6309_v45  ;;  %v2045_v8 = vadd.f32 %v2043_v14, %v2025_v5 }
 0x4ae   : > { %v2077_v55 = vmul.f32 %v7881_v50, %v2074_v4  ;;  %v2078_v42 = vmul.f32 %v7882_v60, %v2073_v59  ;;  %v2083_v19 = vmul.f32 %v7883_v24, %v2074_v4  ;;  %v2066_v51 = vadd.f32 %v2064_v31, %v2046_v34 }
 0x4af   : > { %v2090_v9 = vpop.permute.xlu1 %2089  ;;  %v2065_v32 = vadd.f32 %v2063_v61, %v2045_v8  ;;  %v2222_v14 = vstv %s6502_s19  ;;  %v7892_v61 = vunpack.i.l.bf16 %v6307_v39  ;;  %v7893_v8 = vmov %v7890_v10  ;;  %s6804_s19 = sld [smem:[#allocation4 + $0xe4]] }
 0x4b0   : > { %v2092_v22 = vpop.permute.xlu0 %2091  ;;  %v2094_v1 = vsel %vm459_vm8, %v7880_v35, %v2090_v9  ;;  %v2079_v30 = vadd.f32 %v2077_v55, %v2059_v0  ;;  %v2080_v37 = vadd.f32 %v2078_v42, %v2060_v21  ;;  %v7894_v55 = vmov %v7891_v47 }
 0x4b1   : > { %v2093_v41 = vsel %vm459_vm8, %v2090_v9, %v2092_v22  ;;  %v2084_v9 = vmul.f32 %v7884_v23, %v2073_v59  ;;  %v2097_v22 = vmul.f32 %v7885_v57, %v2094_v1  ;;  %v2103_v40 = vmul.f32 %v7888_v20, %v2094_v1 }
 0x4b2   : > { %v2098_v53 = vmul.f32 %v7886_v58, %v2093_v41  ;;  %v2104_v4 = vmul.f32 %v7889_v48, %v2093_v41  ;;  %v2085_v45 = vadd.f32 %v2083_v19, %v2065_v32  ;;  %v7895_v42 = vunpack.i.h.bf16 %v6307_v39 }
 0x4b3   : > { %v2110_v33 = vpop.permute.xlu1 %2109  ;;  %v2086_v35 = vadd.f32 %v2084_v9, %v2066_v51  ;;  %v2099_v41 = vadd.f32 %v2097_v22, %v2079_v30  ;;  %v7896_v0 = vstv %s6383_s24  ;;  %v7897_v19 = vstv %s6389_s23  ;;  %s6592_s23 = sld [smem:[#allocation4 + $0xc5]] }
 0x4b4   : > { %v2112_v28 = vpop.permute.xlu0 %2111  ;;  %v2114_v49 = vsel %vm459_vm8, %v7887_v25, %v2110_v33  ;;  %v2100_v1 = vadd.f32 %v2098_v53, %v2080_v37  ;;  %v7898_v22 = vmov %v7896_v0  ;;  %v7899_v53 = vmov %v7897_v19  ;;  %s6598_s24 = sld [smem:[#allocation4 + $0xc4]] }
 0x4b5   : > { %v2113_v59 = vsel %vm459_vm8, %v2110_v33, %v2112_v28  ;;  %v2117_v44 = vmul.f32 %v7890_v10, %v2114_v49  ;;  %v2123_v43 = vmul.f32 %v7891_v47, %v2114_v49  ;;  %v2105_v28 = vadd.f32 %v2103_v40, %v2085_v45 }
 0x4b6   : > { %v2118_v50 = vmul.f32 %v7893_v8, %v2113_v59  ;;  %v2124_v60 = vmul.f32 %v7894_v55, %v2113_v59  ;;  %v2106_v21 = vadd.f32 %v2104_v4, %v2086_v35  ;;  %v7900_v20 = vunpack.i.l.bf16 %v6323_v62 }
 0x4b7   : > { %v2132_v38 = vpop.permute.xlu1 %2131  ;;  %v2119_v9 = vadd.f32 %v2117_v44, %v2099_v41  ;;  %v2125_v57 = vadd.f32 %v2123_v43, %v2105_v28  ;;  %v7901_v41 = vunpack.i.h.bf16 %v6323_v62 }
 0x4b8   : > { %v2130_v63 = vpop.permute.xlu0 %2129  ;;  %v2120_v30 = vadd.f32 %v2118_v50, %v2100_v1  ;;  %v2126_v37 = vadd.f32 %v2124_v60, %v2106_v21 }
 0x4b9   : > { %v2134_v27 = vsel %vm541_vm10, %v7892_v61, %v2130_v63  ;;  %v2133_v33 = vsel %vm541_vm10, %v2130_v63, %v2132_v38 }
 0x4ba   : > { %v2137_v24 = vmul.f32 %v7896_v0, %v2134_v27  ;;  %v2143_v23 = vmul.f32 %v7897_v19, %v2134_v27  ;;  %v2138_v58 = vmul.f32 %v7898_v22, %v2133_v33  ;;  %v2144_v39 = vmul.f32 %v7899_v53, %v2133_v33 }
 0x4bb   : > { %v2152_v5 = vpop.permute.xlu1 %2151 }
 0x4bc   : > { %v2150_v31 = vpop.permute.xlu0 %2149  ;;  %v2139_v59 = vadd.f32 %v2137_v24, %v2119_v9  ;;  %v2140_v47 = vadd.f32 %v2138_v58, %v2120_v30  ;;  %v2146_v43 = vadd.f32 %v2144_v39, %v2126_v37  ;;  %v2254_v24 = vstv %s6580_s0  ;;  %s6806_s0 = sld [smem:[#allocation4 + $0xf6]] }
 0x4bd   : > { %v2154_v34 = vsel %vm541_vm10, %v7895_v42, %v2150_v31  ;;  %v2153_v38 = vsel %vm541_vm10, %v2150_v31, %v2152_v5  ;;  %v2145_v5 = vadd.f32 %v2143_v23, %v2125_v57  ;;  %v3760_v42 = vunpack.i.h.bf16 %v6319_v11 }
 0x4be   : > { %v2157_v49 = vmul.f32 %v2156_v36, %v2154_v34  ;;  %v2163_v51 = vmul.f32 %v2162_v46, %v2154_v34  ;;  %v2158_v48 = vmul.f32 %v2156_v36, %v2153_v38  ;;  %v2164_v4 = vmul.f32 %v2162_v46, %v2153_v38 }
 0x4bf   : > { %v2170_v63 = vpop.permute.xlu1 %2169  ;;  %v7902_v38 = vunpack.i.l.bf16 %v6319_v11  ;;  %v2236_v39 = vstv %s6598_s24  ;;  %s6812_s24 = sld [smem:[#allocation4 + $0xee]] }
 0x4c0   : > { %v2172_v25 = vpop.permute.xlu0 %2171  ;;  %v2174_v40 = vsel %vm255_vm0, %v7900_v20, %v2170_v63  ;;  %v2159_v27 = vadd.f32 %v2157_v49, %v2139_v59  ;;  %v2165_v31 = vadd.f32 %v2163_v51, %v2145_v5  ;;  %v2160_v33 = vadd.f32 %v2158_v48, %v2140_v47 }
 0x4c1   : > { %v2173_v32 = vsel %vm255_vm0, %v2170_v63, %v2172_v25  ;;  %v2177_v45 = vmul.f32 %v2176_v7, %v2174_v40  ;;  %v2183_v10 = vmul.f32 %v2182_v54, %v2174_v40  ;;  %v2166_v28 = vadd.f32 %v2164_v4, %v2146_v43 }
 0x4c2   : > { %v2178_v36 = vmul.f32 %v2176_v7, %v2173_v32  ;;  %v2184_v46 = vmul.f32 %v2182_v54, %v2173_v32  ;;  %v2242_v25 = vstv %s6604_s7  ;;  %v2260_v32 = vstv %s6592_s23  ;;  %s6810_s23 = sld [smem:[#allocation4 + $0xdc]] }
 0x4c3   : > { %v2190_v44 = vpop.permute.xlu1 %2189  ;;  %v2179_v8 = vadd.f32 %v2177_v45, %v2159_v27  ;;  %v2185_v50 = vadd.f32 %v2183_v10, %v2165_v31  ;;  %v2266_v20 = vstv %s6610_s9  ;;  %v7903_v45 = vstv %s6311_s12  ;;  %s7909_s12 = smov 5   ;;  %s6816_s7 = sld [smem:[#allocation4 + $0xe5]] }
 0x4c4   : > { %v2192_v61 = vpop.permute.xlu0 %2191  ;;  %v2194_v1 = vsel %vm255_vm0, %v7901_v41, %v2190_v44  ;;  %v2180_v34 = vadd.f32 %v2178_v36, %v2160_v33  ;;  %v2186_v21 = vadd.f32 %v2184_v46, %v2166_v28  ;;  %v2249_v10 = vmul.f32 %v6211_v2, %v7903_v45  ;;  %s6818_s9 = sld [smem:[#allocation4 + $0xf7]] }
 0x4c5   : > { %v2193_v35 = vsel %vm255_vm0, %v2190_v44, %v2192_v61  ;;  %v2197_v7 = vmul.f32 %v2196_v6, %v2194_v1  ;;  %v2203_v54 = vmul.f32 %v2202_v52, %v2194_v1  ;;  %v2255_v44 = vmul.f32 %v6211_v2, %v2254_v24 }
 0x4c6   : > { %v2198_v55 = vmul.f32 %v2196_v6, %v2193_v35  ;;  %v2204_v60 = vmul.f32 %v2202_v52, %v2193_v35  ;;  %v7904_v47 = vmov %v7903_v45  ;;  %v2256_v36 = vmul.f32 %v6213_v29, %v2254_v24 }
 0x4c7   : > { %v2212_v62 = vpop.permute.xlu1 %2211  ;;  %v2199_v19 = vadd.f32 %v2197_v7, %v2179_v8  ;;  %v2205_v23 = vadd.f32 %v2203_v54, %v2185_v50  ;;  %v2250_v43 = vmul.f32 %v6213_v29, %v7904_v47  ;;  %v2261_v35 = vmul.f32 %v6219_v15, %v2260_v32 }
 0x4c8   : > { %v2210_v0 = vpop.permute.xlu0 %2209  ;;  %v2200_v58 = vadd.f32 %v2198_v55, %v2180_v34  ;;  %v2206_v53 = vadd.f32 %v2204_v60, %v2186_v21  ;;  %v2267_v41 = vmul.f32 %v6219_v15, %v2266_v20  ;;  %v2262_v1 = vmul.f32 %v6221_v16, %v2260_v32 }
 0x4c9   : > { %v2214_v6 = vsel %vm339_vm4, %v7902_v38, %v2210_v0  ;;  %v2213_v52 = vsel %vm339_vm4, %v2210_v0, %v2212_v62  ;;  %v2268_v33 = vmul.f32 %v6221_v16, %v2266_v20  ;;  %v2304_v45 = vstv %s6766_s29  ;;  %s6880_s29 = sld [smem:[#allocation4 + $0xe7]] }
 0x4ca   : > { %v2217_v63 = vmul.f32 %v2216_v3, %v2214_v6  ;;  %v2223_v9 = vmul.f32 %v2222_v14, %v2214_v6  ;;  %v2218_v57 = vmul.f32 %v2216_v3, %v2213_v52  ;;  %v2224_v22 = vmul.f32 %v2222_v14, %v2213_v52 }
 0x4cb   : > { %v2232_v11 = vpop.permute.xlu1 %2231  ;;  %v2288_v47 = vstv %s6770_s11  ;;  %s7019_s11 = sld [smem:[#allocation4 + $0xdf]] }
 0x4cc   : > { %v2219_v49 = vadd.f32 %v2217_v63, %v2199_v19  ;;  %v2225_v51 = vadd.f32 %v2223_v9, %v2205_v23  ;;  %v2230_v40 = vpop.permute.xlu0 %2229  ;;  %v2220_v30 = vadd.f32 %v2218_v57, %v2200_v58  ;;  %v2226_v37 = vadd.f32 %v2224_v22, %v2206_v53 }
 0x4cd   : > { %v2234_v48 = vsel %vm339_vm4, %v3760_v42, %v2230_v40  ;;  %v2233_v3 = vsel %vm339_vm4, %v2230_v40, %v2232_v11 }
 0x4ce   : > { %v2237_v14 = vmul.f32 %v2236_v39, %v2234_v48  ;;  %v2243_v4 = vmul.f32 %v2242_v25, %v2234_v48  ;;  %v2238_v59 = vmul.f32 %v2236_v39, %v2233_v3  ;;  %v2244_v5 = vmul.f32 %v2242_v25, %v2233_v3 }
 0x4cf   : > { %v6750_v42 = vpop.permute.xlu1 %3767 }
 0x4d0   : > { %v2239_v46 = vadd.f32 %v2237_v14, %v2219_v49  ;;  %v2245_v61 = vadd.f32 %v2243_v4, %v2225_v51  ;;  %v2240_v27 = vadd.f32 %v2238_v59, %v2220_v30  ;;  %v2246_v31 = vadd.f32 %v2244_v5, %v2226_v37  ;;  %v6752_v34 = vpop.permute.xlu0 %3762 }
 0x4d1   : > { %v3765_v22 = vunpack.i.h.bf16 %v6752_v34  ;;  %v3764_v39 = vunpack.i.l.bf16 %v6752_v34  ;;  %v3770_v25 = vunpack.i.h.bf16 %v6750_v42  ;;  %v3769_v11 = vunpack.i.l.bf16 %v6750_v42 }
 0x4d2   : > { %v2251_v28 = vadd.f32 %v2249_v10, %v2239_v46  ;;  %v2257_v7 = vadd.f32 %v2255_v44, %v2245_v61  ;;  %v2252_v2 = vadd.f32 %v2250_v43, %v2240_v27  ;;  %v2258_v54 = vadd.f32 %v2256_v36, %v2246_v31 }
 0x4d3   : > { %v6754_v21 = vpop.permute.xlu1 %3777  ;;  %v2298_v14 = vstv %s6764_s27  ;;  %v2286_v5 = vstv %s6768_s13  ;;  %v2318_v43 = vstv %s6774_s30  ;;  %v2324_v36 = vstv %s6776_s5  ;;  %s6858_s27 = sld [smem:[#allocation4 + $0xf0]] }
 0x4d4   : > { %v2263_v8 = vadd.f32 %v2261_v35, %v2251_v28  ;;  %v2269_v50 = vadd.f32 %v2267_v41, %v2257_v7  ;;  %v2264_v55 = vadd.f32 %v2262_v1, %v2252_v2  ;;  %v2270_v29 = vadd.f32 %v2268_v33, %v2258_v54  ;;  %v6756_v0 = vpop.permute.xlu0 %3772  ;;  %s6895_s13 = sld [smem:[#allocation4 + $0xf9]] }
 0x4d5   : > { %v3775_v49 = vunpack.i.h.bf16 %v6756_v0  ;;  %v3774_v51 = vunpack.i.l.bf16 %v6756_v0  ;;  %v3780_v32 = vunpack.i.h.bf16 %v6754_v21  ;;  %v3779_v20 = vunpack.i.l.bf16 %v6754_v21  ;;  %s7025_s30 = sld [smem:[#allocation4 + $0xf1]] }
 0x4d6   : > { %3881 = vtanh.f32 %v2263_v8  ;;  %v2338_v46 = vstv %s6780_s8  ;;  %v2344_v61 = vstv %s6782_s28  ;;  %v2358_v27 = vstv %s6784_s6  ;;  %s7051_s5 = sld [smem:[#allocation4 + $0xe8]] }
 0x4d7   : > { %3883 = vtanh.f32 %v2264_v55  ;;  %v6758_v24 = vpop.permute.xlu1 %3787  ;;  %v2364_v31 = vstv %s6786_s26  ;;  %v2378_v1 = vstv %s6788_s22  ;;  %v2384_v33 = vstv %s6790_s1  ;;  %s7191_s8 = sld [smem:[#allocation4 + $0x104]] }
 0x4d8   : > { %3885 = vtanh.f32 %v2269_v50  ;;  %v6762_v19 = vpop.permute.xlu0 %3782  ;;  %v2398_v28 = vstv %s6792_s2  ;;  %v2404_v2 = vstv %s6794_s3  ;;  %s7195_s28 = sld [smem:[#allocation4 + $0xfc]] }
 0x4d9   : > { %3887 = vtanh.f32 %v2270_v29  ;;  %s7197_s6 = sld [smem:[#allocation4 + $0x10e]] }
 0x4da   : > { %s7199_s26 = sld [smem:[#allocation7 + $0xe]] }
 0x4db   : > { %s7201_s22 = sld [smem:[#allocation7 + $0xf]] }
 0x4dc   : > { %v6778_v23 = vpop.permute.xlu0 %3792  ;;  %s7205_s1 = sld [smem:[#allocation4 + $0x105]] }
 0x4dd   : > { %s7207_s2 = sld [smem:[#allocation4 + $0x117]] }
 0x4de   : > { %s7211_s3 = sld [smem:[#allocation4 + $0xfd]] }
 0x4e3   : > { %v6662_v60 = vpop.eup %3881 }
 0x4e4   : > { %2291 = vrot.lane.b32.xlu1 %v6662_v60, %s7870_s18  ;;  %v6666_v15 = vpop.eup %3883 }
 0x4e5   : > { %2293 = vrot.lane.b32.xlu0 %v6666_v15, %s7870_s18  ;;  %v6670_v16 = vpop.eup %3885 }
 0x4e6   : > { %v6674_v62 = vpop.eup %3887 }
 0x4e8   : > { %2311 = vrot.lane.b32.xlu1 %v6670_v16, %s7870_s18 }
 0x4e9   : > { %2313 = vrot.lane.b32.xlu0 %v6674_v62, %s7870_s18  ;;  %s7905_s18 = smov 6  }
 0x4ec   : > { %2333 = vrot.lane.b32.xlu1 %v6666_v15, %s7874_s17 }
 0x4ed   : > { %2331 = vrot.lane.b32.xlu0 %v6662_v60, %s7874_s17 }
 0x4f0   : > { %2353 = vrot.lane.b32.xlu1 %v6674_v62, %s7874_s17 }
 0x4f1   : > { %2351 = vrot.lane.b32.xlu0 %v6670_v16, %s7874_s17  ;;  %s7907_s17 = smov 2  }
 0x4f4   : > { %2371 = vrot.lane.b32.xlu1 %v6662_v60, %s7871_s25 }
 0x4f5   : > { %2373 = vrot.lane.b32.xlu0 %v6666_v15, %s7871_s25 }
 0x4f8   : > { %2391 = vrot.lane.b32.xlu1 %v6670_v16, %s7871_s25 }
 0x4f9   : > { %2393 = vrot.lane.b32.xlu0 %v6674_v62, %s7871_s25  ;;  %s7906_s25 = smov 4  }
 0x4fc   : > { %2413 = vrot.lane.b32.xlu1 %v6666_v15, %s7875_s14 }
 0x4fd   : > { %2411 = vrot.lane.b32.xlu0 %v6662_v60, %s7875_s14 }
 0x500   : > { %2433 = vrot.lane.b32.xlu1 %v6674_v62, %s7875_s14 }
 0x501   : > { %2431 = vrot.lane.b32.xlu0 %v6670_v16, %s7875_s14  ;;  %s7908_s14 = smov 7  }
 0x504   : > { %2451 = vrot.lane.b32.xlu1 %v6662_v60, %s7872_s10 }
 0x505   : > { %2453 = vrot.lane.b32.xlu0 %v6666_v15, %s7872_s10 }
 0x508   : > { %2471 = vrot.lane.b32.xlu1 %v6670_v16, %s7872_s10 }
 0x509   : > { %2473 = vrot.lane.b32.xlu0 %v6674_v62, %s7872_s10 }
 0x50c   : > { %2493 = vrot.lane.b32.xlu1 %v6666_v15, %s7905_s18 }
 0x50d   : > { %2491 = vrot.lane.b32.xlu0 %v6662_v60, %s7905_s18 }
 0x510   : > { %2513 = vrot.lane.b32.xlu1 %v6674_v62, %s7905_s18 }
 0x511   : > { %2511 = vrot.lane.b32.xlu0 %v6670_v16, %s7905_s18 }
 0x514   : > { %2531 = vrot.lane.b32.xlu1 %v6662_v60, %s7906_s25 }
 0x515   : > { %2533 = vrot.lane.b32.xlu0 %v6666_v15, %s7906_s25 }
 0x518   : > { %2551 = vrot.lane.b32.xlu1 %v6670_v16, %s7906_s25 }
 0x519   : > { %2553 = vrot.lane.b32.xlu0 %v6674_v62, %s7906_s25 }
 0x51c   : > { %2573 = vrot.lane.b32.xlu1 %v6666_v15, %s7907_s17 }
 0x51d   : > { %2571 = vrot.lane.b32.xlu0 %v6662_v60, %s7907_s17 }
 0x520   : > { %2593 = vrot.lane.b32.xlu1 %v6674_v62, %s7907_s17 }
 0x521   : > { %2591 = vrot.lane.b32.xlu0 %v6670_v16, %s7907_s17 }
 0x524   : > { %3807 = vrot.lane.b32.xlu1 %v7777_v26, %s7908_s14 }
 0x525   : > { %3802 = vrot.lane.b32.xlu0 %v7777_v26, %s7872_s10 }
 0x528   : > { %3817 = vrot.lane.b32.xlu1 %v7777_v26, %s7909_s12  ;;  %s6852_s12 = sld [smem:[#allocation4 + $0xde]] }
 0x529   : > { %3812 = vrot.lane.b32.xlu0 %v7777_v26, %s7905_s18 }
 0x52c   : > { %3827 = vrot.lane.b32.xlu1 %v7777_v26, %s7910_s16  ;;  %s6838_s16 = sld [smem:[#allocation4 + $0xe6]] }
 0x52d   : > { %3822 = vrot.lane.b32.xlu0 %v7777_v26, %s7906_s25  ;;  %s6844_s25 = sld [smem:[#allocation4 + $0xf8]] }
 0x530   : > { %3837 = vrot.lane.b32.xlu1 %v7777_v26, %s7911_s21  ;;  %s6823_s21 = sld [smem:[#allocation4 + $0xdd]] }
 0x531   : > { %3832 = vrot.lane.b32.xlu0 %v7777_v26, %s7907_s17  ;;  %v6772_v26 = vpop.permute.xlu1 %3797  ;;  %s6830_s17 = sld [smem:[#allocation4 + $0xef]] }
 0x556   : > { %v2292_v38 = vpop.permute.xlu1 %2291 }
 0x557   : > { %v2294_v6 = vpop.permute.xlu0 %2293  ;;  %v2296_v41 = vsel %vm459_vm8, %v3764_v39, %v2292_v38 }
 0x558   : > { %v2295_v7 = vsel %vm459_vm8, %v2292_v38, %v2294_v6  ;;  %v2299_v53 = vmul.f32 %v2298_v14, %v2296_v41  ;;  %v2305_v40 = vmul.f32 %v2304_v45, %v2296_v41  ;;  %v2544_v41 = vstv %s6858_s27  ;;  %s7231_s27 = sld [smem:[#allocation4 + $0x111]] }
 0x559   : > { %v2300_v44 = vmul.f32 %v2298_v14, %v2295_v7  ;;  %v2306_v3 = vmul.f32 %v2304_v45, %v2295_v7  ;;  %v2538_v14 = vstv %s6852_s12  ;;  %s7948_s12 = smov 2  }
 0x55a   : > { %v6796_v52 = vpop.permute.xlu1 %2311  ;;  %v2301_v55 = vadd.f32 %v2299_v53, %v2286_v5  ;;  %v2307_v29 = vadd.f32 %v2305_v40, %v2288_v47 }
 0x55b   : > { %v6802_v63 = vpop.permute.xlu0 %2313  ;;  %v2316_v38 = vsel %vm459_vm8, %v3765_v22, %v6796_v52  ;;  %v2302_v48 = vadd.f32 %v2300_v44, %v2286_v5  ;;  %v2308_v37 = vadd.f32 %v2306_v3, %v2288_v47  ;;  %v2558_v3 = vstv %s6880_s29  ;;  %s7235_s29 = sld [smem:[#allocation4 + $0x108]] }
 0x55c   : > { %v2315_v39 = vsel %vm459_vm8, %v6796_v52, %v6802_v63  ;;  %v2319_v22 = vmul.f32 %v2318_v43, %v2316_v38  ;;  %v2325_v7 = vmul.f32 %v2324_v36, %v2316_v38 }
 0x55d   : > { %v2320_v45 = vmul.f32 %v2318_v43, %v2315_v39  ;;  %v2326_v59 = vmul.f32 %v2324_v36, %v2315_v39 }
 0x55e   : > { %v6808_v9 = vpop.permute.xlu1 %2333 }
 0x55f   : > { %v6814_v57 = vpop.permute.xlu0 %2331  ;;  %v2322_v5 = vadd.f32 %v2320_v45, %v2302_v48  ;;  %v2328_v44 = vadd.f32 %v2326_v59, %v2308_v37 }
 0x560   : > { %v2336_v4 = vsel %vm500_vm9, %v3769_v11, %v6814_v57  ;;  %v2335_v52 = vsel %vm500_vm9, %v6814_v57, %v6808_v9  ;;  %v2321_v57 = vadd.f32 %v2319_v22, %v2301_v55 }
 0x561   : > { %v2339_v50 = vmul.f32 %v2338_v46, %v2336_v4  ;;  %v2345_v8 = vmul.f32 %v2344_v61, %v2336_v4  ;;  %v2340_v53 = vmul.f32 %v2338_v46, %v2335_v52  ;;  %v2346_v40 = vmul.f32 %v2344_v61, %v2335_v52 }
 0x562   : > { %v6821_v58 = vpop.permute.xlu1 %2353  ;;  %v2327_v4 = vadd.f32 %v2325_v7, %v2307_v29  ;;  %v2564_v61 = vstv %s6895_s13  ;;  %s7237_s13 = sld [smem:[#allocation4 + $0x11a]] }
 0x563   : > { %v6836_v30 = vpop.permute.xlu0 %2351  ;;  %v2341_v36 = vadd.f32 %v2339_v50, %v2321_v57  ;;  %v2348_v55 = vadd.f32 %v2346_v40, %v2328_v44 }
 0x564   : > { %v2356_v11 = vsel %vm500_vm9, %v3770_v25, %v6836_v30  ;;  %v2355_v43 = vsel %vm500_vm9, %v6836_v30, %v6821_v58  ;;  %v2347_v37 = vadd.f32 %v2345_v8, %v2327_v4 }
 0x565   : > { %v2359_v25 = vmul.f32 %v2358_v27, %v2356_v11  ;;  %v2365_v30 = vmul.f32 %v2364_v31, %v2356_v11  ;;  %v2360_v47 = vmul.f32 %v2358_v27, %v2355_v43  ;;  %v2366_v59 = vmul.f32 %v2364_v31, %v2355_v43 }
 0x566   : > { %v6850_v10 = vpop.permute.xlu1 %2371 }
 0x567   : > { %v2374_v35 = vpop.permute.xlu0 %2373  ;;  %v2376_v42 = vsel %vm541_vm10, %v3774_v51, %v6850_v10  ;;  %v2342_v51 = vadd.f32 %v2340_v53, %v2322_v5  ;;  %v2361_v39 = vadd.f32 %v2359_v25, %v2341_v36  ;;  %v2367_v38 = vadd.f32 %v2365_v30, %v2347_v37 }
 0x568   : > { %v2375_v48 = vsel %vm541_vm10, %v6850_v10, %v2374_v35  ;;  %v2379_v29 = vmul.f32 %v2378_v1, %v2376_v42  ;;  %v2385_v31 = vmul.f32 %v2384_v33, %v2376_v42  ;;  %v7912_v53 = vstv %s6798_s4  ;;  %s7213_s4 = sld [smem:[#allocation4 + $0x10f]] }
 0x569   : > { %v2380_v10 = vmul.f32 %v2378_v1, %v2375_v48  ;;  %v2386_v35 = vmul.f32 %v2384_v33, %v2375_v48  ;;  %v2362_v0 = vadd.f32 %v2360_v47, %v2342_v51  ;;  %v2368_v1 = vadd.f32 %v2366_v59, %v2348_v55 }
 0x56a   : > { %v6872_v54 = vpop.permute.xlu1 %2391  ;;  %v2381_v45 = vadd.f32 %v2379_v29, %v2361_v39  ;;  %v2387_v43 = vadd.f32 %v2385_v31, %v2367_v38  ;;  %v7914_v4 = vmov %v7912_v53  ;;  %v7916_v25 = vstv %s6804_s19  ;;  %s7217_s19 = sld [smem:[#allocation4 + $0x118]] }
 0x56b   : > { %v2394_v6 = vpop.permute.xlu0 %2393  ;;  %v2396_v27 = vsel %vm541_vm10, %v3775_v49, %v6872_v54  ;;  %v2382_v11 = vadd.f32 %v2380_v10, %v2362_v0  ;;  %v2388_v57 = vadd.f32 %v2386_v35, %v2368_v1  ;;  %v7917_v47 = vunpack.i.l.bf16 %v6762_v19 }
 0x56c   : > { %v2395_v8 = vsel %vm541_vm10, %v6872_v54, %v2394_v6  ;;  %v2399_v33 = vmul.f32 %v2398_v28, %v2396_v27  ;;  %v2405_v22 = vmul.f32 %v2404_v2, %v2396_v27  ;;  %v7918_v51 = vstv %s6806_s0  ;;  %s7219_s0 = sld [smem:[#allocation4 + $0xfe]] }
 0x56d   : > { %v2400_v7 = vmul.f32 %v2398_v28, %v2395_v8  ;;  %v2406_v52 = vmul.f32 %v2404_v2, %v2395_v8  ;;  %v7919_v29 = vmov %v7916_v25  ;;  %v7920_v10 = vmov %v7918_v51 }
 0x56e   : > { %v2414_v34 = vpop.permute.xlu1 %2413  ;;  %v2401_v42 = vadd.f32 %v2399_v33, %v2381_v45  ;;  %v7921_v35 = vunpack.i.h.bf16 %v6762_v19  ;;  %v7922_v1 = vstv %s6810_s23  ;;  %s7221_s23 = sld [smem:[#allocation4 + $0x110]]  ;;  %vm7974_vm10 = vcmp.lt.s32.totalorder %v4265_v12, 3 }
 0x56f   : > { %v2412_v63 = vpop.permute.xlu0 %2411  ;;  %v2402_v37 = vadd.f32 %v2400_v7, %v2382_v11  ;;  %v2408_v59 = vadd.f32 %v2406_v52, %v2388_v57 }
 0x570   : > { %v2416_v49 = vsel %vm582_vm11, %v3779_v20, %v2412_v63  ;;  %v2415_v54 = vsel %vm582_vm11, %v2412_v63, %v2414_v34  ;;  %v7913_v63 = vstv %s6800_s15  ;;  %s7215_s15 = sld [smem:[#allocation4 + $0x106]] }
 0x571   : > { %v2419_v40 = vmul.f32 %v7912_v53, %v2416_v49  ;;  %v2425_v5 = vmul.f32 %v7913_v63, %v2416_v49  ;;  %v2420_v28 = vmul.f32 %v7914_v4, %v2415_v54  ;;  %v7915_v44 = vmov %v7913_v63 }
 0x572   : > { %v2434_v9 = vpop.permute.xlu1 %2433  ;;  %v2426_v2 = vmul.f32 %v7915_v44, %v2415_v54  ;;  %v7924_v54 = vstv %s6812_s24  ;;  %v7927_v53 = vunpack.i.l.bf16 %v6758_v24  ;;  %v7928_v4 = vstv %s6818_s9  ;;  %s7223_s24 = sld [smem:[#allocation4 + $0x107]] }
 0x573   : > { %v2432_v58 = vpop.permute.xlu0 %2431  ;;  %v2422_v0 = vadd.f32 %v2420_v28, %v2402_v37  ;;  %v7932_v37 = vstv %s6823_s21  ;;  %s7039_s21 = sld [smem:[#allocation4 + $0xf2]] }
 0x574   : > { %v2436_v20 = vsel %vm582_vm11, %v3780_v32, %v2432_v58  ;;  %v2435_v21 = vsel %vm582_vm11, %v2432_v58, %v2434_v9  ;;  %v2407_v32 = vadd.f32 %v2405_v22, %v2387_v43  ;;  %v2421_v58 = vadd.f32 %v2419_v40, %v2401_v42  ;;  %s7229_s9 = sld [smem:[#allocation4 + $0xff]]  ;;  %vm7976_vm11 = vmmov %vm7974_vm10 }
 0x575   : > { %v2439_v30 = vmul.f32 %v7916_v25, %v2436_v20  ;;  %v2445_v55 = vmul.f32 %v7918_v51, %v2436_v20  ;;  %v2440_v27 = vmul.f32 %v7919_v29, %v2435_v21  ;;  %v2446_v31 = vmul.f32 %v7920_v10, %v2435_v21 }
 0x576   : > { %v2452_v46 = vpop.permute.xlu1 %2451  ;;  %v2427_v38 = vadd.f32 %v2425_v5, %v2407_v32  ;;  %v2428_v49 = vadd.f32 %v2426_v2, %v2408_v59  ;;  %v7925_v20 = vmov %v7924_v54  ;;  %v7926_v43 = vstv %s6816_s7  ;;  %s7225_s7 = sld [smem:[#allocation4 + $0x119]] }
 0x577   : > { %v2454_v50 = vpop.permute.xlu0 %2453  ;;  %v2456_v48 = vsel %vm255_vm0, %v7917_v47, %v2452_v46  ;;  %v2442_v63 = vadd.f32 %v2440_v27, %v2422_v0  ;;  %v7929_v2 = vmov %v7926_v43  ;;  %v7930_v42 = vmov %v7928_v4 }
 0x578   : > { %v2455_v9 = vsel %vm255_vm0, %v2452_v46, %v2454_v50  ;;  %v2459_v33 = vmul.f32 %v7922_v1, %v2456_v48  ;;  %v2441_v46 = vadd.f32 %v2439_v30, %v2421_v58  ;;  %v7923_v50 = vmov %v7922_v1 }
 0x579   : > { %v2460_v22 = vmul.f32 %v7923_v50, %v2455_v9  ;;  %v2465_v45 = vmul.f32 %v7924_v54, %v2456_v48  ;;  %v2447_v52 = vadd.f32 %v2445_v55, %v2427_v38  ;;  %v2466_v11 = vmul.f32 %v7925_v20, %v2455_v9 }
 0x57a   : > { %v2472_v6 = vpop.permute.xlu1 %2471  ;;  %v2448_v5 = vadd.f32 %v2446_v31, %v2428_v49  ;;  %v2461_v44 = vadd.f32 %v2459_v33, %v2441_v46  ;;  %v7931_v25 = vunpack.i.h.bf16 %v6758_v24  ;;  %v7934_v29 = vmov %v7932_v37 }
 0x57b   : > { %v2474_v34 = vpop.permute.xlu0 %2473  ;;  %v2476_v8 = vsel %vm255_vm0, %v7921_v35, %v2472_v6  ;;  %v2462_v47 = vadd.f32 %v2460_v22, %v2442_v63  ;;  %v2467_v48 = vadd.f32 %v2465_v45, %v2447_v52  ;;  %v7937_v0 = vunpack.i.l.bf16 %v6778_v23 }
 0x57c   : > { %v2475_v19 = vsel %vm255_vm0, %v2472_v6, %v2474_v34  ;;  %v2479_v57 = vmul.f32 %v7926_v43, %v2476_v8  ;;  %v2485_v28 = vmul.f32 %v7928_v4, %v2476_v8  ;;  %v2468_v9 = vadd.f32 %v2466_v11, %v2448_v5 }
 0x57d   : > { %v2480_v21 = vmul.f32 %v7929_v2, %v2475_v19  ;;  %v2486_v32 = vmul.f32 %v7930_v42, %v2475_v19  ;;  %v7936_v8 = vstv %s6838_s16  ;;  %v7938_v46 = vstv %s6844_s25  ;;  %s7061_s16 = sld [smem:[#allocation4 + $0xfa]] }
 0x57e   : > { %v2494_v36 = vpop.permute.xlu1 %2493  ;;  %v2481_v58 = vadd.f32 %v2479_v57, %v2461_v44  ;;  %v2487_v10 = vadd.f32 %v2485_v28, %v2467_v48  ;;  %v7939_v19 = vmov %v7936_v8  ;;  %v7940_v52 = vmov %v7938_v46  ;;  %s7067_s25 = sld [smem:[#allocation4 + $0xfb]] }
 0x57f   : > { %v2492_v39 = vpop.permute.xlu0 %2491  ;;  %v2482_v1 = vadd.f32 %v2480_v21, %v2462_v47  ;;  %v2488_v33 = vadd.f32 %v2486_v32, %v2468_v9  ;;  %v2616_v9 = vstv %s7039_s21  ;;  %s7247_s21 = sld [smem:[#allocation4 + $0x109]] }
 0x580   : > { %v2496_v40 = vsel %vm297_vm2, %v7927_v53, %v2492_v39  ;;  %v2495_v6 = vsel %vm297_vm2, %v2492_v39, %v2494_v36  ;;  %v7933_v36 = vstv %s6830_s17  ;;  %s7045_s17 = sld [smem:[#allocation4 + $0xe9]] }
 0x581   : > { %v2499_v59 = vmul.f32 %v7932_v37, %v2496_v40  ;;  %v2505_v51 = vmul.f32 %v7933_v36, %v2496_v40  ;;  %v2500_v24 = vmul.f32 %v7934_v29, %v2495_v6  ;;  %v7935_v31 = vmov %v7933_v36 }
 0x582   : > { %v2514_v7 = vpop.permute.xlu1 %2513  ;;  %v2506_v35 = vmul.f32 %v7935_v31, %v2495_v6  ;;  %v7941_v40 = vunpack.i.h.bf16 %v6778_v23 }
 0x583   : > { %v2512_v34 = vpop.permute.xlu0 %2511  ;;  %v2501_v54 = vadd.f32 %v2499_v59, %v2481_v58  ;;  %v2507_v45 = vadd.f32 %v2505_v51, %v2487_v10  ;;  %v2502_v43 = vadd.f32 %v2500_v24, %v2482_v1  ;;  %v3800_v59 = vunpack.i.h.bf16 %v6772_v26 }
 0x584   : > { %v2516_v30 = vsel %vm297_vm2, %v7931_v25, %v2512_v34  ;;  %v2515_v27 = vsel %vm297_vm2, %v2512_v34, %v2514_v7  ;;  %v2508_v5 = vadd.f32 %v2506_v35, %v2488_v33  ;;  %v2578_v25 = vstv %s7019_s11  ;;  %s7241_s11 = sld [smem:[#allocation4 + $0x100]] }
 0x585   : > { %v2519_v39 = vmul.f32 %v7936_v8, %v2516_v30  ;;  %v2525_v50 = vmul.f32 %v7938_v46, %v2516_v30  ;;  %v2520_v7 = vmul.f32 %v7939_v19, %v2515_v27  ;;  %v2526_v20 = vmul.f32 %v7940_v52, %v2515_v27 }
 0x586   : > { %v2532_v55 = vpop.permute.xlu1 %2531  ;;  %v2584_v30 = vstv %s7025_s30  ;;  %v7942_v24 = vunpack.i.l.bf16 %v6772_v26  ;;  %v2622_v26 = vstv %s7045_s17  ;;  %v2628_v46 = vstv %s7067_s25  ;;  %s7243_s30 = sld [smem:[#allocation4 + $0x112]] }
 0x587   : > { %v2534_v38 = vpop.permute.xlu0 %2533  ;;  %v2536_v49 = vsel %vm339_vm4, %v7937_v0, %v2532_v55  ;;  %v2521_v4 = vadd.f32 %v2519_v39, %v2501_v54  ;;  %v2527_v44 = vadd.f32 %v2525_v50, %v2507_v45  ;;  %v2522_v42 = vadd.f32 %v2520_v7, %v2502_v43  ;;  %s7249_s17 = sld [smem:[#allocation4 + $0x11b]] }
 0x588   : > { %v2535_v22 = vsel %vm339_vm4, %v2532_v55, %v2534_v38  ;;  %v2539_v57 = vmul.f32 %v2538_v14, %v2536_v49  ;;  %v2545_v53 = vmul.f32 %v2544_v41, %v2536_v49  ;;  %v2528_v32 = vadd.f32 %v2526_v20, %v2508_v5  ;;  %s7269_s25 = sld [smem:[#allocation4 + $0x10a]] }
 0x589   : > { %v2540_v28 = vmul.f32 %v2538_v14, %v2535_v22  ;;  %v2546_v6 = vmul.f32 %v2544_v41, %v2535_v22  ;;  %v2598_v0 = vstv %s7051_s5  ;;  %v2604_v49 = vstv %s7061_s16  ;;  %s7254_s5 = sld [smem:[#allocation4 + $0x101]] }
 0x58a   : > { %v2552_v11 = vpop.permute.xlu1 %2551  ;;  %v2541_v47 = vadd.f32 %v2539_v57, %v2521_v4  ;;  %v2547_v48 = vadd.f32 %v2545_v53, %v2527_v44  ;;  %v7943_v43 = vstv %s6760_s20  ;;  %v2617_v53 = vmul.f32 %v6662_v60, %v2616_v9  ;;  %s7949_s20 = smov 1   ;;  %s7261_s16 = sld [smem:[#allocation4 + $0x113]] }
 0x58b   : > { %v2556_v63 = vsel %vm339_vm4, %v7941_v40, %v2552_v11  ;;  %v2554_v34 = vpop.permute.xlu0 %2553  ;;  %v2542_v36 = vadd.f32 %v2540_v28, %v2522_v42  ;;  %v2548_v51 = vadd.f32 %v2546_v6, %v2528_v32  ;;  %v2611_v57 = vmul.f32 %v6662_v60, %v7943_v43 }
 0x58c   : > { %v2555_v23 = vsel %vm339_vm4, %v2552_v11, %v2554_v34  ;;  %v2559_v2 = vmul.f32 %v2558_v3, %v2556_v63  ;;  %v2565_v21 = vmul.f32 %v2564_v61, %v2556_v63  ;;  %v7944_v40 = vmov %v7943_v43 }
 0x58d   : > { %v2560_v41 = vmul.f32 %v2558_v3, %v2555_v23  ;;  %v2566_v37 = vmul.f32 %v2564_v61, %v2555_v23  ;;  %v2612_v63 = vmul.f32 %v6666_v15, %v7944_v40  ;;  %v2618_v5 = vmul.f32 %v6666_v15, %v2616_v9 }
 0x58e   : > { %v2574_v14 = vpop.permute.xlu1 %2573  ;;  %v2561_v58 = vadd.f32 %v2559_v2, %v2541_v47  ;;  %v2567_v29 = vadd.f32 %v2565_v21, %v2547_v48  ;;  %v2623_v44 = vmul.f32 %v6670_v16, %v2622_v26  ;;  %v2629_v23 = vmul.f32 %v6670_v16, %v2628_v46 }
 0x58f   : > { %v2572_v55 = vpop.permute.xlu0 %2571  ;;  %v2562_v39 = vadd.f32 %v2560_v41, %v2542_v36  ;;  %v2568_v38 = vadd.f32 %v2566_v37, %v2548_v51  ;;  %v2624_v2 = vmul.f32 %v6674_v62, %v2622_v26  ;;  %v2630_v21 = vmul.f32 %v6674_v62, %v2628_v46 }
 0x590   : > { %v2576_v27 = vsel %vm381_vm6, %v7942_v24, %v2572_v55  ;;  %v2575_v3 = vsel %vm381_vm6, %v2572_v55, %v2574_v14  ;;  %v2666_v43 = vstv %s7197_s6  ;;  %v2650_v40 = vstv %s7201_s22  ;;  %s7456_s6 = sld [smem:[#allocation4 + $0x115]] }
 0x591   : > { %v2579_v61 = vmul.f32 %v2578_v25, %v2576_v27  ;;  %v2585_v10 = vmul.f32 %v2584_v30, %v2576_v27  ;;  %v2580_v31 = vmul.f32 %v2578_v25, %v2575_v3  ;;  %v2586_v35 = vmul.f32 %v2584_v30, %v2575_v3  ;;  %s7476_s22 = sld [smem:[#allocation4 + $0x10d]] }
 0x592   : > { %v2594_v8 = vpop.permute.xlu1 %2593 }
 0x593   : > { %v2581_v1 = vadd.f32 %v2579_v61, %v2561_v58  ;;  %v2587_v33 = vadd.f32 %v2585_v10, %v2567_v29  ;;  %v2592_v50 = vpop.permute.xlu0 %2591  ;;  %v2582_v22 = vadd.f32 %v2580_v31, %v2562_v39  ;;  %v2588_v54 = vadd.f32 %v2586_v35, %v2568_v38 }
 0x594   : > { %v2596_v45 = vsel %vm381_vm6, %v3800_v59, %v2592_v50  ;;  %v2595_v19 = vsel %vm381_vm6, %v2592_v50, %v2594_v8 }
 0x595   : > { %v2599_v7 = vmul.f32 %v2598_v0, %v2596_v45  ;;  %v2605_v52 = vmul.f32 %v2604_v49, %v2596_v45  ;;  %v2600_v20 = vmul.f32 %v2598_v0, %v2595_v19  ;;  %v2606_v11 = vmul.f32 %v2604_v49, %v2595_v19 }
 0x596   : > { %v7181_v37 = vpop.permute.xlu1 %3807 }
 0x597   : > { %v2601_v4 = vadd.f32 %v2599_v7, %v2581_v1  ;;  %v2607_v28 = vadd.f32 %v2605_v52, %v2587_v33  ;;  %v2602_v6 = vadd.f32 %v2600_v20, %v2582_v22  ;;  %v2608_v34 = vadd.f32 %v2606_v11, %v2588_v54  ;;  %v7183_v59 = vpop.permute.xlu0 %3802 }
 0x598   : > { %v3810_v35 = vunpack.i.h.bf16 %v7181_v37  ;;  %v3805_v38 = vunpack.i.h.bf16 %v7183_v59  ;;  %v3804_v0 = vunpack.i.l.bf16 %v7183_v59  ;;  %v3809_v49 = vunpack.i.l.bf16 %v7181_v37 }
 0x599   : > { %v2613_v42 = vadd.f32 %v2611_v57, %v2601_v4  ;;  %v2619_v32 = vadd.f32 %v2617_v53, %v2607_v28  ;;  %v2614_v60 = vadd.f32 %v2612_v63, %v2602_v6  ;;  %v2620_v25 = vadd.f32 %v2618_v5, %v2608_v34 }
 0x59a   : > { %v7185_v36 = vpop.permute.xlu1 %3817  ;;  %v2660_v7 = vstv %s7195_s28  ;;  %v2648_v11 = vstv %s7199_s26  ;;  %v2680_v63 = vstv %s7205_s1  ;;  %v2686_v5 = vstv %s7207_s2  ;;  %s7450_s28 = sld [smem:[#allocation4 + $0x103]] }
 0x59b   : > { %v2625_v30 = vadd.f32 %v2623_v44, %v2613_v42  ;;  %v2631_v14 = vadd.f32 %v2629_v23, %v2619_v32  ;;  %v2626_v47 = vadd.f32 %v2624_v2, %v2614_v60  ;;  %v2632_v15 = vadd.f32 %v2630_v21, %v2620_v25  ;;  %v7187_v51 = vpop.permute.xlu0 %3812  ;;  %s7470_s26 = sld [smem:[#allocation4 + $0x116]] }
 0x59c   : > { %v3820_v1 = vunpack.i.h.bf16 %v7185_v36  ;;  %v3815_v33 = vunpack.i.h.bf16 %v7187_v51  ;;  %v3814_v26 = vunpack.i.l.bf16 %v7187_v51  ;;  %v3819_v46 = vunpack.i.l.bf16 %v7185_v36  ;;  %s7482_s1 = sld [smem:[#allocation4 + $0x10c]] }
 0x59d   : > { %3889 = vtanh.f32 %v2625_v30  ;;  %v2700_v4 = vstv %s7211_s3  ;;  %v2706_v28 = vstv %s7213_s4  ;;  %v2720_v6 = vstv %s7215_s15  ;;  %s7492_s2 = sld [smem:[#allocation4 + $0x11e]] }
 0x59e   : > { %3891 = vtanh.f32 %v2626_v47  ;;  %v7189_v55 = vpop.permute.xlu1 %3827  ;;  %v2726_v34 = vstv %s7217_s19  ;;  %v2740_v2 = vstv %s7219_s0  ;;  %v2746_v21 = vstv %s7221_s23  ;;  %s7498_s3 = sld [smem:[#allocation4 + $0x11f]] }
 0x59f   : > { %3893 = vtanh.f32 %v2631_v14  ;;  %v7193_v9 = vpop.permute.xlu0 %3822  ;;  %v2760_v42 = vstv %s7223_s24  ;;  %v2766_v60 = vstv %s7225_s7  ;;  %s7995_s4 = sld [smem:[#allocation17_spill]] }
 0x5a0   : > { %3895 = vtanh.f32 %v2632_v15  ;;  %s8000_s19 = sld [smem:[#allocation20_spill]] }
 0x5a1   : > { %s8001_s7 = sld [smem:[#allocation23_spill]] }
 0x5a2   : > { %v7203_v58 = vpop.permute.xlu1 %3837 }
 0x5a3   : > { %v7209_v29 = vpop.permute.xlu0 %3832 }
 0x5a5   : > { %s7525_s15 = sand.u32 1, %s7995_s4  }
 0x5a6   : > { %s3176_s0 = sshll.u32 %s7525_s15, 4 }
 0x5a7   : > { %s221_s23 = scalar_lea.vmem [#allocation9], %s3176_s0  ;;  %p8003_p12 = scmp.ne.s32.totalorder %s8001_s7, 0 }
 0x5a8   : > { %s3041_s24 = sshll.u32 %s221_s23, 4  ;;  %s7558_s24 = int_to_ptr.vmem [resolvable:$true] %s3041_s24 }
 0x5aa   : > { %v7109_v48 = vpop.eup %3889 }
 0x5ab   : > { %2653 = vrot.lane.b32.xlu1 %v7109_v48, %s7872_s10  ;;  %v7113_v16 = vpop.eup %3891 }
 0x5ac   : > { %2655 = vrot.lane.b32.xlu0 %v7113_v16, %s7872_s10  ;;  %v7117_v62 = vpop.eup %3893 }
 0x5ad   : > { %v7121_v41 = vpop.eup %3895 }
 0x5af   : > { %2673 = vrot.lane.b32.xlu1 %v7117_v62, %s7872_s10 }
 0x5b0   : > { %2675 = vrot.lane.b32.xlu0 %v7121_v41, %s7872_s10  ;;  %s7945_s10 = smov 5  }
 0x5b3   : > { %2695 = vrot.lane.b32.xlu1 %v7113_v16, %s7908_s14 }
 0x5b4   : > { %2693 = vrot.lane.b32.xlu0 %v7109_v48, %s7908_s14 }
 0x5b7   : > { %2715 = vrot.lane.b32.xlu1 %v7121_v41, %s7908_s14 }
 0x5b8   : > { %2713 = vrot.lane.b32.xlu0 %v7117_v62, %s7908_s14  ;;  %s7946_s14 = smov 4  }
 0x5bb   : > { %2733 = vrot.lane.b32.xlu1 %v7109_v48, %s7905_s18 }
 0x5bc   : > { %2735 = vrot.lane.b32.xlu0 %v7113_v16, %s7905_s18 }
 0x5bf   : > { %2753 = vrot.lane.b32.xlu1 %v7117_v62, %s7905_s18 }
 0x5c0   : > { %2755 = vrot.lane.b32.xlu0 %v7121_v41, %s7905_s18  ;;  %s7947_s18 = smov 3  }
 0x5c3   : > { %2775 = vrot.lane.b32.xlu1 %v7113_v16, %s7945_s10 }
 0x5c4   : > { %2773 = vrot.lane.b32.xlu0 %v7109_v48, %s7945_s10 }
 0x5c7   : > { %2795 = vrot.lane.b32.xlu1 %v7121_v41, %s7945_s10 }
 0x5c8   : > { %2793 = vrot.lane.b32.xlu0 %v7117_v62, %s7945_s10  ;;  %s7275_s10 = sld [smem:[#allocation4 + $0x11c]] }
 0x5cb   : > { %2813 = vrot.lane.b32.xlu1 %v7109_v48, %s7946_s14 }
 0x5cc   : > { %2815 = vrot.lane.b32.xlu0 %v7113_v16, %s7946_s14 }
 0x5cf   : > { %2833 = vrot.lane.b32.xlu1 %v7117_v62, %s7946_s14 }
 0x5d0   : > { %2835 = vrot.lane.b32.xlu0 %v7121_v41, %s7946_s14  ;;  %s7283_s14 = sld [smem:[#allocation4 + $0x102]] }
 0x5d3   : > { %2855 = vrot.lane.b32.xlu1 %v7113_v16, %s7947_s18 }
 0x5d4   : > { %2853 = vrot.lane.b32.xlu0 %v7109_v48, %s7947_s18 }
 0x5d7   : > { %2875 = vrot.lane.b32.xlu1 %v7121_v41, %s7947_s18 }
 0x5d8   : > { %2873 = vrot.lane.b32.xlu0 %v7117_v62, %s7947_s18  ;;  %s7289_s18 = sld [smem:[#allocation4 + $0x114]] }
 0x5db   : > { %2893 = vrot.lane.b32.xlu1 %v7109_v48, %s7948_s12 }
 0x5dc   : > { %2895 = vrot.lane.b32.xlu0 %v7113_v16, %s7948_s12 }
 0x5df   : > { %2913 = vrot.lane.b32.xlu1 %v7117_v62, %s7948_s12 }
 0x5e0   : > { %2915 = vrot.lane.b32.xlu0 %v7121_v41, %s7948_s12  ;;  %s7311_s12 = sld [smem:[#allocation4 + $0x10b]] }
 0x5e3   : > { %2935 = vrot.lane.b32.xlu1 %v7113_v16, %s7949_s20 }
 0x5e4   : > { %2933 = vrot.lane.b32.xlu0 %v7109_v48, %s7949_s20 }
 0x5e7   : > { %2955 = vrot.lane.b32.xlu1 %v7121_v41, %s7949_s20 }
 0x5e8   : > { %2953 = vrot.lane.b32.xlu0 %v7117_v62, %s7949_s20  ;;  %s7326_s20 = sld [smem:[#allocation4 + $0x11d]] }
 0x61d   : > { %v2654_v24 = vpop.permute.xlu1 %2653 }
 0x61e   : > { %v2656_v27 = vpop.permute.xlu0 %2655  ;;  %v2658_v23 = vsel %vm255_vm0, %v3804_v0, %v2654_v24 }
 0x61f   : > { %v2657_v32 = vsel %vm255_vm0, %v2654_v24, %v2656_v27  ;;  %v2661_v39 = vmul.f32 %v2660_v7, %v2658_v23  ;;  %v2667_v50 = vmul.f32 %v2666_v43, %v2658_v23  ;;  %v2906_v23 = vstv %s7289_s18 }
 0x620   : > { %v2662_v53 = vmul.f32 %v2660_v7, %v2657_v32  ;;  %v2668_v19 = vmul.f32 %v2666_v43, %v2657_v32  ;;  %v2900_v7 = vstv %s7283_s14 }
 0x621   : > { %v7227_v3 = vpop.permute.xlu1 %2673  ;;  %v2663_v47 = vadd.f32 %v2661_v39, %v2648_v11  ;;  %v2669_v15 = vadd.f32 %v2667_v50, %v2650_v40 }
 0x622   : > { %v7233_v61 = vpop.permute.xlu0 %2675  ;;  %v2678_v24 = vsel %vm255_vm0, %v3805_v38, %v7227_v3  ;;  %v2664_v45 = vadd.f32 %v2662_v53, %v2648_v11  ;;  %v2670_v54 = vadd.f32 %v2668_v19, %v2650_v40  ;;  %v2920_v19 = vstv %s7311_s12 }
 0x623   : > { %v2677_v0 = vsel %vm255_vm0, %v7227_v3, %v7233_v61  ;;  %v2681_v38 = vmul.f32 %v2680_v63, %v2678_v24  ;;  %v2687_v32 = vmul.f32 %v2686_v5, %v2678_v24  ;;  %vm7951_vm0 = vmmov %vm7950_vm1 }
 0x624   : > { %v2682_v43 = vmul.f32 %v2680_v63, %v2677_v0  ;;  %v2688_v20 = vmul.f32 %v2686_v5, %v2677_v0  ;;  %vm7952_vm3 = vmmov %vm7951_vm0 }
 0x625   : > { %v7239_v10 = vpop.permute.xlu1 %2695  ;;  %vm7953_vm5 = vmmov %vm7951_vm0 }
 0x626   : > { %v7245_v31 = vpop.permute.xlu0 %2693  ;;  %v2684_v11 = vadd.f32 %v2682_v43, %v2664_v45  ;;  %v2690_v53 = vadd.f32 %v2688_v20, %v2670_v54 }
 0x627   : > { %v2698_v52 = vsel %vm7950_vm1, %v3809_v49, %v7245_v31  ;;  %v2697_v3 = vsel %vm7951_vm0, %v7245_v31, %v7239_v10  ;;  %v2683_v31 = vadd.f32 %v2681_v38, %v2663_v47 }
 0x628   : > { %v2701_v14 = vmul.f32 %v2700_v4, %v2698_v52  ;;  %v2707_v30 = vmul.f32 %v2706_v28, %v2698_v52  ;;  %v2702_v39 = vmul.f32 %v2700_v4, %v2697_v3  ;;  %v2708_v50 = vmul.f32 %v2706_v28, %v2697_v3 }
 0x629   : > { %v7252_v8 = vpop.permute.xlu1 %2715  ;;  %v2689_v52 = vadd.f32 %v2687_v32, %v2669_v15  ;;  %v2926_v28 = vstv %s7326_s20 }
 0x62a   : > { %v7267_v22 = vpop.permute.xlu0 %2713  ;;  %v2703_v5 = vadd.f32 %v2701_v14, %v2683_v31  ;;  %v2710_v47 = vadd.f32 %v2708_v50, %v2690_v53 }
 0x62b   : > { %v2718_v49 = vsel %vm7952_vm3, %v3810_v35, %v7267_v22  ;;  %v2717_v63 = vsel %vm7953_vm5, %v7267_v22, %v7252_v8  ;;  %v2709_v54 = vadd.f32 %v2707_v30, %v2689_v52 }
 0x62c   : > { %v2721_v8 = vmul.f32 %v2720_v6, %v2718_v49  ;;  %v2727_v22 = vmul.f32 %v2726_v34, %v2718_v49  ;;  %v2722_v40 = vmul.f32 %v2720_v6, %v2717_v63  ;;  %v2728_v20 = vmul.f32 %v2726_v34, %v2717_v63 }
 0x62d   : > { %v7281_v57 = vpop.permute.xlu1 %2733 }
 0x62e   : > { %v2736_v44 = vpop.permute.xlu0 %2735  ;;  %v2738_v37 = vsel %vm297_vm2, %v3814_v26, %v7281_v57  ;;  %v2704_v26 = vadd.f32 %v2702_v39, %v2684_v11  ;;  %v2723_v0 = vadd.f32 %v2721_v8, %v2703_v5  ;;  %v2729_v24 = vadd.f32 %v2727_v22, %v2709_v54 }
 0x62f   : > { %v2737_v45 = vsel %vm297_vm2, %v7281_v57, %v2736_v44  ;;  %v2741_v15 = vmul.f32 %v2740_v2, %v2738_v37  ;;  %v2747_v34 = vmul.f32 %v2746_v21, %v2738_v37  ;;  %v7957_v39 = vstv %s7229_s9 }
 0x630   : > { %v2742_v57 = vmul.f32 %v2740_v2, %v2737_v45  ;;  %v2748_v44 = vmul.f32 %v2746_v21, %v2737_v45  ;;  %v2724_v51 = vadd.f32 %v2722_v40, %v2704_v26  ;;  %v2730_v2 = vadd.f32 %v2728_v20, %v2710_v47 }
 0x631   : > { %v7303_v25 = vpop.permute.xlu1 %2753  ;;  %v2743_v43 = vadd.f32 %v2741_v15, %v2723_v0  ;;  %v2749_v63 = vadd.f32 %v2747_v34, %v2729_v24  ;;  %v7959_v52 = vmov %v7957_v39  ;;  %v7962_v8 = vstv %s7235_s29  ;;  %s8002_s29 = sld [smem:[#allocation28_spill]] }
 0x632   : > { %v2756_v27 = vpop.permute.xlu0 %2755  ;;  %v2758_v6 = vsel %vm297_vm2, %v3815_v33, %v7303_v25  ;;  %v2744_v49 = vadd.f32 %v2742_v57, %v2724_v51  ;;  %v2750_v31 = vadd.f32 %v2748_v44, %v2730_v2  ;;  %v7963_v40 = vunpack.i.l.bf16 %v7193_v9 }
 0x633   : > { %v2757_v30 = vsel %vm297_vm2, %v7303_v25, %v2756_v27  ;;  %v2761_v21 = vmul.f32 %v2760_v42, %v2758_v6  ;;  %v2767_v38 = vmul.f32 %v2766_v60, %v2758_v6  ;;  %vm7955_vm2 = vmmov %vm7954_vm7  ;;  %v7964_v26 = vstv %s7237_s13 }
 0x634   : > { %v2762_v32 = vmul.f32 %v2760_v42, %v2757_v30  ;;  %v2768_v3 = vmul.f32 %v2766_v60, %v2757_v30  ;;  %vm7956_vm8 = vmmov %vm7955_vm2  ;;  %v7965_v15 = vmov %v7962_v8  ;;  %v7966_v57 = vmov %v7964_v26 }
 0x635   : > { %v2776_v59 = vpop.permute.xlu1 %2775  ;;  %vm7961_vm9 = vmmov %vm7955_vm2  ;;  %v2763_v37 = vadd.f32 %v2761_v21, %v2743_v43  ;;  %v7967_v44 = vunpack.i.h.bf16 %v7193_v9  ;;  %v7968_v2 = vstv %s7241_s11  ;;  %s3022_s11 = scalar_lea.sflag [#allocation5], %s7525_s15 }
 0x636   : > { %v2774_v61 = vpop.permute.xlu0 %2773  ;;  %v2764_v54 = vadd.f32 %v2762_v32, %v2744_v49  ;;  %v2770_v20 = vadd.f32 %v2768_v3, %v2750_v31 }
 0x637   : > { %v2778_v33 = vsel %vm7954_vm7, %v3819_v46, %v2774_v61  ;;  %v2777_v25 = vsel %vm7955_vm2, %v2774_v61, %v2776_v59  ;;  %v7958_v61 = vstv %s7231_s27 }
 0x638   : > { %v2781_v50 = vmul.f32 %v7957_v39, %v2778_v33  ;;  %v2787_v11 = vmul.f32 %v7958_v61, %v2778_v33  ;;  %v2782_v42 = vmul.f32 %v7959_v52, %v2777_v25  ;;  %v7960_v53 = vmov %v7958_v61 }
 0x639   : > { %v2796_v10 = vpop.permute.xlu1 %2795  ;;  %v2788_v60 = vmul.f32 %v7960_v53, %v2777_v25  ;;  %v7970_v25 = vstv %s7243_s30  ;;  %v7973_v39 = vunpack.i.l.bf16 %v7189_v55  ;;  %v7975_v52 = vstv %s7249_s17  ;;  %s3931_s30 = scalar_lea.vmem %s7558_s24, 256 }
 0x63a   : > { %v2794_v35 = vpop.permute.xlu0 %2793  ;;  %v2784_v51 = vadd.f32 %v2782_v42, %v2764_v54  ;;  %v7981_v54 = vstv %s7254_s5  ;;  %p3932_p10 = scmp.ne.s32.totalorder %s7558_s24, %s3931_s30 }
 0x63b   : > { %v2798_v46 = vsel %vm7956_vm8, %v3820_v1, %v2794_v35  ;;  %v2797_v36 = vsel %vm7961_vm9, %v2794_v35, %v2796_v10  ;;  %v2769_v1 = vadd.f32 %v2767_v38, %v2749_v63  ;;  %v2783_v35 = vadd.f32 %v2781_v50, %v2763_v37 }
 0x63c   : > { %v2801_v22 = vmul.f32 %v7962_v8, %v2798_v46  ;;  %v2807_v47 = vmul.f32 %v7964_v26, %v2798_v46  ;;  %v2802_v6 = vmul.f32 %v7965_v15, %v2797_v36  ;;  %v2808_v34 = vmul.f32 %v7966_v57, %v2797_v36  ;;  %p3933_p0 = pnand %p3932_p10, %p8003_p12 }
 0x63d   : > { %v2814_v4 = vpop.permute.xlu1 %2813  ;;  %v2789_v24 = vadd.f32 %v2787_v11, %v2769_v1  ;;  %v2790_v33 = vadd.f32 %v2788_v60, %v2770_v20  ;;  %v7971_v46 = vmov %v7970_v25  ;;  %v7972_v63 = vstv %s7247_s21  ;;  %s4054_s21 = smov [#allocation9]  }
 0x63e   : > { %v2816_v14 = vpop.permute.xlu0 %2815  ;;  %v2818_v45 = vsel %vm339_vm4, %v7963_v40, %v2814_v4  ;;  %v2804_v61 = vadd.f32 %v2802_v6, %v2784_v51  ;;  %v7977_v60 = vmov %v7972_v63  ;;  %v7978_v37 = vmov %v7975_v52  ;;  %p3934_p7 = pneg %p3933_p0  ;;  %s3935_s17 = sshll.u32 %s4054_s21, 4  ;;  %s3936_s17 = int_to_ptr.vmem [resolvable:$false] %s3935_s17 }
 0x63f   : > { %v2817_v10 = vsel %vm339_vm4, %v2814_v4, %v2816_v14  ;;  %v2821_v21 = vmul.f32 %v7968_v2, %v2818_v45  ;;  %v2803_v4 = vadd.f32 %v2801_v22, %v2783_v35  ;;  %v7969_v14 = vmov %v7968_v2  ;;  %s3937_s5 = scalar_lea.vmem %s3936_s17, 512  ;;  %p3938_p8 = scmp.lt.s32.totalorder %s7558_s24, %s3936_s17 }
 0x640   : > { %v2822_v38 = vmul.f32 %v7969_v14, %v2817_v10  ;;  %v2827_v43 = vmul.f32 %v7970_v25, %v2818_v45  ;;  %v2809_v3 = vadd.f32 %v2807_v47, %v2789_v24  ;;  %v2828_v49 = vmul.f32 %v7971_v46, %v2817_v10  ;;  %p3939_p11 = scmp.lt.s32.totalorder %s3937_s5, %s3931_s30 }
 0x641   : > { %v2834_v27 = vpop.permute.xlu1 %2833  ;;  %v2810_v11 = vadd.f32 %v2808_v34, %v2790_v33  ;;  %v2823_v53 = vadd.f32 %v2821_v21, %v2803_v4  ;;  %v7979_v8 = vunpack.i.h.bf16 %v7189_v55  ;;  %v7983_v15 = vmov %v7981_v54 }
 0x642   : > { %v2836_v59 = vpop.permute.xlu0 %2835  ;;  %v2838_v30 = vsel %vm339_vm4, %v7967_v44, %v2834_v27  ;;  %v2824_v40 = vadd.f32 %v2822_v38, %v2804_v61  ;;  %v2829_v45 = vadd.f32 %v2827_v43, %v2809_v3  ;;  %v7987_v51 = vunpack.i.l.bf16 %v7209_v29  ;;  %p3940_p13 = por %p3939_p11, %p3938_p8 }
 0x643   : > { %v2837_v9 = vsel %vm339_vm4, %v2834_v27, %v2836_v59  ;;  %v2841_v31 = vmul.f32 %v7972_v63, %v2838_v30  ;;  %v2847_v42 = vmul.f32 %v7975_v52, %v2838_v30  ;;  %vm7980_vm4 = vmmov %vm7974_vm10  ;;  %v2830_v10 = vadd.f32 %v2828_v49, %v2810_v11 }
 0x644   : > { %v2842_v36 = vmul.f32 %v7977_v60, %v2837_v9  ;;  %v2848_v1 = vmul.f32 %v7978_v37, %v2837_v9  ;;  %vm7984_vm12 = vmmov %vm7980_vm4  ;;  %v7986_v30 = vstv %s7269_s25  ;;  %v7988_v4 = vstv %s7275_s10  ;;  %p3941_p1 = pnand %p3940_p13, %p3934_p7 }
 0x645   : > { %v2856_v5 = vpop.permute.xlu1 %2855  ;;  %v2843_v35 = vadd.f32 %v2841_v31, %v2823_v53  ;;  %v2849_v57 = vadd.f32 %v2847_v42, %v2829_v45  ;;  %v7989_v9 = vmov %v7986_v30  ;;  %v7990_v3 = vmov %v7988_v4 }
 0x646   : > { %v2854_v0 = vpop.permute.xlu0 %2853  ;;  %v2844_v2 = vadd.f32 %v2842_v36, %v2824_v40  ;;  %v2850_v21 = vadd.f32 %v2848_v1, %v2830_v10  ;;  %v2978_v10 = vstv %s7470_s26 }
 0x647   : > { %v2858_v50 = vsel %vm7974_vm10, %v7973_v39, %v2854_v0  ;;  %v2857_v27 = vsel %vm7976_vm11, %v2854_v0, %v2856_v5  ;;  %v7982_v5 = vstv %s7261_s16 }
 0x648   : > { %v2861_v20 = vmul.f32 %v7981_v54, %v2858_v50  ;;  %v2867_v26 = vmul.f32 %v7982_v5, %v2858_v50  ;;  %v2862_v55 = vmul.f32 %v7983_v15, %v2857_v27  ;;  %v7985_v34 = vmov %v7982_v5 }
 0x649   : > { %v2876_v32 = vpop.permute.xlu1 %2875  ;;  %v2868_v44 = vmul.f32 %v7985_v34, %v2857_v27  ;;  %v7991_v50 = vunpack.i.h.bf16 %v7209_v29 }
 0x64a   : > { %v2874_v59 = vpop.permute.xlu0 %2873  ;;  %v2863_v25 = vadd.f32 %v2861_v20, %v2843_v35  ;;  %v2869_v43 = vadd.f32 %v2867_v26, %v2849_v57  ;;  %v2864_v63 = vadd.f32 %v2862_v55, %v2844_v2  ;;  %v3840_v20 = vunpack.i.h.bf16 %v7203_v58 }
 0x64b   : > { %v2878_v22 = vsel %vm7980_vm4, %v7979_v8, %v2874_v59  ;;  %v2877_v6 = vsel %vm7984_vm12, %v2874_v59, %v2876_v32  ;;  %v2870_v11 = vadd.f32 %v2868_v44, %v2850_v21  ;;  %v2940_v8 = vstv %s7450_s28 }
 0x64c   : > { %v2881_v0 = vmul.f32 %v7986_v30, %v2878_v22  ;;  %v2887_v14 = vmul.f32 %v7988_v4, %v2878_v22  ;;  %v2882_v32 = vmul.f32 %v7989_v9, %v2877_v6  ;;  %v2888_v46 = vmul.f32 %v7990_v3, %v2877_v6 }
 0x64d   : > { %v2894_v47 = vpop.permute.xlu1 %2893  ;;  %v2946_v22 = vstv %s7456_s6  ;;  %v7992_v55 = vunpack.i.l.bf16 %v7203_v58  ;;  %v2984_v21 = vstv %s7476_s22  ;;  %v2990_v4 = vstv %s7498_s3 }
 0x64e   : > { %v2896_v24 = vpop.permute.xlu0 %2895  ;;  %v2898_v33 = vsel %vm381_vm6, %v7987_v51, %v2894_v47  ;;  %v2883_v52 = vadd.f32 %v2881_v0, %v2863_v25  ;;  %v2889_v53 = vadd.f32 %v2887_v14, %v2869_v43  ;;  %v2884_v37 = vadd.f32 %v2882_v32, %v2864_v63 }
 0x64f   : > { %v2897_v38 = vsel %vm381_vm6, %v2894_v47, %v2896_v24  ;;  %v2901_v31 = vmul.f32 %v2900_v7, %v2898_v33  ;;  %v2907_v39 = vmul.f32 %v2906_v23, %v2898_v33  ;;  %v2890_v1 = vadd.f32 %v2888_v46, %v2870_v11 }
 0x650   : > { %v2902_v42 = vmul.f32 %v2900_v7, %v2897_v38  ;;  %v2908_v27 = vmul.f32 %v2906_v23, %v2897_v38  ;;  %v2960_v51 = vstv %s7482_s1  ;;  %v2966_v33 = vstv %s7492_s2 }
 0x651   : > { %v2914_v49 = vpop.permute.xlu1 %2913  ;;  %v2903_v40 = vadd.f32 %v2901_v31, %v2883_v52  ;;  %v2909_v45 = vadd.f32 %v2907_v39, %v2889_v53  ;;  %v7998_v63 = vstv %s7191_s8  ;;  %v2979_v39 = vmul.f32 %v7109_v48, %v2978_v10  ;;  %s3473_s8 = sshll.u32 %s8000_s19, 8 }
 0x652   : > { %v2918_v61 = vsel %vm381_vm6, %v7991_v50, %v2914_v49  ;;  %v2916_v59 = vpop.permute.xlu0 %2915  ;;  %v2904_v5 = vadd.f32 %v2902_v42, %v2884_v37  ;;  %v2910_v26 = vadd.f32 %v2908_v27, %v2890_v1  ;;  %v2973_v31 = vmul.f32 %v7109_v48, %v7998_v63  ;;  %s7556_s13 = scalar_lea.hbm %s8002_s29, %s3473_s8 }
 0x653   : > { %v2917_v29 = vsel %vm381_vm6, %v2914_v49, %v2916_v59  ;;  %v2921_v60 = vmul.f32 %v2920_v19, %v2918_v61  ;;  %v2927_v36 = vmul.f32 %v2926_v28, %v2918_v61  ;;  %vm7993_vm6 = vcmp.lt.s32.totalorder %v4265_v12, 1 }
 0x654   : > { %v2922_v23 = vmul.f32 %v2920_v19, %v2917_v29  ;;  %v2928_v54 = vmul.f32 %v2926_v28, %v2917_v29  ;;  %vm7994_vm13 = vmmov %vm7993_vm6  ;;  %v7999_v50 = vmov %v7998_v63  ;;  %v2980_v11 = vmul.f32 %v7113_v16, %v2978_v10 }
 0x655   : > { %v2936_v7 = vpop.permute.xlu1 %2935  ;;  %v2923_v35 = vadd.f32 %v2921_v60, %v2903_v40  ;;  %v2929_v15 = vadd.f32 %v2927_v36, %v2909_v45  ;;  %vm7996_vm14 = vmmov %vm7993_vm6  ;;  %v2974_v61 = vmul.f32 %v7113_v16, %v7999_v50  ;;  %v2985_v59 = vmul.f32 %v7117_v62, %v2984_v21 }
 0x656   : > { %v2934_v47 = vpop.permute.xlu0 %2933  ;;  %v2924_v0 = vadd.f32 %v2922_v23, %v2904_v5  ;;  %v2930_v24 = vadd.f32 %v2928_v54, %v2910_v26  ;;  %vm7997_vm15 = vmmov %vm7993_vm6  ;;  %v2991_v53 = vmul.f32 %v7117_v62, %v2990_v4  ;;  %v2986_v29 = vmul.f32 %v7121_v41, %v2984_v21 }
 0x657   : > { %v2938_v6 = vsel %vm7993_vm6, %v7992_v55, %v2934_v47  ;;  %v2937_v19 = vsel %vm7994_vm13, %v2934_v47, %v2936_v7  ;;  %v2992_v48 = vmul.f32 %v7121_v41, %v2990_v4 }
 0x658   : > { %v2941_v28 = vmul.f32 %v2940_v8, %v2938_v6  ;;  %v2947_v57 = vmul.f32 %v2946_v22, %v2938_v6  ;;  %v2942_v34 = vmul.f32 %v2940_v8, %v2937_v19  ;;  %v2948_v44 = vmul.f32 %v2946_v22, %v2937_v19 }
 0x659   : > { %v2956_v30 = vpop.permute.xlu1 %2955 }
 0x65a   : > { %v2943_v2 = vadd.f32 %v2941_v28, %v2923_v35  ;;  %v2949_v58 = vadd.f32 %v2947_v57, %v2929_v15  ;;  %v2954_v14 = vpop.permute.xlu0 %2953  ;;  %v2944_v38 = vadd.f32 %v2942_v34, %v2924_v0  ;;  %v2950_v25 = vadd.f32 %v2948_v44, %v2930_v24 }
 0x65b   : > { %v2958_v43 = vsel %vm7996_vm14, %v3840_v20, %v2954_v14  ;;  %v2957_v9 = vsel %vm7997_vm15, %v2954_v14, %v2956_v30 }
 0x65c   : > { %v2961_v32 = vmul.f32 %v2960_v51, %v2958_v43  ;;  %v2967_v3 = vmul.f32 %v2966_v33, %v2958_v43  ;;  %v2962_v46 = vmul.f32 %v2960_v51, %v2957_v9  ;;  %v2968_v49 = vmul.f32 %v2966_v33, %v2957_v9 }
 0x65e   : > { %v2963_v52 = vadd.f32 %v2961_v32, %v2943_v2  ;;  %v2969_v12 = vadd.f32 %v2967_v3, %v2949_v58  ;;  %v2964_v42 = vadd.f32 %v2962_v46, %v2944_v38  ;;  %v2970_v27 = vadd.f32 %v2968_v49, %v2950_v25 }
 0x660   : > { %v2975_v60 = vadd.f32 %v2973_v31, %v2963_v52  ;;  %v2981_v36 = vadd.f32 %v2979_v39, %v2969_v12  ;;  %v2976_v37 = vadd.f32 %v2974_v61, %v2964_v42  ;;  %v2982_v1 = vadd.f32 %v2980_v11, %v2970_v27 }
 0x662   : > { %v2987_v16 = vadd.f32 %v2985_v59, %v2975_v60  ;;  %v2993_v8 = vadd.f32 %v2991_v53, %v2981_v36  ;;  %v2988_v22 = vadd.f32 %v2986_v29, %v2976_v37  ;;  %v2994_v7 = vadd.f32 %v2992_v48, %v2982_v1 }
 0x664   : > { %v3011_v62 = vadd.f32 %v2993_v8, %v5752_v17  ;;  %v3012_v40 = vadd.f32 %v2994_v7, %v5756_v18  ;;  %v3001_v41 = vadd.f32 %v2987_v16, %v5745_v13  ;;  %v3002_v45 = vadd.f32 %v2988_v22, %v5748_v56 }
 0x666   : > { %v3013_v23 = vmul.f32 0.5, %v3011_v62  ;;  %v3014_v54 = vmul.f32 0.5, %v3012_v40  ;;  %3003 = vst [vmem:[%s221_s23] sm:$0xff] %v3001_v41  ;;  %3004 = vst [vmem:[%s221_s23 + $0x8] sm:$0xff] %v3002_v45 }
 0x667   : > { %3944 = shalt.err (!%p3941_p1)
}
 0x668   : > { %s3945_s16 = scalar_lea.hbm %s7556_s13, 256  ;;  %s3949_s14 = scalar_lea.hbm %s8002_s29, 512 }
 0x669   : > { %p3946_p2 = scmp.ne.s32.totalorder %s7556_s13, %s3945_s16  ;;  %p3950_p9 = scmp.lt.s32.totalorder %s7556_s13, %s8002_s29 }
 0x66a   : > { %p3951_p5 = scmp.lt.s32.totalorder %s3949_s14, %s3945_s16 }
 0x66b   : > { %p3947_p3 = pnand %p3946_p2, %p8003_p12 }
 0x66c   : > { %p3952_p6 = por %p3951_p5, %p3950_p9 }
 0x66d   : > { %p3948_p4 = pneg %p3947_p3 }
 0x66f   : > { %p3953_p10 = pnand %p3952_p6, %p3948_p4 }
 0x671   : > { %3956 = shalt.err (!%p3953_p10)
}
 0x672   : > { %3483 = dma.vmem_to_hbm [thread:$0]  (%p8003_p12), %s7558_s24, 256, %s7556_s13, %s3022_s11   ;;  %v3015_v13 = vmul.f32 1.442695, %v3013_v23  ;;  %v3017_v56 = vmul.f32 1.442695, %v3014_v54 }
 0x673   : > { %s228_s20 = scalar_lea.vmem [#allocation10], %s3176_s0  ;;  %s8004_s22 = sld [smem:[#allocation29_spill]] }
 0x674   : > { %3897 = vpow2.f32 %v3015_v13  ;;  %s3055_s28 = sshll.u32 %s228_s20, 4  ;;  %s3027_s2 = scalar_lea.sflag [#allocation11], %s7525_s15  ;;  %s7590_s28 = int_to_ptr.vmem [resolvable:$true] %s3055_s28 }
 0x675   : > { %3899 = vpow2.f32 %v3017_v56  ;;  %s3957_s3 = scalar_lea.vmem %s7590_s28, 256  ;;  %s4055_s4 = smov [#allocation10]  }
 0x676   : > { %p3958_p0 = scmp.ne.s32.totalorder %s7590_s28, %s3957_s3  ;;  %s3961_s19 = sshll.u32 %s4055_s4, 4  ;;  %s3962_s19 = int_to_ptr.vmem [resolvable:$false] %s3961_s19 }
 0x677   : > { %s3963_s0 = scalar_lea.vmem %s3962_s19, 512  ;;  %p3964_p11 = scmp.lt.s32.totalorder %s7590_s28, %s3962_s19 }
 0x678   : > { %p3959_p7 = pnand %p3958_p0, %p8003_p12  ;;  %p3965_p13 = scmp.lt.s32.totalorder %s3963_s0, %s3957_s3 }
 0x679   : > { %s7588_s1 = scalar_lea.hbm %s8004_s22, %s3473_s8 }
 0x67a   : > { %p3960_p8 = pneg %p3959_p7  ;;  %p3966_p1 = por %p3965_p13, %p3964_p11 }
 0x67c   : > { %p3967_p2 = pnand %p3966_p1, %p3960_p8 }
 0x681   : > { %v3898_v17 = vpop.eup %3897 }
 0x682   : > { %v3900_v18 = vpop.eup %3899  ;;  %3019 = vst [vmem:[%s228_s20] sm:$0xff] %v3898_v17 }
 0x683   : > { %3020 = vst [vmem:[%s228_s20 + $0x8] sm:$0xff] %v3900_v18 }
 0x684   : > { %3970 = shalt.err (!%p3967_p2)
}
 0x685   : > { %s3971_s8 = scalar_lea.hbm %s7588_s1, 256  ;;  %s3975_s24 = scalar_lea.hbm %s8004_s22, 512 }
 0x686   : > { %p3972_p3 = scmp.ne.s32.totalorder %s7588_s1, %s3971_s8  ;;  %p3976_p5 = scmp.lt.s32.totalorder %s7588_s1, %s8004_s22 }
 0x687   : > { %p3977_p6 = scmp.lt.s32.totalorder %s3975_s24, %s3971_s8 }
 0x688   : > { %p3973_p4 = pnand %p3972_p3, %p8003_p12 }
 0x689   : > { %p3978_p10 = por %p3977_p6, %p3976_p5 }
 0x68a   : > { %p3974_p9 = pneg %p3973_p4 }
 0x68c   : > { %p3979_p0 = pnand %p3978_p10, %p3974_p9 }
 0x68e   : > { %3982 = shalt.err (!%p3979_p0)
}
 0x68f   : > { %3484 = dma.vmem_to_hbm [thread:$0]  (%p8003_p12), %s7590_s28, 256, %s7588_s1, %s3027_s2  }
 0x690 PF: > { %s8005_s13 = sld [smem:[#allocation19_spill]] }
 0x691   : > { %s8006_s11 = sld [smem:[#allocation16_spill]] }
 0x692   : > { %s8007_s30 = sld [smem:[#allocation24_spill]] }
 0x696   : > { %p3505_p7 = scmp.ge.s32.totalorder %s8005_s13, 2 }
 0x697   : > { %s3067_s21 = sand.u32 1, %s8006_s11  }
 0x698   : > { %p8008_p8 = scmp.ne.s32.totalorder %s8007_s30, 0  ;;  %s3068_s17 = scalar_lea.sflag [#allocation5], %s3067_s21 }
 0x69a   : > { %p3495_p11 = pnand %p3505_p7, %p8008_p8 }
 0x69c   : > { %p3496_p13 = pneg %p3495_p11 }
 0x69e   : > { %4008 = dma.done.wait (%p3496_p13), %s3068_s17, 256  }
 0x69f   : > { %4010 = vsyncadd (%p3496_p13), %s3068_s17, 4294967040  ;;  %s3077_s5 = scalar_lea.sflag [#allocation11], %s3067_s21 }
 0x6a0   : > { %4012 = dma.done.wait (%p3496_p13), %s3077_s5, 256  }
 0x6a1   : > { %4014 = vsyncadd (%p3496_p13), %s3077_s5, 4294967040  ;;  %s8009_s18 = sld [smem:[#allocation21_spill]] }
 0x6a2   : > { %s8010_s15 = sld [smem:[#allocation17_spill]] }
 0x6a3   : > { %s8011_s16 = sld [smem:[#allocation18_spill]] }
 0x6a4   : > { %s8012_s17 = sld [smem:[#allocation22_spill]] }
 0x6a7   : > { %p20_p12 = scmp.ge.s32.totalorder %s8009_s18, 4  }
 0x6a9   :  { %22 = sbr.rel (!%p20_p12) target bundleno = 13 (0xd), region = 97 }
 0x6ae   :  { %3082 = vsyncpa [#allocation5], 1 }
 0x6af   :  { %3084 = vsyncpa [#allocation5 + $0x1], 1 }
 0x6b0   :  { %3085 = vsyncpa [#allocation11], 1 }
 0x6b1   :  { %3087 = vsyncpa [#allocation11 + $0x1], 1 }
 0x6b2   :  { %3088 = vsyncpa [#allocation6], 1 }
 0x6b3   :  { %3090 = vsyncpa [#allocation6 + $0x1], 1 }
 0x6b4   :  { %3091 = vsyncpa [#allocation8], 1 }

</bundles_post_ra>
